<compile_context>
chip_gen: v5e
topology: v5e:2x2
jax: 0.10.0
libtpu: 0.0.40
codegen_flags: <defaults>
</compile_context>

<pallas_src>
import functools

import numpy as np
import jax
import jax.numpy as jnp
from jax.experimental import pallas as pl
from jax.experimental.pallas import tpu as pltpu

LOG10_INV = 1.0 / float(np.log(10.0))


def _round_up(x, m):
    return ((x + m - 1) // m) * m


# --------------------------------------------------------------------------------------
# librosa-compatible mel filterbank (Slaney scale + Slaney norm), host-side numpy.
# --------------------------------------------------------------------------------------
def _hz_to_mel(freq):
    freq = np.asarray(freq, dtype=np.float64)
    f_sp = 200.0 / 3.0
    mels = freq / f_sp
    min_log_hz = 1000.0
    min_log_mel = min_log_hz / f_sp
    logstep = np.log(6.4) / 27.0
    return np.where(freq >= min_log_hz,
                    min_log_mel + np.log(np.maximum(freq, 1e-10) / min_log_hz) / logstep,
                    mels)


def _mel_to_hz(mels):
    mels = np.asarray(mels, dtype=np.float64)
    f_sp = 200.0 / 3.0
    freqs = f_sp * mels
    min_log_hz = 1000.0
    min_log_mel = min_log_hz / f_sp
    logstep = np.log(6.4) / 27.0
    return np.where(mels >= min_log_mel,
                    min_log_hz * np.exp(logstep * (mels - min_log_mel)),
                    freqs)


def librosa_mel_fn(sr, n_fft, n_mels, fmin, fmax):
    if fmax is None:
        fmax = sr / 2.0
    n_freq = 1 + n_fft // 2
    fftfreqs = np.linspace(0.0, sr / 2.0, n_freq)
    mel_pts = _mel_to_hz(np.linspace(_hz_to_mel(fmin), _hz_to_mel(fmax), n_mels + 2))
    fdiff = np.diff(mel_pts)
    ramps = mel_pts[:, None] - fftfreqs[None, :]
    lower = -ramps[:-2] / fdiff[:-1, None]
    upper = ramps[2:] / fdiff[1:, None]
    weights = np.maximum(0.0, np.minimum(lower, upper))
    enorm = 2.0 / (mel_pts[2:n_mels + 2] - mel_pts[:n_mels])
    weights = weights * enorm[:, None]
    return weights.astype(np.float32)                          # (n_mels, n_freq)


# --------------------------------------------------------------------------------------
# Precomputed constants (window, DFT bases, mel matrix), padded to TPU-friendly shapes.
# --------------------------------------------------------------------------------------
def make_audio2mel_constants(n_fft=2048, hop_length=300, win_length=1200,
                             sampling_rate=16000, n_mel_channels=128,
                             mel_fmin=0.0, mel_fmax=None, freq_tile_target=512):
    n_freq = 1 + n_fft // 2

    # frequency-axis tiling: n_tiles tiles of tf (multiple of 128); pad freq dim to fit.
    n_tiles = max(1, -(-n_freq // freq_tile_target))
    tf = _round_up(-(-n_freq // n_tiles), 128)
    n_freq_pad = tf * n_tiles
    n_mel_pad = _round_up(n_mel_channels, 128)

    # periodic Hann window (torch.hann_window default), zero-padded centered to n_fft,
    # exactly what torch.stft does when win_length < n_fft.
    n = np.arange(win_length, dtype=np.float64)
    win = 0.5 - 0.5 * np.cos(2.0 * np.pi * n / win_length)
    lpad = (n_fft - win_length) // 2
    window = np.zeros((1, n_fft), dtype=np.float64)
    window[0, lpad:lpad + win_length] = win

    # real-DFT bases: re = frames @ cos_b, im = frames @ sin_b (padded freq cols = 0).
    t = np.arange(n_fft, dtype=np.float64)
    k = np.arange(n_freq, dtype=np.float64)
    ang = 2.0 * np.pi * np.outer(t, k) / n_fft                 # (n_fft, n_freq)
    cos_b = np.zeros((n_fft, n_freq_pad), dtype=np.float64)
    sin_b = np.zeros((n_fft, n_freq_pad), dtype=np.float64)
    cos_b[:, :n_freq] = np.cos(ang)
    sin_b[:, :n_freq] = -np.sin(ang)

    mel = librosa_mel_fn(sampling_rate, n_fft, n_mel_channels, mel_fmin, mel_fmax)
    mel_t = np.zeros((n_freq_pad, n_mel_pad), dtype=np.float64)
    mel_t[:n_freq, :n_mel_channels] = mel.T

    return dict(
        n_fft=n_fft, hop_length=hop_length, win_length=win_length,
        n_mel_channels=n_mel_channels, n_freq=n_freq, n_freq_pad=n_freq_pad,
        n_mel_pad=n_mel_pad, freq_tile=tf, n_freq_tiles=n_tiles,
        window=jnp.asarray(window, dtype=jnp.float32),
        # bf16 MXU operands (f32 accumulation happens inside the kernel)
        cos_basis=jnp.asarray(cos_b, dtype=jnp.bfloat16),
        sin_basis=jnp.asarray(sin_b, dtype=jnp.bfloat16),
        mel_t=jnp.asarray(mel_t, dtype=jnp.bfloat16),
        mel_basis=jnp.asarray(mel, dtype=jnp.float32),          # for reference checks
    )


# --------------------------------------------------------------------------------------
# Fused STFT-magnitude-mel-log kernel
# --------------------------------------------------------------------------------------
def _audio2mel_kernel(frames_ref, win_ref, cos_ref, sin_ref, melt_ref,
                      o_ref, wf_ref, acc_ref, *, n_tiles):
    # frames_ref: (F, n_fft) f32      win_ref : (1, n_fft) f32
    # cos_ref/sin_ref: (n_fft, tf) bf16   melt_ref: (tf, n_mel_pad) bf16
    # o_ref: (F, n_mel_pad) f32
    # wf_ref: VMEM (F, n_fft) bf16 (windowed frames, computed once per batch element)
    # acc_ref: VMEM (F, n_mel_pad) f32 (mel accumulator over frequency tiles)
    j = pl.program_id(1)

    @pl.when(j == 0)
    def _init():
        wf_ref[...] = (frames_ref[...] * win_ref[...]).astype(wf_ref.dtype)
        acc_ref[...] = jnp.zeros_like(acc_ref)

    wf = wf_ref[...]                                                       # bf16
    re = jnp.dot(wf, cos_ref[...], preferred_element_type=jnp.float32)     # (F, tf) f32
    im = jnp.dot(wf, sin_ref[...], preferred_element_type=jnp.float32)
    mag = jnp.sqrt(re * re + im * im)                                      # f32
    acc_ref[...] += jnp.dot(mag.astype(melt_ref.dtype), melt_ref[...],
                            preferred_element_type=jnp.float32)

    @pl.when(j == n_tiles - 1)
    def _finalize():
        mel = jnp.maximum(acc_ref[...], 1e-5)                              # clamp
        o_ref[...] = (jnp.log(mel) * LOG10_INV).astype(o_ref.dtype)        # log10


def audio2mel(audio, consts):
    """audio: (B, 1, T) float.  Returns (B, n_mel_channels, n_frames) log10-mel."""
    n_fft = consts["n_fft"]
    hop = consts["hop_length"]
    B = audio.shape[0]

    # reflection padding (matches F.pad(mode='reflect') + squeeze(1))
    p = (n_fft - hop) // 2
    x = jnp.pad(audio[:, 0, :].astype(jnp.float32), ((0, 0), (p, p)), mode="reflect")
    L = x.shape[1]
    n_frames = 1 + (L - n_fft) // hop
    f_rows = _round_up(n_frames, 8)                  # sublane-aligned frame rows

    # frame extraction (torch.stft center=False unfold) -- gather glue in the wrapper.
    # TODO(synk): for very long audio, stream frames into the kernel via manual DMA
    # instead of materializing the ~n_fft/hop x overlap expansion in HBM.
    idx = np.arange(n_frames)[:, None] * hop + np.arange(n_fft)[None, :]
    frames = x[:, idx]                               # (B, n_frames, n_fft)
    frames = jnp.pad(frames, ((0, 0), (0, f_rows - n_frames), (0, 0)))

    tf = consts["freq_tile"]
    n_tiles = consts["n_freq_tiles"]
    n_mel_pad = consts["n_mel_pad"]

    kernel = functools.partial(_audio2mel_kernel, n_tiles=n_tiles)
    out = pl.pallas_call(
        kernel,
        out_shape=jax.ShapeDtypeStruct((B, f_rows, n_mel_pad), jnp.float32),
        grid_spec=pltpu.PrefetchScalarGridSpec(
            num_scalar_prefetch=0,
            grid=(B, n_tiles),                       # batch parallel, freq tiles reduce
            in_specs=[
                pl.BlockSpec((None, f_rows, n_fft), lambda b, j: (b, 0, 0)),   # frames
                pl.BlockSpec((1, n_fft), lambda b, j: (0, 0)),                 # window
                pl.BlockSpec((n_fft, tf), lambda b, j: (0, j)),                # cos
                pl.BlockSpec((n_fft, tf), lambda b, j: (0, j)),                # sin
                pl.BlockSpec((tf, n_mel_pad), lambda b, j: (j, 0)),            # mel^T
            ],
            out_specs=pl.BlockSpec((None, f_rows, n_mel_pad), lambda b, j: (b, 0, 0)),
            scratch_shapes=[
                pltpu.VMEM((f_rows, n_fft), jnp.bfloat16),      # windowed frames
                pltpu.VMEM((f_rows, n_mel_pad), jnp.float32),   # mel accumulator
            ],
        ),
        compiler_params=pltpu.CompilerParams(
            dimension_semantics=("parallel", "arbitrary"),
            vmem_limit_bytes=32 * 1024 * 1024,       # right-sized for v7x's 64 MiB VMEM
        ),
    )(frames, consts["window"], consts["cos_basis"], consts["sin_basis"],
      consts["mel_t"])

    out = out[:, :n_frames, :consts["n_mel_channels"]]           # drop padding rows/cols
    return jnp.transpose(out, (0, 2, 1))                         # PyTorch (B, n_mel, T')


# --------------------------------------------------------------------------------------
# Independent numpy reference (np.fft) for a correctness sanity check.
# --------------------------------------------------------------------------------------
def _reference_numpy(audio, consts):
    n_fft, hop, wl = consts["n_fft"], consts["hop_length"], consts["win_length"]
    mel = np.asarray(consts["mel_basis"], dtype=np.float64)
    a = np.asarray(audio[:, 0, :], dtype=np.float64)
    p = (n_fft - hop) // 2
    a = np.pad(a, ((0, 0), (p, p)), mode="reflect")
    n = np.arange(wl)
    w = 0.5 - 0.5 * np.cos(2.0 * np.pi * n / wl)
    wfull = np.zeros(n_fft)
    wfull[(n_fft - wl) // 2:(n_fft - wl) // 2 + wl] = w
    n_frames = 1 + (a.shape[1] - n_fft) // hop
    outs = []
    for b in range(a.shape[0]):
        frames = np.stack([a[b, i * hop:i * hop + n_fft] * wfull
                           for i in range(n_frames)], axis=0)
        mag = np.abs(np.fft.rfft(frames, n=n_fft, axis=-1))       # (F, n_freq)
        outs.append(np.log10(np.maximum(mel @ mag.T, 1e-5)))      # (n_mel, F)
    return np.stack(outs, axis=0)


if __name__ == "__main__":
    # Small example consistent with the module defaults (n_fft=2048, hop=300, win=1200).
    B, T = 2, 4096
    consts = make_audio2mel_constants()

    audio = jax.random.normal(jax.random.PRNGKey(0), (B, 1, T), jnp.float32)

    out = audio2mel(audio, consts)
    out = jax.block_until_ready(out)

    p = (consts["n_fft"] - consts["hop_length"]) // 2
    n_frames = 1 + (T + 2 * p - consts["n_fft"]) // consts["hop_length"]
    assert out.shape == (B, consts["n_mel_channels"], n_frames), out.shape
    assert bool(jnp.all(jnp.isfinite(out)))

    ref = _reference_numpy(np.asarray(audio), consts)
    max_err = float(np.max(np.abs(np.asarray(out) - ref)))
    assert max_err < 0.25, f"max |log10-mel| error vs numpy reference = {max_err}"
    print("KERNEL_OK")
</pallas_src>

<mosaic_0001>
module attributes {stable_mosaic.version = 11 : i64} {
  func.func @_audio2mel_kernel(%arg0: i32, %arg1: i32, %arg2: memref<1x16x2048xf32, #tpu.memory_space<vmem>>, %arg3: memref<1x2048xf32, #tpu.memory_space<vmem>>, %arg4: memref<2048x384xbf16, #tpu.memory_space<vmem>>, %arg5: memref<2048x384xbf16, #tpu.memory_space<vmem>>, %arg6: memref<384x128xbf16, #tpu.memory_space<vmem>>, %arg7: memref<1x16x128xf32, #tpu.memory_space<vmem>>, %arg8: memref<16x2048xbf16, #tpu.memory_space<vmem>>, %arg9: memref<16x128xf32, #tpu.memory_space<vmem>>) attributes {dimension_semantics = [#tpu.dimension_semantics<parallel>, #tpu.dimension_semantics<arbitrary>], iteration_bounds = array<i64: 2, 3>, scalar_prefetch = 0 : i64, scratch_operands = 2 : i64, tpu.core_type = #tpu.core_type<tc>, window_params = [{transform_indices = @transform_0, window_bounds = array<i64: 1, 16, 2048>}, {pipeline_mode = #tpu.pipeline_mode<synchronous>, transform_indices = @transform_1, window_bounds = array<i64: 1, 2048>}, {transform_indices = @transform_2, window_bounds = array<i64: 2048, 384>}, {transform_indices = @transform_3, window_bounds = array<i64: 2048, 384>}, {transform_indices = @transform_4, window_bounds = array<i64: 384, 128>}, {transform_indices = @transform_5, window_bounds = array<i64: 1, 16, 128>}]} {
    %c0_i32 = arith.constant 0 : i32
    %0 = arith.cmpi eq, %arg1, %c0_i32 : i32
    %1 = arith.extui %0 : i1 to i32
    %c0_i32_0 = arith.constant 0 : i32
    %2 = arith.cmpi ne, %1, %c0_i32_0 : i32
    scf.if %2 {
      %c0_15 = arith.constant 0 : index
      %c0_16 = arith.constant 0 : index
      %c0_17 = arith.constant 0 : index
      %21 = vector.load %arg2[%c0_15, %c0_16, %c0_17] : memref<1x16x2048xf32, #tpu.memory_space<vmem>>, vector<1x16x2048xf32>
      %22 = vector.shape_cast %21 : vector<1x16x2048xf32> to vector<16x2048xf32>
      %c0_18 = arith.constant 0 : index
      %c0_19 = arith.constant 0 : index
      %23 = vector.load %arg3[%c0_18, %c0_19] : memref<1x2048xf32, #tpu.memory_space<vmem>>, vector<1x2048xf32>
      %24 = vector.broadcast %23 : vector<1x2048xf32> to vector<16x2048xf32>
      %25 = arith.mulf %22, %24 : vector<16x2048xf32>
      %26 = arith.truncf %25 : vector<16x2048xf32> to vector<16x2048xbf16>
      %c0_20 = arith.constant 0 : index
      %c0_21 = arith.constant 0 : index
      %27 = vector.load %arg8[%c0_20, %c0_21] : memref<16x2048xbf16, #tpu.memory_space<vmem>>, vector<16x2048xbf16>
      tpu.vector_store %arg8[%c0_20, %c0_21], %26 {strides = array<i32>} : memref<16x2048xbf16, #tpu.memory_space<vmem>>, vector<16x2048xbf16>,
      %cst_22 = arith.constant 0.000000e+00 : f32
      %28 = vector.broadcast %cst_22 : f32 to vector<16x128xf32>
      %c0_23 = arith.constant 0 : index
      %c0_24 = arith.constant 0 : index
      %29 = vector.load %arg9[%c0_23, %c0_24] : memref<16x128xf32, #tpu.memory_space<vmem>>, vector<16x128xf32>
      tpu.vector_store %arg9[%c0_23, %c0_24], %28 {strides = array<i32>} : memref<16x128xf32, #tpu.memory_space<vmem>>, vector<16x128xf32>,
    } else {
    }
    %c0 = arith.constant 0 : index
    %c0_1 = arith.constant 0 : index
    %3 = vector.load %arg8[%c0, %c0_1] : memref<16x2048xbf16, #tpu.memory_space<vmem>>, vector<16x2048xbf16>
    %c0_2 = arith.constant 0 : index
    %c0_3 = arith.constant 0 : index
    %4 = vector.load %arg4[%c0_2, %c0_3] : memref<2048x384xbf16, #tpu.memory_space<vmem>>, vector<2048x384xbf16>
    %cst = arith.constant dense<0.000000e+00> : vector<16x384xf32>
    %5 = tpu.matmul %3, %4, %cst {dimension_numbers = #tpu.dot_dimension_numbers<[1], [0], [0], [1], [0, 0, 1, 1], [], []>} : vector<16x2048xbf16>, vector<2048x384xbf16>, vector<16x384xf32> -> vector<16x384xf32>
    %c0_4 = arith.constant 0 : index
    %c0_5 = arith.constant 0 : index
    %6 = vector.load %arg5[%c0_4, %c0_5] : memref<2048x384xbf16, #tpu.memory_space<vmem>>, vector<2048x384xbf16>
    %cst_6 = arith.constant dense<0.000000e+00> : vector<16x384xf32>
    %7 = tpu.matmul %3, %6, %cst_6 {dimension_numbers = #tpu.dot_dimension_numbers<[1], [0], [0], [1], [0, 0, 1, 1], [], []>} : vector<16x2048xbf16>, vector<2048x384xbf16>, vector<16x384xf32> -> vector<16x384xf32>
    %8 = arith.mulf %5, %5 : vector<16x384xf32>
    %9 = arith.mulf %7, %7 : vector<16x384xf32>
    %10 = arith.addf %8, %9 : vector<16x384xf32>
    %11 = math.sqrt %10 : vector<16x384xf32>
    %c0_7 = arith.constant 0 : index
    %c0_8 = arith.constant 0 : index
    %12 = vector.load %arg9[%c0_7, %c0_8] : memref<16x128xf32, #tpu.memory_space<vmem>>, vector<16x128xf32>
    %13 = arith.truncf %11 : vector<16x384xf32> to vector<16x384xbf16>
    %c0_9 = arith.constant 0 : index
    %c0_10 = arith.constant 0 : index
    %14 = vector.load %arg6[%c0_9, %c0_10] : memref<384x128xbf16, #tpu.memory_space<vmem>>, vector<384x128xbf16>
    %cst_11 = arith.constant dense<0.000000e+00> : vector<16x128xf32>
    %15 = tpu.matmul %13, %14, %cst_11 {dimension_numbers = #tpu.dot_dimension_numbers<[1], [0], [0], [1], [0, 0, 1, 1], [], []>} : vector<16x384xbf16>, vector<384x128xbf16>, vector<16x128xf32> -> vector<16x128xf32>
    %16 = arith.addf %12, %15 : vector<16x128xf32>
    %c0_12 = arith.constant 0 : index
    %c0_13 = arith.constant 0 : index
    %17 = vector.load %arg9[%c0_12, %c0_13] : memref<16x128xf32, #tpu.memory_space<vmem>>, vector<16x128xf32>
    tpu.vector_store %arg9[%c0_12, %c0_13], %16 {strides = array<i32>} : memref<16x128xf32, #tpu.memory_space<vmem>>, vector<16x128xf32>,
    %c2_i32 = arith.constant 2 : i32
    %18 = arith.cmpi eq, %arg1, %c2_i32 : i32
    %19 = arith.extui %18 : i1 to i32
    %c0_i32_14 = arith.constant 0 : i32
    %20 = arith.cmpi ne, %19, %c0_i32_14 : i32
    scf.if %20 {
      %c0_15 = arith.constant 0 : index
      %c0_16 = arith.constant 0 : index
      %21 = vector.load %arg9[%c0_15, %c0_16] : memref<16x128xf32, #tpu.memory_space<vmem>>, vector<16x128xf32>
      %cst_17 = arith.constant 9.99999974E-6 : f32
      %22 = vector.broadcast %cst_17 : f32 to vector<16x128xf32>
      %23 = arith.maximumf %21, %22 : vector<16x128xf32>
      %24 = math.log %23 : vector<16x128xf32>
      %cst_18 = arith.constant 0.434294492 : f32
      %25 = vector.broadcast %cst_18 : f32 to vector<16x128xf32>
      %26 = arith.mulf %24, %25 : vector<16x128xf32>
      %c0_19 = arith.constant 0 : index
      %c0_20 = arith.constant 0 : index
      %c0_21 = arith.constant 0 : index
      %27 = vector.load %arg7[%c0_19, %c0_20, %c0_21] : memref<1x16x128xf32, #tpu.memory_space<vmem>>, vector<1x16x128xf32>
      %28 = vector.shape_cast %27 : vector<1x16x128xf32> to vector<16x128xf32>
      %29 = vector.shape_cast %26 : vector<16x128xf32> to vector<1x16x128xf32>
      tpu.vector_store %arg7[%c0_19, %c0_20, %c0_21], %29 {strides = array<i32>} : memref<1x16x128xf32, #tpu.memory_space<vmem>>, vector<1x16x128xf32>,
    } else {
    }
    return
  }
  func.func @transform_0(%arg0: i32, %arg1: i32) -> (i32, i32, i32) {
    %c0_i32 = arith.constant 0 : i32
    %c0_i32_0 = arith.constant 0 : i32
    %c0_i32_1 = arith.constant 0 : i32
    return %arg0, %c0_i32, %c0_i32_0 : i32, i32, i32
  }
  func.func @transform_1(%arg0: i32, %arg1: i32) -> (i32, i32) {
    %c0_i32 = arith.constant 0 : i32
    %c0_i32_0 = arith.constant 0 : i32
    %c0_i32_1 = arith.constant 0 : i32
    return %c0_i32, %c0_i32_0 : i32, i32
  }
  func.func @transform_2(%arg0: i32, %arg1: i32) -> (i32, i32) {
    %c0_i32 = arith.constant 0 : i32
    %c0_i32_0 = arith.constant 0 : i32
    return %c0_i32, %arg1 : i32, i32
  }
  func.func @transform_3(%arg0: i32, %arg1: i32) -> (i32, i32) {
    %c0_i32 = arith.constant 0 : i32
    %c0_i32_0 = arith.constant 0 : i32
    return %c0_i32, %arg1 : i32, i32
  }
  func.func @transform_4(%arg0: i32, %arg1: i32) -> (i32, i32) {
    %c0_i32 = arith.constant 0 : i32
    %c0_i32_0 = arith.constant 0 : i32
    return %arg1, %c0_i32 : i32, i32
  }
  func.func @transform_5(%arg0: i32, %arg1: i32) -> (i32, i32, i32) {
    %c0_i32 = arith.constant 0 : i32
    %c0_i32_0 = arith.constant 0 : i32
    %c0_i32_1 = arith.constant 0 : i32
    return %arg0, %c0_i32, %c0_i32_0 : i32, i32, i32
  }
}

</mosaic_0001>

<bundles_post_ra>
// kernel: tpu_custom_call.1
= control target key start
LH: loop header
LB: loop body
LE: loop exit
PB: predicated region body
PF: predicated region fallthrough
CT: control target
= control target key end

     0   :  { %s14495_s0 = inlined_call_operand.hbm [shape: f32[2,16,2048], index: 0, kind: input, shape index: {}]   ;;  %s14496_s1 = inlined_call_operand.hbm [shape: f32[1,2048], index: 1, kind: input, shape index: {}]   ;;  %s14497_s2 = inlined_call_operand.hbm [shape: bf16[2048,1152], index: 2, kind: input, shape index: {}]   ;;  %s14498_s3 = inlined_call_operand.hbm [shape: bf16[2048,1152], index: 3, kind: input, shape index: {}]   ;;  %s14499_s4 = inlined_call_operand.hbm [shape: bf16[1152,128], index: 4, kind: input, shape index: {}]   ;;  %s14500_s5 = inlined_call_operand.hbm [shape: f32[2,16,128], index: 5, kind: output, shape index: {}]  }
   0x1   :  { %14507 = sst [smem:[#allocation57_spill]] %s14495_s0 }
   0x2   :  { %14508 = sst [smem:[#allocation58_spill]] %s14496_s1 }
   0x3   :  { %14509 = sst [smem:[#allocation59_spill]] %s14497_s2 }
   0x4   :  { %14510 = sst [smem:[#allocation60_spill]] %s14498_s3 }
   0x5   :  { %14511 = sst [smem:[#allocation61_spill]] %s14500_s5 }
   0x6   :  { %10 = vsyncpa [#allocation5], 0 }
   0x7   :  { %12 = vsyncpa [#allocation5 + $0x1], 0 }
   0x8   :  { %13 = vsyncpa [#allocation8], 0 }
   0x9   :  { %14 = vsyncpa [#allocation6], 0 }
   0xa   :  { %16 = vsyncpa [#allocation6 + $0x1], 0  ;;  %s12158_s18 = smov 0   ;;  %s12160_s19 = smov 0  }
   0xb   :  { %s12162_s20 = smov 0   ;;  %s12164_s21 = smov 0  }
   0xc   :  { %s12166_s22 = smov 0   ;;  %s12168_s23 = smov 0  }
   0xd   :  { %s12170_s24 = smov 0   ;;  %s12172_s25 = smov 0  }
   0xe   :  { %s12174_s26 = smov 0   ;;  %s12176_s27 = smov 0  }
   0xf   :  { %s12178_s28 = smov 0  }
  0x10 LB: > { %14512 = sst [smem:[#allocation17_spill]] %s12111_s27  ;;  %s31_s29 = sadd.s32 1, %s12107_s26  ;;  %s12115_s28 = sphi %s12178_s28, %s22_s28   ;;  %s12111_s27 = sphi %s12176_s27, %s14605_s27   ;;  %s12107_s26 = sphi %s12174_s26, %s14613_s26   ;;  %s12103_s25 = sphi %s12172_s25, %s14603_s25   ;;  %s12099_s24 = sphi %s12170_s24, %s14612_s24   ;;  %s12095_s23 = sphi %s12168_s23, %s14611_s23   ;;  %s12091_s22 = sphi %s12166_s22, %s14610_s22   ;;  %s12087_s21 = sphi %s12164_s21, %s14609_s21   ;;  %s12083_s20 = sphi %s12162_s20, %s14608_s20   ;;  %s12079_s19 = sphi %s12160_s19, %s14607_s19   ;;  %s12075_s18 = sphi %s12158_s18, %s14606_s18  }
  0x11   : > { %s34_s30 = sadd.s32 1, %s12111_s27  ;;  %p32_p0 = scmp.ge.s32.totalorder %s31_s29, 3 }
  0x12   : > { %s41_s6 = sadd.s32 1, %s12095_s23  ;;  %p48_p1 = scmp.ne.s32.totalorder %s12095_s23, %s12091_s22 }
  0x13   : > { %p49_p2 = scmp.eq.s32.totalorder %s12115_s28, 0  ;;  %s14615_s29 = smov (%p32_p0, %s31_s29), 0 }
  0x14   : > { %14513 = sst [smem:[#allocation18_spill]] %s14615_s29  ;;  %s14617_s30 = smov (!%p32_p0, %s34_s30), %s12111_s27 }
  0x15   : > { %p12225_p3 = por %p49_p2, %p48_p1  ;;  %s85_s8 = ssub.s32 %s12107_s26, %s14615_s29 }
  0x16   : > { %p36_p4 = scmp.ge.s32.totalorder %s14617_s30, 2  ;;  %p86_p5 = scmp.eq.s32.totalorder %s85_s8, 0 }
  0x17   : > { %s88_s9 = sadd.s32 1, %s12083_s20  ;;  %p95_p6 = scmp.ne.s32.totalorder %s12083_s20, %s12079_s19 }
  0x18   : > { %s14619_s30 = smov (%p36_p4, %s14617_s30), 0  ;;  %p11717_p9 = scmp.lt.s32.totalorder %s12115_s28, 6 }
  0x19   : > { %14515 = sst [smem:[#allocation19_spill]] %s14619_s30  ;;  %s38_s11 = ssub.s32 %s12111_s27, %s14619_s30 }
  0x1a   : > { %s12237_s10 = scalar_select %p86_p5, %s12083_s20, %s88_s9  }
  0x1b   : > { %p12241_p7 = por %p95_p6, %p49_p2  ;;  %p39_p8 = scmp.eq.s32.totalorder %s38_s11, 0 }
  0x1c   : > { %14516 = sst [smem:[#allocation20_spill]] %s12237_s10  ;;  %s215_s13 = sand.u32 1, %s12115_s28  }
  0x1d   : > { %s12248_s14 = scalar_select %p39_p8, %s12095_s23, %s41_s6  }
  0x1e   : > { %s217_s15 = sand.u32 1, %s12095_s23   ;;  %s10863_s17 = sshll.u32 %s12111_s27, 8 }
  0x1f   : > { %14518 = sst [smem:[#allocation21_spill]] %s12248_s14  ;;  %s7614_s16 = sshll.u32 %s217_s15, 8 }
  0x20   : > { %s14519_s0 = sld [smem:[#allocation57_spill]]  ;;  %s219_s10 = scalar_lea.vmem [#allocation4], %s7614_s16 }
  0x21   : > { %s227_s5 = sshll.u32 %s219_s10, 4  ;;  %p11700_p10 = pnand %p11717_p9, %p12225_p3  ;;  %s228_s5 = int_to_ptr.vmem [resolvable:$true] %s227_s5 }
  0x22   : > { %p12263_p11 = pnand %p11717_p9, %p12241_p7  ;;  %s14504_s11 = sand.u32 1, %s12083_s20  }
  0x23   : > { %s12268_s15 = scalar_lea.sflag [#allocation5], %s215_s13  ;;  %s12118_s16 = smov 128  }
  0x24   : > { %s11676_s10 = smul.u32 3072, %s14504_s11  ;;  %s14521_s2 = sld [smem:[#allocation59_spill]] }
  0x25   : > { %s10864_s7 = smul.u32 12, %s12107_s26  ;;  %s14522_s3 = sld [smem:[#allocation60_spill]] }
  0x26   : > { %s224_s30 = scalar_lea.hbm %s14519_s0, %s10863_s17  ;;  %s241_s9 = scalar_lea.vmem [#allocation9], %s11676_s10 }
  0x27   : > { %s225_s29 = sshll.u32 %s224_s30, 4  ;;  %s12117_s30 = smov 2048   ;;  %s226_s29 = int_to_ptr.hbm [resolvable:$true] %s225_s29 }
  0x28   : > { %11702 = dma.hbm_to_vmem [thread:$0]  (!%p11700_p10), %s226_s29, 4096, %s228_s5, %s12268_s15, %s12117_s30, %s12117_s30, %s12118_s16  }
  0x29   : > { %s249_s0 = sshll.u32 %s241_s9, 4  ;;  %s12119_s5 = smov 576   ;;  %s250_s0 = int_to_ptr.vmem [resolvable:$true] %s249_s0 }
  0x2a   : > { %s246_s12 = scalar_lea.hbm %s14521_s2, %s10864_s7  ;;  %s12120_s29 = smov 192  }
  0x2b   : > { %s247_s13 = sshll.u32 %s246_s12, 4  ;;  %s12121_s30 = smov 12   ;;  %s248_s13 = int_to_ptr.hbm [resolvable:$true] %s247_s13 }
  0x2c   : > { %11705 = dma.hbm_to_vmem [thread:$0]  (!%p12263_p11), %s248_s13, 49152, %s250_s0, %s12268_s15, %s12119_s5, %s12120_s29, %s12121_s30  }
  0x2d   : > { %s268_s8 = scalar_lea.hbm %s14522_s3, %s10864_s7  ;;  %s263_s11 = scalar_lea.vmem [#allocation10], %s11676_s10 }
  0x2e   : > { %s269_s9 = sshll.u32 %s268_s8, 4  ;;  %s271_s12 = sshll.u32 %s263_s11, 4  ;;  %s270_s9 = int_to_ptr.hbm [resolvable:$true] %s269_s9  ;;  %s272_s12 = int_to_ptr.vmem [resolvable:$true] %s271_s12 }
  0x2f   : > { %11708 = dma.hbm_to_vmem [thread:$0]  (!%p12263_p11), %s270_s9, 49152, %s272_s12, %s12268_s15, %s12119_s5, %s12120_s29, %s12121_s30  }
  0x30   : > { %s12287_s2 = sadd.s32 4294967295, %s12115_s28   ;;  %s7610_s0 = sadd.s32 4294967294, %s12115_s28  }
  0x31   : > { %p54_p12 = scmp.ne.s32.totalorder %s12091_s22, %s12087_s21  ;;  %p55_p13 = scmp.eq.s32.totalorder %s12287_s2, 0 }
  0x32   : > { %p101_p0 = scmp.ne.s32.totalorder %s12079_s19, %s12075_s18  ;;  %p177_p2 = scmp.eq.s32.totalorder %s12287_s2, 5 }
  0x33   : > { %p12298_p3 = por %p55_p13, %p54_p12  ;;  %p183_p4 = scmp.eq.s32.totalorder %s7610_s0, 5 }
  0x34   : > { %p12304_p5 = por %p101_p0, %p55_p13  ;;  %p12311_p6 = por %p177_p2, %p48_p1 }
  0x35   : > { %p12315_p7 = por %p183_p4, %p54_p12  ;;  %p7611_p8 = scmp.ge.s32.totalorder %s12115_s28, 1 }
  0x36   : > { %p190_p9 = scmp.lt.s32.totalorder %s12115_s28, 7  ;;  %s14527_s1 = sld [smem:[#allocation58_spill]] }
  0x37   : > { %s12122_s16 = smov [#allocation7]   ;;  %s14529_s8 = sand.u32 1, %s12083_s20  }
  0x38   : > { %p12324_p10 = pnand %p7611_p8, %p190_p9  ;;  %s204_s17 = sshll.u32 %s12122_s16, 4  ;;  %s205_s17 = int_to_ptr.vmem [resolvable:$true] %s204_s17 }
  0x39   : > { %s11678_s9 = smul.u32 192, %s14529_s8  ;;  %s12123_s14 = smov 64  }
  0x3a   : > { %p11695_p1 = pneg %p12324_p10  ;;  %s10866_s12 = smul.u32 192, %s12107_s26 }
  0x3b   : > { %s285_s0 = scalar_lea.vmem [#allocation11], %s11678_s9  ;;  %s12124_s16 = smov 4  }
  0x3c   : > { %s202_s29 = sshll.u32 %s14527_s1, 4  ;;  %p11696_p12 = pnand %p11695_p1, %p55_p13  ;;  %s203_s29 = int_to_ptr.hbm [resolvable:$true] %s202_s29 }
  0x3d   : > { %s293_s13 = sshll.u32 %s285_s0, 4  ;;  %s290_s3 = scalar_lea.hbm %s14499_s4, %s10866_s12  ;;  %s294_s13 = int_to_ptr.vmem [resolvable:$true] %s293_s13 }
  0x3e   : > { %s291_s27 = sshll.u32 %s290_s3, 4  ;;  %305 = sbr.rel (%p12324_p10) target bundleno = 1241 (0x4d9), region = 40  ;;  %s292_s27 = int_to_ptr.hbm [resolvable:$true] %s291_s27 }
  0x3f   : > { %11698 = dma.hbm_to_vmem [thread:$0]  (!%p11696_p12), %s203_s29, 256, %s205_s17, [#allocation8]  }
  0x40   : > { %11711 = dma.hbm_to_vmem [thread:$0]  (!%p12263_p11), %s292_s27, 3072, %s294_s13, %s12268_s15, %s12123_s14, %s12123_s14, %s12124_s16  }
  0x43   : > { %s307_s8 = sand.u32 1, %s12287_s2   ;;  %s12345_s9 = sand.u32 1, %s12091_s22  }
  0x44   : > { %s7621_s1 = sshll.u32 %s12345_s9, 8  ;;  %s308_s12 = scalar_lea.sflag [#allocation5], %s307_s8 }
  0x45   : > { %s12348_s0 = scalar_lea.vmem [#allocation4], %s7621_s1 }
  0x46   : > { %12058 = dma.done.wait (%p12298_p3), %s308_s12, 4096  }
  0x47   : > { %12060 = vsyncadd (%p12298_p3), %s308_s12, 4294963200 }
  0x48   : > { %12062 = dma.done.wait (%p55_p13), [#allocation8], 256  }
  0x49   : > { %12064 = vsyncadd (%p55_p13), [#allocation8], 4294967040  ;;  %s324_s3 = sand.u32 1, %s12079_s19  }
  0x4a   : > { %s11679_s27 = smul.u32 3072, %s324_s3 }
  0x4c   : > { %s12359_s14 = scalar_lea.vmem [#allocation9], %s11679_s27 }
  0x4d   : > { %12066 = dma.done.wait (%p12304_p5), %s308_s12, 101376  }
  0x4e   : > { %12068 = vsyncadd (%p12304_p5), %s308_s12, 4294865920  ;;  %s11680_s6 = smul.u32 192, %s324_s3  ;;  %s7623_s15 = sshll.u32 %s12345_s9, 4 }
  0x4f   : > { %s12366_s11 = scalar_lea.vmem [#allocation10], %s11679_s27  ;;  %s12370_s2 = scalar_lea.vmem [#allocation12], %s7623_s15 }
  0x50   : > { %s12368_s29 = scalar_lea.vmem [#allocation11], %s11680_s6  ;;  %p7624_p11 = scmp.ne.s32.totalorder %s12099_s24, 0 }
  0x52   : > { %395 = sbr.rel (%p7624_p11) target bundleno = 111 (0x6f), region = 64 }
  0x57   : > { %v396_v0 = vld [vmem:[%s12348_s0] sm:$0xff]  ;;  %v397_v1 = vld [vmem:[%s12348_s0 + $0x8] sm:$0xff]  ;;  %v398_v5 = vld [vmem:[%s12348_s0 + $0x10] sm:$0xff]  ;;  %v12125_v20 = vmov 0.0  }
  0x58   : > { %v12375_v2 = vld [vmem:[#allocation7] sm:$0xff]  ;;  %v399_v6 = vld [vmem:[%s12348_s0 + $0x18] sm:$0xff]  ;;  %v401_v10 = vld [vmem:[%s12348_s0 + $0x28] sm:$0xff]  ;;  %528 = vst [vmem:[#allocation3] sm:$0xff] %v12125_v20 }
  0x59   : > { %v432_v3 = vperm.slane %v12375_v2, 0  ;;  %v433_v4 = vperm.slane %v12375_v2, 1  ;;  %v434_v7 = vperm.slane %v12375_v2, 2  ;;  %v435_v8 = vperm.slane %v12375_v2, 3  ;;  %v400_v9 = vld [vmem:[%s12348_s0 + $0x20] sm:$0xff]  ;;  %v402_v13 = vld [vmem:[%s12348_s0 + $0x30] sm:$0xff] }
  0x5a   : > { %v436_v11 = vperm.slane %v12375_v2, 4  ;;  %v437_v12 = vperm.slane %v12375_v2, 5  ;;  %v438_v14 = vperm.slane %v12375_v2, 6  ;;  %v403_v19 = vld [vmem:[%s12348_s0 + $0x38] sm:$0xff]  ;;  %v439_v23 = vperm.slane %v12375_v2, 7  ;;  %v404_v25 = vld [vmem:[%s12348_s0 + $0x40] sm:$0xff] }
  0x5b   : > { %v464_v15 = vmul.f32 %v432_v3, %v396_v0  ;;  %v465_v16 = vmul.f32 %v433_v4, %v397_v1  ;;  %v466_v17 = vmul.f32 %v434_v7, %v398_v5  ;;  %v467_v18 = vmul.f32 %v435_v8, %v399_v6  ;;  %v405_v26 = vld [vmem:[%s12348_s0 + $0x48] sm:$0xff]  ;;  %529 = vst [vmem:[#allocation3 + $0x8] sm:$0xff] %v12125_v20  ;;  %v406_v32 = vld [vmem:[%s12348_s0 + $0x50] sm:$0xff]  ;;  %v407_v33 = vld [vmem:[%s12348_s0 + $0x58] sm:$0xff] }
  0x5c   : > { %v468_v21 = vmul.f32 %v436_v11, %v400_v9  ;;  %v469_v22 = vmul.f32 %v437_v12, %v401_v10  ;;  %v470_v24 = vmul.f32 %v438_v14, %v402_v13  ;;  %v12407_v27 = vld [vmem:[#allocation7 + $0x8] sm:$0xff]  ;;  %v471_v35 = vmul.f32 %v439_v23, %v403_v19  ;;  %v408_v38 = vld [vmem:[%s12348_s0 + $0x60] sm:$0xff]  ;;  %v410_v44 = vld [vmem:[%s12348_s0 + $0x70] sm:$0xff] }
  0x5d   : > { %v496_v28 = vpack.c.bf16 %v465_v16, %v464_v15  ;;  %v497_v29 = vpack.c.bf16 %v467_v18, %v466_v17  ;;  %v440_v30 = vperm.slane %v12407_v27, 0  ;;  %v441_v31 = vperm.slane %v12407_v27, 1  ;;  %v409_v39 = vld [vmem:[%s12348_s0 + $0x68] sm:$0xff]  ;;  %v412_v45 = vld [vmem:[%s12348_s0 + $0x80] sm:$0xff]  ;;  %v411_v50 = vld [vmem:[%s12348_s0 + $0x78] sm:$0xff] }
  0x5e   : > { %v498_v34 = vpack.c.bf16 %v469_v22, %v468_v21  ;;  %v442_v36 = vperm.slane %v12407_v27, 2  ;;  %v443_v37 = vperm.slane %v12407_v27, 3  ;;  %v444_v42 = vperm.slane %v12407_v27, 4  ;;  %v413_v46 = vld [vmem:[%s12348_s0 + $0x88] sm:$0xff]  ;;  %v414_v52 = vld [vmem:[%s12348_s0 + $0x90] sm:$0xff]  ;;  %v415_v53 = vld [vmem:[%s12348_s0 + $0x98] sm:$0xff] }
  0x5f   : > { %512 = vst [vmem:[#allocation2] sm:$0xff] %v496_v28  ;;  %v472_v40 = vmul.f32 %v440_v30, %v404_v25  ;;  %v473_v41 = vmul.f32 %v441_v31, %v405_v26  ;;  %v445_v43 = vperm.slane %v12407_v27, 5  ;;  %v499_v47 = vpack.c.bf16 %v471_v35, %v470_v24  ;;  %v416_v58 = vld [vmem:[%s12348_s0 + $0xa0] sm:$0xff]  ;;  %v417_v59 = vld [vmem:[%s12348_s0 + $0xa8] sm:$0xff]  ;;  %v418_v60 = vld [vmem:[%s12348_s0 + $0xb0] sm:$0xff] }
  0x60   : > { %513 = vst [vmem:[#allocation2 + $0x8] sm:$0xff] %v497_v29  ;;  %v474_v48 = vmul.f32 %v442_v36, %v406_v32  ;;  %v475_v49 = vmul.f32 %v443_v37, %v407_v33  ;;  %v446_v51 = vperm.slane %v12407_v27, 6  ;;  %v476_v55 = vmul.f32 %v444_v42, %v408_v38  ;;  %v419_v1 = vld [vmem:[%s12348_s0 + $0xb8] sm:$0xff]  ;;  %v420_v5 = vld [vmem:[%s12348_s0 + $0xc0] sm:$0xff]  ;;  %v421_v15 = vld [vmem:[%s12348_s0 + $0xc8] sm:$0xff] }
  0x61   : > { %514 = vst [vmem:[#allocation2 + $0x10] sm:$0xff] %v498_v34  ;;  %v500_v54 = vpack.c.bf16 %v473_v41, %v472_v40  ;;  %v477_v56 = vmul.f32 %v445_v43, %v409_v39  ;;  %v447_v57 = vperm.slane %v12407_v27, 7  ;;  %v480_v63 = vmul.f32 %v432_v3, %v412_v45  ;;  %v422_v3 = vld [vmem:[%s12348_s0 + $0xd0] sm:$0xff]  ;;  %v423_v16 = vld [vmem:[%s12348_s0 + $0xd8] sm:$0xff]  ;;  %v424_v20 = vld [vmem:[%s12348_s0 + $0xe0] sm:$0xff] }
  0x62   : > { %515 = vst [vmem:[#allocation2 + $0x18] sm:$0xff] %v499_v47  ;;  %v501_v61 = vpack.c.bf16 %v475_v49, %v474_v48  ;;  %v478_v62 = vmul.f32 %v446_v51, %v410_v44  ;;  %v481_v0 = vmul.f32 %v433_v4, %v413_v46  ;;  %v482_v10 = vmul.f32 %v434_v7, %v414_v52  ;;  %v425_v7 = vld [vmem:[%s12348_s0 + $0xe8] sm:$0xff]  ;;  %v426_v21 = vld [vmem:[%s12348_s0 + $0xf0] sm:$0xff]  ;;  %v427_v26 = vld [vmem:[%s12348_s0 + $0xf8] sm:$0xff] }
  0x63   : > { %516 = vst [vmem:[#allocation2 + $0x20] sm:$0xff] %v500_v54  ;;  %v502_v6 = vpack.c.bf16 %v477_v56, %v476_v55  ;;  %v479_v9 = vmul.f32 %v447_v57, %v411_v50  ;;  %v483_v13 = vmul.f32 %v435_v8, %v415_v53  ;;  %v484_v17 = vmul.f32 %v436_v11, %v416_v58 }
  0x64   : > { %517 = vst [vmem:[#allocation2 + $0x28] sm:$0xff] %v501_v61  ;;  %v504_v4 = vpack.c.bf16 %v481_v0, %v480_v63  ;;  %v485_v18 = vmul.f32 %v437_v12, %v417_v59  ;;  %v486_v19 = vmul.f32 %v438_v14, %v418_v60  ;;  %v487_v24 = vmul.f32 %v439_v23, %v419_v1 }
  0x65   : > { %518 = vst [vmem:[#allocation2 + $0x30] sm:$0xff] %v502_v6  ;;  %v503_v8 = vpack.c.bf16 %v479_v9, %v478_v62  ;;  %v505_v22 = vpack.c.bf16 %v483_v13, %v482_v10  ;;  %v488_v25 = vmul.f32 %v440_v30, %v420_v5  ;;  %v489_v11 = vmul.f32 %v441_v31, %v421_v15 }
  0x66   : > { %520 = vst [vmem:[#allocation2 + $0x40] sm:$0xff] %v504_v4  ;;  %v506_v28 = vpack.c.bf16 %v485_v18, %v484_v17  ;;  %v490_v12 = vmul.f32 %v442_v36, %v422_v3  ;;  %v491_v29 = vmul.f32 %v443_v37, %v423_v16  ;;  %v507_v14 = vpack.c.bf16 %v487_v24, %v486_v19 }
  0x67   : > { %519 = vst [vmem:[#allocation2 + $0x38] sm:$0xff] %v503_v8  ;;  %v492_v32 = vmul.f32 %v444_v42, %v424_v20  ;;  %v493_v33 = vmul.f32 %v445_v43, %v425_v7  ;;  %v494_v34 = vmul.f32 %v446_v51, %v426_v21  ;;  %v508_v35 = vpack.c.bf16 %v489_v11, %v488_v25 }
  0x68   : > { %521 = vst [vmem:[#allocation2 + $0x48] sm:$0xff] %v505_v22  ;;  %v509_v38 = vpack.c.bf16 %v491_v29, %v490_v12  ;;  %v495_v39 = vmul.f32 %v447_v57, %v427_v26 }
  0x69   : > { %522 = vst [vmem:[#allocation2 + $0x50] sm:$0xff] %v506_v28  ;;  %v510_v2 = vpack.c.bf16 %v493_v33, %v492_v32 }
  0x6a   : > { %523 = vst [vmem:[#allocation2 + $0x58] sm:$0xff] %v507_v14  ;;  %v511_v23 = vpack.c.bf16 %v495_v39, %v494_v34 }
  0x6b   : > { %524 = vst [vmem:[#allocation2 + $0x60] sm:$0xff] %v508_v35 }
  0x6c   : > { %525 = vst [vmem:[#allocation2 + $0x68] sm:$0xff] %v509_v38 }
  0x6d   : > { %526 = vst [vmem:[#allocation2 + $0x70] sm:$0xff] %v510_v2 }
  0x6e   : > { %527 = vst [vmem:[#allocation2 + $0x78] sm:$0xff] %v511_v23 }
  0x6f PF: > { %v7775_v27 = vld [vmem:[%s12359_s14 + $0xa8] sm:$0xf]  ;;  %v10905_v30 = vld [vmem:[%s12359_s14 + $0xb0] sm:$0xf0]  ;;  %v7763_v46 = vld [vmem:[%s12359_s14 + $0x90] sm:$0xf] }
  0x70   : > { %v7871_v31 = vld [vmem:[%s12359_s14 + $0x168] sm:$0xf]  ;;  %v7776_v36 = vor.u32 %v10905_v30, %v7775_v27  ;;  %v10929_v37 = vld [vmem:[%s12359_s14 + $0x170] sm:$0xf0]  ;;  %v10902_v48 = vld [vmem:[%s12359_s14 + $0x98] sm:$0xf0] }
  0x71   : > { %v7967_v40 = vld [vmem:[%s12359_s14 + $0x228] sm:$0xf]  ;;  %v10953_v41 = vld [vmem:[%s12359_s14 + $0x230] sm:$0xf0]  ;;  %v7872_v42 = vor.u32 %v10929_v37, %v7871_v31  ;;  %v7859_v49 = vld [vmem:[%s12359_s14 + $0x150] sm:$0xf]  ;;  %v7764_v51 = vor.u32 %v10902_v48, %v7763_v46 }
  0x72   : > { %v7968_v43 = vor.u32 %v10953_v41, %v7967_v40  ;;  %v8063_v44 = vld [vmem:[%s12359_s14 + $0x2e8] sm:$0xf]  ;;  %v10977_v45 = vld [vmem:[%s12359_s14 + $0x2f0] sm:$0xf0]  ;;  %3186 = vmatpush.bf16.msra.mxu0 %v7776_v36  ;;  %v10926_v50 = vld [vmem:[%s12359_s14 + $0x158] sm:$0xf0] }
  0x73   : > { %v8064_v47 = vor.u32 %v10977_v45, %v8063_v44  ;;  %3200 = vmatpush.bf16.msra.mxu1 %v7872_v42  ;;  %v7860_v52 = vor.u32 %v10926_v50, %v7859_v49  ;;  %v7955_v53 = vld [vmem:[%s12359_s14 + $0x210] sm:$0xf]  ;;  %v10950_v54 = vld [vmem:[%s12359_s14 + $0x218] sm:$0xf0]  ;;  %v7751_v58 = vld [vmem:[%s12359_s14 + $0x78] sm:$0xf] }
  0x74   : > { %3214 = vmatpush.bf16.msra.mxu2 %v7968_v43  ;;  %v8051_v55 = vld [vmem:[%s12359_s14 + $0x2d0] sm:$0xf]  ;;  %v7956_v56 = vor.u32 %v10950_v54, %v7955_v53  ;;  %v10974_v57 = vld [vmem:[%s12359_s14 + $0x2d8] sm:$0xf0]  ;;  %v10899_v59 = vld [vmem:[%s12359_s14 + $0x80] sm:$0xf0] }
  0x75   : > { %3228 = vmatpush.bf16.msra.mxu3 %v8064_v47  ;;  %v8052_v60 = vor.u32 %v10974_v57, %v8051_v55  ;;  %v7847_v61 = vld [vmem:[%s12359_s14 + $0x138] sm:$0xf]  ;;  %v10923_v62 = vld [vmem:[%s12359_s14 + $0x140] sm:$0xf0]  ;;  %v7752_v0 = vor.u32 %v10899_v59, %v7751_v58  ;;  %v7739_v13 = vld [vmem:[%s12359_s14 + $0x60] sm:$0xf] }
  0x76   : > { %v7943_v63 = vld [vmem:[%s12359_s14 + $0x1f8] sm:$0xf]  ;;  %3187 = vmatpush.bf16.msra.mxu0 %v7764_v51  ;;  %v10947_v1 = vld [vmem:[%s12359_s14 + $0x200] sm:$0xf0]  ;;  %v7848_v9 = vor.u32 %v10923_v62, %v7847_v61  ;;  %v10896_v15 = vld [vmem:[%s12359_s14 + $0x68] sm:$0xf0] }
  0x77   : > { %v8039_v5 = vld [vmem:[%s12359_s14 + $0x2b8] sm:$0xf]  ;;  %v10971_v6 = vld [vmem:[%s12359_s14 + $0x2c0] sm:$0xf0]  ;;  %3201 = vmatpush.bf16.msra.mxu1 %v7860_v52  ;;  %v7944_v10 = vor.u32 %v10947_v1, %v7943_v63  ;;  %v7835_v3 = vld [vmem:[%s12359_s14 + $0x120] sm:$0xf]  ;;  %v7740_v7 = vor.u32 %v10896_v15, %v7739_v13 }
  0x78   : > { %3215 = vmatpush.bf16.msra.mxu2 %v7956_v56  ;;  %v8040_v16 = vor.u32 %v10971_v6, %v8039_v5  ;;  %v10920_v4 = vld [vmem:[%s12359_s14 + $0x128] sm:$0xf0]  ;;  %v7931_v17 = vld [vmem:[%s12359_s14 + $0x1e0] sm:$0xf]  ;;  %v7727_v22 = vld [vmem:[%s12359_s14 + $0x48] sm:$0xf] }
  0x79   : > { %3229 = vmatpush.bf16.msra.mxu3 %v8052_v60  ;;  %v10944_v18 = vld [vmem:[%s12359_s14 + $0x1e8] sm:$0xf0]  ;;  %v8027_v19 = vld [vmem:[%s12359_s14 + $0x2a0] sm:$0xf]  ;;  %v7836_v21 = vor.u32 %v10920_v4, %v7835_v3  ;;  %v10893_v24 = vld [vmem:[%s12359_s14 + $0x50] sm:$0xf0] }
  0x7a   : > { %v10968_v20 = vld [vmem:[%s12359_s14 + $0x2a8] sm:$0xf0]  ;;  %3188 = vmatpush.bf16.msra.mxu0 %v7752_v0  ;;  %v7932_v8 = vor.u32 %v10944_v18, %v7931_v17  ;;  %v7823_v25 = vld [vmem:[%s12359_s14 + $0x108] sm:$0xf]  ;;  %v10917_v28 = vld [vmem:[%s12359_s14 + $0x110] sm:$0xf0]  ;;  %v7728_v32 = vor.u32 %v10893_v24, %v7727_v22 }
  0x7b   : > { %3202 = vmatpush.bf16.msra.mxu1 %v7848_v9  ;;  %v8028_v26 = vor.u32 %v10968_v20, %v8027_v19  ;;  %v7919_v11 = vld [vmem:[%s12359_s14 + $0x1c8] sm:$0xf]  ;;  %v10941_v12 = vld [vmem:[%s12359_s14 + $0x1d0] sm:$0xf0]  ;;  %v7824_v33 = vor.u32 %v10917_v28, %v7823_v25  ;;  %v7715_v35 = vld [vmem:[%s12359_s14 + $0x30] sm:$0xf] }
  0x7c   : > { %3216 = vmatpush.bf16.msra.mxu2 %v7944_v10  ;;  %v8015_v29 = vld [vmem:[%s12359_s14 + $0x288] sm:$0xf]  ;;  %v10965_v14 = vld [vmem:[%s12359_s14 + $0x290] sm:$0xf0]  ;;  %v7920_v34 = vor.u32 %v10941_v12, %v7919_v11  ;;  %v10890_v38 = vld [vmem:[%s12359_s14 + $0x38] sm:$0xf0] }
  0x7d   : > { %3230 = vmatpush.bf16.msra.mxu3 %v8040_v16  ;;  %v7811_v39 = vld [vmem:[%s12359_s14 + $0xf0] sm:$0xf]  ;;  %v8016_v2 = vor.u32 %v10965_v14, %v8015_v29  ;;  %v10914_v23 = vld [vmem:[%s12359_s14 + $0xf8] sm:$0xf0]  ;;  %v7716_v37 = vor.u32 %v10890_v38, %v7715_v35  ;;  %v7703_v42 = vld [vmem:[%s12359_s14 + $0x18] sm:$0xf] }
  0x7e   : > { %3189 = vmatpush.bf16.msra.mxu0 %v7740_v7  ;;  %v7907_v27 = vld [vmem:[%s12359_s14 + $0x1b0] sm:$0xf]  ;;  %v10938_v30 = vld [vmem:[%s12359_s14 + $0x1b8] sm:$0xf0]  ;;  %v7812_v40 = vor.u32 %v10914_v23, %v7811_v39  ;;  %v10887_v43 = vld [vmem:[%s12359_s14 + $0x20] sm:$0xf0] }
  0x7f   : > { %3203 = vmatpush.bf16.msra.mxu1 %v7836_v21  ;;  %v8003_v31 = vld [vmem:[%s12359_s14 + $0x270] sm:$0xf]  ;;  %v10962_v36 = vld [vmem:[%s12359_s14 + $0x278] sm:$0xf0]  ;;  %v7908_v41 = vor.u32 %v10938_v30, %v7907_v27  ;;  %v7799_v44 = vld [vmem:[%s12359_s14 + $0xd8] sm:$0xf]  ;;  %v7704_v51 = vor.u32 %v10887_v43, %v7703_v42 }
  0x80   : > { %3217 = vmatpush.bf16.msra.mxu2 %v7932_v8  ;;  %v8004_v45 = vor.u32 %v10962_v36, %v8003_v31  ;;  %v10911_v46 = vld [vmem:[%s12359_s14 + $0xe0] sm:$0xf0]  ;;  %v7895_v47 = vld [vmem:[%s12359_s14 + $0x198] sm:$0xf]  ;;  %v7691_v52 = vld [vmem:[%s12359_s14] sm:$0xf] }
  0x81   : > { %3231 = vmatpush.bf16.msra.mxu3 %v8028_v26  ;;  %v10935_v48 = vld [vmem:[%s12359_s14 + $0x1a0] sm:$0xf0]  ;;  %v7991_v49 = vld [vmem:[%s12359_s14 + $0x258] sm:$0xf]  ;;  %v10884_v53 = vld [vmem:[%s12359_s14 + $0x8] sm:$0xf0]  ;;  %v7800_v54 = vor.u32 %v10911_v46, %v7799_v44 }
  0x82   : > { %3190 = vmatpush.bf16.msra.mxu0 %v7728_v32  ;;  %v10959_v50 = vld [vmem:[%s12359_s14 + $0x260] sm:$0xf0]  ;;  %v7896_v55 = vor.u32 %v10935_v48, %v7895_v47  ;;  %v7787_v56 = vld [vmem:[%s12359_s14 + $0xc0] sm:$0xf]  ;;  %v10908_v57 = vld [vmem:[%s12359_s14 + $0xc8] sm:$0xf0]  ;;  %v7692_v5 = vor.u32 %v10884_v53, %v7691_v52 }
  0x83   : > { %3204 = vmatpush.bf16.msra.mxu1 %v7824_v33  ;;  %v7883_v58 = vld [vmem:[%s12359_s14 + $0x180] sm:$0xf]  ;;  %v7992_v59 = vor.u32 %v10959_v50, %v7991_v49  ;;  %v10932_v60 = vld [vmem:[%s12359_s14 + $0x188] sm:$0xf0]  ;;  %v8159_v63 = vld [vmem:[%s12359_s14 + $0x3a8] sm:$0xf]  ;;  %v7788_v13 = vor.u32 %v10908_v57, %v7787_v56 }
  0x84   : > { %3218 = vmatpush.bf16.msra.mxu2 %v7920_v34  ;;  %v7979_v61 = vld [vmem:[%s12359_s14 + $0x240] sm:$0xf]  ;;  %v10956_v62 = vld [vmem:[%s12359_s14 + $0x248] sm:$0xf0]  ;;  %v11001_v0 = vld [vmem:[%s12359_s14 + $0x3b0] sm:$0xf0]  ;;  %v7884_v15 = vor.u32 %v10932_v60, %v7883_v58 }
  0x85   : > { %3232 = vmatpush.bf16.msra.mxu3 %v8016_v2  ;;  %v8255_v1 = vld [vmem:[%s12359_s14 + $0x468] sm:$0xf]  ;;  %v11025_v6 = vld [vmem:[%s12359_s14 + $0x470] sm:$0xf0]  ;;  %v7980_v4 = vor.u32 %v10956_v62, %v7979_v61  ;;  %v8160_v17 = vor.u32 %v11001_v0, %v8159_v63  ;;  %v8147_v18 = vld [vmem:[%s12359_s14 + $0x390] sm:$0xf] }
  0x86   : > { %3191 = vmatpush.bf16.msra.mxu0 %v7716_v37  ;;  %v8351_v9 = vld [vmem:[%s12359_s14 + $0x528] sm:$0xf]  ;;  %v11049_v10 = vld [vmem:[%s12359_s14 + $0x530] sm:$0xf0]  ;;  %v10998_v19 = vld [vmem:[%s12359_s14 + $0x398] sm:$0xf0]  ;;  %v8256_v20 = vor.u32 %v11025_v6, %v8255_v1 }
  0x87   : > { %3205 = vmatpush.bf16.msra.mxu1 %v7812_v40  ;;  %v8447_v3 = vld [vmem:[%s12359_s14 + $0x5e8] sm:$0xf]  ;;  %v11073_v16 = vld [vmem:[%s12359_s14 + $0x5f0] sm:$0xf0]  ;;  %v8352_v7 = vor.u32 %v11049_v10, %v8351_v9  ;;  %v8243_v21 = vld [vmem:[%s12359_s14 + $0x450] sm:$0xf]  ;;  %v8148_v14 = vor.u32 %v10998_v19, %v8147_v18 }
  0x88   : > { %3219 = vmatpush.bf16.msra.mxu2 %v7908_v41  ;;  %v11022_v8 = vld [vmem:[%s12359_s14 + $0x458] sm:$0xf0]  ;;  %v8339_v22 = vld [vmem:[%s12359_s14 + $0x510] sm:$0xf]  ;;  %v8448_v24 = vor.u32 %v11073_v16, %v8447_v3  ;;  %v7627_v11 = vld [vmem:[#allocation2] sm:$0xf] }
  0x89   : > { %3233 = vmatpush.bf16.msra.mxu3 %v8004_v45  ;;  %v11046_v25 = vld [vmem:[%s12359_s14 + $0x518] sm:$0xf0]  ;;  %v8435_v26 = vld [vmem:[%s12359_s14 + $0x5d0] sm:$0xf]  ;;  %v10875_v12 = vld [vmem:[#allocation2 + $0x3c] sm:$0xf0]  ;;  %v8244_v38 = vor.u32 %v11022_v8, %v8243_v21 }
  0x8a   : > { %3192 = vmatpush.bf16.msra.mxu0 %v7704_v51  ;;  %v11070_v28 = vld [vmem:[%s12359_s14 + $0x5d8] sm:$0xf0]  ;;  %v7635_v29 = vld [vmem:[#allocation2 + $0x8] sm:$0xf]  ;;  %v8135_v32 = vld [vmem:[%s12359_s14 + $0x378] sm:$0xf]  ;;  %v12543_v34 = vor.u32 %v10875_v12, %v7627_v11  ;;  %v8340_v39 = vor.u32 %v11046_v25, %v8339_v22 }
  0x8b   : > { %3206 = vmatpush.bf16.msra.mxu1 %v7800_v54  ;;  %v10995_v33 = vld [vmem:[%s12359_s14 + $0x380] sm:$0xf0]  ;;  %v10876_v35 = vld [vmem:[#allocation2 + $0x44] sm:$0xf0]  ;;  %v8231_v2 = vld [vmem:[%s12359_s14 + $0x438] sm:$0xf]  ;;  %v8436_v31 = vor.u32 %v11070_v28, %v8435_v26 }
  0x8c   : > { %3220 = vmatpush.bf16.msra.mxu2 %v7896_v55  ;;  %v11019_v23 = vld [vmem:[%s12359_s14 + $0x440] sm:$0xf0]  ;;  %v8327_v27 = vld [vmem:[%s12359_s14 + $0x4f8] sm:$0xf]  ;;  %v12548_v30 = vor.u32 %v10876_v35, %v7635_v29  ;;  %v10868_v43 = vld [vmem:[#allocation2 + $0xc] sm:$0xf]  ;;  %v8136_v44 = vor.u32 %v10995_v33, %v8135_v32 }
  0x8d   : > { %3234 = vmatpush.bf16.msra.mxu3 %v7992_v59  ;;  %v11043_v36 = vld [vmem:[%s12359_s14 + $0x500] sm:$0xf0]  ;;  %v8423_v37 = vld [vmem:[%s12359_s14 + $0x5b8] sm:$0xf]  ;;  %v7637_v46 = vld [vmem:[#allocation2 + $0x48] sm:$0xf0]  ;;  %v8232_v47 = vor.u32 %v11019_v23, %v8231_v2 }
  0x8e   : > { %3193 = vmatpush.bf16.msra.mxu0 %v7692_v5  ;;  %v11067_v40 = vld [vmem:[%s12359_s14 + $0x5c0] sm:$0xf0]  ;;  %v8328_v48 = vor.u32 %v11043_v36, %v8327_v27  ;;  %v8123_v49 = vld [vmem:[%s12359_s14 + $0x360] sm:$0xf]  ;;  %v10992_v50 = vld [vmem:[%s12359_s14 + $0x368] sm:$0xf0]  ;;  %v12560_v52 = vor.u32 %v10868_v43, %v7637_v46 }
  0x8f   : > { %3207 = vmatpush.bf16.msra.mxu1 %v7788_v13  ;;  %v10867_v41 = vld [vmem:[#allocation2 + $0x4] sm:$0xf]  ;;  %v8219_v51 = vld [vmem:[%s12359_s14 + $0x420] sm:$0xf]  ;;  %v8424_v53 = vor.u32 %v11067_v40, %v8423_v37  ;;  %v11016_v54 = vld [vmem:[%s12359_s14 + $0x428] sm:$0xf0]  ;;  %v8124_v59 = vor.u32 %v10992_v50, %v8123_v49 }
  0x90   : > { %3221 = vmatpush.bf16.msra.mxu2 %v7884_v15  ;;  %v7629_v42 = vld [vmem:[#allocation2 + $0x40] sm:$0xf0]  ;;  %v8315_v55 = vld [vmem:[%s12359_s14 + $0x4e0] sm:$0xf]  ;;  %v11040_v56 = vld [vmem:[%s12359_s14 + $0x4e8] sm:$0xf0]  ;;  %v8220_v60 = vor.u32 %v11016_v54, %v8219_v51 }
  0x91   : > { %3235 = vmatpush.bf16.msra.mxu3 %v7980_v4  ;;  %3194 = vmatmul.bf16.vlgmr.msra.gmra.mxu0 %v12543_v34  ;;  %v12555_v45 = vor.u32 %v10867_v41, %v7629_v42  ;;  %v8411_v57 = vld [vmem:[%s12359_s14 + $0x5a0] sm:$0xf]  ;;  %v11064_v58 = vld [vmem:[%s12359_s14 + $0x5a8] sm:$0xf0]  ;;  %v8316_v61 = vor.u32 %v11040_v56, %v8315_v55  ;;  %v8111_v62 = vld [vmem:[%s12359_s14 + $0x348] sm:$0xf] }
  0x92   : > { %3242 = vmatpush.bf16.msrb.mxu0 %v8160_v17  ;;  %v10989_v63 = vld [vmem:[%s12359_s14 + $0x350] sm:$0xf0]  ;;  %v8207_v0 = vld [vmem:[%s12359_s14 + $0x408] sm:$0xf]  ;;  %v8412_v1 = vor.u32 %v11064_v58, %v8411_v57  ;;  %v8099_v4 = vld [vmem:[%s12359_s14 + $0x330] sm:$0xf] }
  0x93   : > { %3256 = vmatpush.bf16.msrb.mxu1 %v8256_v20  ;;  %3222 = vmatmul.bf16.vlgmr.msra.gmra.mxu2 %v12548_v30  ;;  %v11013_v5 = vld [vmem:[%s12359_s14 + $0x410] sm:$0xf0]  ;;  %v8303_v6 = vld [vmem:[%s12359_s14 + $0x4c8] sm:$0xf]  ;;  %v8112_v15 = vor.u32 %v10989_v63, %v8111_v62  ;;  %v10986_v17 = vld [vmem:[%s12359_s14 + $0x338] sm:$0xf0] }
  0x94   : > { %3270 = vmatpush.bf16.msrb.mxu2 %v8352_v7  ;;  %3208 = vmatmul.bf16.vlgmr.msra.gmra.mxu1 %v12555_v45  ;;  %v11037_v9 = vld [vmem:[%s12359_s14 + $0x4d0] sm:$0xf0]  ;;  %v8399_v10 = vld [vmem:[%s12359_s14 + $0x588] sm:$0xf]  ;;  %v8208_v3 = vor.u32 %v11013_v5, %v8207_v0  ;;  %v8195_v18 = vld [vmem:[%s12359_s14 + $0x3f0] sm:$0xf] }
  0x95   : > { %3284 = vmatpush.bf16.msrb.mxu3 %v8448_v24  ;;  %v11061_v13 = vld [vmem:[%s12359_s14 + $0x590] sm:$0xf0]  ;;  %v8304_v16 = vor.u32 %v11037_v9, %v8303_v6  ;;  %v11010_v20 = vld [vmem:[%s12359_s14 + $0x3f8] sm:$0xf0]  ;;  %v8291_v7 = vld [vmem:[%s12359_s14 + $0x4b0] sm:$0xf]  ;;  %v8100_v24 = vor.u32 %v10986_v17, %v8099_v4 }
  0x96   : > { %3243 = vmatpush.bf16.msrb.mxu0 %v8148_v14  ;;  %3236 = vmatmul.bf16.vlgmr.msra.gmra.mxu3 %v12560_v52  ;;  %v8400_v19 = vor.u32 %v11061_v13, %v8399_v10  ;;  %v11034_v21 = vld [vmem:[%s12359_s14 + $0x4b8] sm:$0xf0]  ;;  %v8387_v8 = vld [vmem:[%s12359_s14 + $0x570] sm:$0xf]  ;;  %v8087_v25 = vld [vmem:[%s12359_s14 + $0x318] sm:$0xf]  ;;  %v8196_v26 = vor.u32 %v11010_v20, %v8195_v18 }
  0x97   : > { %3257 = vmatpush.bf16.msrb.mxu1 %v8244_v38  ;;  %v11058_v22 = vld [vmem:[%s12359_s14 + $0x578] sm:$0xf0]  ;;  %v8292_v28 = vor.u32 %v11034_v21, %v8291_v7  ;;  %v10983_v11 = vld [vmem:[%s12359_s14 + $0x320] sm:$0xf0]  ;;  %v8183_v12 = vld [vmem:[%s12359_s14 + $0x3d8] sm:$0xf] }
  0x98   : > { %3271 = vmatpush.bf16.msrb.mxu2 %v8340_v39  ;;  %v11007_v29 = vld [vmem:[%s12359_s14 + $0x3e0] sm:$0xf0]  ;;  %v8388_v14 = vor.u32 %v11058_v22, %v8387_v8  ;;  %v8279_v32 = vld [vmem:[%s12359_s14 + $0x498] sm:$0xf]  ;;  %v8075_v39 = vld [vmem:[%s12359_s14 + $0x300] sm:$0xf]  ;;  %v8088_v23 = vor.u32 %v10983_v11, %v8087_v25 }
  0x99   : > { %3285 = vmatpush.bf16.msrb.mxu3 %v8436_v31  ;;  %v11031_v33 = vld [vmem:[%s12359_s14 + $0x4a0] sm:$0xf0]  ;;  %v8375_v35 = vld [vmem:[%s12359_s14 + $0x558] sm:$0xf]  ;;  %v10980_v2 = vld [vmem:[%s12359_s14 + $0x308] sm:$0xf0]  ;;  %v8184_v40 = vor.u32 %v11007_v29, %v8183_v12 }
  0x9a   : > { %3244 = vmatpush.bf16.msrb.mxu0 %v8136_v44  ;;  %v11055_v38 = vld [vmem:[%s12359_s14 + $0x560] sm:$0xf0]  ;;  %v8171_v27 = vld [vmem:[%s12359_s14 + $0x3c0] sm:$0xf]  ;;  %v11004_v31 = vld [vmem:[%s12359_s14 + $0x3c8] sm:$0xf0]  ;;  %v8280_v41 = vor.u32 %v11031_v33, %v8279_v32  ;;  %v8076_v54 = vor.u32 %v10980_v2, %v8075_v39 }
  0x9b   : > { %3258 = vmatpush.bf16.msrb.mxu1 %v8232_v47  ;;  %v8267_v36 = vld [vmem:[%s12359_s14 + $0x480] sm:$0xf]  ;;  %v11028_v37 = vld [vmem:[%s12359_s14 + $0x488] sm:$0xf0]  ;;  %v8543_v44 = vld [vmem:[%s12359_s14 + $0x6a8] sm:$0xf]  ;;  %v8376_v46 = vor.u32 %v11055_v38, %v8375_v35  ;;  %v8172_v58 = vor.u32 %v11004_v31, %v8171_v27 }
  0x9c   : > { %3272 = vmatpush.bf16.msrb.mxu2 %v8328_v48  ;;  %v8363_v42 = vld [vmem:[%s12359_s14 + $0x540] sm:$0xf]  ;;  %v11052_v43 = vld [vmem:[%s12359_s14 + $0x548] sm:$0xf0]  ;;  %v11097_v47 = vld [vmem:[%s12359_s14 + $0x6b0] sm:$0xf0] }
  0x9d   : > { %3286 = vmatpush.bf16.msrb.mxu3 %v8424_v53  ;;  %v8639_v48 = vld [vmem:[%s12359_s14 + $0x768] sm:$0xf]  ;;  %v11121_v49 = vld [vmem:[%s12359_s14 + $0x770] sm:$0xf0]  ;;  %v7643_v56 = vld [vmem:[#allocation2 + $0x10] sm:$0xf]  ;;  %v8364_v63 = vor.u32 %v11052_v43, %v8363_v42  ;;  %v8544_v0 = vor.u32 %v11097_v47, %v8543_v44 }
  0x9e   : > { %3245 = vmatpush.bf16.msrb.mxu0 %v8124_v59  ;;  %v8735_v50 = vld [vmem:[%s12359_s14 + $0x828] sm:$0xf]  ;;  %v11145_v51 = vld [vmem:[%s12359_s14 + $0x830] sm:$0xf0]  ;;  %v10877_v57 = vld [vmem:[#allocation2 + $0x4c] sm:$0xf0]  ;;  %v8268_v59 = vor.u32 %v11028_v37, %v8267_v36  ;;  %v8640_v9 = vor.u32 %v11121_v49, %v8639_v48 }
  0x9f   : > { %3259 = vmatpush.bf16.msrb.mxu1 %v8220_v60  ;;  %v8831_v53 = vld [vmem:[%s12359_s14 + $0x8e8] sm:$0xf]  ;;  %v11169_v55 = vld [vmem:[%s12359_s14 + $0x8f0] sm:$0xf0]  ;;  %v7651_v60 = vld [vmem:[#allocation2 + $0x18] sm:$0xf]  ;;  %v8736_v10 = vor.u32 %v11145_v51, %v8735_v50  ;;  %v12612_v4 = vor.u32 %v10877_v57, %v7643_v56 }
  0xa0   : > { %3273 = vmatpush.bf16.msrb.mxu2 %v8316_v61  ;;  %v10878_v61 = vld [vmem:[#allocation2 + $0x54] sm:$0xf0]  ;;  %v10869_v62 = vld [vmem:[#allocation2 + $0x14] sm:$0xf]  ;;  %v10870_v5 = vld [vmem:[#allocation2 + $0x1c] sm:$0xf] }
  0xa1   : > { %3287 = vmatpush.bf16.msrb.mxu3 %v8412_v1  ;;  %v7645_v1 = vld [vmem:[#allocation2 + $0x50] sm:$0xf0]  ;;  %v7653_v6 = vld [vmem:[#allocation2 + $0x58] sm:$0xf0]  ;;  %v8531_v13 = vld [vmem:[%s12359_s14 + $0x690] sm:$0xf]  ;;  %v12617_v20 = vor.u32 %v10878_v61, %v7651_v60 }
  0xa2   : > { %3246 = vmatpush.bf16.msrb.mxu0 %v8112_v15  ;;  %v11094_v15 = vld [vmem:[%s12359_s14 + $0x698] sm:$0xf0]  ;;  %v8723_v18 = vld [vmem:[%s12359_s14 + $0x810] sm:$0xf]  ;;  %v12619_v7 = vor.u32 %v10869_v62, %v7645_v1  ;;  %v12623_v22 = vor.u32 %v10870_v5, %v7653_v6  ;;  %v11091_v11 = vld [vmem:[%s12359_s14 + $0x680] sm:$0xf0] }
  0xa3   : > { %3260 = vmatpush.bf16.msrb.mxu1 %v8208_v3  ;;  %v8627_v3 = vld [vmem:[%s12359_s14 + $0x750] sm:$0xf]  ;;  %v11118_v17 = vld [vmem:[%s12359_s14 + $0x758] sm:$0xf0]  ;;  %v8615_v12 = vld [vmem:[%s12359_s14 + $0x738] sm:$0xf] }
  0xa4   : > { %3274 = vmatpush.bf16.msrb.mxu2 %v8304_v16  ;;  %v8832_v16 = vor.u32 %v11169_v55, %v8831_v53  ;;  %v8819_v21 = vld [vmem:[%s12359_s14 + $0x8d0] sm:$0xf]  ;;  %v11166_v8 = vld [vmem:[%s12359_s14 + $0x8d8] sm:$0xf0]  ;;  %14530 = vst [vmem:[#allocation22_spill] sm:$0xff] %v12623_v22  ;;  %v8628_v25 = vor.u32 %v11118_v17, %v8627_v3  ;;  %p10857_p13 = scmp.ne.s32.totalorder %s12099_s24, 2 }
  0xa5   : > { %3288 = vmatpush.bf16.msrb.mxu3 %v8400_v19  ;;  %v11142_v19 = vld [vmem:[%s12359_s14 + $0x818] sm:$0xf0]  ;;  %v8820_v29 = vor.u32 %v11166_v8, %v8819_v21  ;;  %v8711_v32 = vld [vmem:[%s12359_s14 + $0x7f8] sm:$0xf]  ;;  %v11139_v33 = vld [vmem:[%s12359_s14 + $0x800] sm:$0xf0] }
  0xa6   : > { %3247 = vmatpush.bf16.msrb.mxu0 %v8100_v24  ;;  %v8532_v24 = vor.u32 %v11094_v15, %v8531_v13  ;;  %v8807_v35 = vld [vmem:[%s12359_s14 + $0x8b8] sm:$0xf]  ;;  %v11163_v38 = vld [vmem:[%s12359_s14 + $0x8c0] sm:$0xf0]  ;;  %v8507_v27 = vld [vmem:[%s12359_s14 + $0x660] sm:$0xf] }
  0xa7   : > { %3261 = vmatpush.bf16.msrb.mxu1 %v8196_v26  ;;  %v8724_v26 = vor.u32 %v11142_v19, %v8723_v18  ;;  %v11088_v31 = vld [vmem:[%s12359_s14 + $0x668] sm:$0xf0]  ;;  %v8603_v36 = vld [vmem:[%s12359_s14 + $0x720] sm:$0xf]  ;;  %v8808_v37 = vor.u32 %v11163_v38, %v8807_v35  ;;  %v8495_v49 = vld [vmem:[%s12359_s14 + $0x648] sm:$0xf] }
  0xa8   : > { %3275 = vmatpush.bf16.msrb.mxu2 %v8292_v28  ;;  %v8519_v28 = vld [vmem:[%s12359_s14 + $0x678] sm:$0xf]  ;;  %v11136_v42 = vld [vmem:[%s12359_s14 + $0x7e8] sm:$0xf0]  ;;  %v8795_v43 = vld [vmem:[%s12359_s14 + $0x8a0] sm:$0xf] }
  0xa9   : > { %3289 = vmatpush.bf16.msrb.mxu3 %v8388_v14  ;;  %v11115_v14 = vld [vmem:[%s12359_s14 + $0x740] sm:$0xf0]  ;;  %v8520_v39 = vor.u32 %v11091_v11, %v8519_v28  ;;  %v11160_v44 = vld [vmem:[%s12359_s14 + $0x8a8] sm:$0xf0]  ;;  %v11085_v50 = vld [vmem:[%s12359_s14 + $0x650] sm:$0xf0] }
  0xaa   : > { %3248 = vmatpush.bf16.msrb.mxu0 %v8088_v23  ;;  %v8616_v2 = vor.u32 %v11115_v14, %v8615_v12  ;;  %v8712_v23 = vor.u32 %v11139_v33, %v8711_v32  ;;  %v8591_v51 = vld [vmem:[%s12359_s14 + $0x708] sm:$0xf]  ;;  %v8796_v53 = vor.u32 %v11160_v44, %v8795_v43  ;;  %v11133_v56 = vld [vmem:[%s12359_s14 + $0x7d0] sm:$0xf0]  ;;  %v8483_v62 = vld [vmem:[%s12359_s14 + $0x630] sm:$0xf] }
  0xab   : > { %3262 = vmatpush.bf16.msrb.mxu1 %v8184_v40  ;;  %v11112_v40 = vld [vmem:[%s12359_s14 + $0x728] sm:$0xf0]  ;;  %v8687_v55 = vld [vmem:[%s12359_s14 + $0x7c8] sm:$0xf]  ;;  %v11106_v5 = vld [vmem:[%s12359_s14 + $0x6f8] sm:$0xf0] }
  0xac   : > { %3276 = vmatpush.bf16.msrb.mxu2 %v8280_v41  ;;  %v8699_v41 = vld [vmem:[%s12359_s14 + $0x7e0] sm:$0xf]  ;;  %v8604_v47 = vor.u32 %v11112_v40, %v8603_v36  ;;  %v8783_v57 = vld [vmem:[%s12359_s14 + $0x888] sm:$0xf]  ;;  %v8688_v61 = vor.u32 %v11133_v56, %v8687_v55  ;;  %v8675_v6 = vld [vmem:[%s12359_s14 + $0x7b0] sm:$0xf] }
  0xad   : > { %3290 = vmatpush.bf16.msrb.mxu3 %v8376_v46  ;;  %v8508_v46 = vor.u32 %v11088_v31, %v8507_v27  ;;  %v8700_v48 = vor.u32 %v11136_v42, %v8699_v41  ;;  %v11154_v13 = vld [vmem:[%s12359_s14 + $0x878] sm:$0xf0]  ;;  %v8471_v3 = vld [vmem:[%s12359_s14 + $0x618] sm:$0xf]  ;;  %v11079_v18 = vld [vmem:[%s12359_s14 + $0x620] sm:$0xf0] }
  0xae   : > { %3249 = vmatpush.bf16.msrb.mxu0 %v8076_v54  ;;  %v11109_v54 = vld [vmem:[%s12359_s14 + $0x710] sm:$0xf0]  ;;  %v8567_v19 = vld [vmem:[%s12359_s14 + $0x6d8] sm:$0xf]  ;;  %v11103_v21 = vld [vmem:[%s12359_s14 + $0x6e0] sm:$0xf0] }
  0xaf   : > { %3263 = vmatpush.bf16.msrb.mxu1 %v8172_v58  ;;  %v11157_v58 = vld [vmem:[%s12359_s14 + $0x890] sm:$0xf0]  ;;  %v8592_v60 = vor.u32 %v11109_v54, %v8591_v51  ;;  %v11151_v28 = vld [vmem:[%s12359_s14 + $0x860] sm:$0xf0]  ;;  %v8459_v11 = vld [vmem:[%s12359_s14 + $0x600] sm:$0xf]  ;;  %v8568_v38 = vor.u32 %v11103_v21, %v8567_v19 }
  0xb0   : > { %3277 = vmatpush.bf16.msrb.mxu2 %v8268_v59  ;;  %v8496_v59 = vor.u32 %v11085_v50, %v8495_v49  ;;  %v8784_v1 = vor.u32 %v11157_v58, %v8783_v57  ;;  %v11076_v12 = vld [vmem:[%s12359_s14 + $0x608] sm:$0xf0]  ;;  %v8555_v14 = vld [vmem:[%s12359_s14 + $0x6c0] sm:$0xf]  ;;  %v8927_v27 = vld [vmem:[%s12359_s14 + $0x9a8] sm:$0xf] }
  0xb1   : > { %3291 = vmatpush.bf16.msrb.mxu3 %v8364_v63  ;;  %3250 = vmatmul.bf16.vlgmr.msrb.gmra.mxu0 %v12612_v4  ;;  %v11082_v63 = vld [vmem:[%s12359_s14 + $0x638] sm:$0xf0]  ;;  %v11100_v32 = vld [vmem:[%s12359_s14 + $0x6c8] sm:$0xf0]  ;;  %v8651_v33 = vld [vmem:[%s12359_s14 + $0x780] sm:$0xf]  ;;  %v8460_v44 = vor.u32 %v11076_v12, %v8459_v11 }
  0xb2   : > { %3298 = vmatpush.bf16.msra.mxu0 %v8544_v0  ;;  %3264 = vmatmul.bf16.vlgmr.msrb.gmra.mxu1 %v12619_v7  ;;  %v8579_v0 = vld [vmem:[%s12359_s14 + $0x6f0] sm:$0xf]  ;;  %v8484_v15 = vor.u32 %v11082_v63, %v8483_v62  ;;  %v11124_v35 = vld [vmem:[%s12359_s14 + $0x788] sm:$0xf0]  ;;  %v11193_v36 = vld [vmem:[%s12359_s14 + $0x9b0] sm:$0xf0]  ;;  %v8556_v49 = vor.u32 %v11100_v32, %v8555_v14 }
  0xb3   : > { %3312 = vmatpush.bf16.msra.mxu1 %v8640_v9  ;;  %3278 = vmatmul.bf16.vlgmr.msrb.gmra.mxu2 %v12617_v20  ;;  %v11130_v9 = vld [vmem:[%s12359_s14 + $0x7b8] sm:$0xf0]  ;;  %v11217_v40 = vld [vmem:[%s12359_s14 + $0xa70] sm:$0xf0]  ;;  %v9119_v41 = vld [vmem:[%s12359_s14 + $0xb28] sm:$0xf]  ;;  %v8652_v50 = vor.u32 %v11124_v35, %v8651_v33  ;;  %v8928_v56 = vor.u32 %v11193_v36, %v8927_v27 }
  0xb4   : > { %3326 = vmatpush.bf16.msra.mxu2 %v8736_v10  ;;  %3292 = vmatmul.bf16.vlgmr.msrb.gmra.mxu3 %v12623_v22  ;;  %v8771_v10 = vld [vmem:[%s12359_s14 + $0x870] sm:$0xf]  ;;  %v8676_v17 = vor.u32 %v11130_v9, %v8675_v6  ;;  %v11241_v42 = vld [vmem:[%s12359_s14 + $0xb30] sm:$0xf0]  ;;  %v9215_v43 = vld [vmem:[%s12359_s14 + $0xbe8] sm:$0xf] }
  0xb5   : > { %3340 = vmatpush.bf16.msra.mxu3 %v8832_v16  ;;  %v8580_v16 = vor.u32 %v11106_v5, %v8579_v0  ;;  %v8772_v8 = vor.u32 %v11154_v13, %v8771_v10  ;;  %v7667_v51 = vld [vmem:[#allocation2 + $0x28] sm:$0xf]  ;;  %v10871_v54 = vld [vmem:[#allocation2 + $0x24] sm:$0xf]  ;;  %v10872_v58 = vld [vmem:[#allocation2 + $0x2c] sm:$0xf] }
  0xb6   : > { %3299 = vmatpush.bf16.msra.mxu0 %v8532_v24  ;;  %v8663_v24 = vld [vmem:[%s12359_s14 + $0x798] sm:$0xf]  ;;  %v7661_v57 = vld [vmem:[#allocation2 + $0x60] sm:$0xf0]  ;;  %v8915_v62 = vld [vmem:[%s12359_s14 + $0x990] sm:$0xf] }
  0xb7   : > { %3313 = vmatpush.bf16.msra.mxu1 %v8628_v25  ;;  %v11127_v25 = vld [vmem:[%s12359_s14 + $0x7a0] sm:$0xf0]  ;;  %v11190_v63 = vld [vmem:[%s12359_s14 + $0x998] sm:$0xf0]  ;;  %v9011_v0 = vld [vmem:[%s12359_s14 + $0xa50] sm:$0xf] }
  0xb8   : > { %3327 = vmatpush.bf16.msra.mxu2 %v8724_v26  ;;  %v8759_v26 = vld [vmem:[%s12359_s14 + $0x858] sm:$0xf]  ;;  %v11214_v6 = vld [vmem:[%s12359_s14 + $0xa58] sm:$0xf0]  ;;  %v9107_v9 = vld [vmem:[%s12359_s14 + $0xb10] sm:$0xf] }
  0xb9   : > { %3341 = vmatpush.bf16.msra.mxu3 %v8820_v29  ;;  %v8472_v29 = vor.u32 %v11079_v18, %v8471_v3  ;;  %v8760_v31 = vor.u32 %v11151_v28, %v8759_v26  ;;  %v11238_v10 = vld [vmem:[%s12359_s14 + $0xb18] sm:$0xf0]  ;;  %v9203_v3 = vld [vmem:[%s12359_s14 + $0xbd0] sm:$0xf]  ;;  %v8916_v18 = vor.u32 %v11190_v63, %v8915_v62  ;;  %v9012_v19 = vor.u32 %v11214_v6, %v9011_v0  ;;  %v11211_v28 = vld [vmem:[%s12359_s14 + $0xa40] sm:$0xf0] }
  0xba   : > { %3300 = vmatpush.bf16.msra.mxu0 %v8520_v39  ;;  %v8664_v39 = vor.u32 %v11127_v25, %v8663_v24  ;;  %v9108_v21 = vor.u32 %v11238_v10, %v9107_v9  ;;  %v11187_v24 = vld [vmem:[%s12359_s14 + $0x980] sm:$0xf0]  ;;  %v8999_v25 = vld [vmem:[%s12359_s14 + $0xa38] sm:$0xf]  ;;  %v11208_v27 = vld [vmem:[%s12359_s14 + $0xa28] sm:$0xf0] }
  0xbb   : > { %3314 = vmatpush.bf16.msra.mxu1 %v8616_v2  ;;  %v8747_v2 = vld [vmem:[%s12359_s14 + $0x840] sm:$0xf]  ;;  %v9095_v11 = vld [vmem:[%s12359_s14 + $0xaf8] sm:$0xf]  ;;  %v11235_v12 = vld [vmem:[%s12359_s14 + $0xb00] sm:$0xf0]  ;;  %v9000_v33 = vor.u32 %v11211_v28, %v8999_v25 }
  0xbc   : > { %3328 = vmatpush.bf16.msra.mxu2 %v8712_v23  ;;  %v11148_v23 = vld [vmem:[%s12359_s14 + $0x848] sm:$0xf0]  ;;  %v11259_v14 = vld [vmem:[%s12359_s14 + $0xbc0] sm:$0xf0]  ;;  %v9096_v35 = vor.u32 %v11235_v12, %v9095_v11  ;;  %v11202_v62 = vld [vmem:[%s12359_s14 + $0x9f8] sm:$0xf0] }
  0xbd   : > { %3342 = vmatpush.bf16.msra.mxu3 %v8808_v37  ;;  %v9023_v37 = vld [vmem:[%s12359_s14 + $0xa68] sm:$0xf]  ;;  %v8748_v55 = vor.u32 %v11148_v23, %v8747_v2  ;;  %v8987_v2 = vld [vmem:[%s12359_s14 + $0xa20] sm:$0xf]  ;;  %v11232_v36 = vld [vmem:[%s12359_s14 + $0xae8] sm:$0xf0] }
  0xbe   : > { %3301 = vmatpush.bf16.msra.mxu0 %v8508_v46  ;;  %v11265_v46 = vld [vmem:[%s12359_s14 + $0xbf0] sm:$0xf0]  ;;  %v9059_v63 = vld [vmem:[%s12359_s14 + $0xab0] sm:$0xf]  ;;  %v11226_v0 = vld [vmem:[%s12359_s14 + $0xab8] sm:$0xf0] }
  0xbf   : > { %3315 = vmatpush.bf16.msra.mxu1 %v8604_v47  ;;  %v7659_v47 = vld [vmem:[#allocation2 + $0x20] sm:$0xf]  ;;  %v11250_v6 = vld [vmem:[%s12359_s14 + $0xb78] sm:$0xf0]  ;;  %v8855_v10 = vld [vmem:[%s12359_s14 + $0x918] sm:$0xf] }
  0xc0   : > { %3329 = vmatpush.bf16.msra.mxu2 %v8700_v48  ;;  %v10879_v48 = vld [vmem:[#allocation2 + $0x5c] sm:$0xf0]  ;;  %v11223_v25 = vld [vmem:[%s12359_s14 + $0xaa0] sm:$0xf0]  ;;  %v11172_v12 = vld [vmem:[%s12359_s14 + $0x908] sm:$0xf0] }
  0xc1   : > { %3343 = vmatpush.bf16.msra.mxu3 %v8796_v53  ;;  %v10880_v53 = vld [vmem:[#allocation2 + $0x64] sm:$0xf0]  ;;  %v12688_v5 = vor.u32 %v10879_v48, %v7659_v47  ;;  %v11247_v28 = vld [vmem:[%s12359_s14 + $0xb60] sm:$0xf0]  ;;  %v8843_v11 = vld [vmem:[%s12359_s14 + $0x900] sm:$0xf] }
  0xc2   : > { %3302 = vmatpush.bf16.msra.mxu0 %v8496_v59  ;;  %v7669_v59 = vld [vmem:[#allocation2 + $0x68] sm:$0xf0]  ;;  %v12693_v13 = vor.u32 %v10880_v53, %v7667_v51  ;;  %v8975_v47 = vld [vmem:[%s12359_s14 + $0xa08] sm:$0xf]  ;;  %v11229_v51 = vld [vmem:[%s12359_s14 + $0xad0] sm:$0xf0] }
  0xc3   : > { %3316 = vmatpush.bf16.msra.mxu1 %v8592_v60  ;;  %v9024_v60 = vor.u32 %v11217_v40, %v9023_v37  ;;  %v9179_v37 = vld [vmem:[%s12359_s14 + $0xba0] sm:$0xf]  ;;  %v11256_v40 = vld [vmem:[%s12359_s14 + $0xba8] sm:$0xf0]  ;;  %v9167_v53 = vld [vmem:[%s12359_s14 + $0xb88] sm:$0xf] }
  0xc4   : > { %3330 = vmatpush.bf16.msra.mxu2 %v8688_v61  ;;  %v9120_v61 = vor.u32 %v11241_v42, %v9119_v41  ;;  %v8988_v42 = vor.u32 %v11208_v27, %v8987_v2  ;;  %v9180_v48 = vor.u32 %v11256_v40, %v9179_v37  ;;  %v9131_v2 = vld [vmem:[%s12359_s14 + $0xb40] sm:$0xf]  ;;  %v10904_v27 = vld [vmem:[%s12359_s14 + $0xac] sm:$0xf]  ;;  %v7873_v40 = vld [vmem:[%s12359_s14 + $0x174] sm:$0xf0] }
  0xc5   : > { %3344 = vmatpush.bf16.msra.mxu3 %v8784_v1  ;;  %v9216_v1 = vor.u32 %v11265_v46, %v9215_v43  ;;  %v11181_v46 = vld [vmem:[%s12359_s14 + $0x950] sm:$0xf0]  ;;  %v10928_v37 = vld [vmem:[%s12359_s14 + $0x16c] sm:$0xf] }
  0xc6   : > { %3303 = vmatpush.bf16.msra.mxu0 %v8484_v15  ;;  %v12695_v15 = vor.u32 %v10871_v54, %v7661_v57  ;;  %v11253_v54 = vld [vmem:[%s12359_s14 + $0xb90] sm:$0xf0] }
  0xc7   : > { %3317 = vmatpush.bf16.msra.mxu1 %v8580_v16  ;;  %v11262_v16 = vld [vmem:[%s12359_s14 + $0xbd8] sm:$0xf0] }
  0xc8   : > { %3331 = vmatpush.bf16.msra.mxu2 %v8676_v17  ;;  %v12699_v17 = vor.u32 %v10872_v58, %v7669_v59  ;;  %v9204_v26 = vor.u32 %v11262_v16, %v9203_v3  ;;  %v8867_v58 = vld [vmem:[%s12359_s14 + $0x930] sm:$0xf]  ;;  %v11178_v59 = vld [vmem:[%s12359_s14 + $0x938] sm:$0xf0]  ;;  %v9060_v16 = vor.u32 %v11226_v0, %v9059_v63  ;;  %v7765_v63 = vld [vmem:[%s12359_s14 + $0x9c] sm:$0xf0] }
  0xc9   : > { %3345 = vmatpush.bf16.msra.mxu3 %v8772_v8  ;;  %v8903_v8 = vld [vmem:[%s12359_s14 + $0x978] sm:$0xf]  ;;  %v8868_v9 = vor.u32 %v11178_v59, %v8867_v58  ;;  %v10874_v58 = vld [vmem:[#allocation2 + $0x3c] sm:$0xf]  ;;  %v10925_v0 = vld [vmem:[%s12359_s14 + $0x154] sm:$0xf] }
  0xca   : > { %3304 = vmatpush.bf16.msra.mxu0 %v8472_v29  ;;  %v9191_v29 = vld [vmem:[%s12359_s14 + $0xbb8] sm:$0xf]  ;;  %v8904_v32 = vor.u32 %v11187_v24, %v8903_v8  ;;  %v7685_v59 = vld [vmem:[#allocation2 + $0x78] sm:$0xf0] }
  0xcb   : > { %3318 = vmatpush.bf16.msra.mxu1 %v8568_v38  ;;  %v8891_v38 = vld [vmem:[%s12359_s14 + $0x960] sm:$0xf]  ;;  %v9192_v23 = vor.u32 %v11259_v14, %v9191_v29  ;;  %v9047_v24 = vld [vmem:[%s12359_s14 + $0xa98] sm:$0xf] }
  0xcc   : > { %3332 = vmatpush.bf16.msra.mxu2 %v8664_v39  ;;  %v11184_v39 = vld [vmem:[%s12359_s14 + $0x968] sm:$0xf0]  ;;  %v8939_v14 = vld [vmem:[%s12359_s14 + $0x9c0] sm:$0xf] }
  0xcd   : > { %3346 = vmatpush.bf16.msra.mxu3 %v8760_v31  ;;  %v9083_v31 = vld [vmem:[%s12359_s14 + $0xae0] sm:$0xf]  ;;  %v8892_v41 = vor.u32 %v11184_v39, %v8891_v38  ;;  %v9048_v39 = vor.u32 %v11223_v25, %v9047_v24 }
  0xce   : > { %3305 = vmatpush.bf16.msra.mxu0 %v8460_v44  ;;  %v9084_v43 = vor.u32 %v11232_v36, %v9083_v31  ;;  %v8879_v44 = vld [vmem:[%s12359_s14 + $0x948] sm:$0xf]  ;;  %v7777_v36 = vld [vmem:[%s12359_s14 + $0xb4] sm:$0xf0] }
  0xcf   : > { %3319 = vmatpush.bf16.msra.mxu1 %v8556_v49  ;;  %v11205_v49 = vld [vmem:[%s12359_s14 + $0xa10] sm:$0xf0] }
  0xd0   : > { %3333 = vmatpush.bf16.msra.mxu2 %v8652_v50  ;;  %v9071_v50 = vld [vmem:[%s12359_s14 + $0xac8] sm:$0xf] }
  0xd1   : > { %3347 = vmatpush.bf16.msra.mxu3 %v8748_v55  ;;  %3306 = vmatmul.bf16.vlgmr.msra.gmra.mxu0 %v12688_v5  ;;  %v8880_v55 = vor.u32 %v11181_v46, %v8879_v44  ;;  %v9072_v57 = vor.u32 %v11229_v51, %v9071_v50  ;;  %v8844_v44 = vor.u32 %v11172_v12, %v8843_v11  ;;  %v8065_v46 = vld [vmem:[%s12359_s14 + $0x2f4] sm:$0xf0]  ;;  %v7753_v11 = vld [vmem:[%s12359_s14 + $0x84] sm:$0xf0]  ;;  %v10922_v12 = vld [vmem:[%s12359_s14 + $0x13c] sm:$0xf] }
  0xd2   : > { %3354 = vmatpush.bf16.msrb.mxu0 %v8928_v56  ;;  %3320 = vmatmul.bf16.vlgmr.msra.gmra.mxu1 %v12695_v15  ;;  %v8976_v56 = vor.u32 %v11205_v49, %v8975_v47  ;;  %v7675_v47 = vld [vmem:[#allocation2 + $0x30] sm:$0xf]  ;;  %v7683_v51 = vld [vmem:[#allocation2 + $0x38] sm:$0xf] }
  0xd3   : > { %3368 = vmatpush.bf16.msrb.mxu1 %v9024_v60  ;;  %3334 = vmatmul.bf16.vlgmr.msra.gmra.mxu2 %v12693_v13  ;;  %v8963_v60 = vld [vmem:[%s12359_s14 + $0x9f0] sm:$0xf] }
  0xd4   : > { %3382 = vmatpush.bf16.msrb.mxu2 %v9120_v61  ;;  %3348 = vmatmul.bf16.vlgmr.msra.gmra.mxu3 %v12699_v17  ;;  %v9168_v61 = vor.u32 %v11253_v54, %v9167_v53  ;;  %v8964_v3 = vor.u32 %v11202_v62, %v8963_v60  ;;  %v10882_v53 = vld [vmem:[#allocation2 + $0x74] sm:$0xf0]  ;;  %v10873_v54 = vld [vmem:[#allocation2 + $0x34] sm:$0xf]  ;;  %v7876_v60 = vor.u32 %v10928_v37, %v7873_v40  ;;  %v7837_v40 = vld [vmem:[%s12359_s14 + $0x12c] sm:$0xf0] }
  0xd5   : > { %3396 = vmatpush.bf16.msrb.mxu3 %v9216_v1  ;;  %v9155_v1 = vld [vmem:[%s12359_s14 + $0xb70] sm:$0xf]  ;;  %v10901_v62 = vld [vmem:[%s12359_s14 + $0x94] sm:$0xf] }
  0xd6   : > { %3355 = vmatpush.bf16.msrb.mxu0 %v8916_v18  ;;  %v11175_v18 = vld [vmem:[%s12359_s14 + $0x920] sm:$0xf0]  ;;  %v9156_v8 = vor.u32 %v11250_v6, %v9155_v1  ;;  %v7768_v24 = vor.u32 %v10901_v62, %v7765_v63  ;;  %v10889_v62 = vld [vmem:[%s12359_s14 + $0x34] sm:$0xf]  ;;  %v7717_v63 = vld [vmem:[%s12359_s14 + $0x3c] sm:$0xf0] }
  0xd7   : > { %3369 = vmatpush.bf16.msrb.mxu1 %v9012_v19  ;;  %v8951_v19 = vld [vmem:[%s12359_s14 + $0x9d8] sm:$0xf]  ;;  %v8856_v29 = vor.u32 %v11175_v18, %v8855_v10  ;;  %v10949_v10 = vld [vmem:[%s12359_s14 + $0x214] sm:$0xf] }
  0xd8   : > { %3383 = vmatpush.bf16.msrb.mxu2 %v9108_v21  ;;  %v11199_v21 = vld [vmem:[%s12359_s14 + $0x9e0] sm:$0xf0] }
  0xd9   : > { %3397 = vmatpush.bf16.msrb.mxu3 %v9204_v26  ;;  %v9143_v26 = vld [vmem:[%s12359_s14 + $0xb58] sm:$0xf]  ;;  %v8952_v38 = vor.u32 %v11199_v21, %v8951_v19  ;;  %v10973_v19 = vld [vmem:[%s12359_s14 + $0x2d4] sm:$0xf]  ;;  %v8053_v21 = vld [vmem:[%s12359_s14 + $0x2dc] sm:$0xf0] }
  0xda   : > { %3356 = vmatpush.bf16.msrb.mxu0 %v8904_v32  ;;  %v11196_v32 = vld [vmem:[%s12359_s14 + $0x9c8] sm:$0xf0]  ;;  %v9144_v31 = vor.u32 %v11247_v28, %v9143_v26  ;;  %v10898_v28 = vld [vmem:[%s12359_s14 + $0x7c] sm:$0xf] }
  0xdb   : > { %3370 = vmatpush.bf16.msrb.mxu1 %v9000_v33  ;;  %v9035_v33 = vld [vmem:[%s12359_s14 + $0xa80] sm:$0xf]  ;;  %v8940_v49 = vor.u32 %v11196_v32, %v8939_v14  ;;  %v7849_v14 = vld [vmem:[%s12359_s14 + $0x144] sm:$0xf0]  ;;  %v10946_v32 = vld [vmem:[%s12359_s14 + $0x1fc] sm:$0xf] }
  0xdc   : > { %3384 = vmatpush.bf16.msrb.mxu2 %v9096_v35  ;;  %v11220_v35 = vld [vmem:[%s12359_s14 + $0xa88] sm:$0xf0] }
  0xdd   : > { %3398 = vmatpush.bf16.msrb.mxu3 %v9192_v23  ;;  %v11244_v23 = vld [vmem:[%s12359_s14 + $0xb48] sm:$0xf0]  ;;  %v9036_v50 = vor.u32 %v11220_v35, %v9035_v33  ;;  %v7945_v33 = vld [vmem:[%s12359_s14 + $0x204] sm:$0xf0]  ;;  %v10970_v35 = vld [vmem:[%s12359_s14 + $0x2bc] sm:$0xf] }
  0xde   : > { %3357 = vmatpush.bf16.msrb.mxu0 %v8892_v41  ;;  %v10952_v41 = vld [vmem:[%s12359_s14 + $0x22c] sm:$0xf] }
  0xdf   : > { %3371 = vmatpush.bf16.msrb.mxu1 %v8988_v42  ;;  %v7969_v42 = vld [vmem:[%s12359_s14 + $0x234] sm:$0xf0] }
  0xe0   : > { %3385 = vmatpush.bf16.msrb.mxu2 %v9084_v43  ;;  %v10976_v43 = vld [vmem:[%s12359_s14 + $0x2ec] sm:$0xf] }
  0xe1   : > { %3399 = vmatpush.bf16.msrb.mxu3 %v9180_v48  ;;  %v10881_v48 = vld [vmem:[#allocation2 + $0x6c] sm:$0xf0]  ;;  %v8068_v1 = vor.u32 %v10976_v43, %v8065_v46  ;;  %v10967_v43 = vld [vmem:[%s12359_s14 + $0x2a4] sm:$0xf] }
  0xe2   : > { %3358 = vmatpush.bf16.msrb.mxu0 %v8880_v55  ;;  %v9132_v55 = vor.u32 %v11244_v23, %v9131_v2  ;;  %v12764_v6 = vor.u32 %v10881_v48, %v7675_v47  ;;  %v7852_v2 = vor.u32 %v10922_v12, %v7849_v14  ;;  %v7948_v23 = vor.u32 %v10946_v32, %v7945_v33  ;;  %v10910_v12 = vld [vmem:[%s12359_s14 + $0xdc] sm:$0xf]  ;;  %v7801_v14 = vld [vmem:[%s12359_s14 + $0xe4] sm:$0xf0] }
  0xe3   : > { %3372 = vmatpush.bf16.msrb.mxu1 %v8976_v56  ;;  %v7780_v56 = vor.u32 %v10904_v27, %v7777_v36  ;;  %v10895_v27 = vld [vmem:[%s12359_s14 + $0x64] sm:$0xf]  ;;  %v10934_v32 = vld [vmem:[%s12359_s14 + $0x19c] sm:$0xf]  ;;  %v7897_v33 = vld [vmem:[%s12359_s14 + $0x1a4] sm:$0xf0] }
  0xe4   : > { %3386 = vmatpush.bf16.msrb.mxu2 %v9072_v57  ;;  %v7677_v57 = vld [vmem:[#allocation2 + $0x70] sm:$0xf0]  ;;  %v10919_v36 = vld [vmem:[%s12359_s14 + $0x124] sm:$0xf] }
  0xe5   : > { %3400 = vmatpush.bf16.msrb.mxu3 %v9168_v61  ;;  %v7972_v61 = vor.u32 %v10952_v41, %v7969_v42  ;;  %v12771_v18 = vor.u32 %v10873_v54, %v7677_v57  ;;  %v10943_v41 = vld [vmem:[%s12359_s14 + $0x1e4] sm:$0xf]  ;;  %v7933_v42 = vld [vmem:[%s12359_s14 + $0x1ec] sm:$0xf0]  ;;  %v7840_v47 = vor.u32 %v10919_v36, %v7837_v40  ;;  %v7825_v54 = vld [vmem:[%s12359_s14 + $0x114] sm:$0xf0] }
  0xe6   : > { %3359 = vmatpush.bf16.msrb.mxu0 %v8868_v9  ;;  %v7861_v9 = vld [vmem:[%s12359_s14 + $0x15c] sm:$0xf0]  ;;  %v7936_v48 = vor.u32 %v10943_v41, %v7933_v42  ;;  %v10964_v57 = vld [vmem:[%s12359_s14 + $0x28c] sm:$0xf]  ;;  %v10907_v36 = vld [vmem:[%s12359_s14 + $0xc4] sm:$0xf] }
  0xe7   : > { %3373 = vmatpush.bf16.msrb.mxu1 %v8964_v3  ;;  %v7957_v3 = vld [vmem:[%s12359_s14 + $0x21c] sm:$0xf0]  ;;  %v7864_v25 = vor.u32 %v10925_v0, %v7861_v9  ;;  %v10913_v0 = vld [vmem:[%s12359_s14 + $0xf4] sm:$0xf]  ;;  %v10931_v40 = vld [vmem:[%s12359_s14 + $0x184] sm:$0xf] }
  0xe8   : > { %3387 = vmatpush.bf16.msrb.mxu2 %v9060_v16  ;;  %v12769_v16 = vor.u32 %v10882_v53, %v7683_v51  ;;  %v7960_v26 = vor.u32 %v10949_v10, %v7957_v3  ;;  %v10916_v51 = vld [vmem:[%s12359_s14 + $0x10c] sm:$0xf]  ;;  %v7813_v9 = vld [vmem:[%s12359_s14 + $0xfc] sm:$0xf0]  ;;  %v10937_v10 = vld [vmem:[%s12359_s14 + $0x1b4] sm:$0xf] }
  0xe9   : > { %3401 = vmatpush.bf16.msrb.mxu3 %v9156_v8  ;;  %v12775_v8 = vor.u32 %v10874_v58, %v7685_v59  ;;  %v8017_v58 = vld [vmem:[%s12359_s14 + $0x294] sm:$0xf0]  ;;  %v7909_v3 = vld [vmem:[%s12359_s14 + $0x1bc] sm:$0xf0]  ;;  %v7885_v42 = vld [vmem:[%s12359_s14 + $0x18c] sm:$0xf0] }
  0xea   : > { %3360 = vmatpush.bf16.msrb.mxu0 %v8856_v29  ;;  %v8056_v29 = vor.u32 %v10973_v19, %v8053_v21  ;;  %v10961_v19 = vld [vmem:[%s12359_s14 + $0x274] sm:$0xf]  ;;  %v8005_v21 = vld [vmem:[%s12359_s14 + $0x27c] sm:$0xf0] }
  0xeb   : > { %3374 = vmatpush.bf16.msrb.mxu1 %v8952_v38  ;;  %v8041_v38 = vld [vmem:[%s12359_s14 + $0x2c4] sm:$0xf0] }
  0xec   : > { %3388 = vmatpush.bf16.msrb.mxu2 %v9048_v39  ;;  %v7756_v39 = vor.u32 %v10898_v28, %v7753_v11  ;;  %v8044_v37 = vor.u32 %v10970_v35, %v8041_v38  ;;  %v10886_v28 = vld [vmem:[%s12359_s14 + $0x1c] sm:$0xf]  ;;  %v7705_v11 = vld [vmem:[%s12359_s14 + $0x24] sm:$0xf0] }
  0xed   : > { %3402 = vmatpush.bf16.msrb.mxu3 %v9144_v31  ;;  %v7741_v31 = vld [vmem:[%s12359_s14 + $0x6c] sm:$0xf0]  ;;  %v10958_v35 = vld [vmem:[%s12359_s14 + $0x25c] sm:$0xf]  ;;  %v7993_v38 = vld [vmem:[%s12359_s14 + $0x264] sm:$0xf0] }
  0xee   : > { %3361 = vmatpush.bf16.msrb.mxu0 %v8844_v44  ;;  %v8029_v44 = vld [vmem:[%s12359_s14 + $0x2ac] sm:$0xf0]  ;;  %v7744_v46 = vor.u32 %v10895_v27, %v7741_v31  ;;  %v7804_v27 = vor.u32 %v10910_v12, %v7801_v14  ;;  %v7900_v31 = vor.u32 %v10934_v32, %v7897_v33  ;;  %v7996_v41 = vor.u32 %v10958_v35, %v7993_v38  ;;  %v11018_v12 = vld [vmem:[%s12359_s14 + $0x43c] sm:$0xf]  ;;  %v8233_v14 = vld [vmem:[%s12359_s14 + $0x444] sm:$0xf0] }
  0xef   : > { %3375 = vmatpush.bf16.msrb.mxu1 %v8940_v49  ;;  %v10892_v49 = vld [vmem:[%s12359_s14 + $0x4c] sm:$0xf]  ;;  %v8032_v53 = vor.u32 %v10967_v43, %v8029_v44  ;;  %v10955_v43 = vld [vmem:[%s12359_s14 + $0x244] sm:$0xf]  ;;  %v7981_v44 = vld [vmem:[%s12359_s14 + $0x24c] sm:$0xf0] }
  0xf0   : > { %3389 = vmatpush.bf16.msrb.mxu2 %v9036_v50  ;;  %v7729_v50 = vld [vmem:[%s12359_s14 + $0x54] sm:$0xf0]  ;;  %v11042_v32 = vld [vmem:[%s12359_s14 + $0x4fc] sm:$0xf]  ;;  %v8329_v33 = vld [vmem:[%s12359_s14 + $0x504] sm:$0xf0] }
  0xf1   : > { %3403 = vmatpush.bf16.msrb.mxu3 %v9132_v55  ;;  %3362 = vmatmul.bf16.vlgmr.msrb.gmra.mxu0 %v12764_v6  ;;  %v10940_v55 = vld [vmem:[%s12359_s14 + $0x1cc] sm:$0xf]  ;;  %v7732_v59 = vor.u32 %v10892_v49, %v7729_v50  ;;  %v8257_v50 = vld [vmem:[%s12359_s14 + $0x474] sm:$0xf0]  ;;  %v11066_v35 = vld [vmem:[%s12359_s14 + $0x5bc] sm:$0xf] }
  0xf2   : > { %3410 = vmatpush.bf16.msra.mxu0 %v7780_v56  ;;  %3376 = vmatmul.bf16.vlgmr.msrb.gmra.mxu1 %v12771_v18  ;;  %v7921_v56 = vld [vmem:[%s12359_s14 + $0x1d4] sm:$0xf0]  ;;  %v8425_v38 = vld [vmem:[%s12359_s14 + $0x5c4] sm:$0xf0] }
  0xf3   : > { %3424 = vmatpush.bf16.msra.mxu1 %v7876_v60  ;;  %3390 = vmatmul.bf16.vlgmr.msrb.gmra.mxu2 %v12769_v16  ;;  %v7828_v60 = vor.u32 %v10916_v51, %v7825_v54  ;;  %v11048_v51 = vld [vmem:[%s12359_s14 + $0x52c] sm:$0xf] }
  0xf4   : > { %3438 = vmatpush.bf16.msra.mxu2 %v7972_v61  ;;  %3404 = vmatmul.bf16.vlgmr.msrb.gmra.mxu3 %v12775_v8  ;;  %v7924_v61 = vor.u32 %v10940_v55, %v7921_v56  ;;  %v7888_v55 = vor.u32 %v10931_v40, %v7885_v42  ;;  %v11072_v56 = vld [vmem:[%s12359_s14 + $0x5ec] sm:$0xf]  ;;  %v8221_v40 = vld [vmem:[%s12359_s14 + $0x42c] sm:$0xf0] }
  0xf5   : > { %3452 = vmatpush.bf16.msra.mxu3 %v8068_v1  ;;  %v8020_v1 = vor.u32 %v10964_v57, %v8017_v58  ;;  %v8449_v57 = vld [vmem:[%s12359_s14 + $0x5f4] sm:$0xf0]  ;;  %v7984_v58 = vor.u32 %v10955_v43, %v7981_v44  ;;  %v8317_v42 = vld [vmem:[%s12359_s14 + $0x4ec] sm:$0xf0]  ;;  %v11063_v43 = vld [vmem:[%s12359_s14 + $0x5a4] sm:$0xf] }
  0xf6   : > { %3411 = vmatpush.bf16.msra.mxu0 %v7768_v24  ;;  %v7720_v24 = vor.u32 %v10889_v62, %v7717_v63  ;;  %v10997_v62 = vld [vmem:[%s12359_s14 + $0x394] sm:$0xf]  ;;  %v8149_v63 = vld [vmem:[%s12359_s14 + $0x39c] sm:$0xf0]  ;;  %v8413_v44 = vld [vmem:[%s12359_s14 + $0x5ac] sm:$0xf0] }
  0xf7   : > { %3425 = vmatpush.bf16.msra.mxu1 %v7864_v25  ;;  %v7816_v25 = vor.u32 %v10913_v0, %v7813_v9  ;;  %v11021_v0 = vld [vmem:[%s12359_s14 + $0x454] sm:$0xf]  ;;  %v8245_v9 = vld [vmem:[%s12359_s14 + $0x45c] sm:$0xf0] }
  0xf8   : > { %3439 = vmatpush.bf16.msra.mxu2 %v7960_v26  ;;  %v7912_v26 = vor.u32 %v10937_v10, %v7909_v3  ;;  %v11045_v10 = vld [vmem:[%s12359_s14 + $0x514] sm:$0xf]  ;;  %v8341_v3 = vld [vmem:[%s12359_s14 + $0x51c] sm:$0xf0] }
  0xf9   : > { %3453 = vmatpush.bf16.msra.mxu3 %v8056_v29  ;;  %v8008_v29 = vor.u32 %v10961_v19, %v8005_v21  ;;  %v11069_v19 = vld [vmem:[%s12359_s14 + $0x5d4] sm:$0xf]  ;;  %v8437_v21 = vld [vmem:[%s12359_s14 + $0x5dc] sm:$0xf0] }
  0xfa   : > { %3412 = vmatpush.bf16.msra.mxu0 %v7756_v39  ;;  %v7708_v39 = vor.u32 %v10886_v28, %v7705_v11  ;;  %v10994_v28 = vld [vmem:[%s12359_s14 + $0x37c] sm:$0xf]  ;;  %v8137_v11 = vld [vmem:[%s12359_s14 + $0x384] sm:$0xf0] }
  0xfb   : > { %3426 = vmatpush.bf16.msra.mxu1 %v7852_v2  ;;  %v10883_v2 = vld [vmem:[%s12359_s14 + $0x4] sm:$0xf] }
  0xfc   : > { %3440 = vmatpush.bf16.msra.mxu2 %v7948_v23  ;;  %v7693_v23 = vld [vmem:[%s12359_s14 + $0xc] sm:$0xf0] }
  0xfd   : > { %3454 = vmatpush.bf16.msra.mxu3 %v8044_v37  ;;  %v7789_v37 = vld [vmem:[%s12359_s14 + $0xcc] sm:$0xf0]  ;;  %v7696_v49 = vor.u32 %v10883_v2, %v7693_v23  ;;  %v8236_v2 = vor.u32 %v11018_v12, %v8233_v14  ;;  %v8332_v23 = vor.u32 %v11042_v32, %v8329_v33  ;;  %v10982_v32 = vld [vmem:[%s12359_s14 + $0x31c] sm:$0xf]  ;;  %v8089_v33 = vld [vmem:[%s12359_s14 + $0x324] sm:$0xf0] }
  0xfe   : > { %3413 = vmatpush.bf16.msra.mxu0 %v7744_v46  ;;  %v11000_v46 = vld [vmem:[%s12359_s14 + $0x3ac] sm:$0xf]  ;;  %v7792_v54 = vor.u32 %v10907_v36, %v7789_v37  ;;  %v11015_v36 = vld [vmem:[%s12359_s14 + $0x424] sm:$0xf]  ;;  %v8428_v37 = vor.u32 %v11066_v35, %v8425_v38  ;;  %v11006_v35 = vld [vmem:[%s12359_s14 + $0x3dc] sm:$0xf] }
  0xff   : > { %3427 = vmatpush.bf16.msra.mxu1 %v7840_v47  ;;  %v8161_v47 = vld [vmem:[%s12359_s14 + $0x3b4] sm:$0xf0] }
 0x100   : > { %3441 = vmatpush.bf16.msra.mxu2 %v7936_v48  ;;  %v11024_v48 = vld [vmem:[%s12359_s14 + $0x46c] sm:$0xf] }
 0x101   : > { %3455 = vmatpush.bf16.msra.mxu3 %v8032_v53  ;;  %v8353_v53 = vld [vmem:[%s12359_s14 + $0x534] sm:$0xf0] }
 0x102   : > { %3414 = vmatpush.bf16.msra.mxu0 %v7732_v59  ;;  %v8164_v59 = vor.u32 %v11000_v46, %v8161_v47  ;;  %v8224_v47 = vor.u32 %v11015_v36, %v8221_v40  ;;  %v8377_v36 = vld [vmem:[%s12359_s14 + $0x564] sm:$0xf0]  ;;  %v8092_v40 = vor.u32 %v10982_v32, %v8089_v33 }
 0x103   : > { %3428 = vmatpush.bf16.msra.mxu1 %v7828_v60  ;;  %v8260_v60 = vor.u32 %v11024_v48, %v8257_v50  ;;  %v8113_v50 = vld [vmem:[%s12359_s14 + $0x354] sm:$0xf0] }
 0x104   : > { %3442 = vmatpush.bf16.msra.mxu2 %v7924_v61  ;;  %v8356_v61 = vor.u32 %v11048_v51, %v8353_v53  ;;  %v11012_v51 = vld [vmem:[%s12359_s14 + $0x40c] sm:$0xf]  ;;  %v8416_v53 = vor.u32 %v11063_v43, %v8413_v44 }
 0x105   : > { %3456 = vmatpush.bf16.msra.mxu3 %v8020_v1  ;;  %v8452_v1 = vor.u32 %v11072_v56, %v8449_v57  ;;  %v8305_v56 = vld [vmem:[%s12359_s14 + $0x4d4] sm:$0xf0]  ;;  %v11060_v57 = vld [vmem:[%s12359_s14 + $0x58c] sm:$0xf] }
 0x106   : > { %3415 = vmatpush.bf16.msra.mxu0 %v7720_v24  ;;  %v8152_v24 = vor.u32 %v10997_v62, %v8149_v63 }
 0x107   : > { %3429 = vmatpush.bf16.msra.mxu1 %v7816_v25  ;;  %v8248_v25 = vor.u32 %v11021_v0, %v8245_v9  ;;  %v8101_v9 = vld [vmem:[%s12359_s14 + $0x33c] sm:$0xf0] }
 0x108   : > { %3443 = vmatpush.bf16.msra.mxu2 %v7912_v26  ;;  %v8344_v26 = vor.u32 %v11045_v10, %v8341_v3  ;;  %v11009_v10 = vld [vmem:[%s12359_s14 + $0x3f4] sm:$0xf] }
 0x109   : > { %3457 = vmatpush.bf16.msra.mxu3 %v8008_v29  ;;  %v8440_v29 = vor.u32 %v11069_v19, %v8437_v21  ;;  %v8197_v19 = vld [vmem:[%s12359_s14 + $0x3fc] sm:$0xf0]  ;;  %v11033_v21 = vld [vmem:[%s12359_s14 + $0x4b4] sm:$0xf] }
 0x10a   : > { %3416 = vmatpush.bf16.msra.mxu0 %v7708_v39  ;;  %v8140_v39 = vor.u32 %v10994_v28, %v8137_v11  ;;  %v8389_v28 = vld [vmem:[%s12359_s14 + $0x57c] sm:$0xf0] }
 0x10b   : > { %3430 = vmatpush.bf16.msra.mxu1 %v7804_v27  ;;  %v10991_v27 = vld [vmem:[%s12359_s14 + $0x364] sm:$0xf] }
 0x10c   : > { %3444 = vmatpush.bf16.msra.mxu2 %v7900_v31  ;;  %v8125_v31 = vld [vmem:[%s12359_s14 + $0x36c] sm:$0xf0] }
 0x10d   : > { %3458 = vmatpush.bf16.msra.mxu3 %v7996_v41  ;;  %v11039_v41 = vld [vmem:[%s12359_s14 + $0x4e4] sm:$0xf]  ;;  %v8128_v46 = vor.u32 %v10991_v27, %v8125_v31  ;;  %v11054_v31 = vld [vmem:[%s12359_s14 + $0x55c] sm:$0xf] }
 0x10e   : > { %3417 = vmatpush.bf16.msra.mxu0 %v7696_v49  ;;  %v8320_v48 = vor.u32 %v11039_v41, %v8317_v42  ;;  %v10988_v49 = vld [vmem:[%s12359_s14 + $0x34c] sm:$0xf]  ;;  %v10979_v41 = vld [vmem:[%s12359_s14 + $0x304] sm:$0xf]  ;;  %v8077_v42 = vld [vmem:[%s12359_s14 + $0x30c] sm:$0xf0] }
 0x10f   : > { %3431 = vmatpush.bf16.msra.mxu1 %v7792_v54  ;;  %v8209_v54 = vld [vmem:[%s12359_s14 + $0x414] sm:$0xf0] }
 0x110   : > { %3445 = vmatpush.bf16.msra.mxu2 %v7888_v55  ;;  %v11036_v55 = vld [vmem:[%s12359_s14 + $0x4cc] sm:$0xf]  ;;  %v8212_v63 = vor.u32 %v11012_v51, %v8209_v54  ;;  %v11051_v51 = vld [vmem:[%s12359_s14 + $0x544] sm:$0xf] }
 0x111   : > { %3459 = vmatpush.bf16.msra.mxu3 %v7984_v58  ;;  %3418 = vmatmul.bf16.vlgmr.msra.gmra.mxu0 %v12543_v34  ;;  %v8401_v58 = vld [vmem:[%s12359_s14 + $0x594] sm:$0xf0]  ;;  %v8308_v0 = vor.u32 %v11036_v55, %v8305_v56  ;;  %v11096_v54 = vld [vmem:[%s12359_s14 + $0x6ac] sm:$0xf] }
 0x112   : > { %3466 = vmatpush.bf16.msrb.mxu0 %v8164_v59  ;;  %3432 = vmatmul.bf16.vlgmr.msra.gmra.mxu1 %v12555_v45  ;;  %v3195_v59 = vpop.f32.mrf.mxu0  ;;  %v8404_v3 = vor.u32 %v11060_v57, %v8401_v58  ;;  %v8545_v55 = vld [vmem:[%s12359_s14 + $0x6b4] sm:$0xf0]  ;;  %v11120_v56 = vld [vmem:[%s12359_s14 + $0x76c] sm:$0xf]  ;;  %v8080_v57 = vor.u32 %v10979_v41, %v8077_v42  ;;  %v11162_v41 = vld [vmem:[%s12359_s14 + $0x8bc] sm:$0xf] }
 0x113   : > { %3480 = vmatpush.bf16.msrb.mxu1 %v8260_v60  ;;  %3446 = vmatmul.bf16.vlgmr.msra.gmra.mxu2 %v12548_v30  ;;  %v3209_v60 = vpop.f32.mrf.mxu1  ;;  %v8641_v58 = vld [vmem:[%s12359_s14 + $0x774] sm:$0xf0]  ;;  %v8809_v42 = vld [vmem:[%s12359_s14 + $0x8c4] sm:$0xf0] }
 0x114   : > { %3494 = vmatpush.bf16.msrb.mxu2 %v8356_v61  ;;  %3460 = vmatmul.bf16.vlgmr.msra.gmra.mxu3 %v12560_v52  ;;  %v8116_v61 = vor.u32 %v10988_v49, %v8113_v50  ;;  %v3210_v62 = vadd.f32 %v3209_v60, %v3195_v59  ;;  %v8380_v49 = vor.u32 %v11054_v31, %v8377_v36  ;;  %v8269_v50 = vld [vmem:[%s12359_s14 + $0x48c] sm:$0xf0]  ;;  %v11144_v59 = vld [vmem:[%s12359_s14 + $0x82c] sm:$0xf]  ;;  %v8737_v60 = vld [vmem:[%s12359_s14 + $0x834] sm:$0xf0] }
 0x115   : > { %3508 = vmatpush.bf16.msrb.mxu3 %v8452_v1  ;;  %v10985_v1 = vld [vmem:[%s12359_s14 + $0x334] sm:$0xf]  ;;  %v8617_v31 = vld [vmem:[%s12359_s14 + $0x744] sm:$0xf0]  ;;  %v11138_v36 = vld [vmem:[%s12359_s14 + $0x7fc] sm:$0xf] }
 0x116   : > { %3467 = vmatpush.bf16.msrb.mxu0 %v8152_v24  ;;  %v8293_v24 = vld [vmem:[%s12359_s14 + $0x4bc] sm:$0xf0]  ;;  %v8104_v12 = vor.u32 %v10985_v1, %v8101_v9  ;;  %v8548_v9 = vor.u32 %v11096_v54, %v8545_v55  ;;  %v8605_v54 = vld [vmem:[%s12359_s14 + $0x72c] sm:$0xf0]  ;;  %v11135_v55 = vld [vmem:[%s12359_s14 + $0x7e4] sm:$0xf] }
 0x117   : > { %3481 = vmatpush.bf16.msrb.mxu1 %v8248_v25  ;;  %v3223_v25 = vpop.f32.mrf.mxu2  ;;  %v8296_v14 = vor.u32 %v11033_v21, %v8293_v24  ;;  %v11093_v21 = vld [vmem:[%s12359_s14 + $0x694] sm:$0xf]  ;;  %v8533_v24 = vld [vmem:[%s12359_s14 + $0x69c] sm:$0xf0] }
 0x118   : > { %3495 = vmatpush.bf16.msrb.mxu2 %v8344_v26  ;;  %v11057_v26 = vld [vmem:[%s12359_s14 + $0x574] sm:$0xf]  ;;  %v3224_v11 = vadd.f32 %v3223_v25, %v3210_v62  ;;  %v8536_v33 = vor.u32 %v11093_v21, %v8533_v24  ;;  %v8593_v24 = vld [vmem:[%s12359_s14 + $0x714] sm:$0xf0] }
 0x119   : > { %3509 = vmatpush.bf16.msrb.mxu3 %v8440_v29  ;;  %v8200_v29 = vor.u32 %v11009_v10, %v8197_v19  ;;  %v8392_v38 = vor.u32 %v11057_v26, %v8389_v28  ;;  %v3237_v27 = vpop.f32.mrf.mxu3  ;;  %v8644_v10 = vor.u32 %v11120_v56, %v8641_v58  ;;  %v11117_v25 = vld [vmem:[%s12359_s14 + $0x754] sm:$0xf]  ;;  %v8629_v28 = vld [vmem:[%s12359_s14 + $0x75c] sm:$0xf0]  ;;  %v8701_v56 = vld [vmem:[%s12359_s14 + $0x7ec] sm:$0xf0] }
 0x11a   : > { %3468 = vmatpush.bf16.msrb.mxu0 %v8140_v39  ;;  %v8185_v39 = vld [vmem:[%s12359_s14 + $0x3e4] sm:$0xf0]  ;;  %v12907_v19 = vpop.f32.mrf.mxu0  ;;  %v11159_v58 = vld [vmem:[%s12359_s14 + $0x8a4] sm:$0xf] }
 0x11b   : > { %3482 = vmatpush.bf16.msrb.mxu1 %v8236_v2  ;;  %v11030_v2 = vld [vmem:[%s12359_s14 + $0x49c] sm:$0xf]  ;;  %v8188_v43 = vor.u32 %v11006_v35, %v8185_v39  ;;  %v12917_v32 = vpop.f32.mrf.mxu1  ;;  %v8632_v35 = vor.u32 %v11117_v25, %v8629_v28  ;;  %v11132_v25 = vld [vmem:[%s12359_s14 + $0x7cc] sm:$0xf]  ;;  %v8785_v28 = vld [vmem:[%s12359_s14 + $0x894] sm:$0xf0] }
 0x11c   : > { %3496 = vmatpush.bf16.msrb.mxu2 %v8332_v23  ;;  %v8281_v23 = vld [vmem:[%s12359_s14 + $0x4a4] sm:$0xf0]  ;;  %v11090_v39 = vld [vmem:[%s12359_s14 + $0x67c] sm:$0xf] }
 0x11d   : > { %3510 = vmatpush.bf16.msrb.mxu3 %v8428_v37  ;;  %v12889_v37 = vadd.f32 %v3237_v27, %v3224_v11  ;;  %v8284_v44 = vor.u32 %v11030_v2, %v8281_v23  ;;  %v11141_v11 = vld [vmem:[%s12359_s14 + $0x814] sm:$0xf]  ;;  %v8521_v2 = vld [vmem:[%s12359_s14 + $0x684] sm:$0xf0]  ;;  %v11114_v23 = vld [vmem:[%s12359_s14 + $0x73c] sm:$0xf] }
 0x11e   : > { %3469 = vmatpush.bf16.msrb.mxu0 %v8128_v46  ;;  %v11003_v46 = vld [vmem:[%s12359_s14 + $0x3c4] sm:$0xf] }
 0x11f   : > { %3483 = vmatpush.bf16.msrb.mxu1 %v8224_v47  ;;  %v8173_v47 = vld [vmem:[%s12359_s14 + $0x3cc] sm:$0xf0] }
 0x120   : > { %3497 = vmatpush.bf16.msrb.mxu2 %v8320_v48  ;;  %v11027_v48 = vld [vmem:[%s12359_s14 + $0x484] sm:$0xf] }
 0x121   : > { %3511 = vmatpush.bf16.msrb.mxu3 %v8416_v53  ;;  %v8365_v53 = vld [vmem:[%s12359_s14 + $0x54c] sm:$0xf0]  ;;  %v8272_v62 = vor.u32 %v11027_v48, %v8269_v50  ;;  %v11087_v48 = vld [vmem:[%s12359_s14 + $0x664] sm:$0xf] }
 0x122   : > { %3470 = vmatpush.bf16.msrb.mxu0 %v8116_v61  ;;  %v8176_v61 = vor.u32 %v11003_v46, %v8173_v47  ;;  %v8368_v1 = vor.u32 %v11051_v51, %v8365_v53  ;;  %v8620_v46 = vor.u32 %v11114_v23, %v8617_v31  ;;  %v11111_v50 = vld [vmem:[%s12359_s14 + $0x724] sm:$0xf]  ;;  %v8812_v51 = vor.u32 %v11162_v41, %v8809_v42  ;;  %v12936_v53 = vpop.f32.mrf.mxu3  ;;  %v11129_v23 = vld [vmem:[%s12359_s14 + $0x7b4] sm:$0xf] }
 0x123   : > { %3484 = vmatpush.bf16.msrb.mxu1 %v8212_v63  ;;  %v11168_v63 = vld [vmem:[%s12359_s14 + $0x8ec] sm:$0xf] }
 0x124   : > { %3498 = vmatpush.bf16.msrb.mxu2 %v8308_v0  ;;  %v8833_v0 = vld [vmem:[%s12359_s14 + $0x8f4] sm:$0xf0] }
 0x125   : > { %3512 = vmatpush.bf16.msrb.mxu3 %v8404_v3  ;;  %v8740_v3 = vor.u32 %v11144_v59, %v8737_v60  ;;  %v8836_v26 = vor.u32 %v11168_v63, %v8833_v0  ;;  %v8797_v59 = vld [vmem:[%s12359_s14 + $0x8ac] sm:$0xf0]  ;;  %v8704_v63 = vor.u32 %v11135_v55, %v8701_v56  ;;  %v11126_v55 = vld [vmem:[%s12359_s14 + $0x79c] sm:$0xf]  ;;  %v8665_v56 = vld [vmem:[%s12359_s14 + $0x7a4] sm:$0xf0] }
 0x126   : > { %3471 = vmatpush.bf16.msrb.mxu0 %v8104_v12  ;;  %v8725_v12 = vld [vmem:[%s12359_s14 + $0x81c] sm:$0xf0] }
 0x127   : > { %3485 = vmatpush.bf16.msrb.mxu1 %v8200_v29  ;;  %v11165_v29 = vld [vmem:[%s12359_s14 + $0x8d4] sm:$0xf] }
 0x128   : > { %3499 = vmatpush.bf16.msrb.mxu2 %v8296_v14  ;;  %v8821_v14 = vld [vmem:[%s12359_s14 + $0x8dc] sm:$0xf0] }
 0x129   : > { %3513 = vmatpush.bf16.msrb.mxu3 %v8392_v38  ;;  %v8728_v38 = vor.u32 %v11141_v11, %v8725_v12  ;;  %v8824_v27 = vor.u32 %v11165_v29, %v8821_v14  ;;  %v11081_v14 = vld [vmem:[%s12359_s14 + $0x634] sm:$0xf] }
 0x12a   : > { %3472 = vmatpush.bf16.msrb.mxu0 %v8092_v40  ;;  %v8713_v40 = vld [vmem:[%s12359_s14 + $0x804] sm:$0xf0] }
 0x12b   : > { %3486 = vmatpush.bf16.msrb.mxu1 %v8188_v43  ;;  %v8524_v43 = vor.u32 %v11090_v39, %v8521_v2  ;;  %v8716_v47 = vor.u32 %v11138_v36, %v8713_v40  ;;  %v8581_v2 = vld [vmem:[%s12359_s14 + $0x6fc] sm:$0xf0]  ;;  %v11153_v36 = vld [vmem:[%s12359_s14 + $0x874] sm:$0xf] }
 0x12c   : > { %3500 = vmatpush.bf16.msrb.mxu2 %v8284_v44  ;;  %v12931_v44 = vpop.f32.mrf.mxu2  ;;  %v8773_v40 = vld [vmem:[%s12359_s14 + $0x87c] sm:$0xf0] }
 0x12d   : > { %3514 = vmatpush.bf16.msrb.mxu3 %v8380_v49  ;;  %v8509_v49 = vld [vmem:[%s12359_s14 + $0x66c] sm:$0xf0] }
 0x12e   : > { %3473 = vmatpush.bf16.msrb.mxu0 %v8080_v57  ;;  %v3251_v57 = vpop.f32.mrf.mxu0 }
 0x12f   : > { %3487 = vmatpush.bf16.msrb.mxu1 %v8176_v61  ;;  %v3252_v60 = vadd.f32 %v3251_v57, %v12889_v37  ;;  %v8512_v61 = vor.u32 %v11087_v48, %v8509_v49  ;;  %v3265_v0 = vpop.f32.mrf.mxu1  ;;  %v8689_v37 = vld [vmem:[%s12359_s14 + $0x7d4] sm:$0xf0]  ;;  %v11078_v48 = vld [vmem:[%s12359_s14 + $0x61c] sm:$0xf]  ;;  %v8473_v49 = vld [vmem:[%s12359_s14 + $0x624] sm:$0xf0] }
 0x130   : > { %3501 = vmatpush.bf16.msrb.mxu2 %v8272_v62  ;;  %v8608_v62 = vor.u32 %v11111_v50, %v8605_v54  ;;  %v8692_v29 = vor.u32 %v11132_v25, %v8689_v37  ;;  %v11102_v50 = vld [vmem:[%s12359_s14 + $0x6dc] sm:$0xf]  ;;  %v8569_v54 = vld [vmem:[%s12359_s14 + $0x6e4] sm:$0xf0]  ;;  %v11192_v25 = vld [vmem:[%s12359_s14 + $0x9ac] sm:$0xf] }
 0x131   : > { %3515 = vmatpush.bf16.msrb.mxu3 %v8368_v1  ;;  %3474 = vmatmul.bf16.vlgmr.msrb.gmra.mxu0 %v12612_v4  ;;  %v11084_v1 = vld [vmem:[%s12359_s14 + $0x64c] sm:$0xf]  ;;  %v3266_v21 = vadd.f32 %v3265_v0, %v3252_v60  ;;  %v11150_v57 = vld [vmem:[%s12359_s14 + $0x85c] sm:$0xf]  ;;  %v11075_v60 = vld [vmem:[%s12359_s14 + $0x604] sm:$0xf] }
 0x132   : > { %3522 = vmatpush.bf16.msra.mxu0 %v8548_v9  ;;  %3488 = vmatmul.bf16.vlgmr.msrb.gmra.mxu1 %v12619_v7  ;;  %v8497_v9 = vld [vmem:[%s12359_s14 + $0x654] sm:$0xf0]  ;;  %v11099_v0 = vld [vmem:[%s12359_s14 + $0x6c4] sm:$0xf] }
 0x133   : > { %3536 = vmatpush.bf16.msra.mxu1 %v8644_v10  ;;  %3502 = vmatmul.bf16.vlgmr.msrb.gmra.mxu2 %v12617_v20  ;;  %v11108_v10 = vld [vmem:[%s12359_s14 + $0x70c] sm:$0xf]  ;;  %v8500_v11 = vor.u32 %v11084_v1, %v8497_v9  ;;  %v8557_v1 = vld [vmem:[%s12359_s14 + $0x6cc] sm:$0xf0]  ;;  %v11123_v9 = vld [vmem:[%s12359_s14 + $0x784] sm:$0xf] }
 0x134   : > { %3550 = vmatpush.bf16.msra.mxu2 %v8740_v3  ;;  %3516 = vmatmul.bf16.vlgmr.msrb.gmra.mxu3 %v12623_v22  ;;  %v8800_v3 = vor.u32 %v11159_v58, %v8797_v59  ;;  %v8596_v12 = vor.u32 %v11108_v10, %v8593_v24  ;;  %v8761_v58 = vld [vmem:[%s12359_s14 + $0x864] sm:$0xf0]  ;;  %v8476_v59 = vor.u32 %v11078_v48, %v8473_v49  ;;  %v8749_v24 = vld [vmem:[%s12359_s14 + $0x84c] sm:$0xf0]  ;;  %v8929_v37 = vld [vmem:[%s12359_s14 + $0x9b4] sm:$0xf0] }
 0x135   : > { %3564 = vmatpush.bf16.msra.mxu3 %v8836_v26  ;;  %v11156_v26 = vld [vmem:[%s12359_s14 + $0x88c] sm:$0xf]  ;;  %v8764_v10 = vor.u32 %v11150_v57, %v8761_v58  ;;  %v11261_v49 = vld [vmem:[%s12359_s14 + $0xbd4] sm:$0xf]  ;;  %v11186_v57 = vld [vmem:[%s12359_s14 + $0x97c] sm:$0xf] }
 0x136   : > { %3523 = vmatpush.bf16.msra.mxu0 %v8536_v33  ;;  %v8485_v33 = vld [vmem:[%s12359_s14 + $0x63c] sm:$0xf0]  ;;  %v3279_v39 = vpop.f32.mrf.mxu2  ;;  %v12992_v48 = vpop.f32.mrf.mxu0  ;;  %v8905_v58 = vld [vmem:[%s12359_s14 + $0x984] sm:$0xf0] }
 0x137   : > { %3537 = vmatpush.bf16.msra.mxu1 %v8632_v35  ;;  %v11105_v35 = vld [vmem:[%s12359_s14 + $0x6f4] sm:$0xf]  ;;  %v3280_v31 = vadd.f32 %v3279_v39, %v3266_v21  ;;  %v3293_v41 = vpop.f32.mrf.mxu3  ;;  %v8488_v42 = vor.u32 %v11081_v14, %v8485_v33  ;;  %v11147_v21 = vld [vmem:[%s12359_s14 + $0x844] sm:$0xf]  ;;  %v8560_v14 = vor.u32 %v11099_v0, %v8557_v1  ;;  %v11258_v0 = vld [vmem:[%s12359_s14 + $0xbbc] sm:$0xf] }
 0x138   : > { %3551 = vmatpush.bf16.msra.mxu2 %v8728_v38  ;;  %v8788_v38 = vor.u32 %v11156_v26, %v8785_v28  ;;  %v11216_v26 = vld [vmem:[%s12359_s14 + $0xa6c] sm:$0xf]  ;;  %v8752_v39 = vor.u32 %v11147_v21, %v8749_v24  ;;  %v9193_v1 = vld [vmem:[%s12359_s14 + $0xbc4] sm:$0xf0]  ;;  %v11183_v21 = vld [vmem:[%s12359_s14 + $0x964] sm:$0xf] }
 0x139   : > { %3565 = vmatpush.bf16.msra.mxu3 %v8824_v27  ;;  %v8677_v27 = vld [vmem:[%s12359_s14 + $0x7bc] sm:$0xf0]  ;;  %v8893_v24 = vld [vmem:[%s12359_s14 + $0x96c] sm:$0xf0] }
 0x13a   : > { %3524 = vmatpush.bf16.msra.mxu0 %v8524_v43  ;;  %v12960_v43 = vadd.f32 %v3293_v41, %v3280_v31  ;;  %v11189_v31 = vld [vmem:[%s12359_s14 + $0x994] sm:$0xf] }
 0x13b   : > { %3538 = vmatpush.bf16.msra.mxu1 %v8620_v46  ;;  %v8584_v46 = vor.u32 %v11105_v35, %v8581_v2  ;;  %v11264_v35 = vld [vmem:[%s12359_s14 + $0xbec] sm:$0xf]  ;;  %v8932_v2 = vor.u32 %v11192_v25, %v8929_v37  ;;  %v11207_v25 = vld [vmem:[%s12359_s14 + $0xa24] sm:$0xf] }
 0x13c   : > { %3552 = vmatpush.bf16.msra.mxu2 %v8716_v47  ;;  %v8680_v47 = vor.u32 %v11129_v23, %v8677_v27 }
 0x13d   : > { %3566 = vmatpush.bf16.msra.mxu3 %v8812_v51  ;;  %v8776_v51 = vor.u32 %v11153_v36, %v8773_v40  ;;  %v8917_v36 = vld [vmem:[%s12359_s14 + $0x99c] sm:$0xf0]  ;;  %v11213_v40 = vld [vmem:[%s12359_s14 + $0xa54] sm:$0xf] }
 0x13e   : > { %3525 = vmatpush.bf16.msra.mxu0 %v8512_v61  ;;  %v8461_v61 = vld [vmem:[%s12359_s14 + $0x60c] sm:$0xf0]  ;;  %v13013_v37 = vpop.f32.mrf.mxu2 }
 0x13f   : > { %3539 = vmatpush.bf16.msra.mxu1 %v8608_v62  ;;  %v8572_v62 = vor.u32 %v11102_v50, %v8569_v54  ;;  %v8464_v28 = vor.u32 %v11075_v60, %v8461_v61  ;;  %v9205_v50 = vld [vmem:[%s12359_s14 + $0xbdc] sm:$0xf0]  ;;  %v8920_v54 = vor.u32 %v11189_v31, %v8917_v36  ;;  %v9001_v61 = vld [vmem:[%s12359_s14 + $0xa44] sm:$0xf0]  ;;  %v11180_v31 = vld [vmem:[%s12359_s14 + $0x94c] sm:$0xf] }
 0x140   : > { %3553 = vmatpush.bf16.msra.mxu2 %v8704_v63  ;;  %v8668_v63 = vor.u32 %v11126_v55, %v8665_v56  ;;  %v9208_v60 = vor.u32 %v11261_v49, %v9205_v50  ;;  %v8881_v36 = vld [vmem:[%s12359_s14 + $0x954] sm:$0xf0]  ;;  %v11252_v49 = vld [vmem:[%s12359_s14 + $0xb8c] sm:$0xf] }
 0x141   : > { %3567 = vmatpush.bf16.msra.mxu3 %v8800_v3  ;;  %v8653_v3 = vld [vmem:[%s12359_s14 + $0x78c] sm:$0xf0]  ;;  %v9169_v50 = vld [vmem:[%s12359_s14 + $0xb94] sm:$0xf0] }
 0x142   : > { %3526 = vmatpush.bf16.msra.mxu0 %v8500_v11  ;;  %v9025_v11 = vld [vmem:[%s12359_s14 + $0xa74] sm:$0xf0]  ;;  %v8656_v33 = vor.u32 %v11123_v9, %v8653_v3  ;;  %v8908_v9 = vor.u32 %v11186_v57, %v8905_v58  ;;  %v11177_v57 = vld [vmem:[%s12359_s14 + $0x934] sm:$0xf]  ;;  %v8869_v58 = vld [vmem:[%s12359_s14 + $0x93c] sm:$0xf0] }
 0x143   : > { %3540 = vmatpush.bf16.msra.mxu1 %v8596_v12  ;;  %v11240_v12 = vld [vmem:[%s12359_s14 + $0xb2c] sm:$0xf]  ;;  %v9028_v23 = vor.u32 %v11216_v26, %v9025_v11  ;;  %v9196_v26 = vor.u32 %v11258_v0, %v9193_v1  ;;  %v11231_v11 = vld [vmem:[%s12359_s14 + $0xae4] sm:$0xf]  ;;  %v9061_v0 = vld [vmem:[%s12359_s14 + $0xabc] sm:$0xf0] }
 0x144   : > { %3554 = vmatpush.bf16.msra.mxu2 %v8692_v29  ;;  %v9121_v29 = vld [vmem:[%s12359_s14 + $0xb34] sm:$0xf0] }
 0x145   : > { %3568 = vmatpush.bf16.msra.mxu3 %v8788_v38  ;;  %v9217_v38 = vld [vmem:[%s12359_s14 + $0xbf4] sm:$0xf0]  ;;  %v9124_v27 = vor.u32 %v11240_v12, %v9121_v29  ;;  %v9085_v12 = vld [vmem:[%s12359_s14 + $0xaec] sm:$0xf0]  ;;  %v13018_v29 = vpop.f32.mrf.mxu3 }
 0x146   : > { %3527 = vmatpush.bf16.msra.mxu0 %v8488_v42  ;;  %v9220_v41 = vor.u32 %v11264_v35, %v9217_v38  ;;  %v9013_v42 = vld [vmem:[%s12359_s14 + $0xa5c] sm:$0xf0]  ;;  %v9181_v35 = vld [vmem:[%s12359_s14 + $0xbac] sm:$0xf0] }
 0x147   : > { %3541 = vmatpush.bf16.msra.mxu1 %v8584_v46  ;;  %v11237_v46 = vld [vmem:[%s12359_s14 + $0xb14] sm:$0xf]  ;;  %v9016_v55 = vor.u32 %v11213_v40, %v9013_v42  ;;  %v11204_v40 = vld [vmem:[%s12359_s14 + $0xa0c] sm:$0xf] }
 0x148   : > { %3555 = vmatpush.bf16.msra.mxu2 %v8680_v47  ;;  %v9109_v47 = vld [vmem:[%s12359_s14 + $0xb1c] sm:$0xf0] }
 0x149   : > { %3569 = vmatpush.bf16.msra.mxu3 %v8776_v51  ;;  %v12996_v51 = vpop.f32.mrf.mxu1  ;;  %v9112_v56 = vor.u32 %v11237_v46, %v9109_v47  ;;  %v8977_v46 = vld [vmem:[%s12359_s14 + $0xa14] sm:$0xf0]  ;;  %v11228_v47 = vld [vmem:[%s12359_s14 + $0xacc] sm:$0xf] }
 0x14a   : > { %3528 = vmatpush.bf16.msra.mxu0 %v8476_v59  ;;  %v11210_v59 = vld [vmem:[%s12359_s14 + $0xa3c] sm:$0xf] }
 0x14b   : > { %3542 = vmatpush.bf16.msra.mxu1 %v8572_v62  ;;  %v11234_v62 = vld [vmem:[%s12359_s14 + $0xafc] sm:$0xf] }
 0x14c   : > { %3556 = vmatpush.bf16.msra.mxu2 %v8668_v63  ;;  %v9097_v63 = vld [vmem:[%s12359_s14 + $0xb04] sm:$0xf0] }
 0x14d   : > { %3570 = vmatpush.bf16.msra.mxu3 %v8764_v10  ;;  %v9004_v10 = vor.u32 %v11210_v59, %v9001_v61  ;;  %v9100_v3 = vor.u32 %v11234_v62, %v9097_v63  ;;  %v11201_v59 = vld [vmem:[%s12359_s14 + $0x9f4] sm:$0xf]  ;;  %v8965_v62 = vld [vmem:[%s12359_s14 + $0x9fc] sm:$0xf0] }
 0x14e   : > { %3529 = vmatpush.bf16.msra.mxu0 %v8464_v28  ;;  %v8989_v28 = vld [vmem:[%s12359_s14 + $0xa2c] sm:$0xf0]  ;;  %v11225_v63 = vld [vmem:[%s12359_s14 + $0xab4] sm:$0xf] }
 0x14f   : > { %3543 = vmatpush.bf16.msra.mxu1 %v8560_v14  ;;  %v3307_v14 = vpop.f32.mrf.mxu0 }
 0x150   : > { %3557 = vmatpush.bf16.msra.mxu2 %v8656_v33  ;;  %v11255_v33 = vld [vmem:[%s12359_s14 + $0xba4] sm:$0xf]  ;;  %v3308_v38 = vadd.f32 %v3307_v14, %v12960_v43  ;;  %v9073_v43 = vld [vmem:[%s12359_s14 + $0xad4] sm:$0xf0] }
 0x151   : > { %3571 = vmatpush.bf16.msra.mxu3 %v8752_v39  ;;  %3530 = vmatmul.bf16.vlgmr.msra.gmra.mxu0 %v12688_v5  ;;  %v8896_v39 = vor.u32 %v11183_v21, %v8893_v24  ;;  %v8872_v21 = vor.u32 %v11177_v57, %v8869_v58  ;;  %v10930_v58 = vld [vmem:[%s12359_s14 + $0x178] sm:$0xf0] }
 0x152   : > { %3578 = vmatpush.bf16.msrb.mxu0 %v8932_v2  ;;  %3544 = vmatmul.bf16.vlgmr.msra.gmra.mxu1 %v12695_v15  ;;  %v3321_v2 = vpop.f32.mrf.mxu1 }
 0x153   : > { %3592 = vmatpush.bf16.msrb.mxu1 %v9028_v23  ;;  %3558 = vmatmul.bf16.vlgmr.msra.gmra.mxu2 %v12693_v13  ;;  %v8992_v23 = vor.u32 %v11207_v25, %v8989_v28  ;;  %v3322_v42 = vadd.f32 %v3321_v2, %v3308_v38  ;;  %v8968_v25 = vor.u32 %v11201_v59, %v8965_v62  ;;  %v11174_v28 = vld [vmem:[%s12359_s14 + $0x91c] sm:$0xf]  ;;  %v9049_v38 = vld [vmem:[%s12359_s14 + $0xaa4] sm:$0xf0]  ;;  %v7975_v59 = vld [vmem:[%s12359_s14 + $0x230] sm:$0xf] }
 0x154   : > { %3606 = vmatpush.bf16.msrb.mxu2 %v9124_v27  ;;  %3572 = vmatmul.bf16.vlgmr.msra.gmra.mxu3 %v12699_v17  ;;  %v9088_v27 = vor.u32 %v11231_v11, %v9085_v12  ;;  %v8857_v11 = vld [vmem:[%s12359_s14 + $0x924] sm:$0xf0]  ;;  %v11198_v12 = vld [vmem:[%s12359_s14 + $0x9dc] sm:$0xf] }
 0x155   : > { %3620 = vmatpush.bf16.msrb.mxu3 %v9220_v41  ;;  %v9184_v41 = vor.u32 %v11255_v33, %v9181_v35  ;;  %v8953_v33 = vld [vmem:[%s12359_s14 + $0x9e4] sm:$0xf0]  ;;  %v11222_v35 = vld [vmem:[%s12359_s14 + $0xa9c] sm:$0xf] }
 0x156   : > { %3579 = vmatpush.bf16.msrb.mxu0 %v8920_v54  ;;  %v8884_v54 = vor.u32 %v11180_v31, %v8881_v36  ;;  %v3335_v61 = vpop.f32.mrf.mxu2  ;;  %v9145_v2 = vld [vmem:[%s12359_s14 + $0xb64] sm:$0xf0]  ;;  %v8845_v31 = vld [vmem:[%s12359_s14 + $0x90c] sm:$0xf0]  ;;  %v8956_v36 = vor.u32 %v11198_v12, %v8953_v33  ;;  %v7963_v12 = vld [vmem:[%s12359_s14 + $0x218] sm:$0xf] }
 0x157   : > { %3593 = vmatpush.bf16.msrb.mxu1 %v9016_v55  ;;  %v8980_v55 = vor.u32 %v11204_v40, %v8977_v46  ;;  %v3336_v1 = vadd.f32 %v3335_v61, %v3322_v42  ;;  %v9052_v40 = vor.u32 %v11222_v35, %v9049_v38  ;;  %v8941_v42 = vld [vmem:[%s12359_s14 + $0x9cc] sm:$0xf0]  ;;  %v11219_v46 = vld [vmem:[%s12359_s14 + $0xa84] sm:$0xf]  ;;  %v13071_v33 = vpop.f32.mrf.mxu0  ;;  %v8059_v35 = vld [vmem:[%s12359_s14 + $0x2d8] sm:$0xf] }
 0x158   : > { %3607 = vmatpush.bf16.msrb.mxu2 %v9112_v56  ;;  %v9076_v56 = vor.u32 %v11228_v47, %v9073_v43  ;;  %v9037_v43 = vld [vmem:[%s12359_s14 + $0xa8c] sm:$0xf0]  ;;  %v10975_v38 = vld [vmem:[%s12359_s14 + $0x2e0] sm:$0xf0] }
 0x159   : > { %3621 = vmatpush.bf16.msrb.mxu3 %v9208_v60  ;;  %v9172_v60 = vor.u32 %v11252_v49, %v9169_v50  ;;  %v11243_v49 = vld [vmem:[%s12359_s14 + $0xb44] sm:$0xf]  ;;  %v9133_v50 = vld [vmem:[%s12359_s14 + $0xb4c] sm:$0xf0]  ;;  %v9040_v62 = vor.u32 %v11219_v46, %v9037_v43  ;;  %v7951_v46 = vld [vmem:[%s12359_s14 + $0x200] sm:$0xf] }
 0x15a   : > { %3580 = vmatpush.bf16.msrb.mxu0 %v8908_v9  ;;  %v3349_v9 = vpop.f32.mrf.mxu3  ;;  %v8047_v43 = vld [vmem:[%s12359_s14 + $0x2c0] sm:$0xf] }
 0x15b   : > { %3594 = vmatpush.bf16.msrb.mxu1 %v9004_v10  ;;  %v11249_v10 = vld [vmem:[%s12359_s14 + $0xb74] sm:$0xf]  ;;  %v13039_v24 = vadd.f32 %v3349_v9, %v3336_v1  ;;  %v9136_v1 = vor.u32 %v11243_v49, %v9133_v50  ;;  %v10972_v49 = vld [vmem:[%s12359_s14 + $0x2c8] sm:$0xf0] }
 0x15c   : > { %3608 = vmatpush.bf16.msrb.mxu2 %v9100_v3  ;;  %v9157_v3 = vld [vmem:[%s12359_s14 + $0xb7c] sm:$0xf0] }
 0x15d   : > { %3622 = vmatpush.bf16.msrb.mxu3 %v9196_v26  ;;  %v9064_v26 = vor.u32 %v11225_v63, %v9061_v0  ;;  %v9160_v14 = vor.u32 %v11249_v10, %v9157_v3  ;;  %v8071_v63 = vld [vmem:[%s12359_s14 + $0x2f0] sm:$0xf]  ;;  %v10978_v0 = vld [vmem:[%s12359_s14 + $0x2f8] sm:$0xf0] }
 0x15e   : > { %3581 = vmatpush.bf16.msrb.mxu0 %v8896_v39  ;;  %v11246_v39 = vld [vmem:[%s12359_s14 + $0xb5c] sm:$0xf] }
 0x15f   : > { %3595 = vmatpush.bf16.msrb.mxu1 %v8992_v23  ;;  %v8860_v23 = vor.u32 %v11174_v28, %v8857_v11  ;;  %v9148_v47 = vor.u32 %v11246_v39, %v9145_v2  ;;  %v8072_v28 = vor.u32 %v10978_v0, %v8071_v63  ;;  %v10927_v11 = vld [vmem:[%s12359_s14 + $0x160] sm:$0xf0]  ;;  %v13075_v39 = vpop.f32.mrf.mxu1  ;;  %v10945_v63 = vld [vmem:[%s12359_s14 + $0x1f0] sm:$0xf0] }
 0x160   : > { %3609 = vmatpush.bf16.msrb.mxu2 %v9088_v27  ;;  %v11171_v27 = vld [vmem:[%s12359_s14 + $0x904] sm:$0xf] }
 0x161   : > { %3623 = vmatpush.bf16.msrb.mxu3 %v9184_v41  ;;  %v11195_v41 = vld [vmem:[%s12359_s14 + $0x9c4] sm:$0xf]  ;;  %v8848_v57 = vor.u32 %v11171_v27, %v8845_v31  ;;  %v7759_v31 = vld [vmem:[%s12359_s14 + $0x80] sm:$0xf] }
 0x162   : > { %3582 = vmatpush.bf16.msrb.mxu0 %v8884_v54  ;;  %v7783_v54 = vld [vmem:[%s12359_s14 + $0xb0] sm:$0xf]  ;;  %v8944_v61 = vor.u32 %v11195_v41, %v8941_v42  ;;  %v8060_v41 = vor.u32 %v10975_v38, %v8059_v35  ;;  %v10924_v42 = vld [vmem:[%s12359_s14 + $0x148] sm:$0xf0]  ;;  %v13097_v0 = vpop.f32.mrf.mxu3 }
 0x163   : > { %3596 = vmatpush.bf16.msrb.mxu1 %v8980_v55  ;;  %v10906_v55 = vld [vmem:[%s12359_s14 + $0xb8] sm:$0xf0] }
 0x164   : > { %3610 = vmatpush.bf16.msrb.mxu2 %v9076_v56  ;;  %v7879_v56 = vld [vmem:[%s12359_s14 + $0x170] sm:$0xf]  ;;  %v7784_v9 = vor.u32 %v10906_v55, %v7783_v54 }
 0x165   : > { %3624 = vmatpush.bf16.msrb.mxu3 %v9172_v60  ;;  %v10954_v60 = vld [vmem:[%s12359_s14 + $0x238] sm:$0xf0]  ;;  %v7880_v10 = vor.u32 %v10930_v58, %v7879_v56  ;;  %v7747_v56 = vld [vmem:[%s12359_s14 + $0x68] sm:$0xf] }
 0x166   : > { %3583 = vmatpush.bf16.msrb.mxu0 %v8872_v21  ;;  %v7976_v3 = vor.u32 %v10954_v60, %v7975_v59  ;;  %v7771_v21 = vld [vmem:[%s12359_s14 + $0x98] sm:$0xf]  ;;  %v7843_v58 = vld [vmem:[%s12359_s14 + $0x128] sm:$0xf]  ;;  %v13092_v59 = vpop.f32.mrf.mxu2  ;;  %v8048_v60 = vor.u32 %v10972_v49, %v8047_v43 }
 0x167   : > { %3597 = vmatpush.bf16.msrb.mxu1 %v8968_v25  ;;  %v10903_v25 = vld [vmem:[%s12359_s14 + $0xa0] sm:$0xf0] }
 0x168   : > { %3611 = vmatpush.bf16.msrb.mxu2 %v9064_v26  ;;  %v7867_v26 = vld [vmem:[%s12359_s14 + $0x158] sm:$0xf]  ;;  %v7772_v2 = vor.u32 %v10903_v25, %v7771_v21 }
 0x169   : > { %3625 = vmatpush.bf16.msrb.mxu3 %v9160_v14  ;;  %v10951_v14 = vld [vmem:[%s12359_s14 + $0x220] sm:$0xf0] }
 0x16a   : > { %3584 = vmatpush.bf16.msrb.mxu0 %v8860_v23  ;;  %v7868_v23 = vor.u32 %v10927_v11, %v7867_v26  ;;  %v7964_v27 = vor.u32 %v10951_v14, %v7963_v12  ;;  %v7735_v11 = vld [vmem:[%s12359_s14 + $0x50] sm:$0xf]  ;;  %v10894_v12 = vld [vmem:[%s12359_s14 + $0x58] sm:$0xf0] }
 0x16b   : > { %3598 = vmatpush.bf16.msrb.mxu1 %v8956_v36  ;;  %v10900_v36 = vld [vmem:[%s12359_s14 + $0x88] sm:$0xf0]  ;;  %v7831_v14 = vld [vmem:[%s12359_s14 + $0x110] sm:$0xf] }
 0x16c   : > { %3612 = vmatpush.bf16.msrb.mxu2 %v9052_v40  ;;  %v7855_v40 = vld [vmem:[%s12359_s14 + $0x140] sm:$0xf]  ;;  %v7760_v50 = vor.u32 %v10900_v36, %v7759_v31  ;;  %v10966_v31 = vld [vmem:[%s12359_s14 + $0x298] sm:$0xf0]  ;;  %v7736_v36 = vor.u32 %v10894_v12, %v7735_v11  ;;  %v10960_v12 = vld [vmem:[%s12359_s14 + $0x268] sm:$0xf0] }
 0x16d   : > { %3626 = vmatpush.bf16.msrb.mxu3 %v9148_v47  ;;  %v10948_v47 = vld [vmem:[%s12359_s14 + $0x208] sm:$0xf0]  ;;  %v7856_v54 = vor.u32 %v10924_v42, %v7855_v40  ;;  %v7723_v42 = vld [vmem:[%s12359_s14 + $0x38] sm:$0xf]  ;;  %v7999_v11 = vld [vmem:[%s12359_s14 + $0x260] sm:$0xf] }
 0x16e   : > { %3585 = vmatpush.bf16.msrb.mxu0 %v8848_v57  ;;  %v7952_v55 = vor.u32 %v10948_v47, %v7951_v46  ;;  %v10897_v57 = vld [vmem:[%s12359_s14 + $0x70] sm:$0xf0]  ;;  %v10891_v46 = vld [vmem:[%s12359_s14 + $0x40] sm:$0xf0]  ;;  %v7819_v47 = vld [vmem:[%s12359_s14 + $0xf8] sm:$0xf] }
 0x16f   : > { %3599 = vmatpush.bf16.msrb.mxu1 %v8944_v61  ;;  %v10921_v61 = vld [vmem:[%s12359_s14 + $0x130] sm:$0xf0]  ;;  %v7748_v21 = vor.u32 %v10897_v57, %v7747_v56  ;;  %v3377_v25 = vpop.f32.mrf.mxu1 }
 0x170   : > { %3613 = vmatpush.bf16.msrb.mxu2 %v9040_v62  ;;  %v7939_v62 = vld [vmem:[%s12359_s14 + $0x1e8] sm:$0xf]  ;;  %v7844_v26 = vor.u32 %v10921_v61, %v7843_v58  ;;  %v8011_v58 = vld [vmem:[%s12359_s14 + $0x278] sm:$0xf]  ;;  %v7724_v61 = vor.u32 %v10891_v46, %v7723_v42  ;;  %v10957_v42 = vld [vmem:[%s12359_s14 + $0x250] sm:$0xf0] }
 0x171   : > { %3627 = vmatpush.bf16.msrb.mxu3 %v9136_v1  ;;  %3586 = vmatmul.bf16.vlgmr.msrb.gmra.mxu0 %v12764_v6  ;;  %v3363_v1 = vpop.f32.mrf.mxu0  ;;  %v8167_v46 = vld [vmem:[%s12359_s14 + $0x3b0] sm:$0xf] }
 0x172   : > { %3634 = vmatpush.bf16.msra.mxu0 %v7784_v9  ;;  %3600 = vmatmul.bf16.vlgmr.msrb.gmra.mxu1 %v12771_v18  ;;  %v8035_v9 = vld [vmem:[%s12359_s14 + $0x2a8] sm:$0xf] }
 0x173   : > { %3648 = vmatpush.bf16.msra.mxu1 %v7880_v10  ;;  %3614 = vmatmul.bf16.vlgmr.msrb.gmra.mxu2 %v12769_v16  ;;  %v10969_v10 = vld [vmem:[%s12359_s14 + $0x2b0] sm:$0xf0] }
 0x174   : > { %3662 = vmatpush.bf16.msra.mxu2 %v7976_v3  ;;  %3628 = vmatmul.bf16.vlgmr.msrb.gmra.mxu3 %v12775_v8  ;;  %v3364_v3 = vadd.f32 %v3363_v1, %v13039_v24  ;;  %v8036_v35 = vor.u32 %v10969_v10, %v8035_v9  ;;  %v10942_v24 = vld [vmem:[%s12359_s14 + $0x1d8] sm:$0xf0]  ;;  %v7711_v9 = vld [vmem:[%s12359_s14 + $0x20] sm:$0xf]  ;;  %v10888_v10 = vld [vmem:[%s12359_s14 + $0x28] sm:$0xf0] }
 0x175   : > { %3676 = vmatpush.bf16.msra.mxu3 %v8072_v28  ;;  %v7940_v28 = vor.u32 %v10945_v63, %v7939_v62 }
 0x176   : > { %3635 = vmatpush.bf16.msra.mxu0 %v7772_v2  ;;  %v3378_v38 = vadd.f32 %v3377_v25, %v3364_v3  ;;  %v10918_v2 = vld [vmem:[%s12359_s14 + $0x118] sm:$0xf0]  ;;  %v3391_v49 = vpop.f32.mrf.mxu2  ;;  %v7807_v3 = vld [vmem:[%s12359_s14 + $0xe0] sm:$0xf]  ;;  %v10912_v25 = vld [vmem:[%s12359_s14 + $0xe8] sm:$0xf0] }
 0x177   : > { %3649 = vmatpush.bf16.msra.mxu1 %v7868_v23  ;;  %v7927_v23 = vld [vmem:[%s12359_s14 + $0x1d0] sm:$0xf]  ;;  %v7832_v40 = vor.u32 %v10918_v2, %v7831_v14  ;;  %v3405_v57 = vpop.f32.mrf.mxu3  ;;  %v7712_v14 = vor.u32 %v10888_v10, %v7711_v9  ;;  %v7808_v2 = vor.u32 %v10912_v25, %v7807_v3  ;;  %v8155_v10 = vld [vmem:[%s12359_s14 + $0x398] sm:$0xf]  ;;  %v10999_v3 = vld [vmem:[%s12359_s14 + $0x3a0] sm:$0xf0] }
 0x178   : > { %3663 = vmatpush.bf16.msra.mxu2 %v7964_v27  ;;  %v8023_v27 = vld [vmem:[%s12359_s14 + $0x290] sm:$0xf]  ;;  %v3392_v56 = vadd.f32 %v3391_v49, %v3378_v38  ;;  %v10885_v38 = vld [vmem:[%s12359_s14 + $0x10] sm:$0xf0] }
 0x179   : > { %3677 = vmatpush.bf16.msra.mxu3 %v8060_v41  ;;  %v7928_v41 = vor.u32 %v10942_v24, %v7927_v23  ;;  %v8024_v43 = vor.u32 %v10966_v31, %v8023_v27  ;;  %v7795_v24 = vld [vmem:[%s12359_s14 + $0xc8] sm:$0xf]  ;;  %v10909_v27 = vld [vmem:[%s12359_s14 + $0xd0] sm:$0xf0] }
 0x17a   : > { %3636 = vmatpush.bf16.msra.mxu0 %v7760_v50  ;;  %v10915_v50 = vld [vmem:[%s12359_s14 + $0x100] sm:$0xf0]  ;;  %v13118_v62 = vadd.f32 %v3405_v57, %v3392_v56  ;;  %v7891_v31 = vld [vmem:[%s12359_s14 + $0x188] sm:$0xf]  ;;  %v7796_v56 = vor.u32 %v10909_v27, %v7795_v24  ;;  %v8143_v27 = vld [vmem:[%s12359_s14 + $0x380] sm:$0xf] }
 0x17b   : > { %3650 = vmatpush.bf16.msra.mxu1 %v7856_v54  ;;  %v7915_v54 = vld [vmem:[%s12359_s14 + $0x1b8] sm:$0xf]  ;;  %v7820_v63 = vor.u32 %v10915_v50, %v7819_v47  ;;  %v11002_v47 = vld [vmem:[%s12359_s14 + $0x3b8] sm:$0xf0] }
 0x17c   : > { %3664 = vmatpush.bf16.msra.mxu2 %v7952_v55  ;;  %v10939_v55 = vld [vmem:[%s12359_s14 + $0x1c0] sm:$0xf0]  ;;  %v11026_v50 = vld [vmem:[%s12359_s14 + $0x478] sm:$0xf0] }
 0x17d   : > { %3678 = vmatpush.bf16.msra.mxu3 %v8048_v60  ;;  %v10963_v60 = vld [vmem:[%s12359_s14 + $0x280] sm:$0xf0]  ;;  %v7916_v1 = vor.u32 %v10939_v55, %v7915_v54  ;;  %v8359_v54 = vld [vmem:[%s12359_s14 + $0x530] sm:$0xf]  ;;  %v11050_v55 = vld [vmem:[%s12359_s14 + $0x538] sm:$0xf0] }
 0x17e   : > { %3637 = vmatpush.bf16.msra.mxu0 %v7748_v21  ;;  %v8012_v21 = vor.u32 %v10963_v60, %v8011_v58  ;;  %v8455_v58 = vld [vmem:[%s12359_s14 + $0x5f0] sm:$0xf]  ;;  %v11074_v60 = vld [vmem:[%s12359_s14 + $0x5f8] sm:$0xf0]  ;;  %v8360_v9 = vor.u32 %v11050_v55, %v8359_v54  ;;  %v8131_v55 = vld [vmem:[%s12359_s14 + $0x368] sm:$0xf] }
 0x17f   : > { %3651 = vmatpush.bf16.msra.mxu1 %v7844_v26  ;;  %v7903_v26 = vld [vmem:[%s12359_s14 + $0x1a0] sm:$0xf]  ;;  %v8456_v25 = vor.u32 %v11074_v60, %v8455_v58  ;;  %v13171_v58 = vpop.f32.mrf.mxu2 }
 0x180   : > { %3665 = vmatpush.bf16.msra.mxu2 %v7940_v28  ;;  %v10936_v28 = vld [vmem:[%s12359_s14 + $0x1a8] sm:$0xf0] }
 0x181   : > { %3679 = vmatpush.bf16.msra.mxu3 %v8036_v35  ;;  %v7699_v35 = vld [vmem:[%s12359_s14 + $0x8] sm:$0xf]  ;;  %v7904_v23 = vor.u32 %v10936_v28, %v7903_v26  ;;  %v11023_v26 = vld [vmem:[%s12359_s14 + $0x460] sm:$0xf0]  ;;  %v8347_v28 = vld [vmem:[%s12359_s14 + $0x518] sm:$0xf] }
 0x182   : > { %3638 = vmatpush.bf16.msra.mxu0 %v7736_v36  ;;  %v8000_v36 = vor.u32 %v10960_v12, %v7999_v11  ;;  %v7700_v49 = vor.u32 %v10885_v38, %v7699_v35  ;;  %v11047_v11 = vld [vmem:[%s12359_s14 + $0x520] sm:$0xf0]  ;;  %v8443_v12 = vld [vmem:[%s12359_s14 + $0x5d8] sm:$0xf]  ;;  %v13152_v35 = vpop.f32.mrf.mxu0  ;;  %v13154_v38 = vpop.f32.mrf.mxu1 }
 0x183   : > { %3652 = vmatpush.bf16.msra.mxu1 %v7832_v40  ;;  %v10933_v40 = vld [vmem:[%s12359_s14 + $0x190] sm:$0xf0]  ;;  %v8348_v24 = vor.u32 %v11047_v11, %v8347_v28 }
 0x184   : > { %3666 = vmatpush.bf16.msra.mxu2 %v7928_v41  ;;  %v7987_v41 = vld [vmem:[%s12359_s14 + $0x248] sm:$0xf]  ;;  %v7892_v57 = vor.u32 %v10933_v40, %v7891_v31  ;;  %v10996_v31 = vld [vmem:[%s12359_s14 + $0x388] sm:$0xf0] }
 0x185   : > { %3680 = vmatpush.bf16.msra.mxu3 %v8024_v43  ;;  %v8263_v43 = vld [vmem:[%s12359_s14 + $0x470] sm:$0xf] }
 0x186   : > { %3639 = vmatpush.bf16.msra.mxu0 %v7724_v61  ;;  %v7988_v61 = vor.u32 %v10957_v42, %v7987_v41  ;;  %v11020_v41 = vld [vmem:[%s12359_s14 + $0x448] sm:$0xf0]  ;;  %v8335_v42 = vld [vmem:[%s12359_s14 + $0x500] sm:$0xf] }
 0x187   : > { %3653 = vmatpush.bf16.msra.mxu1 %v7820_v63  ;;  %v8168_v63 = vor.u32 %v11002_v47, %v8167_v46  ;;  %v11044_v46 = vld [vmem:[%s12359_s14 + $0x508] sm:$0xf0]  ;;  %v8431_v47 = vld [vmem:[%s12359_s14 + $0x5c0] sm:$0xf] }
 0x188   : > { %3667 = vmatpush.bf16.msra.mxu2 %v7916_v1  ;;  %v8264_v1 = vor.u32 %v11026_v50, %v8263_v43  ;;  %v11068_v43 = vld [vmem:[%s12359_s14 + $0x5c8] sm:$0xf0]  ;;  %v8336_v54 = vor.u32 %v11044_v46, %v8335_v42 }
 0x189   : > { %3681 = vmatpush.bf16.msra.mxu3 %v8012_v21  ;;  %v8251_v21 = vld [vmem:[%s12359_s14 + $0x458] sm:$0xf]  ;;  %v8432_v60 = vor.u32 %v11068_v43, %v8431_v47 }
 0x18a   : > { %3640 = vmatpush.bf16.msra.mxu0 %v7712_v14  ;;  %v11071_v14 = vld [vmem:[%s12359_s14 + $0x5e0] sm:$0xf0]  ;;  %v8107_v43 = vld [vmem:[%s12359_s14 + $0x338] sm:$0xf] }
 0x18b   : > { %3654 = vmatpush.bf16.msra.mxu1 %v7808_v2  ;;  %v8156_v2 = vor.u32 %v10999_v3, %v8155_v10  ;;  %v8444_v40 = vor.u32 %v11071_v14, %v8443_v12  ;;  %v8419_v10 = vld [vmem:[%s12359_s14 + $0x5a8] sm:$0xf]  ;;  %v11065_v3 = vld [vmem:[%s12359_s14 + $0x5b0] sm:$0xf0]  ;;  %v8119_v12 = vld [vmem:[%s12359_s14 + $0x350] sm:$0xf] }
 0x18c   : > { %3668 = vmatpush.bf16.msra.mxu2 %v7904_v23  ;;  %v8252_v23 = vor.u32 %v11023_v26, %v8251_v21  ;;  %v10990_v14 = vld [vmem:[%s12359_s14 + $0x358] sm:$0xf0] }
 0x18d   : > { %3682 = vmatpush.bf16.msra.mxu3 %v8000_v36  ;;  %v8239_v36 = vld [vmem:[%s12359_s14 + $0x440] sm:$0xf]  ;;  %v8120_v42 = vor.u32 %v10990_v14, %v8119_v12 }
 0x18e   : > { %3641 = vmatpush.bf16.msra.mxu0 %v7700_v49  ;;  %v8144_v49 = vor.u32 %v10996_v31, %v8143_v27  ;;  %v8240_v50 = vor.u32 %v11020_v41, %v8239_v36  ;;  %v11014_v27 = vld [vmem:[%s12359_s14 + $0x418] sm:$0xf0]  ;;  %v8311_v31 = vld [vmem:[%s12359_s14 + $0x4d0] sm:$0xf] }
 0x18f   : > { %3655 = vmatpush.bf16.msra.mxu1 %v7796_v56  ;;  %v10993_v56 = vld [vmem:[%s12359_s14 + $0x370] sm:$0xf0]  ;;  %v3433_v26 = vpop.f32.mrf.mxu1  ;;  %v11038_v36 = vld [vmem:[%s12359_s14 + $0x4d8] sm:$0xf0] }
 0x190   : > { %3669 = vmatpush.bf16.msra.mxu2 %v7892_v57  ;;  %v8227_v57 = vld [vmem:[%s12359_s14 + $0x428] sm:$0xf]  ;;  %v8132_v21 = vor.u32 %v10993_v56, %v8131_v55  ;;  %v11062_v41 = vld [vmem:[%s12359_s14 + $0x598] sm:$0xf0]  ;;  %v8312_v47 = vor.u32 %v11038_v36, %v8311_v31  ;;  %v11011_v55 = vld [vmem:[%s12359_s14 + $0x400] sm:$0xf0] }
 0x191   : > { %3683 = vmatpush.bf16.msra.mxu3 %v7988_v61  ;;  %3642 = vmatmul.bf16.vlgmr.msra.gmra.mxu0 %v12543_v34  ;;  %v11017_v61 = vld [vmem:[%s12359_s14 + $0x430] sm:$0xf0]  ;;  %v8299_v56 = vld [vmem:[%s12359_s14 + $0x4b8] sm:$0xf]  ;;  %v11056_v31 = vld [vmem:[%s12359_s14 + $0x568] sm:$0xf0] }
 0x192   : > { %3690 = vmatpush.bf16.msrb.mxu0 %v8168_v63  ;;  %3656 = vmatmul.bf16.vlgmr.msra.gmra.mxu1 %v12555_v45  ;;  %v8323_v63 = vld [vmem:[%s12359_s14 + $0x4e8] sm:$0xf]  ;;  %v8228_v28 = vor.u32 %v11017_v61, %v8227_v57  ;;  %v11035_v57 = vld [vmem:[%s12359_s14 + $0x4c0] sm:$0xf0]  ;;  %v8395_v61 = vld [vmem:[%s12359_s14 + $0x578] sm:$0xf] }
 0x193   : > { %3704 = vmatpush.bf16.msrb.mxu1 %v8264_v1  ;;  %3670 = vmatmul.bf16.vlgmr.msra.gmra.mxu2 %v12548_v30  ;;  %v11041_v1 = vld [vmem:[%s12359_s14 + $0x4f0] sm:$0xf0] }
 0x194   : > { %3718 = vmatpush.bf16.msrb.mxu2 %v8360_v9  ;;  %3684 = vmatmul.bf16.vlgmr.msra.gmra.mxu3 %v12560_v52  ;;  %v13176_v9 = vpop.f32.mrf.mxu3  ;;  %v8324_v11 = vor.u32 %v11041_v1, %v8323_v63  ;;  %v11059_v63 = vld [vmem:[%s12359_s14 + $0x580] sm:$0xf0] }
 0x195   : > { %3732 = vmatpush.bf16.msrb.mxu3 %v8456_v25  ;;  %v3419_v25 = vpop.f32.mrf.mxu0  ;;  %v8396_v14 = vor.u32 %v11059_v63, %v8395_v61  ;;  %v8647_v61 = vld [vmem:[%s12359_s14 + $0x770] sm:$0xf] }
 0x196   : > { %3691 = vmatpush.bf16.msrb.mxu0 %v8156_v2  ;;  %v8215_v2 = vld [vmem:[%s12359_s14 + $0x410] sm:$0xf] }
 0x197   : > { %3705 = vmatpush.bf16.msrb.mxu1 %v8252_v23  ;;  %v3434_v23 = vadd.f32 %v3433_v26, %v3419_v25  ;;  %v8216_v46 = vor.u32 %v11014_v27, %v8215_v2  ;;  %v8300_v25 = vor.u32 %v11035_v57, %v8299_v56  ;;  %v8095_v26 = vld [vmem:[%s12359_s14 + $0x320] sm:$0xf]  ;;  %v11008_v2 = vld [vmem:[%s12359_s14 + $0x3e8] sm:$0xf0]  ;;  %v11053_v56 = vld [vmem:[%s12359_s14 + $0x550] sm:$0xf0] }
 0x198   : > { %3719 = vmatpush.bf16.msrb.mxu2 %v8348_v24  ;;  %v8420_v24 = vor.u32 %v11065_v3, %v8419_v10  ;;  %v8383_v27 = vld [vmem:[%s12359_s14 + $0x560] sm:$0xf]  ;;  %v8551_v57 = vld [vmem:[%s12359_s14 + $0x6b0] sm:$0xf] }
 0x199   : > { %3733 = vmatpush.bf16.msrb.mxu3 %v8444_v40  ;;  %v8407_v40 = vld [vmem:[%s12359_s14 + $0x590] sm:$0xf] }
 0x19a   : > { %3692 = vmatpush.bf16.msrb.mxu0 %v8144_v49  ;;  %v10987_v49 = vld [vmem:[%s12359_s14 + $0x340] sm:$0xf0] }
 0x19b   : > { %3706 = vmatpush.bf16.msrb.mxu1 %v8240_v50  ;;  %v8203_v50 = vld [vmem:[%s12359_s14 + $0x3f8] sm:$0xf]  ;;  %v8108_v10 = vor.u32 %v10987_v49, %v8107_v43  ;;  %v11005_v43 = vld [vmem:[%s12359_s14 + $0x3d0] sm:$0xf0]  ;;  %v8275_v49 = vld [vmem:[%s12359_s14 + $0x488] sm:$0xf] }
 0x19c   : > { %3720 = vmatpush.bf16.msrb.mxu2 %v8336_v54  ;;  %v8408_v54 = vor.u32 %v11062_v41, %v8407_v40  ;;  %v3461_v3 = vpop.f32.mrf.mxu3  ;;  %v8083_v40 = vld [vmem:[%s12359_s14 + $0x308] sm:$0xf]  ;;  %v10981_v41 = vld [vmem:[%s12359_s14 + $0x310] sm:$0xf0] }
 0x19d   : > { %3734 = vmatpush.bf16.msrb.mxu3 %v8432_v60  ;;  %v3447_v60 = vpop.f32.mrf.mxu2  ;;  %v8084_v63 = vor.u32 %v10981_v41, %v8083_v40  ;;  %v11119_v41 = vld [vmem:[%s12359_s14 + $0x760] sm:$0xf0] }
 0x19e   : > { %3693 = vmatpush.bf16.msrb.mxu0 %v8132_v21  ;;  %v3448_v1 = vadd.f32 %v3447_v60, %v3434_v23  ;;  %v8204_v21 = vor.u32 %v11011_v55, %v8203_v50  ;;  %v8287_v23 = vld [vmem:[%s12359_s14 + $0x4a0] sm:$0xf]  ;;  %v8384_v50 = vor.u32 %v11056_v31, %v8383_v27  ;;  %v8371_v55 = vld [vmem:[%s12359_s14 + $0x548] sm:$0xf]  ;;  %v11098_v60 = vld [vmem:[%s12359_s14 + $0x6b8] sm:$0xf0] }
 0x19f   : > { %3707 = vmatpush.bf16.msrb.mxu1 %v8228_v28  ;;  %v10984_v28 = vld [vmem:[%s12359_s14 + $0x328] sm:$0xf0]  ;;  %v8539_v27 = vld [vmem:[%s12359_s14 + $0x698] sm:$0xf]  ;;  %v11095_v31 = vld [vmem:[%s12359_s14 + $0x6a0] sm:$0xf0] }
 0x1a0   : > { %3721 = vmatpush.bf16.msrb.mxu2 %v8324_v11  ;;  %v8191_v11 = vld [vmem:[%s12359_s14 + $0x3e0] sm:$0xf]  ;;  %v13199_v12 = vadd.f32 %v3461_v3, %v3448_v1  ;;  %v8096_v36 = vor.u32 %v10984_v28, %v8095_v26  ;;  %v11122_v1 = vld [vmem:[%s12359_s14 + $0x778] sm:$0xf0]  ;;  %v8839_v26 = vld [vmem:[%s12359_s14 + $0x8f0] sm:$0xf] }
 0x1a1   : > { %3735 = vmatpush.bf16.msrb.mxu3 %v8420_v24  ;;  %v11032_v24 = vld [vmem:[%s12359_s14 + $0x4a8] sm:$0xf0]  ;;  %v11146_v3 = vld [vmem:[%s12359_s14 + $0x838] sm:$0xf0] }
 0x1a2   : > { %3694 = vmatpush.bf16.msrb.mxu0 %v8120_v42  ;;  %v8192_v42 = vor.u32 %v11008_v2, %v8191_v11  ;;  %v11170_v28 = vld [vmem:[%s12359_s14 + $0x8f8] sm:$0xf0]  ;;  %v8372_v11 = vor.u32 %v11053_v56, %v8371_v55  ;;  %v8648_v2 = vor.u32 %v11122_v1, %v8647_v61  ;;  %v8527_v56 = vld [vmem:[%s12359_s14 + $0x680] sm:$0xf] }
 0x1a3   : > { %3708 = vmatpush.bf16.msrb.mxu1 %v8216_v46  ;;  %v8288_v46 = vor.u32 %v11032_v24, %v8287_v23  ;;  %v13222_v24 = vpop.f32.mrf.mxu0  ;;  %v8840_v40 = vor.u32 %v11170_v28, %v8839_v26  ;;  %v8719_v1 = vld [vmem:[%s12359_s14 + $0x800] sm:$0xf] }
 0x1a4   : > { %3722 = vmatpush.bf16.msrb.mxu2 %v8312_v47  ;;  %v8179_v47 = vld [vmem:[%s12359_s14 + $0x3c8] sm:$0xf]  ;;  %14531 = vst [vmem:[#allocation23_spill] sm:$0xff] %v13222_v24  ;;  %v10453_v24 = vld [vmem:[%s12366_s11 + $0x99c] sm:$0xf0] }
 0x1a5   : > { %3736 = vmatpush.bf16.msrb.mxu3 %v8408_v54  ;;  %v11029_v54 = vld [vmem:[%s12359_s14 + $0x490] sm:$0xf0]  ;;  %v13246_v26 = vpop.f32.mrf.mxu2 }
 0x1a6   : > { %3695 = vmatpush.bf16.msrb.mxu0 %v8108_v10  ;;  %v8743_v10 = vld [vmem:[%s12359_s14 + $0x830] sm:$0xf]  ;;  %14533 = vst [vmem:[#allocation25_spill] sm:$0xff] %v13246_v26  ;;  %v11215_v26 = vld [vmem:[%s12359_s14 + $0xa60] sm:$0xf0] }
 0x1a7   : > { %3709 = vmatpush.bf16.msrb.mxu1 %v8204_v21  ;;  %v8180_v21 = vor.u32 %v11005_v43, %v8179_v47  ;;  %v8744_v23 = vor.u32 %v11146_v3, %v8743_v10  ;;  %v8827_v47 = vld [vmem:[%s12359_s14 + $0x8d8] sm:$0xf]  ;;  %v11167_v43 = vld [vmem:[%s12359_s14 + $0x8e0] sm:$0xf0]  ;;  %v11140_v10 = vld [vmem:[%s12359_s14 + $0x808] sm:$0xf0] }
 0x1a8   : > { %3723 = vmatpush.bf16.msrb.mxu2 %v8300_v25  ;;  %v8276_v25 = vor.u32 %v11029_v54, %v8275_v49  ;;  %v13232_v49 = vpop.f32.mrf.mxu1  ;;  %v8828_v61 = vor.u32 %v11167_v43, %v8827_v47  ;;  %v8815_v3 = vld [vmem:[%s12359_s14 + $0x8c0] sm:$0xf]  ;;  %v11161_v47 = vld [vmem:[%s12359_s14 + $0x8b0] sm:$0xf0] }
 0x1a9   : > { %3737 = vmatpush.bf16.msrb.mxu3 %v8396_v14  ;;  %v8552_v14 = vor.u32 %v11098_v60, %v8551_v57  ;;  %14532 = vst [vmem:[#allocation24_spill] sm:$0xff] %v13232_v49  ;;  %v11092_v57 = vld [vmem:[%s12359_s14 + $0x688] sm:$0xf0]  ;;  %v8623_v60 = vld [vmem:[%s12359_s14 + $0x740] sm:$0xf] }
 0x1aa   : > { %3696 = vmatpush.bf16.msrb.mxu0 %v8096_v36  ;;  %v8635_v36 = vld [vmem:[%s12359_s14 + $0x758] sm:$0xf]  ;;  %v11573_v49 = vld [vmem:[%s12366_s11 + $0x994] sm:$0xf] }
 0x1ab   : > { %3710 = vmatpush.bf16.msrb.mxu1 %v8192_v42  ;;  %v8731_v42 = vld [vmem:[%s12359_s14 + $0x818] sm:$0xf]  ;;  %v8636_v54 = vor.u32 %v11119_v41, %v8635_v36  ;;  %v11113_v36 = vld [vmem:[%s12359_s14 + $0x730] sm:$0xf0] }
 0x1ac   : > { %3724 = vmatpush.bf16.msrb.mxu2 %v8288_v46  ;;  %v11143_v46 = vld [vmem:[%s12359_s14 + $0x820] sm:$0xf0]  ;;  %v11137_v41 = vld [vmem:[%s12359_s14 + $0x7f0] sm:$0xf0] }
 0x1ad   : > { %3738 = vmatpush.bf16.msrb.mxu3 %v8384_v50  ;;  %v8540_v50 = vor.u32 %v11095_v31, %v8539_v27  ;;  %v8732_v55 = vor.u32 %v11143_v46, %v8731_v42  ;;  %v13251_v31 = vpop.f32.mrf.mxu3  ;;  %v8803_v46 = vld [vmem:[%s12359_s14 + $0x8a8] sm:$0xf] }
 0x1ae   : > { %3697 = vmatpush.bf16.msrb.mxu0 %v8084_v63  ;;  %v11116_v63 = vld [vmem:[%s12359_s14 + $0x748] sm:$0xf0]  ;;  %14534 = vst [vmem:[#allocation26_spill] sm:$0xff] %v13251_v31  ;;  %v3475_v42 = vpop.f32.mrf.mxu0  ;;  %v9019_v31 = vld [vmem:[%s12359_s14 + $0xa58] sm:$0xf] }
 0x1af   : > { %3711 = vmatpush.bf16.msrb.mxu1 %v8180_v21  ;;  %v11164_v21 = vld [vmem:[%s12359_s14 + $0x8c8] sm:$0xf0]  ;;  %v8624_v28 = vor.u32 %v11116_v63, %v8623_v60  ;;  %v3476_v43 = vadd.f32 %v3475_v42, %v13199_v12  ;;  %v11086_v60 = vld [vmem:[%s12359_s14 + $0x658] sm:$0xf0]  ;;  %v8804_v63 = vor.u32 %v11161_v47, %v8803_v46  ;;  %v8683_v42 = vld [vmem:[%s12359_s14 + $0x7b8] sm:$0xf] }
 0x1b0   : > { %3725 = vmatpush.bf16.msrb.mxu2 %v8276_v25  ;;  %v8528_v25 = vor.u32 %v11092_v57, %v8527_v56  ;;  %v8816_v27 = vor.u32 %v11164_v21, %v8815_v3  ;;  %v3489_v56 = vpop.f32.mrf.mxu1  ;;  %v8503_v57 = vld [vmem:[%s12359_s14 + $0x650] sm:$0xf]  ;;  %v11134_v12 = vld [vmem:[%s12359_s14 + $0x7d8] sm:$0xf0]  ;;  %v11131_v46 = vld [vmem:[%s12359_s14 + $0x7c0] sm:$0xf0] }
 0x1b1   : > { %3739 = vmatpush.bf16.msrb.mxu3 %v8372_v11  ;;  %3698 = vmatmul.bf16.vlgmr.msrb.gmra.mxu0 %v12612_v4  ;;  %v8720_v11 = vor.u32 %v11140_v10, %v8719_v1  ;;  %v3490_v1 = vadd.f32 %v3489_v56, %v3476_v43  ;;  %v11110_v10 = vld [vmem:[%s12359_s14 + $0x718] sm:$0xf0]  ;;  %v8695_v3 = vld [vmem:[%s12359_s14 + $0x7d0] sm:$0xf]  ;;  %v8779_v43 = vld [vmem:[%s12359_s14 + $0x878] sm:$0xf] }
 0x1b2   : > { %3746 = vmatpush.bf16.msra.mxu0 %v8552_v14  ;;  %3712 = vmatmul.bf16.vlgmr.msrb.gmra.mxu1 %v12619_v7  ;;  %v8515_v14 = vld [vmem:[%s12359_s14 + $0x668] sm:$0xf]  ;;  %v8791_v21 = vld [vmem:[%s12359_s14 + $0x890] sm:$0xf] }
 0x1b3   : > { %3760 = vmatpush.bf16.msra.mxu1 %v8648_v2  ;;  %3726 = vmatmul.bf16.vlgmr.msrb.gmra.mxu2 %v12617_v20  ;;  %v11089_v2 = vld [vmem:[%s12359_s14 + $0x670] sm:$0xf0] }
 0x1b4   : > { %3774 = vmatpush.bf16.msra.mxu2 %v8744_v23  ;;  %3740 = vmatmul.bf16.vlgmr.msrb.gmra.mxu3 %v12623_v22  ;;  %v8611_v23 = vld [vmem:[%s12359_s14 + $0x728] sm:$0xf] }
 0x1b5   : > { %3788 = vmatpush.bf16.msra.mxu3 %v8840_v40  ;;  %v8707_v40 = vld [vmem:[%s12359_s14 + $0x7e8] sm:$0xf] }
 0x1b6   : > { %3747 = vmatpush.bf16.msra.mxu0 %v8540_v50  ;;  %v8516_v50 = vor.u32 %v11089_v2, %v8515_v14  ;;  %v8696_v14 = vor.u32 %v11134_v12, %v8695_v3  ;;  %v8491_v2 = vld [vmem:[%s12359_s14 + $0x638] sm:$0xf]  ;;  %v11104_v3 = vld [vmem:[%s12359_s14 + $0x6e8] sm:$0xf0]  ;;  %v8671_v12 = vld [vmem:[%s12359_s14 + $0x7a0] sm:$0xf] }
 0x1b7   : > { %3761 = vmatpush.bf16.msra.mxu1 %v8636_v54  ;;  %v8612_v54 = vor.u32 %v11113_v36, %v8611_v23  ;;  %v11083_v23 = vld [vmem:[%s12359_s14 + $0x640] sm:$0xf0] }
 0x1b8   : > { %3775 = vmatpush.bf16.msra.mxu2 %v8732_v55  ;;  %v8708_v55 = vor.u32 %v11137_v41, %v8707_v40  ;;  %v3503_v40 = vpop.f32.mrf.mxu2  ;;  %v11107_v41 = vld [vmem:[%s12359_s14 + $0x700] sm:$0xf0] }
 0x1b9   : > { %3789 = vmatpush.bf16.msra.mxu3 %v8828_v61  ;;  %v8599_v61 = vld [vmem:[%s12359_s14 + $0x710] sm:$0xf]  ;;  %v3504_v47 = vadd.f32 %v3503_v40, %v3490_v1  ;;  %v8575_v1 = vld [vmem:[%s12359_s14 + $0x6e0] sm:$0xf]  ;;  %v11101_v40 = vld [vmem:[%s12359_s14 + $0x6d0] sm:$0xf0] }
 0x1ba   : > { %3748 = vmatpush.bf16.msra.mxu0 %v8528_v25  ;;  %v11158_v25 = vld [vmem:[%s12359_s14 + $0x898] sm:$0xf0] }
 0x1bb   : > { %3762 = vmatpush.bf16.msra.mxu1 %v8624_v28  ;;  %v8504_v28 = vor.u32 %v11086_v60, %v8503_v57  ;;  %v8792_v36 = vor.u32 %v11158_v25, %v8791_v21  ;;  %v8684_v60 = vor.u32 %v11131_v46, %v8683_v42  ;;  %v11128_v21 = vld [vmem:[%s12359_s14 + $0x7a8] sm:$0xf0]  ;;  %v8767_v25 = vld [vmem:[%s12359_s14 + $0x860] sm:$0xf]  ;;  %v11125_v46 = vld [vmem:[%s12359_s14 + $0x790] sm:$0xf0] }
 0x1bc   : > { %3776 = vmatpush.bf16.msra.mxu2 %v8720_v11  ;;  %v8600_v11 = vor.u32 %v11110_v10, %v8599_v61  ;;  %v8479_v61 = vld [vmem:[%s12359_s14 + $0x620] sm:$0xf] }
 0x1bd   : > { %3790 = vmatpush.bf16.msra.mxu3 %v8816_v27  ;;  %v8587_v27 = vld [vmem:[%s12359_s14 + $0x6f8] sm:$0xf] }
 0x1be   : > { %3749 = vmatpush.bf16.msra.mxu0 %v8516_v50  ;;  %v11155_v50 = vld [vmem:[%s12359_s14 + $0x880] sm:$0xf0]  ;;  %v8588_v57 = vor.u32 %v11107_v41, %v8587_v27  ;;  %v8672_v27 = vor.u32 %v11128_v21, %v8671_v12  ;;  %v8659_v41 = vld [vmem:[%s12359_s14 + $0x788] sm:$0xf]  ;;  %v11266_v12 = vld [vmem:[%s12359_s14 + $0xbf8] sm:$0xf0] }
 0x1bf   : > { %3763 = vmatpush.bf16.msra.mxu1 %v8612_v54  ;;  %v3517_v54 = vpop.f32.mrf.mxu3  ;;  %v8780_v10 = vor.u32 %v11155_v50, %v8779_v43  ;;  %v11149_v43 = vld [vmem:[%s12359_s14 + $0x850] sm:$0xf0]  ;;  %v8935_v50 = vld [vmem:[%s12359_s14 + $0x9b0] sm:$0xf] }
 0x1c0   : > { %3777 = vmatpush.bf16.msra.mxu2 %v8708_v55  ;;  %v8492_v55 = vor.u32 %v11083_v23, %v8491_v2  ;;  %v13275_v56 = vadd.f32 %v3517_v54, %v3504_v47  ;;  %v11077_v2 = vld [vmem:[%s12359_s14 + $0x610] sm:$0xf0]  ;;  %v8576_v23 = vor.u32 %v11104_v3, %v8575_v1  ;;  %v8755_v47 = vld [vmem:[%s12359_s14 + $0x848] sm:$0xf]  ;;  %v11194_v54 = vld [vmem:[%s12359_s14 + $0x9b8] sm:$0xf0] }
 0x1c1   : > { %3791 = vmatpush.bf16.msra.mxu3 %v8804_v63  ;;  %v11080_v63 = vld [vmem:[%s12359_s14 + $0x628] sm:$0xf0]  ;;  %v9223_v3 = vld [vmem:[%s12359_s14 + $0xbf0] sm:$0xf]  ;;  %v8756_v21 = vor.u32 %v11149_v43, %v8755_v47  ;;  %v9020_v43 = vor.u32 %v11215_v26, %v9019_v31  ;;  %v9199_v26 = vld [vmem:[%s12359_s14 + $0xbc0] sm:$0xf] }
 0x1c2   : > { %3750 = vmatpush.bf16.msra.mxu0 %v8504_v28  ;;  %v11152_v28 = vld [vmem:[%s12359_s14 + $0x868] sm:$0xf0] }
 0x1c3   : > { %3764 = vmatpush.bf16.msra.mxu1 %v8600_v11  ;;  %v8480_v11 = vor.u32 %v11080_v63, %v8479_v61  ;;  %v8768_v42 = vor.u32 %v11152_v28, %v8767_v25  ;;  %v9127_v61 = vld [vmem:[%s12359_s14 + $0xb30] sm:$0xf]  ;;  %v11242_v63 = vld [vmem:[%s12359_s14 + $0xb38] sm:$0xf0]  ;;  %v8936_v25 = vor.u32 %v11194_v54, %v8935_v50  ;;  %v8911_v54 = vld [vmem:[%s12359_s14 + $0x980] sm:$0xf] }
 0x1c4   : > { %3778 = vmatpush.bf16.msra.mxu2 %v8696_v14  ;;  %v8467_v14 = vld [vmem:[%s12359_s14 + $0x608] sm:$0xf]  ;;  %v11260_v31 = vld [vmem:[%s12359_s14 + $0xbc8] sm:$0xf0] }
 0x1c5   : > { %3792 = vmatpush.bf16.msra.mxu3 %v8792_v36  ;;  %v8563_v36 = vld [vmem:[%s12359_s14 + $0x6c8] sm:$0xf] }
 0x1c6   : > { %3751 = vmatpush.bf16.msra.mxu0 %v8492_v55  ;;  %v9031_v55 = vld [vmem:[%s12359_s14 + $0xa70] sm:$0xf]  ;;  %v8564_v1 = vor.u32 %v11101_v40, %v8563_v36  ;;  %v11239_v36 = vld [vmem:[%s12359_s14 + $0xb20] sm:$0xf0]  ;;  %v13307_v40 = vpop.f32.mrf.mxu0 }
 0x1c7   : > { %3765 = vmatpush.bf16.msra.mxu1 %v8588_v57  ;;  %v8468_v57 = vor.u32 %v11077_v2, %v8467_v14  ;;  %v8923_v14 = vld [vmem:[%s12359_s14 + $0x998] sm:$0xf]  ;;  %v11191_v2 = vld [vmem:[%s12359_s14 + $0x9a0] sm:$0xf0]  ;;  %14535 = vst [vmem:[#allocation27_spill] sm:$0xff] %v13307_v40 }
 0x1c8   : > { %3779 = vmatpush.bf16.msra.mxu2 %v8684_v60  ;;  %v11218_v60 = vld [vmem:[%s12359_s14 + $0xa78] sm:$0xf0]  ;;  %v8924_v47 = vor.u32 %v11191_v2, %v8923_v14  ;;  %v9200_v14 = vor.u32 %v11260_v31, %v9199_v26  ;;  %v11209_v2 = vld [vmem:[%s12359_s14 + $0xa30] sm:$0xf0] }
 0x1c9   : > { %3793 = vmatpush.bf16.msra.mxu3 %v8780_v10  ;;  %v8660_v10 = vor.u32 %v11125_v46, %v8659_v41  ;;  %v9032_v28 = vor.u32 %v11218_v60, %v9031_v55  ;;  %v9211_v41 = vld [vmem:[%s12359_s14 + $0xbd8] sm:$0xf]  ;;  %v13311_v46 = vpop.f32.mrf.mxu1  ;;  %v11188_v55 = vld [vmem:[%s12359_s14 + $0x988] sm:$0xf0]  ;;  %v11206_v31 = vld [vmem:[%s12359_s14 + $0xa18] sm:$0xf0] }
 0x1ca   : > { %3752 = vmatpush.bf16.msra.mxu0 %v8480_v11  ;;  %v9128_v11 = vor.u32 %v11242_v63, %v9127_v61  ;;  %14536 = vst [vmem:[#allocation28_spill] sm:$0xff] %v13311_v46  ;;  %v11212_v61 = vld [vmem:[%s12359_s14 + $0xa48] sm:$0xf0]  ;;  %v9103_v63 = vld [vmem:[%s12359_s14 + $0xb00] sm:$0xf] }
 0x1cb   : > { %3766 = vmatpush.bf16.msra.mxu1 %v8576_v23  ;;  %v9224_v23 = vor.u32 %v11266_v12, %v9223_v3  ;;  %v9395_v46 = vld [vmem:[%s12366_s11 + $0x150] sm:$0xf]  ;;  %v11310_v40 = vld [vmem:[%s12366_s11 + $0x158] sm:$0xf0] }
 0x1cc   : > { %3780 = vmatpush.bf16.msra.mxu2 %v8672_v27  ;;  %v9115_v27 = vld [vmem:[%s12359_s14 + $0xb18] sm:$0xf] }
 0x1cd   : > { %3794 = vmatpush.bf16.msra.mxu3 %v8768_v42  ;;  %v11263_v42 = vld [vmem:[%s12359_s14 + $0xbe0] sm:$0xf0]  ;;  %v9116_v50 = vor.u32 %v11239_v36, %v9115_v27  ;;  %v11233_v27 = vld [vmem:[%s12359_s14 + $0xaf0] sm:$0xf0]  ;;  %v13333_v36 = vpop.f32.mrf.mxu3 }
 0x1ce   : > { %3753 = vmatpush.bf16.msra.mxu0 %v8468_v57  ;;  %v9007_v57 = vld [vmem:[%s12359_s14 + $0xa40] sm:$0xf]  ;;  %v9212_v60 = vor.u32 %v11263_v42, %v9211_v41  ;;  %14538 = vst [vmem:[#allocation30_spill] sm:$0xff] %v13333_v36  ;;  %v3531_v41 = vpop.f32.mrf.mxu0  ;;  %v9187_v42 = vld [vmem:[%s12359_s14 + $0xba8] sm:$0xf] }
 0x1cf   : > { %3767 = vmatpush.bf16.msra.mxu1 %v8564_v1  ;;  %v11236_v1 = vld [vmem:[%s12359_s14 + $0xb08] sm:$0xf0]  ;;  %v9008_v3 = vor.u32 %v11212_v61, %v9007_v57  ;;  %v11182_v61 = vld [vmem:[%s12359_s14 + $0x958] sm:$0xf0]  ;;  %v9299_v36 = vld [vmem:[%s12366_s11 + $0x90] sm:$0xf] }
 0x1d0   : > { %3781 = vmatpush.bf16.msra.mxu2 %v8660_v10  ;;  %v8912_v10 = vor.u32 %v11188_v55, %v8911_v54  ;;  %v9104_v12 = vor.u32 %v11236_v1, %v9103_v63  ;;  %v8983_v63 = vld [vmem:[%s12359_s14 + $0xa10] sm:$0xf] }
 0x1d1   : > { %3795 = vmatpush.bf16.msra.mxu3 %v8756_v21  ;;  %3754 = vmatmul.bf16.vlgmr.msra.gmra.mxu0 %v12688_v5  ;;  %v8899_v21 = vld [vmem:[%s12359_s14 + $0x968] sm:$0xf]  ;;  %v3545_v54 = vpop.f32.mrf.mxu1 }
 0x1d2   : > { %3802 = vmatpush.bf16.msrb.mxu0 %v8936_v25  ;;  %3768 = vmatmul.bf16.vlgmr.msra.gmra.mxu1 %v12695_v15  ;;  %v11185_v25 = vld [vmem:[%s12359_s14 + $0x970] sm:$0xf0] }
 0x1d3   : > { %3816 = vmatpush.bf16.msrb.mxu1 %v9032_v28  ;;  %3782 = vmatmul.bf16.vlgmr.msra.gmra.mxu2 %v12693_v13  ;;  %v8995_v28 = vld [vmem:[%s12359_s14 + $0xa28] sm:$0xf] }
 0x1d4   : > { %3830 = vmatpush.bf16.msrb.mxu2 %v9128_v11  ;;  %3796 = vmatmul.bf16.vlgmr.msra.gmra.mxu3 %v12699_v17  ;;  %v13328_v11 = vpop.f32.mrf.mxu2  ;;  %v8996_v55 = vor.u32 %v11209_v2, %v8995_v28  ;;  %v11179_v2 = vld [vmem:[%s12359_s14 + $0x940] sm:$0xf0] }
 0x1d5   : > { %3844 = vmatpush.bf16.msrb.mxu3 %v9224_v23  ;;  %14537 = vst [vmem:[#allocation29_spill] sm:$0xff] %v13328_v11  ;;  %v9091_v23 = vld [vmem:[%s12359_s14 + $0xae8] sm:$0xf]  ;;  %v11286_v11 = vld [vmem:[%s12366_s11 + $0x98] sm:$0xf0] }
 0x1d6   : > { %3803 = vmatpush.bf16.msrb.mxu0 %v8924_v47  ;;  %v11257_v47 = vld [vmem:[%s12359_s14 + $0xbb0] sm:$0xf0]  ;;  %v9092_v57 = vor.u32 %v11233_v27, %v9091_v23  ;;  %v8971_v23 = vld [vmem:[%s12359_s14 + $0x9f8] sm:$0xf] }
 0x1d7   : > { %3817 = vmatpush.bf16.msrb.mxu1 %v9020_v43  ;;  %v3532_v43 = vadd.f32 %v3531_v41, %v13275_v56  ;;  %v9188_v1 = vor.u32 %v11257_v47, %v9187_v42  ;;  %v11230_v56 = vld [vmem:[%s12359_s14 + $0xad8] sm:$0xf0]  ;;  %v11203_v42 = vld [vmem:[%s12359_s14 + $0xa00] sm:$0xf0]  ;;  %v9067_v47 = vld [vmem:[%s12359_s14 + $0xab8] sm:$0xf] }
 0x1d8   : > { %3831 = vmatpush.bf16.msrb.mxu2 %v9116_v50  ;;  %v8900_v50 = vor.u32 %v11185_v25, %v8899_v21  ;;  %v9175_v21 = vld [vmem:[%s12359_s14 + $0xb90] sm:$0xf]  ;;  %v8984_v25 = vor.u32 %v11206_v31, %v8983_v63  ;;  %v8972_v63 = vor.u32 %v11203_v42, %v8971_v23  ;;  %v8863_v31 = vld [vmem:[%s12359_s14 + $0x920] sm:$0xf]  ;;  %v11173_v23 = vld [vmem:[%s12359_s14 + $0x910] sm:$0xf0] }
 0x1d9   : > { %3845 = vmatpush.bf16.msrb.mxu3 %v9212_v60  ;;  %v8887_v60 = vld [vmem:[%s12359_s14 + $0x950] sm:$0xf]  ;;  %v3546_v26 = vadd.f32 %v3545_v54, %v3532_v43  ;;  %v11227_v43 = vld [vmem:[%s12359_s14 + $0xac0] sm:$0xf0]  ;;  %v3573_v54 = vpop.f32.mrf.mxu3  ;;  %v8947_v42 = vld [vmem:[%s12359_s14 + $0x9c8] sm:$0xf] }
 0x1da   : > { %3804 = vmatpush.bf16.msrb.mxu0 %v8912_v10  ;;  %v9079_v10 = vld [vmem:[%s12359_s14 + $0xad0] sm:$0xf] }
 0x1db   : > { %3818 = vmatpush.bf16.msrb.mxu1 %v9008_v3  ;;  %v11254_v3 = vld [vmem:[%s12359_s14 + $0xb98] sm:$0xf0]  ;;  %v9080_v28 = vor.u32 %v11230_v56, %v9079_v10  ;;  %v8959_v10 = vld [vmem:[%s12359_s14 + $0x9e0] sm:$0xf] }
 0x1dc   : > { %3832 = vmatpush.bf16.msrb.mxu2 %v9104_v12  ;;  %v8888_v12 = vor.u32 %v11182_v61, %v8887_v60  ;;  %v9176_v27 = vor.u32 %v11254_v3, %v9175_v21  ;;  %v3559_v41 = vpop.f32.mrf.mxu2  ;;  %v11200_v21 = vld [vmem:[%s12359_s14 + $0x9e8] sm:$0xf0]  ;;  %v9055_v3 = vld [vmem:[%s12359_s14 + $0xaa0] sm:$0xf] }
 0x1dd   : > { %3846 = vmatpush.bf16.msrb.mxu3 %v9200_v14  ;;  %v8875_v14 = vld [vmem:[%s12359_s14 + $0x938] sm:$0xf] }
 0x1de   : > { %3805 = vmatpush.bf16.msrb.mxu0 %v8900_v50  ;;  %v3560_v50 = vadd.f32 %v3559_v41, %v3546_v26  ;;  %v8876_v60 = vor.u32 %v11179_v2, %v8875_v14  ;;  %v11176_v26 = vld [vmem:[%s12359_s14 + $0x928] sm:$0xf0]  ;;  %v8851_v2 = vld [vmem:[%s12359_s14 + $0x908] sm:$0xf] }
 0x1df   : > { %3819 = vmatpush.bf16.msrb.mxu1 %v8996_v55  ;;  %v9163_v55 = vld [vmem:[%s12359_s14 + $0xb78] sm:$0xf]  ;;  %v8864_v14 = vor.u32 %v11176_v26, %v8863_v31  ;;  %v11289_v31 = vld [vmem:[%s12366_s11 + $0xb0] sm:$0xf0]  ;;  %v9407_v26 = vld [vmem:[%s12366_s11 + $0x168] sm:$0xf] }
 0x1e0   : > { %3833 = vmatpush.bf16.msrb.mxu2 %v9092_v57  ;;  %v11251_v57 = vld [vmem:[%s12359_s14 + $0xb80] sm:$0xf0]  ;;  %v13354_v61 = vadd.f32 %v3573_v54, %v3560_v50  ;;  %v11221_v54 = vld [vmem:[%s12359_s14 + $0xa90] sm:$0xf0] }
 0x1e1   : > { %3847 = vmatpush.bf16.msrb.mxu3 %v9188_v1  ;;  %v9068_v1 = vor.u32 %v11227_v43, %v9067_v47  ;;  %v9164_v56 = vor.u32 %v11251_v57, %v9163_v55  ;;  %v11197_v47 = vld [vmem:[%s12359_s14 + $0x9d0] sm:$0xf0]  ;;  %v9043_v43 = vld [vmem:[%s12359_s14 + $0xa88] sm:$0xf] }
 0x1e2   : > { %3806 = vmatpush.bf16.msrb.mxu0 %v8888_v12  ;;  %v11224_v12 = vld [vmem:[%s12359_s14 + $0xaa8] sm:$0xf0]  ;;  %v9139_v55 = vld [vmem:[%s12359_s14 + $0xb48] sm:$0xf]  ;;  %v11245_v57 = vld [vmem:[%s12359_s14 + $0xb50] sm:$0xf0] }
 0x1e3   : > { %3820 = vmatpush.bf16.msrb.mxu1 %v8984_v25  ;;  %v9151_v25 = vld [vmem:[%s12359_s14 + $0xb60] sm:$0xf]  ;;  %v9056_v41 = vor.u32 %v11224_v12, %v9055_v3  ;;  %v9044_v3 = vor.u32 %v11221_v54, %v9043_v43  ;;  %v9599_v12 = vld [vmem:[%s12366_s11 + $0x2e8] sm:$0xf]  ;;  %v9587_v43 = vld [vmem:[%s12366_s11 + $0x2d0] sm:$0xf]  ;;  %v13390_v54 = vpop.f32.mrf.mxu1 }
 0x1e4   : > { %3834 = vmatpush.bf16.msrb.mxu2 %v9080_v28  ;;  %v11248_v28 = vld [vmem:[%s12359_s14 + $0xb68] sm:$0xf0]  ;;  %14540 = vst [vmem:[#allocation32_spill] sm:$0xff] %v13390_v54  ;;  %v11406_v54 = vld [vmem:[%s12366_s11 + $0x458] sm:$0xf0] }
 0x1e5   : > { %3848 = vmatpush.bf16.msrb.mxu3 %v9176_v27  ;;  %v8960_v27 = vor.u32 %v11200_v21, %v8959_v10  ;;  %v9152_v50 = vor.u32 %v11248_v28, %v9151_v25  ;;  %v9503_v10 = vld [vmem:[%s12366_s11 + $0x228] sm:$0xf]  ;;  %v11337_v21 = vld [vmem:[%s12366_s11 + $0x230] sm:$0xf0]  ;;  %v9140_v28 = vor.u32 %v11245_v57, %v9139_v55  ;;  %v9300_v55 = vor.u32 %v11286_v11, %v9299_v36 }
 0x1e6   : > { %3807 = vmatpush.bf16.msrb.mxu0 %v8876_v60  ;;  %v9311_v60 = vld [vmem:[%s12366_s11 + $0xa8] sm:$0xf]  ;;  %v11361_v25 = vld [vmem:[%s12366_s11 + $0x2f0] sm:$0xf0]  ;;  %v9396_v57 = vor.u32 %v11310_v40, %v9395_v46  ;;  %v9575_v40 = vld [vmem:[%s12366_s11 + $0x2b8] sm:$0xf] }
 0x1e7   : > { %3821 = vmatpush.bf16.msrb.mxu1 %v8972_v63  ;;  %v8852_v63 = vor.u32 %v11173_v23, %v8851_v2  ;;  %v9504_v23 = vor.u32 %v11337_v21, %v9503_v10  ;;  %v11307_v10 = vld [vmem:[%s12366_s11 + $0x140] sm:$0xf0]  ;;  %v9479_v21 = vld [vmem:[%s12366_s11 + $0x1f8] sm:$0xf] }
 0x1e8   : > { %3835 = vmatpush.bf16.msrb.mxu2 %v9068_v1  ;;  %v11313_v1 = vld [vmem:[%s12366_s11 + $0x170] sm:$0xf0]  ;;  %v11355_v46 = vld [vmem:[%s12366_s11 + $0x2c0] sm:$0xf0] }
 0x1e9   : > { %3849 = vmatpush.bf16.msrb.mxu3 %v9164_v56  ;;  %v8948_v56 = vor.u32 %v11197_v47, %v8947_v42  ;;  %v9408_v2 = vor.u32 %v11313_v1, %v9407_v26  ;;  %v11334_v42 = vld [vmem:[%s12366_s11 + $0x218] sm:$0xf0]  ;;  %v13386_v47 = vpop.f32.mrf.mxu0  ;;  %v11283_v26 = vld [vmem:[%s12366_s11 + $0x80] sm:$0xf0] }
 0x1ea   : > { %3808 = vmatpush.bf16.msrb.mxu0 %v8864_v14  ;;  %v9312_v14 = vor.u32 %v11289_v31, %v9311_v60  ;;  %14539 = vst [vmem:[#allocation31_spill] sm:$0xff] %v13386_v47  ;;  %v9287_v31 = vld [vmem:[%s12366_s11 + $0x78] sm:$0xf]  ;;  %v11598_v47 = vld [vmem:[%s12366_s11 + $0xa58] sm:$0xf0] }
 0x1eb   : > { %3822 = vmatpush.bf16.msrb.mxu1 %v8960_v27  ;;  %v9600_v27 = vor.u32 %v11361_v25, %v9599_v12  ;;  %v9288_v11 = vor.u32 %v11283_v26, %v9287_v31  ;;  %v9275_v12 = vld [vmem:[%s12366_s11 + $0x60] sm:$0xf]  ;;  %v11280_v25 = vld [vmem:[%s12366_s11 + $0x68] sm:$0xf0] }
 0x1ec   : > { %3836 = vmatpush.bf16.msrb.mxu2 %v9056_v41  ;;  %v9491_v41 = vld [vmem:[%s12366_s11 + $0x210] sm:$0xf] }
 0x1ed   : > { %3850 = vmatpush.bf16.msrb.mxu3 %v9152_v50  ;;  %v11358_v50 = vld [vmem:[%s12366_s11 + $0x2d8] sm:$0xf0]  ;;  %v9492_v60 = vor.u32 %v11334_v42, %v9491_v41  ;;  %v11328_v41 = vld [vmem:[%s12366_s11 + $0x1e8] sm:$0xf0]  ;;  %v13412_v42 = vpop.f32.mrf.mxu3 }
 0x1ee   : > { %3809 = vmatpush.bf16.msrb.mxu0 %v8852_v63  ;;  %v9383_v63 = vld [vmem:[%s12366_s11 + $0x138] sm:$0xf]  ;;  %v9588_v1 = vor.u32 %v11358_v50, %v9587_v43  ;;  %14542 = vst [vmem:[#allocation34_spill] sm:$0xff] %v13412_v42  ;;  %v9563_v50 = vld [vmem:[%s12366_s11 + $0x2a0] sm:$0xf] }
 0x1ef   : > { %3823 = vmatpush.bf16.msrb.mxu1 %v8948_v56  ;;  %v11331_v56 = vld [vmem:[%s12366_s11 + $0x200] sm:$0xf0]  ;;  %v9384_v36 = vor.u32 %v11307_v10, %v9383_v63  ;;  %v3601_v31 = vpop.f32.mrf.mxu1  ;;  %v11277_v10 = vld [vmem:[%s12366_s11 + $0x50] sm:$0xf0]  ;;  %v11382_v42 = vld [vmem:[%s12366_s11 + $0x398] sm:$0xf0] }
 0x1f0   : > { %3837 = vmatpush.bf16.msrb.mxu2 %v9044_v3  ;;  %v9480_v3 = vor.u32 %v11331_v56, %v9479_v21  ;;  %v9359_v21 = vld [vmem:[%s12366_s11 + $0x108] sm:$0xf] }
 0x1f1   : > { %3851 = vmatpush.bf16.msrb.mxu3 %v9140_v28  ;;  %3810 = vmatmul.bf16.vlgmr.msrb.gmra.mxu0 %v12764_v6  ;;  %v9371_v28 = vld [vmem:[%s12366_s11 + $0x120] sm:$0xf]  ;;  %v3587_v43 = vpop.f32.mrf.mxu0 }
 0x1f2   : > { %6418 = vmatpush.bf16.msra.mxu0 %v9312_v14  ;;  %3824 = vmatmul.bf16.vlgmr.msrb.gmra.mxu1 %v12771_v18  ;;  %v13407_v14 = vpop.f32.mrf.mxu2 }
 0x1f3   : > { %6432 = vmatpush.bf16.msra.mxu1 %v9408_v2  ;;  %3838 = vmatmul.bf16.vlgmr.msrb.gmra.mxu2 %v12769_v16  ;;  %14541 = vst [vmem:[#allocation33_spill] sm:$0xff] %v13407_v14  ;;  %v9576_v2 = vor.u32 %v11355_v46, %v9575_v40  ;;  %v11301_v46 = vld [vmem:[%s12366_s11 + $0x110] sm:$0xf0]  ;;  %v9779_v14 = vld [vmem:[%s12366_s11 + $0x450] sm:$0xf] }
 0x1f4   : > { %6446 = vmatpush.bf16.msra.mxu2 %v9504_v23  ;;  %3852 = vmatmul.bf16.vlgmr.msrb.gmra.mxu3 %v12775_v8  ;;  %v11304_v23 = vld [vmem:[%s12366_s11 + $0x128] sm:$0xf0] }
 0x1f5   : > { %6460 = vmatpush.bf16.msra.mxu3 %v9600_v27  ;;  %v9467_v27 = vld [vmem:[%s12366_s11 + $0x1e0] sm:$0xf]  ;;  %v9372_v26 = vor.u32 %v11304_v23, %v9371_v28  ;;  %v11274_v23 = vld [vmem:[%s12366_s11 + $0x38] sm:$0xf0] }
 0x1f6   : > { %6419 = vmatpush.bf16.msra.mxu0 %v9300_v55  ;;  %v11352_v55 = vld [vmem:[%s12366_s11 + $0x2a8] sm:$0xf0]  ;;  %v9468_v63 = vor.u32 %v11328_v41, %v9467_v27  ;;  %v9347_v27 = vld [vmem:[%s12366_s11 + $0xf0] sm:$0xf] }
 0x1f7   : > { %6433 = vmatpush.bf16.msra.mxu1 %v9396_v57  ;;  %v3588_v57 = vadd.f32 %v3587_v43, %v13354_v61  ;;  %v9564_v56 = vor.u32 %v11352_v55, %v9563_v50  ;;  %v11325_v61 = vld [vmem:[%s12366_s11 + $0x1d0] sm:$0xf0]  ;;  %v11298_v50 = vld [vmem:[%s12366_s11 + $0xf8] sm:$0xf0]  ;;  %v9443_v55 = vld [vmem:[%s12366_s11 + $0x1b0] sm:$0xf] }
 0x1f8   : > { %6447 = vmatpush.bf16.msra.mxu2 %v9492_v60  ;;  %v9276_v60 = vor.u32 %v11280_v25, %v9275_v12  ;;  %v9551_v12 = vld [vmem:[%s12366_s11 + $0x288] sm:$0xf]  ;;  %v9360_v25 = vor.u32 %v11301_v46, %v9359_v21  ;;  %v9348_v21 = vor.u32 %v11298_v50, %v9347_v27  ;;  %v9239_v46 = vld [vmem:[%s12366_s11 + $0x18] sm:$0xf]  ;;  %v11268_v27 = vld [vmem:[%s12366_s11 + $0x8] sm:$0xf0] }
 0x1f9   : > { %6461 = vmatpush.bf16.msra.mxu3 %v9588_v1  ;;  %v9263_v1 = vld [vmem:[%s12366_s11 + $0x48] sm:$0xf]  ;;  %v3602_v40 = vadd.f32 %v3601_v31, %v3588_v57  ;;  %v11322_v57 = vld [vmem:[%s12366_s11 + $0x1b8] sm:$0xf0]  ;;  %v3629_v31 = vpop.f32.mrf.mxu3  ;;  %v9323_v50 = vld [vmem:[%s12366_s11 + $0xc0] sm:$0xf] }
 0x1fa   : > { %6420 = vmatpush.bf16.msra.mxu0 %v9288_v11  ;;  %v9455_v11 = vld [vmem:[%s12366_s11 + $0x1c8] sm:$0xf]  ;;  %v3615_v43 = vpop.f32.mrf.mxu2 }
 0x1fb   : > { %6434 = vmatpush.bf16.msra.mxu1 %v9384_v36  ;;  %v11349_v36 = vld [vmem:[%s12366_s11 + $0x290] sm:$0xf0]  ;;  %v9456_v28 = vor.u32 %v11325_v61, %v9455_v11  ;;  %v9335_v11 = vld [vmem:[%s12366_s11 + $0xd8] sm:$0xf] }
 0x1fc   : > { %6448 = vmatpush.bf16.msra.mxu2 %v9480_v3  ;;  %v9264_v3 = vor.u32 %v11277_v10, %v9263_v1  ;;  %v9552_v41 = vor.u32 %v11349_v36, %v9551_v12  ;;  %v11295_v12 = vld [vmem:[%s12366_s11 + $0xe0] sm:$0xf0]  ;;  %v9431_v36 = vld [vmem:[%s12366_s11 + $0x198] sm:$0xf] }
 0x1fd   : > { %6462 = vmatpush.bf16.msra.mxu3 %v9576_v2  ;;  %v9251_v2 = vld [vmem:[%s12366_s11 + $0x30] sm:$0xf] }
 0x1fe   : > { %6421 = vmatpush.bf16.msra.mxu0 %v9276_v60  ;;  %v3616_v60 = vadd.f32 %v3615_v43, %v3602_v40  ;;  %v9252_v1 = vor.u32 %v11274_v23, %v9251_v2  ;;  %v11271_v40 = vld [vmem:[%s12366_s11 + $0x20] sm:$0xf0]  ;;  %v9227_v23 = vld [vmem:[%s12366_s11] sm:$0xf] }
 0x1ff   : > { %6435 = vmatpush.bf16.msra.mxu1 %v9372_v26  ;;  %v9539_v26 = vld [vmem:[%s12366_s11 + $0x270] sm:$0xf]  ;;  %v9240_v2 = vor.u32 %v11271_v40, %v9239_v46  ;;  %v11385_v46 = vld [vmem:[%s12366_s11 + $0x3b0] sm:$0xf0]  ;;  %v9791_v40 = vld [vmem:[%s12366_s11 + $0x468] sm:$0xf] }
 0x200   : > { %6449 = vmatpush.bf16.msra.mxu2 %v9468_v63  ;;  %v11346_v63 = vld [vmem:[%s12366_s11 + $0x278] sm:$0xf0]  ;;  %v13433_v10 = vadd.f32 %v3629_v31, %v3616_v60  ;;  %v11316_v31 = vld [vmem:[%s12366_s11 + $0x188] sm:$0xf0] }
 0x201   : > { %6463 = vmatpush.bf16.msra.mxu3 %v9564_v56  ;;  %v9444_v56 = vor.u32 %v11322_v57, %v9443_v55  ;;  %v9540_v61 = vor.u32 %v11346_v63, %v9539_v26  ;;  %v11292_v55 = vld [vmem:[%s12366_s11 + $0xc8] sm:$0xf0]  ;;  %v9419_v57 = vld [vmem:[%s12366_s11 + $0x180] sm:$0xf] }
 0x202   : > { %6422 = vmatpush.bf16.msra.mxu0 %v9264_v3  ;;  %14543 = vst [vmem:[#allocation35_spill] sm:$0xff] %v13433_v10  ;;  %v11319_v3 = vld [vmem:[%s12366_s11 + $0x1a0] sm:$0xf0]  ;;  %v9515_v26 = vld [vmem:[%s12366_s11 + $0x240] sm:$0xf] }
 0x203   : > { %6436 = vmatpush.bf16.msra.mxu1 %v9360_v25  ;;  %v9527_v25 = vld [vmem:[%s12366_s11 + $0x258] sm:$0xf]  ;;  %v9432_v43 = vor.u32 %v11319_v3, %v9431_v36  ;;  %v11340_v63 = vld [vmem:[%s12366_s11 + $0x248] sm:$0xf0]  ;;  %v9420_v36 = vor.u32 %v11316_v31, %v9419_v57  ;;  %v9983_v3 = vld [vmem:[%s12366_s11 + $0x5e8] sm:$0xf]  ;;  %v13469_v31 = vpop.f32.mrf.mxu1 }
 0x204   : > { %6450 = vmatpush.bf16.msra.mxu2 %v9456_v28  ;;  %v11343_v28 = vld [vmem:[%s12366_s11 + $0x260] sm:$0xf0]  ;;  %v9683_v10 = vld [vmem:[%s12366_s11 + $0x390] sm:$0xf]  ;;  %v11454_v57 = vld [vmem:[%s12366_s11 + $0x5d8] sm:$0xf0] }
 0x205   : > { %6464 = vmatpush.bf16.msra.mxu3 %v9552_v41  ;;  %v9336_v41 = vor.u32 %v11295_v12, %v9335_v11  ;;  %v9528_v60 = vor.u32 %v11343_v28, %v9527_v25  ;;  %v9887_v11 = vld [vmem:[%s12366_s11 + $0x528] sm:$0xf]  ;;  %v11433_v12 = vld [vmem:[%s12366_s11 + $0x530] sm:$0xf0]  ;;  %v9516_v28 = vor.u32 %v11340_v63, %v9515_v26  ;;  %14545 = vst [vmem:[#allocation37_spill] sm:$0xff] %v13469_v31 }
 0x206   : > { %6423 = vmatpush.bf16.msra.mxu0 %v9252_v1  ;;  %v9695_v1 = vld [vmem:[%s12366_s11 + $0x3a8] sm:$0xf]  ;;  %v11457_v25 = vld [vmem:[%s12366_s11 + $0x5f0] sm:$0xf0]  ;;  %v9684_v26 = vor.u32 %v11382_v42, %v9683_v10  ;;  %v9780_v63 = vor.u32 %v11406_v54, %v9779_v14  ;;  %v9659_v10 = vld [vmem:[%s12366_s11 + $0x360] sm:$0xf] }
 0x207   : > { %6437 = vmatpush.bf16.msra.mxu1 %v9348_v21  ;;  %v9228_v21 = vor.u32 %v11268_v27, %v9227_v23  ;;  %v9888_v27 = vor.u32 %v11433_v12, %v9887_v11  ;;  %v11403_v11 = vld [vmem:[%s12366_s11 + $0x440] sm:$0xf0]  ;;  %v9863_v12 = vld [vmem:[%s12366_s11 + $0x4f8] sm:$0xf]  ;;  %v10067_v31 = vld [vmem:[%s12366_s11 + $0x690] sm:$0xf] }
 0x208   : > { %6451 = vmatpush.bf16.msra.mxu2 %v9444_v56  ;;  %v11409_v56 = vld [vmem:[%s12366_s11 + $0x470] sm:$0xf0] }
 0x209   : > { %6465 = vmatpush.bf16.msra.mxu3 %v9540_v61  ;;  %v9324_v61 = vor.u32 %v11292_v55, %v9323_v50  ;;  %v9792_v23 = vor.u32 %v11409_v56, %v9791_v40  ;;  %v11430_v50 = vld [vmem:[%s12366_s11 + $0x518] sm:$0xf0]  ;;  %v9971_v55 = vld [vmem:[%s12366_s11 + $0x5d0] sm:$0xf]  ;;  %v11379_v40 = vld [vmem:[%s12366_s11 + $0x380] sm:$0xf0] }
 0x20a   : > { %6424 = vmatpush.bf16.msra.mxu0 %v9240_v2  ;;  %v9696_v2 = vor.u32 %v11385_v46, %v9695_v1  ;;  %v9671_v46 = vld [vmem:[%s12366_s11 + $0x378] sm:$0xf]  ;;  %v9972_v56 = vor.u32 %v11454_v57, %v9971_v55  ;;  %v9947_v55 = vld [vmem:[%s12366_s11 + $0x5a0] sm:$0xf]  ;;  %v11448_v57 = vld [vmem:[%s12366_s11 + $0x5a8] sm:$0xf0] }
 0x20b   : > { %6438 = vmatpush.bf16.msra.mxu1 %v9336_v41  ;;  %v9984_v41 = vor.u32 %v11457_v25, %v9983_v3  ;;  %v11451_v3 = vld [vmem:[%s12366_s11 + $0x5c0] sm:$0xf0]  ;;  %v9672_v54 = vor.u32 %v11379_v40, %v9671_v46  ;;  %v11376_v25 = vld [vmem:[%s12366_s11 + $0x368] sm:$0xf0] }
 0x20c   : > { %6452 = vmatpush.bf16.msra.mxu2 %v9432_v43  ;;  %v9875_v43 = vld [vmem:[%s12366_s11 + $0x510] sm:$0xf] }
 0x20d   : > { %6466 = vmatpush.bf16.msra.mxu3 %v9528_v60  ;;  %v13467_v60 = vpop.f32.mrf.mxu0  ;;  %v9876_v1 = vor.u32 %v11430_v50, %v9875_v43  ;;  %v11424_v43 = vld [vmem:[%s12366_s11 + $0x4e8] sm:$0xf0]  ;;  %v13491_v50 = vpop.f32.mrf.mxu3 }
 0x20e   : > { %6425 = vmatpush.bf16.msra.mxu0 %v9228_v21  ;;  %14544 = vst [vmem:[#allocation36_spill] sm:$0xff] %v13467_v60  ;;  %v9767_v21 = vld [vmem:[%s12366_s11 + $0x438] sm:$0xf]  ;;  %v11478_v60 = vld [vmem:[%s12366_s11 + $0x698] sm:$0xf0] }
 0x20f   : > { %6439 = vmatpush.bf16.msra.mxu1 %v9324_v61  ;;  %v11427_v61 = vld [vmem:[%s12366_s11 + $0x500] sm:$0xf0]  ;;  %v9768_v14 = vor.u32 %v11403_v11, %v9767_v21  ;;  %14547 = vst [vmem:[#allocation39_spill] sm:$0xff] %v13491_v50  ;;  %v9647_v21 = vld [vmem:[%s12366_s11 + $0x348] sm:$0xf] }
 0x210   : > { %6453 = vmatpush.bf16.msra.mxu2 %v9420_v36  ;;  %v9959_v36 = vld [vmem:[%s12366_s11 + $0x5b8] sm:$0xf]  ;;  %v9864_v42 = vor.u32 %v11427_v61, %v9863_v12  ;;  %v9743_v11 = vld [vmem:[%s12366_s11 + $0x408] sm:$0xf]  ;;  %v9948_v61 = vor.u32 %v11448_v57, %v9947_v55  ;;  %v11394_v55 = vld [vmem:[%s12366_s11 + $0x3f8] sm:$0xf0] }
 0x211   : > { %6467 = vmatpush.bf16.msra.mxu3 %v9516_v28  ;;  %6426 = vmatmul.bf16.vlgmr.msra.gmra.mxu0 %v12543_v34  ;;  %v9755_v28 = vld [vmem:[%s12366_s11 + $0x420] sm:$0xf]  ;;  %v9827_v57 = vld [vmem:[%s12366_s11 + $0x4b0] sm:$0xf] }
 0x212   : > { %6474 = vmatpush.bf16.msrb.mxu0 %v9696_v2  ;;  %6440 = vmatmul.bf16.vlgmr.msra.gmra.mxu1 %v12555_v45  ;;  %v13486_v2 = vpop.f32.mrf.mxu2  ;;  %v9923_v50 = vld [vmem:[%s12366_s11 + $0x570] sm:$0xf] }
 0x213   : > { %6488 = vmatpush.bf16.msrb.mxu1 %v9792_v23  ;;  %6454 = vmatmul.bf16.vlgmr.msra.gmra.mxu2 %v12548_v30  ;;  %14546 = vst [vmem:[#allocation38_spill] sm:$0xff] %v13486_v2  ;;  %v9960_v23 = vor.u32 %v11451_v3, %v9959_v36  ;;  %v11397_v36 = vld [vmem:[%s12366_s11 + $0x410] sm:$0xf0]  ;;  %v9839_v3 = vld [vmem:[%s12366_s11 + $0x4c8] sm:$0xf] }
 0x214   : > { %6502 = vmatpush.bf16.msrb.mxu2 %v9888_v27  ;;  %6468 = vmatmul.bf16.vlgmr.msra.gmra.mxu3 %v12560_v52  ;;  %v11400_v27 = vld [vmem:[%s12366_s11 + $0x428] sm:$0xf0] }
 0x215   : > { %6516 = vmatpush.bf16.msrb.mxu3 %v9984_v41  ;;  %v9851_v41 = vld [vmem:[%s12366_s11 + $0x4e0] sm:$0xf]  ;;  %v9756_v46 = vor.u32 %v11400_v27, %v9755_v28  ;;  %v9635_v27 = vld [vmem:[%s12366_s11 + $0x330] sm:$0xf] }
 0x216   : > { %6475 = vmatpush.bf16.msrb.mxu0 %v9684_v26  ;;  %v9660_v26 = vor.u32 %v11376_v25, %v9659_v10  ;;  %v9852_v40 = vor.u32 %v11424_v43, %v9851_v41  ;;  %v9935_v10 = vld [vmem:[%s12366_s11 + $0x588] sm:$0xf]  ;;  %v9744_v25 = vor.u32 %v11397_v36, %v9743_v11  ;;  %v11370_v41 = vld [vmem:[%s12366_s11 + $0x338] sm:$0xf0]  ;;  %v11367_v36 = vld [vmem:[%s12366_s11 + $0x320] sm:$0xf0] }
 0x217   : > { %6489 = vmatpush.bf16.msrb.mxu1 %v9780_v63  ;;  %v3643_v63 = vpop.f32.mrf.mxu0 }
 0x218   : > { %6503 = vmatpush.bf16.msrb.mxu2 %v9876_v1  ;;  %v3657_v1 = vpop.f32.mrf.mxu1 }
 0x219   : > { %6517 = vmatpush.bf16.msrb.mxu3 %v9972_v56  ;;  %v11373_v56 = vld [vmem:[%s12366_s11 + $0x350] sm:$0xf0]  ;;  %v3658_v12 = vadd.f32 %v3657_v1, %v3643_v63  ;;  %v11418_v63 = vld [vmem:[%s12366_s11 + $0x4b8] sm:$0xf0] }
 0x21a   : > { %6476 = vmatpush.bf16.msrb.mxu0 %v9672_v54  ;;  %v11421_v54 = vld [vmem:[%s12366_s11 + $0x4d0] sm:$0xf0]  ;;  %v3671_v1 = vpop.f32.mrf.mxu2  ;;  %v9828_v11 = vor.u32 %v11418_v63, %v9827_v57  ;;  %v11388_v57 = vld [vmem:[%s12366_s11 + $0x3c8] sm:$0xf0]  ;;  %v9803_v63 = vld [vmem:[%s12366_s11 + $0x480] sm:$0xf] }
 0x21b   : > { %6490 = vmatpush.bf16.msrb.mxu1 %v9768_v14  ;;  %v11445_v14 = vld [vmem:[%s12366_s11 + $0x590] sm:$0xf0]  ;;  %v9840_v28 = vor.u32 %v11421_v54, %v9839_v3  ;;  %v9719_v3 = vld [vmem:[%s12366_s11 + $0x3d8] sm:$0xf] }
 0x21c   : > { %6504 = vmatpush.bf16.msrb.mxu2 %v9864_v42  ;;  %v9648_v42 = vor.u32 %v11373_v56, %v9647_v21  ;;  %v9936_v43 = vor.u32 %v11445_v14, %v9935_v10  ;;  %v3685_v21 = vpop.f32.mrf.mxu3  ;;  %v11391_v10 = vld [vmem:[%s12366_s11 + $0x3e0] sm:$0xf0]  ;;  %v9815_v14 = vld [vmem:[%s12366_s11 + $0x498] sm:$0xf] }
 0x21d   : > { %6518 = vmatpush.bf16.msrb.mxu3 %v9960_v23  ;;  %v9731_v23 = vld [vmem:[%s12366_s11 + $0x3f0] sm:$0xf] }
 0x21e   : > { %6477 = vmatpush.bf16.msrb.mxu0 %v9660_v26  ;;  %v11442_v26 = vld [vmem:[%s12366_s11 + $0x578] sm:$0xf0]  ;;  %v9732_v56 = vor.u32 %v11394_v55, %v9731_v23  ;;  %v11364_v23 = vld [vmem:[%s12366_s11 + $0x308] sm:$0xf0]  ;;  %v9707_v55 = vld [vmem:[%s12366_s11 + $0x3c0] sm:$0xf] }
 0x21f   : > { %6491 = vmatpush.bf16.msrb.mxu1 %v9756_v46  ;;  %v3672_v46 = vadd.f32 %v3671_v1, %v3658_v12  ;;  %v9924_v12 = vor.u32 %v11442_v26, %v9923_v50  ;;  %v9720_v50 = vor.u32 %v11391_v10, %v9719_v3  ;;  %v11412_v26 = vld [vmem:[%s12366_s11 + $0x488] sm:$0xf0]  ;;  %v10271_v3 = vld [vmem:[%s12366_s11 + $0x828] sm:$0xf]  ;;  %v11529_v10 = vld [vmem:[%s12366_s11 + $0x830] sm:$0xf0]  ;;  %v13537_v2 = vpop.f32.mrf.mxu0 }
 0x220   : > { %6505 = vmatpush.bf16.msrb.mxu2 %v9852_v40  ;;  %v9636_v40 = vor.u32 %v11370_v41, %v9635_v27  ;;  %v9611_v41 = vld [vmem:[%s12366_s11 + $0x300] sm:$0xf]  ;;  %14548 = vst [vmem:[#allocation40_spill] sm:$0xff] %v13537_v2  ;;  %v10547_v2 = vld [vmem:[%s12366_s11 + $0xa50] sm:$0xf] }
 0x221   : > { %6519 = vmatpush.bf16.msrb.mxu3 %v9948_v61  ;;  %v9623_v61 = vld [vmem:[%s12366_s11 + $0x318] sm:$0xf]  ;;  %v13514_v54 = vadd.f32 %v3685_v21, %v3672_v46  ;;  %v9899_v46 = vld [vmem:[%s12366_s11 + $0x540] sm:$0xf]  ;;  %v10079_v21 = vld [vmem:[%s12366_s11 + $0x6a8] sm:$0xf] }
 0x222   : > { %6478 = vmatpush.bf16.msrb.mxu0 %v9648_v42  ;;  %v11415_v42 = vld [vmem:[%s12366_s11 + $0x4a0] sm:$0xf0]  ;;  %v9624_v27 = vor.u32 %v11367_v36, %v9623_v61  ;;  %v11481_v61 = vld [vmem:[%s12366_s11 + $0x6b0] sm:$0xf0]  ;;  %v10175_v36 = vld [vmem:[%s12366_s11 + $0x768] sm:$0xf] }
 0x223   : > { %6492 = vmatpush.bf16.msrb.mxu1 %v9744_v25  ;;  %v9911_v25 = vld [vmem:[%s12366_s11 + $0x558] sm:$0xf] }
 0x224   : > { %6506 = vmatpush.bf16.msrb.mxu2 %v9840_v28  ;;  %v11439_v28 = vld [vmem:[%s12366_s11 + $0x560] sm:$0xf0] }
 0x225   : > { %6520 = vmatpush.bf16.msrb.mxu3 %v9936_v43  ;;  %v9816_v43 = vor.u32 %v11415_v42, %v9815_v14  ;;  %v9912_v1 = vor.u32 %v11439_v28, %v9911_v25  ;;  %v9804_v14 = vor.u32 %v11412_v26, %v9803_v63  ;;  %v10367_v42 = vld [vmem:[%s12366_s11 + $0x8e8] sm:$0xf]  ;;  %v11553_v25 = vld [vmem:[%s12366_s11 + $0x8f0] sm:$0xf0]  ;;  %v11526_v63 = vld [vmem:[%s12366_s11 + $0x818] sm:$0xf0] }
 0x226   : > { %6479 = vmatpush.bf16.msrb.mxu0 %v9636_v40  ;;  %v11436_v40 = vld [vmem:[%s12366_s11 + $0x548] sm:$0xf0]  ;;  %v11550_v26 = vld [vmem:[%s12366_s11 + $0x8d8] sm:$0xf0] }
 0x227   : > { %6493 = vmatpush.bf16.msrb.mxu1 %v9732_v56  ;;  %v9612_v56 = vor.u32 %v11364_v23, %v9611_v41  ;;  %v9900_v28 = vor.u32 %v11436_v40, %v9899_v46  ;;  %v10272_v23 = vor.u32 %v11529_v10, %v10271_v3  ;;  %v13547_v46 = vpop.f32.mrf.mxu1  ;;  %v10068_v40 = vor.u32 %v11478_v60, %v10067_v31  ;;  %v11499_v10 = vld [vmem:[%s12366_s11 + $0x740] sm:$0xf0]  ;;  %v10343_v60 = vld [vmem:[%s12366_s11 + $0x8b8] sm:$0xf] }
 0x228   : > { %6507 = vmatpush.bf16.msrb.mxu2 %v9828_v11  ;;  %v11505_v11 = vld [vmem:[%s12366_s11 + $0x770] sm:$0xf0]  ;;  %14549 = vst [vmem:[#allocation41_spill] sm:$0xff] %v13547_v46  ;;  %v11547_v31 = vld [vmem:[%s12366_s11 + $0x8c0] sm:$0xf0] }
 0x229   : > { %6521 = vmatpush.bf16.msrb.mxu3 %v9924_v12  ;;  %v9708_v12 = vor.u32 %v11388_v57, %v9707_v55  ;;  %v10176_v41 = vor.u32 %v11505_v11, %v10175_v36  ;;  %v11502_v55 = vld [vmem:[%s12366_s11 + $0x758] sm:$0xf0]  ;;  %v10259_v57 = vld [vmem:[%s12366_s11 + $0x810] sm:$0xf]  ;;  %v10055_v36 = vld [vmem:[%s12366_s11 + $0x678] sm:$0xf] }
 0x22a   : > { %6480 = vmatpush.bf16.msrb.mxu0 %v9624_v27  ;;  %v10080_v27 = vor.u32 %v11481_v61, %v10079_v21  ;;  %v10260_v61 = vor.u32 %v11526_v63, %v10259_v57  ;;  %v10151_v11 = vld [vmem:[%s12366_s11 + $0x738] sm:$0xf]  ;;  %v11496_v57 = vld [vmem:[%s12366_s11 + $0x728] sm:$0xf0]  ;;  %v10235_v63 = vld [vmem:[%s12366_s11 + $0x7e0] sm:$0xf] }
 0x22b   : > { %6494 = vmatpush.bf16.msrb.mxu1 %v9720_v50  ;;  %v10163_v50 = vld [vmem:[%s12366_s11 + $0x750] sm:$0xf]  ;;  %v11574_v46 = vld [vmem:[%s12366_s11 + $0x998] sm:$0xf0] }
 0x22c   : > { %6508 = vmatpush.bf16.msrb.mxu2 %v9816_v43  ;;  %v10368_v43 = vor.u32 %v11553_v25, %v10367_v42  ;;  %v10164_v21 = vor.u32 %v11502_v55, %v10163_v50  ;;  %v13561_v25 = vpop.f32.mrf.mxu2  ;;  %v10139_v50 = vld [vmem:[%s12366_s11 + $0x720] sm:$0xf]  ;;  %v13566_v55 = vpop.f32.mrf.mxu3 }
 0x22d   : > { %6522 = vmatpush.bf16.msrb.mxu3 %v9912_v1  ;;  %v10355_v1 = vld [vmem:[%s12366_s11 + $0x8d0] sm:$0xf]  ;;  %14550 = vst [vmem:[#allocation42_spill] sm:$0xff] %v13561_v25 }
 0x22e   : > { %6481 = vmatpush.bf16.msrb.mxu0 %v9612_v56  ;;  %v11475_v56 = vld [vmem:[%s12366_s11 + $0x680] sm:$0xf0]  ;;  %v10356_v3 = vor.u32 %v11550_v26, %v10355_v1  ;;  %14551 = vst [vmem:[#allocation43_spill] sm:$0xff] %v13566_v55  ;;  %v11520_v1 = vld [vmem:[%s12366_s11 + $0x7e8] sm:$0xf0]  ;;  %v3699_v26 = vpop.f32.mrf.mxu0 }
 0x22f   : > { %6495 = vmatpush.bf16.msrb.mxu1 %v9708_v12  ;;  %v10247_v12 = vld [vmem:[%s12366_s11 + $0x7f8] sm:$0xf]  ;;  %v10056_v42 = vor.u32 %v11475_v56, %v10055_v36  ;;  %v10140_v56 = vor.u32 %v11496_v57, %v10139_v50  ;;  %v10223_v55 = vld [vmem:[%s12366_s11 + $0x7c8] sm:$0xf]  ;;  %v11466_v57 = vld [vmem:[%s12366_s11 + $0x638] sm:$0xf0] }
 0x230   : > { %6509 = vmatpush.bf16.msrb.mxu2 %v9804_v14  ;;  %v11523_v14 = vld [vmem:[%s12366_s11 + $0x800] sm:$0xf0]  ;;  %v10451_v25 = vld [vmem:[%s12366_s11 + $0x990] sm:$0xf] }
 0x231   : > { %6523 = vmatpush.bf16.msrb.mxu3 %v9900_v28  ;;  %6482 = vmatmul.bf16.vlgmr.msrb.gmra.mxu0 %v12612_v4  ;;  %v10152_v28 = vor.u32 %v11499_v10, %v10151_v11  ;;  %v10236_v11 = vor.u32 %v11520_v1, %v10235_v63  ;;  %v10031_v10 = vld [vmem:[%s12366_s11 + $0x648] sm:$0xf]  ;;  %v10115_v63 = vld [vmem:[%s12366_s11 + $0x6f0] sm:$0xf] }
 0x232   : > { %6530 = vmatpush.bf16.msra.mxu0 %v10080_v27  ;;  %6496 = vmatmul.bf16.vlgmr.msrb.gmra.mxu1 %v12619_v7  ;;  %v10248_v27 = vor.u32 %v11523_v14, %v10247_v12  ;;  %v11469_v12 = vld [vmem:[%s12366_s11 + $0x650] sm:$0xf0]  ;;  %v10127_v14 = vld [vmem:[%s12366_s11 + $0x708] sm:$0xf] }
 0x233   : > { %6544 = vmatpush.bf16.msra.mxu1 %v10176_v41  ;;  %6510 = vmatmul.bf16.vlgmr.msrb.gmra.mxu2 %v12617_v20  ;;  %v10043_v41 = vld [vmem:[%s12366_s11 + $0x660] sm:$0xf] }
 0x234   : > { %6558 = vmatpush.bf16.msra.mxu2 %v10272_v23  ;;  %6524 = vmatmul.bf16.vlgmr.msrb.gmra.mxu3 %v12623_v22  ;;  %v11472_v23 = vld [vmem:[%s12366_s11 + $0x668] sm:$0xf0] }
 0x235   : > { %6572 = vmatpush.bf16.msra.mxu3 %v10368_v43  ;;  %v10344_v43 = vor.u32 %v11547_v31, %v10343_v60  ;;  %v10044_v36 = vor.u32 %v11472_v23, %v10043_v41  ;;  %v10319_v41 = vld [vmem:[%s12366_s11 + $0x888] sm:$0xf] }
 0x236   : > { %6531 = vmatpush.bf16.msra.mxu0 %v10068_v40  ;;  %v10331_v40 = vld [vmem:[%s12366_s11 + $0x8a0] sm:$0xf] }
 0x237   : > { %6545 = vmatpush.bf16.msra.mxu1 %v10164_v21  ;;  %v11544_v21 = vld [vmem:[%s12366_s11 + $0x8a8] sm:$0xf0] }
 0x238   : > { %6559 = vmatpush.bf16.msra.mxu2 %v10260_v61  ;;  %v3700_v61 = vadd.f32 %v3699_v26, %v13514_v54  ;;  %v10332_v60 = vor.u32 %v11544_v21, %v10331_v40  ;;  %v11517_v54 = vld [vmem:[%s12366_s11 + $0x7d0] sm:$0xf0]  ;;  %v3727_v26 = vpop.f32.mrf.mxu2  ;;  %v11490_v40 = vld [vmem:[%s12366_s11 + $0x6f8] sm:$0xf0]  ;;  %v10211_v21 = vld [vmem:[%s12366_s11 + $0x7b0] sm:$0xf] }
 0x239   : > { %6573 = vmatpush.bf16.msra.mxu3 %v10356_v3  ;;  %v3713_v3 = vpop.f32.mrf.mxu1  ;;  %v10224_v50 = vor.u32 %v11517_v54, %v10223_v55  ;;  %v3741_v55 = vpop.f32.mrf.mxu3 }
 0x23a   : > { %6532 = vmatpush.bf16.msra.mxu0 %v10056_v42  ;;  %v3714_v31 = vadd.f32 %v3713_v3, %v3700_v61  ;;  %v11493_v42 = vld [vmem:[%s12366_s11 + $0x710] sm:$0xf0]  ;;  %v11514_v61 = vld [vmem:[%s12366_s11 + $0x7b8] sm:$0xf0]  ;;  %v10307_v3 = vld [vmem:[%s12366_s11 + $0x870] sm:$0xf] }
 0x23b   : > { %6546 = vmatpush.bf16.msra.mxu1 %v10152_v28  ;;  %v11541_v28 = vld [vmem:[%s12366_s11 + $0x890] sm:$0xf0]  ;;  %v10128_v23 = vor.u32 %v11493_v42, %v10127_v14  ;;  %v10212_v14 = vor.u32 %v11514_v61, %v10211_v21  ;;  %v10103_v42 = vld [vmem:[%s12366_s11 + $0x6d8] sm:$0xf]  ;;  %v11484_v21 = vld [vmem:[%s12366_s11 + $0x6c8] sm:$0xf0] }
 0x23c   : > { %6560 = vmatpush.bf16.msra.mxu2 %v10248_v27  ;;  %v10032_v27 = vor.u32 %v11469_v12, %v10031_v10  ;;  %v10320_v1 = vor.u32 %v11541_v28, %v10319_v41  ;;  %v10116_v12 = vor.u32 %v11490_v40, %v10115_v63  ;;  %v11487_v41 = vld [vmem:[%s12366_s11 + $0x6e0] sm:$0xf0]  ;;  %v10199_v28 = vld [vmem:[%s12366_s11 + $0x798] sm:$0xf]  ;;  %v11460_v63 = vld [vmem:[%s12366_s11 + $0x608] sm:$0xf0] }
 0x23d   : > { %6574 = vmatpush.bf16.msra.mxu3 %v10344_v43  ;;  %v10019_v43 = vld [vmem:[%s12366_s11 + $0x630] sm:$0xf]  ;;  %v10091_v40 = vld [vmem:[%s12366_s11 + $0x6c0] sm:$0xf] }
 0x23e   : > { %6533 = vmatpush.bf16.msra.mxu0 %v10044_v36  ;;  %v3728_v36 = vadd.f32 %v3727_v26, %v3714_v31  ;;  %v11463_v31 = vld [vmem:[%s12366_s11 + $0x620] sm:$0xf0]  ;;  %v10187_v61 = vld [vmem:[%s12366_s11 + $0x780] sm:$0xf] }
 0x23f   : > { %6547 = vmatpush.bf16.msra.mxu1 %v10140_v56  ;;  %v11538_v56 = vld [vmem:[%s12366_s11 + $0x878] sm:$0xf0] }
 0x240   : > { %6561 = vmatpush.bf16.msra.mxu2 %v10236_v11  ;;  %v10020_v11 = vor.u32 %v11466_v57, %v10019_v43  ;;  %v13590_v10 = vadd.f32 %v3741_v55, %v3728_v36  ;;  %v10308_v54 = vor.u32 %v11538_v56, %v10307_v3  ;;  %v9995_v57 = vld [vmem:[%s12366_s11 + $0x600] sm:$0xf]  ;;  %v11508_v3 = vld [vmem:[%s12366_s11 + $0x788] sm:$0xf0] }
 0x241   : > { %6575 = vmatpush.bf16.msra.mxu3 %v10332_v60  ;;  %v10007_v60 = vld [vmem:[%s12366_s11 + $0x618] sm:$0xf]  ;;  %v10283_v56 = vld [vmem:[%s12366_s11 + $0x840] sm:$0xf]  ;;  %v11532_v55 = vld [vmem:[%s12366_s11 + $0x848] sm:$0xf0] }
 0x242   : > { %6534 = vmatpush.bf16.msra.mxu0 %v10032_v27  ;;  %v11511_v27 = vld [vmem:[%s12366_s11 + $0x7a0] sm:$0xf0]  ;;  %v10008_v43 = vor.u32 %v11463_v31, %v10007_v60  ;;  %v11577_v60 = vld [vmem:[%s12366_s11 + $0x9b0] sm:$0xf0]  ;;  %v10559_v31 = vld [vmem:[%s12366_s11 + $0xa68] sm:$0xf] }
 0x243   : > { %6548 = vmatpush.bf16.msra.mxu1 %v10128_v23  ;;  %v10295_v23 = vld [vmem:[%s12366_s11 + $0x858] sm:$0xf]  ;;  %v10200_v26 = vor.u32 %v11511_v27, %v10199_v28  ;;  %v10188_v28 = vor.u32 %v11508_v3, %v10187_v61  ;;  %v10751_v27 = vld [vmem:[%s12366_s11 + $0xbe8] sm:$0xf]  ;;  %v10739_v61 = vld [vmem:[%s12366_s11 + $0xbd0] sm:$0xf]  ;;  %v13626_v3 = vpop.f32.mrf.mxu1 }
 0x244   : > { %6562 = vmatpush.bf16.msra.mxu2 %v10224_v50  ;;  %v11535_v50 = vld [vmem:[%s12366_s11 + $0x860] sm:$0xf0]  ;;  %14553 = vst [vmem:[#allocation45_spill] sm:$0xff] %v13626_v3  ;;  %v11309_v3 = vld [vmem:[%s12366_s11 + $0x154] sm:$0xf] }
 0x245   : > { %6576 = vmatpush.bf16.msra.mxu3 %v10320_v1  ;;  %v10104_v1 = vor.u32 %v11487_v41, %v10103_v42  ;;  %v10296_v36 = vor.u32 %v11535_v50, %v10295_v23  ;;  %v10655_v42 = vld [vmem:[%s12366_s11 + $0xb28] sm:$0xf]  ;;  %v11625_v41 = vld [vmem:[%s12366_s11 + $0xb30] sm:$0xf0]  ;;  %v10284_v50 = vor.u32 %v11532_v55, %v10283_v56  ;;  %v10452_v56 = vor.u32 %v11574_v46, %v10451_v25 }
 0x246   : > { %6535 = vmatpush.bf16.msra.mxu0 %v10020_v11  ;;  %v10463_v11 = vld [vmem:[%s12366_s11 + $0x9a8] sm:$0xf]  ;;  %v11649_v23 = vld [vmem:[%s12366_s11 + $0xbf0] sm:$0xf0]  ;;  %v10548_v55 = vor.u32 %v11598_v47, %v10547_v2  ;;  %v10727_v47 = vld [vmem:[%s12366_s11 + $0xbb8] sm:$0xf] }
 0x247   : > { %6549 = vmatpush.bf16.msra.mxu1 %v10116_v12  ;;  %v9996_v12 = vor.u32 %v11460_v63, %v9995_v57  ;;  %v10656_v63 = vor.u32 %v11625_v41, %v10655_v42  ;;  %v11595_v42 = vld [vmem:[%s12366_s11 + $0xa40] sm:$0xf0]  ;;  %v10631_v41 = vld [vmem:[%s12366_s11 + $0xaf8] sm:$0xf] }
 0x248   : > { %6563 = vmatpush.bf16.msra.mxu2 %v10212_v14  ;;  %v11601_v14 = vld [vmem:[%s12366_s11 + $0xa70] sm:$0xf0]  ;;  %v11643_v2 = vld [vmem:[%s12366_s11 + $0xbc0] sm:$0xf0] }
 0x249   : > { %6577 = vmatpush.bf16.msra.mxu3 %v10308_v54  ;;  %v10092_v54 = vor.u32 %v11484_v21, %v10091_v40  ;;  %v10560_v57 = vor.u32 %v11601_v14, %v10559_v31  ;;  %v11622_v40 = vld [vmem:[%s12366_s11 + $0xb18] sm:$0xf0]  ;;  %v13622_v21 = vpop.f32.mrf.mxu0  ;;  %v11571_v31 = vld [vmem:[%s12366_s11 + $0x980] sm:$0xf0] }
 0x24a   : > { %6536 = vmatpush.bf16.msra.mxu0 %v10008_v43  ;;  %v10464_v43 = vor.u32 %v11577_v60, %v10463_v11  ;;  %14552 = vst [vmem:[#allocation44_spill] sm:$0xff] %v13622_v21  ;;  %v10439_v60 = vld [vmem:[%s12366_s11 + $0x978] sm:$0xf]  ;;  %v9397_v21 = vld [vmem:[%s12366_s11 + $0x15c] sm:$0xf0] }
 0x24b   : > { %6550 = vmatpush.bf16.msra.mxu1 %v10104_v1  ;;  %v10752_v1 = vor.u32 %v11649_v23, %v10751_v27  ;;  %v10440_v46 = vor.u32 %v11571_v31, %v10439_v60  ;;  %v10427_v27 = vld [vmem:[%s12366_s11 + $0x960] sm:$0xf]  ;;  %v11568_v23 = vld [vmem:[%s12366_s11 + $0x968] sm:$0xf0] }
 0x24c   : > { %6564 = vmatpush.bf16.msra.mxu2 %v10200_v26  ;;  %v10643_v26 = vld [vmem:[%s12366_s11 + $0xb10] sm:$0xf] }
 0x24d   : > { %6578 = vmatpush.bf16.msra.mxu3 %v10296_v36  ;;  %v11646_v36 = vld [vmem:[%s12366_s11 + $0xbd8] sm:$0xf0]  ;;  %v10644_v11 = vor.u32 %v11622_v40, %v10643_v26  ;;  %v11616_v26 = vld [vmem:[%s12366_s11 + $0xae8] sm:$0xf0]  ;;  %v13648_v40 = vpop.f32.mrf.mxu3 }
 0x24e   : > { %6537 = vmatpush.bf16.msra.mxu0 %v9996_v12  ;;  %v10535_v12 = vld [vmem:[%s12366_s11 + $0xa38] sm:$0xf]  ;;  %v10740_v14 = vor.u32 %v11646_v36, %v10739_v61  ;;  %14555 = vst [vmem:[#allocation47_spill] sm:$0xff] %v13648_v40  ;;  %v10715_v36 = vld [vmem:[%s12366_s11 + $0xba0] sm:$0xf] }
 0x24f   : > { %6551 = vmatpush.bf16.msra.mxu1 %v10092_v54  ;;  %v11619_v54 = vld [vmem:[%s12366_s11 + $0xb00] sm:$0xf0]  ;;  %v10536_v25 = vor.u32 %v11595_v42, %v10535_v12  ;;  %v3769_v60 = vpop.f32.mrf.mxu1  ;;  %v11565_v42 = vld [vmem:[%s12366_s11 + $0x950] sm:$0xf0] }
 0x250   : > { %6565 = vmatpush.bf16.msra.mxu2 %v10188_v28  ;;  %v10632_v28 = vor.u32 %v11619_v54, %v10631_v41  ;;  %v10511_v41 = vld [vmem:[%s12366_s11 + $0xa08] sm:$0xf]  ;;  %v11285_v40 = vld [vmem:[%s12366_s11 + $0x94] sm:$0xf] }
 0x251   : > { %6579 = vmatpush.bf16.msra.mxu3 %v10284_v50  ;;  %6538 = vmatmul.bf16.vlgmr.msra.gmra.mxu0 %v12688_v5  ;;  %v10523_v50 = vld [vmem:[%s12366_s11 + $0xa20] sm:$0xf]  ;;  %v3755_v61 = vpop.f32.mrf.mxu0 }
 0x252   : > { %6586 = vmatpush.bf16.msrb.mxu0 %v10464_v43  ;;  %6552 = vmatmul.bf16.vlgmr.msra.gmra.mxu1 %v12695_v15  ;;  %v13643_v43 = vpop.f32.mrf.mxu2 }
 0x253   : > { %6600 = vmatpush.bf16.msrb.mxu1 %v10560_v57  ;;  %6566 = vmatmul.bf16.vlgmr.msra.gmra.mxu2 %v12693_v13  ;;  %14554 = vst [vmem:[#allocation46_spill] sm:$0xff] %v13643_v43  ;;  %v10728_v57 = vor.u32 %v11643_v2, %v10727_v47  ;;  %v11589_v2 = vld [vmem:[%s12366_s11 + $0xa10] sm:$0xf0]  ;;  %v9301_v43 = vld [vmem:[%s12366_s11 + $0x9c] sm:$0xf0] }
 0x254   : > { %6614 = vmatpush.bf16.msrb.mxu2 %v10656_v63  ;;  %6580 = vmatmul.bf16.vlgmr.msra.gmra.mxu3 %v12699_v17  ;;  %v11592_v63 = vld [vmem:[%s12366_s11 + $0xa28] sm:$0xf0] }
 0x255   : > { %6628 = vmatpush.bf16.msrb.mxu3 %v10752_v1  ;;  %v10619_v1 = vld [vmem:[%s12366_s11 + $0xae0] sm:$0xf]  ;;  %v10524_v31 = vor.u32 %v11592_v63, %v10523_v50  ;;  %v11562_v63 = vld [vmem:[%s12366_s11 + $0x938] sm:$0xf0] }
 0x256   : > { %6587 = vmatpush.bf16.msrb.mxu0 %v10452_v56  ;;  %v11640_v56 = vld [vmem:[%s12366_s11 + $0xba8] sm:$0xf0]  ;;  %v10620_v12 = vor.u32 %v11616_v26, %v10619_v1  ;;  %v10499_v1 = vld [vmem:[%s12366_s11 + $0x9f0] sm:$0xf] }
 0x257   : > { %6601 = vmatpush.bf16.msrb.mxu1 %v10548_v55  ;;  %v3756_v55 = vadd.f32 %v3755_v61, %v13590_v10  ;;  %v10716_v54 = vor.u32 %v11640_v56, %v10715_v36  ;;  %v11613_v10 = vld [vmem:[%s12366_s11 + $0xad0] sm:$0xf0]  ;;  %v11586_v36 = vld [vmem:[%s12366_s11 + $0x9f8] sm:$0xf0]  ;;  %v10595_v56 = vld [vmem:[%s12366_s11 + $0xab0] sm:$0xf] }
 0x258   : > { %6615 = vmatpush.bf16.msrb.mxu2 %v10644_v11  ;;  %v10428_v11 = vor.u32 %v11568_v23, %v10427_v27  ;;  %v10703_v27 = vld [vmem:[%s12366_s11 + $0xb88] sm:$0xf]  ;;  %v10512_v23 = vor.u32 %v11589_v2, %v10511_v41  ;;  %v10500_v41 = vor.u32 %v11586_v36, %v10499_v1  ;;  %v10391_v2 = vld [vmem:[%s12366_s11 + $0x918] sm:$0xf]  ;;  %v11556_v1 = vld [vmem:[%s12366_s11 + $0x908] sm:$0xf0] }
 0x259   : > { %6629 = vmatpush.bf16.msrb.mxu3 %v10740_v14  ;;  %v10415_v14 = vld [vmem:[%s12366_s11 + $0x948] sm:$0xf]  ;;  %v3770_v47 = vadd.f32 %v3769_v60, %v3756_v55  ;;  %v11610_v55 = vld [vmem:[%s12366_s11 + $0xab8] sm:$0xf0]  ;;  %v3797_v60 = vpop.f32.mrf.mxu3  ;;  %v10475_v36 = vld [vmem:[%s12366_s11 + $0x9c0] sm:$0xf] }
 0x25a   : > { %6588 = vmatpush.bf16.msrb.mxu0 %v10440_v46  ;;  %v10607_v46 = vld [vmem:[%s12366_s11 + $0xac8] sm:$0xf]  ;;  %v3783_v61 = vpop.f32.mrf.mxu2 }
 0x25b   : > { %6602 = vmatpush.bf16.msrb.mxu1 %v10536_v25  ;;  %v11637_v25 = vld [vmem:[%s12366_s11 + $0xb90] sm:$0xf0]  ;;  %v10608_v50 = vor.u32 %v11613_v10, %v10607_v46  ;;  %v10487_v46 = vld [vmem:[%s12366_s11 + $0x9d8] sm:$0xf] }
 0x25c   : > { %6616 = vmatpush.bf16.msrb.mxu2 %v10632_v28  ;;  %v10416_v28 = vor.u32 %v11565_v42, %v10415_v14  ;;  %v10704_v26 = vor.u32 %v11637_v25, %v10703_v27  ;;  %v11583_v27 = vld [vmem:[%s12366_s11 + $0x9e0] sm:$0xf0]  ;;  %v10583_v25 = vld [vmem:[%s12366_s11 + $0xa98] sm:$0xf] }
 0x25d   : > { %6630 = vmatpush.bf16.msrb.mxu3 %v10728_v57  ;;  %v10403_v57 = vld [vmem:[%s12366_s11 + $0x930] sm:$0xf] }
 0x25e   : > { %6589 = vmatpush.bf16.msrb.mxu0 %v10428_v11  ;;  %v3784_v11 = vadd.f32 %v3783_v61, %v3770_v47  ;;  %v10404_v14 = vor.u32 %v11562_v63, %v10403_v57  ;;  %v11559_v47 = vld [vmem:[%s12366_s11 + $0x920] sm:$0xf0]  ;;  %v10379_v63 = vld [vmem:[%s12366_s11 + $0x900] sm:$0xf] }
 0x25f   : > { %6603 = vmatpush.bf16.msrb.mxu1 %v10524_v31  ;;  %v10691_v31 = vld [vmem:[%s12366_s11 + $0xb70] sm:$0xf]  ;;  %v10392_v57 = vor.u32 %v11559_v47, %v10391_v2  ;;  %v9313_v2 = vld [vmem:[%s12366_s11 + $0xb4] sm:$0xf0]  ;;  %v11312_v47 = vld [vmem:[%s12366_s11 + $0x16c] sm:$0xf] }
 0x260   : > { %6617 = vmatpush.bf16.msrb.mxu2 %v10620_v12  ;;  %v11634_v12 = vld [vmem:[%s12366_s11 + $0xb78] sm:$0xf0]  ;;  %v13669_v42 = vadd.f32 %v3797_v60, %v3784_v11  ;;  %v11604_v60 = vld [vmem:[%s12366_s11 + $0xa88] sm:$0xf0] }
 0x261   : > { %6631 = vmatpush.bf16.msrb.mxu3 %v10716_v54  ;;  %v10596_v54 = vor.u32 %v11610_v55, %v10595_v56  ;;  %v10692_v10 = vor.u32 %v11634_v12, %v10691_v31  ;;  %v11580_v56 = vld [vmem:[%s12366_s11 + $0x9c8] sm:$0xf0]  ;;  %v10571_v55 = vld [vmem:[%s12366_s11 + $0xa80] sm:$0xf] }
 0x262   : > { %6590 = vmatpush.bf16.msrb.mxu0 %v10416_v28  ;;  %v11607_v28 = vld [vmem:[%s12366_s11 + $0xaa0] sm:$0xf0]  ;;  %v10667_v31 = vld [vmem:[%s12366_s11 + $0xb40] sm:$0xf]  ;;  %v11628_v12 = vld [vmem:[%s12366_s11 + $0xb48] sm:$0xf0] }
 0x263   : > { %6604 = vmatpush.bf16.msrb.mxu1 %v10512_v23  ;;  %v10679_v23 = vld [vmem:[%s12366_s11 + $0xb58] sm:$0xf]  ;;  %v10584_v61 = vor.u32 %v11607_v28, %v10583_v25  ;;  %v10572_v25 = vor.u32 %v11604_v60, %v10571_v55  ;;  %v11360_v28 = vld [vmem:[%s12366_s11 + $0x2ec] sm:$0xf]  ;;  %v11357_v55 = vld [vmem:[%s12366_s11 + $0x2d4] sm:$0xf]  ;;  %v13705_v60 = vpop.f32.mrf.mxu1 }
 0x264   : > { %6618 = vmatpush.bf16.msrb.mxu2 %v10608_v50  ;;  %v11631_v50 = vld [vmem:[%s12366_s11 + $0xb60] sm:$0xf0]  ;;  %14557 = vst [vmem:[#allocation49_spill] sm:$0xff] %v13705_v60  ;;  %v9781_v60 = vld [vmem:[%s12366_s11 + $0x45c] sm:$0xf0] }
 0x265   : > { %6632 = vmatpush.bf16.msrb.mxu3 %v10704_v26  ;;  %v10488_v26 = vor.u32 %v11583_v27, %v10487_v46  ;;  %v10680_v11 = vor.u32 %v11631_v50, %v10679_v23  ;;  %v11336_v46 = vld [vmem:[%s12366_s11 + $0x22c] sm:$0xf]  ;;  %v9505_v27 = vld [vmem:[%s12366_s11 + $0x234] sm:$0xf0]  ;;  %v10668_v50 = vor.u32 %v11628_v12, %v10667_v31  ;;  %v9304_v31 = vor.u32 %v11285_v40, %v9301_v43 }
 0x266   : > { %6591 = vmatpush.bf16.msrb.mxu0 %v10404_v14  ;;  %v11288_v14 = vld [vmem:[%s12366_s11 + $0xac] sm:$0xf]  ;;  %v9601_v23 = vld [vmem:[%s12366_s11 + $0x2f4] sm:$0xf0]  ;;  %v9400_v12 = vor.u32 %v11309_v3, %v9397_v21  ;;  %v11354_v21 = vld [vmem:[%s12366_s11 + $0x2bc] sm:$0xf] }
 0x267   : > { %6605 = vmatpush.bf16.msrb.mxu1 %v10500_v41  ;;  %v10380_v41 = vor.u32 %v11556_v1, %v10379_v63  ;;  %v9508_v1 = vor.u32 %v11336_v46, %v9505_v27  ;;  %v9385_v46 = vld [vmem:[%s12366_s11 + $0x144] sm:$0xf0]  ;;  %v11330_v27 = vld [vmem:[%s12366_s11 + $0x1fc] sm:$0xf] }
 0x268   : > { %6619 = vmatpush.bf16.msrb.mxu2 %v10596_v54  ;;  %v9409_v54 = vld [vmem:[%s12366_s11 + $0x174] sm:$0xf0]  ;;  %v9577_v3 = vld [vmem:[%s12366_s11 + $0x2c4] sm:$0xf0] }
 0x269   : > { %6633 = vmatpush.bf16.msrb.mxu3 %v10692_v10  ;;  %v10476_v10 = vor.u32 %v11580_v56, %v10475_v36  ;;  %v9412_v63 = vor.u32 %v11312_v47, %v9409_v54  ;;  %v9493_v36 = vld [vmem:[%s12366_s11 + $0x21c] sm:$0xf0]  ;;  %v13701_v56 = vpop.f32.mrf.mxu0  ;;  %v9289_v47 = vld [vmem:[%s12366_s11 + $0x84] sm:$0xf0] }
 0x26a   : > { %6592 = vmatpush.bf16.msrb.mxu0 %v10392_v57  ;;  %v9316_v57 = vor.u32 %v11288_v14, %v9313_v2  ;;  %14556 = vst [vmem:[#allocation48_spill] sm:$0xff] %v13701_v56  ;;  %v11282_v2 = vld [vmem:[%s12366_s11 + $0x7c] sm:$0xf]  ;;  %v11516_v56 = vld [vmem:[%s12366_s11 + $0x7cc] sm:$0xf] }
 0x26b   : > { %6606 = vmatpush.bf16.msrb.mxu1 %v10488_v26  ;;  %v9604_v26 = vor.u32 %v11360_v28, %v9601_v23  ;;  %v9292_v43 = vor.u32 %v11282_v2, %v9289_v47  ;;  %v11279_v28 = vld [vmem:[%s12366_s11 + $0x64] sm:$0xf]  ;;  %v9277_v23 = vld [vmem:[%s12366_s11 + $0x6c] sm:$0xf0] }
 0x26c   : > { %6620 = vmatpush.bf16.msrb.mxu2 %v10584_v61  ;;  %v11333_v61 = vld [vmem:[%s12366_s11 + $0x214] sm:$0xf] }
 0x26d   : > { %6634 = vmatpush.bf16.msrb.mxu3 %v10680_v11  ;;  %v9589_v11 = vld [vmem:[%s12366_s11 + $0x2dc] sm:$0xf0]  ;;  %v9496_v14 = vor.u32 %v11333_v61, %v9493_v36  ;;  %v9469_v61 = vld [vmem:[%s12366_s11 + $0x1ec] sm:$0xf0]  ;;  %v13727_v36 = vpop.f32.mrf.mxu3 }
 0x26e   : > { %6593 = vmatpush.bf16.msrb.mxu0 %v10380_v41  ;;  %v11306_v41 = vld [vmem:[%s12366_s11 + $0x13c] sm:$0xf]  ;;  %v9592_v54 = vor.u32 %v11357_v55, %v9589_v11  ;;  %14559 = vst [vmem:[#allocation51_spill] sm:$0xff] %v13727_v36  ;;  %v11351_v11 = vld [vmem:[%s12366_s11 + $0x2a4] sm:$0xf] }
 0x26f   : > { %6607 = vmatpush.bf16.msrb.mxu1 %v10476_v10  ;;  %v9481_v10 = vld [vmem:[%s12366_s11 + $0x204] sm:$0xf0]  ;;  %v9388_v40 = vor.u32 %v11306_v41, %v9385_v46  ;;  %v3825_v2 = vpop.f32.mrf.mxu1  ;;  %v9265_v46 = vld [vmem:[%s12366_s11 + $0x54] sm:$0xf0]  ;;  %v9685_v36 = vld [vmem:[%s12366_s11 + $0x39c] sm:$0xf0] }
 0x270   : > { %6621 = vmatpush.bf16.msrb.mxu2 %v10572_v25  ;;  %v9484_v25 = vor.u32 %v11330_v27, %v9481_v10  ;;  %v11300_v27 = vld [vmem:[%s12366_s11 + $0x10c] sm:$0xf] }
 0x271   : > { %6635 = vmatpush.bf16.msrb.mxu3 %v10668_v50  ;;  %6594 = vmatmul.bf16.vlgmr.msrb.gmra.mxu0 %v12764_v6  ;;  %v11303_v50 = vld [vmem:[%s12366_s11 + $0x124] sm:$0xf]  ;;  %v3811_v55 = vpop.f32.mrf.mxu0 }
 0x272   : > { %6642 = vmatpush.bf16.msra.mxu0 %v9316_v57  ;;  %6608 = vmatmul.bf16.vlgmr.msrb.gmra.mxu1 %v12771_v18  ;;  %v13722_v57 = vpop.f32.mrf.mxu2 }
 0x273   : > { %6656 = vmatpush.bf16.msra.mxu1 %v9412_v63  ;;  %6622 = vmatmul.bf16.vlgmr.msrb.gmra.mxu2 %v12769_v16  ;;  %14558 = vst [vmem:[#allocation50_spill] sm:$0xff] %v13722_v57  ;;  %v9580_v63 = vor.u32 %v11354_v21, %v9577_v3  ;;  %v9361_v3 = vld [vmem:[%s12366_s11 + $0x114] sm:$0xf0]  ;;  %v11405_v57 = vld [vmem:[%s12366_s11 + $0x454] sm:$0xf] }
 0x274   : > { %6670 = vmatpush.bf16.msra.mxu2 %v9508_v1  ;;  %6636 = vmatmul.bf16.vlgmr.msrb.gmra.mxu3 %v12775_v8  ;;  %v9373_v1 = vld [vmem:[%s12366_s11 + $0x12c] sm:$0xf0] }
 0x275   : > { %6684 = vmatpush.bf16.msra.mxu3 %v9604_v26  ;;  %v11327_v26 = vld [vmem:[%s12366_s11 + $0x1e4] sm:$0xf]  ;;  %v9376_v47 = vor.u32 %v11303_v50, %v9373_v1  ;;  %v9253_v1 = vld [vmem:[%s12366_s11 + $0x3c] sm:$0xf0] }
 0x276   : > { %6643 = vmatpush.bf16.msra.mxu0 %v9304_v31  ;;  %v9565_v31 = vld [vmem:[%s12366_s11 + $0x2ac] sm:$0xf0]  ;;  %v9472_v41 = vor.u32 %v11327_v26, %v9469_v61  ;;  %v11297_v26 = vld [vmem:[%s12366_s11 + $0xf4] sm:$0xf] }
 0x277   : > { %6657 = vmatpush.bf16.msra.mxu1 %v9400_v12  ;;  %v3812_v12 = vadd.f32 %v3811_v55, %v13669_v42  ;;  %v9568_v10 = vor.u32 %v11351_v11, %v9565_v31  ;;  %v9457_v42 = vld [vmem:[%s12366_s11 + $0x1d4] sm:$0xf0]  ;;  %v9349_v11 = vld [vmem:[%s12366_s11 + $0xfc] sm:$0xf0]  ;;  %v11321_v31 = vld [vmem:[%s12366_s11 + $0x1b4] sm:$0xf] }
 0x278   : > { %6671 = vmatpush.bf16.msra.mxu2 %v9496_v14  ;;  %v9280_v14 = vor.u32 %v11279_v28, %v9277_v23  ;;  %v11348_v28 = vld [vmem:[%s12366_s11 + $0x28c] sm:$0xf]  ;;  %v9364_v23 = vor.u32 %v11300_v27, %v9361_v3  ;;  %v9352_v27 = vor.u32 %v11297_v26, %v9349_v11  ;;  %v11270_v3 = vld [vmem:[%s12366_s11 + $0x1c] sm:$0xf]  ;;  %v9229_v26 = vld [vmem:[%s12366_s11 + $0xc] sm:$0xf0] }
 0x279   : > { %6685 = vmatpush.bf16.msra.mxu3 %v9592_v54  ;;  %v11276_v54 = vld [vmem:[%s12366_s11 + $0x4c] sm:$0xf]  ;;  %v3826_v21 = vadd.f32 %v3825_v2, %v3812_v12  ;;  %v9445_v12 = vld [vmem:[%s12366_s11 + $0x1bc] sm:$0xf0]  ;;  %v3853_v2 = vpop.f32.mrf.mxu3  ;;  %v11291_v11 = vld [vmem:[%s12366_s11 + $0xc4] sm:$0xf] }
 0x27a   : > { %6644 = vmatpush.bf16.msra.mxu0 %v9292_v43  ;;  %v11324_v43 = vld [vmem:[%s12366_s11 + $0x1cc] sm:$0xf]  ;;  %v3839_v55 = vpop.f32.mrf.mxu2 }
 0x27b   : > { %6658 = vmatpush.bf16.msra.mxu1 %v9388_v40  ;;  %v9553_v40 = vld [vmem:[%s12366_s11 + $0x294] sm:$0xf0]  ;;  %v9460_v50 = vor.u32 %v11324_v43, %v9457_v42  ;;  %v11294_v43 = vld [vmem:[%s12366_s11 + $0xdc] sm:$0xf] }
 0x27c   : > { %6672 = vmatpush.bf16.msra.mxu2 %v9484_v25  ;;  %v9268_v25 = vor.u32 %v11276_v54, %v9265_v46  ;;  %v9556_v61 = vor.u32 %v11348_v28, %v9553_v40  ;;  %v9337_v28 = vld [vmem:[%s12366_s11 + $0xe4] sm:$0xf0]  ;;  %v11318_v40 = vld [vmem:[%s12366_s11 + $0x19c] sm:$0xf] }
 0x27d   : > { %6686 = vmatpush.bf16.msra.mxu3 %v9580_v63  ;;  %v11273_v63 = vld [vmem:[%s12366_s11 + $0x34] sm:$0xf] }
 0x27e   : > { %6645 = vmatpush.bf16.msra.mxu0 %v9280_v14  ;;  %v3840_v14 = vadd.f32 %v3839_v55, %v3826_v21  ;;  %v9256_v54 = vor.u32 %v11273_v63, %v9253_v1  ;;  %v9241_v21 = vld [vmem:[%s12366_s11 + $0x24] sm:$0xf0]  ;;  %v11267_v1 = vld [vmem:[%s12366_s11 + $0x4] sm:$0xf] }
 0x27f   : > { %6659 = vmatpush.bf16.msra.mxu1 %v9376_v47  ;;  %v11345_v47 = vld [vmem:[%s12366_s11 + $0x274] sm:$0xf]  ;;  %v9244_v63 = vor.u32 %v11270_v3, %v9241_v21  ;;  %v9697_v3 = vld [vmem:[%s12366_s11 + $0x3b4] sm:$0xf0]  ;;  %v11408_v21 = vld [vmem:[%s12366_s11 + $0x46c] sm:$0xf] }
 0x280   : > { %6673 = vmatpush.bf16.msra.mxu2 %v9472_v41  ;;  %v9541_v41 = vld [vmem:[%s12366_s11 + $0x27c] sm:$0xf0]  ;;  %v13748_v46 = vadd.f32 %v3853_v2, %v3840_v14  ;;  %v9421_v2 = vld [vmem:[%s12366_s11 + $0x18c] sm:$0xf0] }
 0x281   : > { %6687 = vmatpush.bf16.msra.mxu3 %v9568_v10  ;;  %v9448_v10 = vor.u32 %v11321_v31, %v9445_v12  ;;  %v9544_v42 = vor.u32 %v11345_v47, %v9541_v41  ;;  %v9325_v31 = vld [vmem:[%s12366_s11 + $0xcc] sm:$0xf0]  ;;  %v11315_v12 = vld [vmem:[%s12366_s11 + $0x184] sm:$0xf] }
 0x282   : > { %6646 = vmatpush.bf16.msra.mxu0 %v9268_v25  ;;  %14560 = vst [vmem:[#allocation52_spill] sm:$0xff] %v13748_v46  ;;  %v9433_v25 = vld [vmem:[%s12366_s11 + $0x1a4] sm:$0xf0]  ;;  %v11339_v47 = vld [vmem:[%s12366_s11 + $0x244] sm:$0xf] }
 0x283   : > { %6660 = vmatpush.bf16.msra.mxu1 %v9364_v23  ;;  %v11342_v23 = vld [vmem:[%s12366_s11 + $0x25c] sm:$0xf]  ;;  %v9436_v55 = vor.u32 %v11318_v40, %v9433_v25  ;;  %v9517_v41 = vld [vmem:[%s12366_s11 + $0x24c] sm:$0xf0]  ;;  %v9424_v40 = vor.u32 %v11315_v12, %v9421_v2  ;;  %v11456_v25 = vld [vmem:[%s12366_s11 + $0x5ec] sm:$0xf]  ;;  %v13784_v2 = vpop.f32.mrf.mxu1 }
 0x284   : > { %6674 = vmatpush.bf16.msra.mxu2 %v9460_v50  ;;  %v9529_v50 = vld [vmem:[%s12366_s11 + $0x264] sm:$0xf0]  ;;  %v11381_v46 = vld [vmem:[%s12366_s11 + $0x394] sm:$0xf]  ;;  %v9973_v12 = vld [vmem:[%s12366_s11 + $0x5dc] sm:$0xf0] }
 0x285   : > { %6688 = vmatpush.bf16.msra.mxu3 %v9556_v61  ;;  %v9340_v61 = vor.u32 %v11294_v43, %v9337_v28  ;;  %v9532_v14 = vor.u32 %v11342_v23, %v9529_v50  ;;  %v11432_v43 = vld [vmem:[%s12366_s11 + $0x52c] sm:$0xf]  ;;  %v9889_v28 = vld [vmem:[%s12366_s11 + $0x534] sm:$0xf0]  ;;  %v9520_v50 = vor.u32 %v11339_v47, %v9517_v41  ;;  %14562 = vst [vmem:[#allocation54_spill] sm:$0xff] %v13784_v2 }
 0x286   : > { %6647 = vmatpush.bf16.msra.mxu0 %v9256_v54  ;;  %v11384_v54 = vld [vmem:[%s12366_s11 + $0x3ac] sm:$0xf]  ;;  %v9985_v23 = vld [vmem:[%s12366_s11 + $0x5f4] sm:$0xf0]  ;;  %v9688_v47 = vor.u32 %v11381_v46, %v9685_v36  ;;  %v9784_v41 = vor.u32 %v11405_v57, %v9781_v60  ;;  %v11375_v46 = vld [vmem:[%s12366_s11 + $0x364] sm:$0xf] }
 0x287   : > { %6661 = vmatpush.bf16.msra.mxu1 %v9352_v27  ;;  %v9232_v27 = vor.u32 %v11267_v1, %v9229_v26  ;;  %v9892_v26 = vor.u32 %v11432_v43, %v9889_v28  ;;  %v9769_v43 = vld [vmem:[%s12366_s11 + $0x444] sm:$0xf0]  ;;  %v11426_v28 = vld [vmem:[%s12366_s11 + $0x4fc] sm:$0xf]  ;;  %v11477_v2 = vld [vmem:[%s12366_s11 + $0x694] sm:$0xf] }
 0x288   : > { %6675 = vmatpush.bf16.msra.mxu2 %v9448_v10  ;;  %v9793_v10 = vld [vmem:[%s12366_s11 + $0x474] sm:$0xf0] }
 0x289   : > { %6689 = vmatpush.bf16.msra.mxu3 %v9544_v42  ;;  %v9328_v42 = vor.u32 %v11291_v11, %v9325_v31  ;;  %v9796_v1 = vor.u32 %v11408_v21, %v9793_v10  ;;  %v9877_v11 = vld [vmem:[%s12366_s11 + $0x51c] sm:$0xf0]  ;;  %v11453_v31 = vld [vmem:[%s12366_s11 + $0x5d4] sm:$0xf]  ;;  %v9673_v21 = vld [vmem:[%s12366_s11 + $0x384] sm:$0xf0] }
 0x28a   : > { %6648 = vmatpush.bf16.msra.mxu0 %v9244_v63  ;;  %v9700_v63 = vor.u32 %v11384_v54, %v9697_v3  ;;  %v11378_v3 = vld [vmem:[%s12366_s11 + $0x37c] sm:$0xf]  ;;  %v9976_v10 = vor.u32 %v11453_v31, %v9973_v12  ;;  %v11447_v31 = vld [vmem:[%s12366_s11 + $0x5a4] sm:$0xf]  ;;  %v9949_v12 = vld [vmem:[%s12366_s11 + $0x5ac] sm:$0xf0] }
 0x28b   : > { %6662 = vmatpush.bf16.msra.mxu1 %v9340_v61  ;;  %v9988_v61 = vor.u32 %v11456_v25, %v9985_v23  ;;  %v9961_v25 = vld [vmem:[%s12366_s11 + $0x5c4] sm:$0xf0]  ;;  %v9676_v60 = vor.u32 %v11378_v3, %v9673_v21  ;;  %v9661_v23 = vld [vmem:[%s12366_s11 + $0x36c] sm:$0xf0] }
 0x28c   : > { %6676 = vmatpush.bf16.msra.mxu2 %v9436_v55  ;;  %v11429_v55 = vld [vmem:[%s12366_s11 + $0x514] sm:$0xf] }
 0x28d   : > { %6690 = vmatpush.bf16.msra.mxu3 %v9532_v14  ;;  %v13782_v14 = vpop.f32.mrf.mxu0  ;;  %v9880_v54 = vor.u32 %v11429_v55, %v9877_v11  ;;  %v9853_v55 = vld [vmem:[%s12366_s11 + $0x4ec] sm:$0xf0]  ;;  %v13806_v11 = vpop.f32.mrf.mxu3 }
 0x28e   : > { %6649 = vmatpush.bf16.msra.mxu0 %v9232_v27  ;;  %14561 = vst [vmem:[#allocation53_spill] sm:$0xff] %v13782_v14  ;;  %v11402_v27 = vld [vmem:[%s12366_s11 + $0x43c] sm:$0xf]  ;;  %v10069_v14 = vld [vmem:[%s12366_s11 + $0x69c] sm:$0xf0] }
 0x28f   : > { %6663 = vmatpush.bf16.msra.mxu1 %v9328_v42  ;;  %v9865_v42 = vld [vmem:[%s12366_s11 + $0x504] sm:$0xf0]  ;;  %v9772_v57 = vor.u32 %v11402_v27, %v9769_v43  ;;  %14564 = vst [vmem:[#allocation56_spill] sm:$0xff] %v13806_v11  ;;  %v11372_v27 = vld [vmem:[%s12366_s11 + $0x34c] sm:$0xf] }
 0x290   : > { %6677 = vmatpush.bf16.msra.mxu2 %v9424_v40  ;;  %v11450_v40 = vld [vmem:[%s12366_s11 + $0x5bc] sm:$0xf]  ;;  %v9868_v36 = vor.u32 %v11426_v28, %v9865_v42  ;;  %v11396_v43 = vld [vmem:[%s12366_s11 + $0x40c] sm:$0xf]  ;;  %v9952_v42 = vor.u32 %v11447_v31, %v9949_v12  ;;  %v9733_v31 = vld [vmem:[%s12366_s11 + $0x3fc] sm:$0xf0] }
 0x291   : > { %6691 = vmatpush.bf16.msra.mxu3 %v9520_v50  ;;  %6650 = vmatmul.bf16.vlgmr.msra.gmra.mxu0 %v12543_v34  ;;  %v11399_v50 = vld [vmem:[%s12366_s11 + $0x424] sm:$0xf]  ;;  %v11417_v12 = vld [vmem:[%s12366_s11 + $0x4b4] sm:$0xf] }
 0x292   : > { %6698 = vmatpush.bf16.msrb.mxu0 %v9700_v63  ;;  %6664 = vmatmul.bf16.vlgmr.msra.gmra.mxu1 %v12555_v45  ;;  %v13801_v63 = vpop.f32.mrf.mxu2  ;;  %v11441_v11 = vld [vmem:[%s12366_s11 + $0x574] sm:$0xf] }
 0x293   : > { %6712 = vmatpush.bf16.msrb.mxu1 %v9796_v1  ;;  %6678 = vmatmul.bf16.vlgmr.msra.gmra.mxu2 %v12548_v30  ;;  %14563 = vst [vmem:[#allocation55_spill] sm:$0xff] %v13801_v63  ;;  %v9964_v1 = vor.u32 %v11450_v40, %v9961_v25  ;;  %v9745_v40 = vld [vmem:[%s12366_s11 + $0x414] sm:$0xf0]  ;;  %v11420_v25 = vld [vmem:[%s12366_s11 + $0x4cc] sm:$0xf] }
 0x294   : > { %6726 = vmatpush.bf16.msrb.mxu2 %v9892_v26  ;;  %6692 = vmatmul.bf16.vlgmr.msra.gmra.mxu3 %v12560_v52  ;;  %v9757_v26 = vld [vmem:[%s12366_s11 + $0x42c] sm:$0xf0] }
 0x295   : > { %6740 = vmatpush.bf16.msrb.mxu3 %v9988_v61  ;;  %v11423_v61 = vld [vmem:[%s12366_s11 + $0x4e4] sm:$0xf]  ;;  %v9760_v3 = vor.u32 %v11399_v50, %v9757_v26  ;;  %v11369_v26 = vld [vmem:[%s12366_s11 + $0x334] sm:$0xf] }
 0x296   : > { %6699 = vmatpush.bf16.msrb.mxu0 %v9688_v47  ;;  %v9664_v47 = vor.u32 %v11375_v46, %v9661_v23  ;;  %v9856_v21 = vor.u32 %v11423_v61, %v9853_v55  ;;  %v11444_v46 = vld [vmem:[%s12366_s11 + $0x58c] sm:$0xf]  ;;  %v9748_v23 = vor.u32 %v11396_v43, %v9745_v40  ;;  %v9637_v61 = vld [vmem:[%s12366_s11 + $0x33c] sm:$0xf0]  ;;  %v9625_v40 = vld [vmem:[%s12366_s11 + $0x324] sm:$0xf0] }
 0x297   : > { %6713 = vmatpush.bf16.msrb.mxu1 %v9784_v41  ;;  %v6427_v41 = vpop.f32.mrf.mxu0 }
 0x298   : > { %6727 = vmatpush.bf16.msrb.mxu2 %v9880_v54  ;;  %v6441_v54 = vpop.f32.mrf.mxu1 }
 0x299   : > { %6741 = vmatpush.bf16.msrb.mxu3 %v9976_v10  ;;  %v9649_v10 = vld [vmem:[%s12366_s11 + $0x354] sm:$0xf0]  ;;  %v6442_v28 = vadd.f32 %v6441_v54, %v6427_v41  ;;  %v9829_v41 = vld [vmem:[%s12366_s11 + $0x4bc] sm:$0xf0] }
 0x29a   : > { %6700 = vmatpush.bf16.msrb.mxu0 %v9676_v60  ;;  %v9841_v60 = vld [vmem:[%s12366_s11 + $0x4d4] sm:$0xf0]  ;;  %v6455_v54 = vpop.f32.mrf.mxu2  ;;  %v9832_v43 = vor.u32 %v11417_v12, %v9829_v41  ;;  %v9709_v12 = vld [vmem:[%s12366_s11 + $0x3cc] sm:$0xf0]  ;;  %v11411_v41 = vld [vmem:[%s12366_s11 + $0x484] sm:$0xf] }
 0x29b   : > { %6714 = vmatpush.bf16.msrb.mxu1 %v9772_v57  ;;  %v9937_v57 = vld [vmem:[%s12366_s11 + $0x594] sm:$0xf0]  ;;  %v9844_v50 = vor.u32 %v11420_v25, %v9841_v60  ;;  %v11390_v25 = vld [vmem:[%s12366_s11 + $0x3dc] sm:$0xf] }
 0x29c   : > { %6728 = vmatpush.bf16.msrb.mxu2 %v9868_v36  ;;  %v9652_v36 = vor.u32 %v11372_v27, %v9649_v10  ;;  %v9940_v55 = vor.u32 %v11444_v46, %v9937_v57  ;;  %v6469_v27 = vpop.f32.mrf.mxu3  ;;  %v9721_v46 = vld [vmem:[%s12366_s11 + $0x3e4] sm:$0xf0]  ;;  %v11414_v57 = vld [vmem:[%s12366_s11 + $0x49c] sm:$0xf] }
 0x29d   : > { %6742 = vmatpush.bf16.msrb.mxu3 %v9964_v1  ;;  %v11393_v1 = vld [vmem:[%s12366_s11 + $0x3f4] sm:$0xf] }
 0x29e   : > { %6701 = vmatpush.bf16.msrb.mxu0 %v9664_v47  ;;  %v9925_v47 = vld [vmem:[%s12366_s11 + $0x57c] sm:$0xf0]  ;;  %v9736_v10 = vor.u32 %v11393_v1, %v9733_v31  ;;  %v9613_v1 = vld [vmem:[%s12366_s11 + $0x30c] sm:$0xf0]  ;;  %v11387_v31 = vld [vmem:[%s12366_s11 + $0x3c4] sm:$0xf] }
 0x29f   : > { %6715 = vmatpush.bf16.msrb.mxu1 %v9760_v3  ;;  %v6456_v3 = vadd.f32 %v6455_v54, %v6442_v28  ;;  %v9928_v28 = vor.u32 %v11441_v11, %v9925_v47  ;;  %v9724_v11 = vor.u32 %v11390_v25, %v9721_v46  ;;  %v9805_v47 = vld [vmem:[%s12366_s11 + $0x48c] sm:$0xf0]  ;;  %v11528_v25 = vld [vmem:[%s12366_s11 + $0x82c] sm:$0xf]  ;;  %v10273_v46 = vld [vmem:[%s12366_s11 + $0x834] sm:$0xf0]  ;;  %v13852_v63 = vpop.f32.mrf.mxu0 }
 0x2a0   : > { %6729 = vmatpush.bf16.msrb.mxu2 %v9856_v21  ;;  %v9640_v21 = vor.u32 %v11369_v26, %v9637_v61  ;;  %v11363_v61 = vld [vmem:[%s12366_s11 + $0x304] sm:$0xf] }
 0x2a1   : > { %6743 = vmatpush.bf16.msrb.mxu3 %v9952_v42  ;;  %v11366_v42 = vld [vmem:[%s12366_s11 + $0x31c] sm:$0xf]  ;;  %v13829_v60 = vadd.f32 %v6469_v27, %v6456_v3  ;;  %v11435_v3 = vld [vmem:[%s12366_s11 + $0x544] sm:$0xf]  ;;  %v11480_v27 = vld [vmem:[%s12366_s11 + $0x6ac] sm:$0xf] }
 0x2a2   : > { %6702 = vmatpush.bf16.msrb.mxu0 %v9652_v36  ;;  %v9817_v36 = vld [vmem:[%s12366_s11 + $0x4a4] sm:$0xf0]  ;;  %v9628_v26 = vor.u32 %v11366_v42, %v9625_v40  ;;  %v10081_v42 = vld [vmem:[%s12366_s11 + $0x6b4] sm:$0xf0]  ;;  %v11504_v40 = vld [vmem:[%s12366_s11 + $0x76c] sm:$0xf] }
 0x2a3   : > { %6716 = vmatpush.bf16.msrb.mxu1 %v9748_v23  ;;  %v11438_v23 = vld [vmem:[%s12366_s11 + $0x55c] sm:$0xf] }
 0x2a4   : > { %6730 = vmatpush.bf16.msrb.mxu2 %v9844_v50  ;;  %v9913_v50 = vld [vmem:[%s12366_s11 + $0x564] sm:$0xf0] }
 0x2a5   : > { %6744 = vmatpush.bf16.msrb.mxu3 %v9940_v55  ;;  %v9820_v55 = vor.u32 %v11414_v57, %v9817_v36  ;;  %v9916_v54 = vor.u32 %v11438_v23, %v9913_v50  ;;  %v9808_v57 = vor.u32 %v11411_v41, %v9805_v47  ;;  %v11552_v36 = vld [vmem:[%s12366_s11 + $0x8ec] sm:$0xf]  ;;  %v10369_v23 = vld [vmem:[%s12366_s11 + $0x8f4] sm:$0xf0]  ;;  %v10261_v41 = vld [vmem:[%s12366_s11 + $0x81c] sm:$0xf0] }
 0x2a6   : > { %6703 = vmatpush.bf16.msrb.mxu0 %v9640_v21  ;;  %v9901_v21 = vld [vmem:[%s12366_s11 + $0x54c] sm:$0xf0]  ;;  %v10357_v47 = vld [vmem:[%s12366_s11 + $0x8dc] sm:$0xf0] }
 0x2a7   : > { %6717 = vmatpush.bf16.msrb.mxu1 %v9736_v10  ;;  %v9616_v10 = vor.u32 %v11363_v61, %v9613_v1  ;;  %v9904_v50 = vor.u32 %v11435_v3, %v9901_v21  ;;  %v10276_v1 = vor.u32 %v11528_v25, %v10273_v46  ;;  %v13862_v3 = vpop.f32.mrf.mxu1  ;;  %v10072_v21 = vor.u32 %v11477_v2, %v10069_v14  ;;  %v10153_v46 = vld [vmem:[%s12366_s11 + $0x744] sm:$0xf0]  ;;  %v11546_v14 = vld [vmem:[%s12366_s11 + $0x8bc] sm:$0xf] }
 0x2a8   : > { %6731 = vmatpush.bf16.msrb.mxu2 %v9832_v43  ;;  %v10177_v43 = vld [vmem:[%s12366_s11 + $0x774] sm:$0xf0]  ;;  %v10345_v2 = vld [vmem:[%s12366_s11 + $0x8c4] sm:$0xf0] }
 0x2a9   : > { %6745 = vmatpush.bf16.msrb.mxu3 %v9928_v28  ;;  %v9712_v28 = vor.u32 %v11387_v31, %v9709_v12  ;;  %v10180_v61 = vor.u32 %v11504_v40, %v10177_v43  ;;  %v10165_v31 = vld [vmem:[%s12366_s11 + $0x75c] sm:$0xf0]  ;;  %v11525_v12 = vld [vmem:[%s12366_s11 + $0x814] sm:$0xf]  ;;  %v11474_v40 = vld [vmem:[%s12366_s11 + $0x67c] sm:$0xf] }
 0x2aa   : > { %6704 = vmatpush.bf16.msrb.mxu0 %v9628_v26  ;;  %v10084_v26 = vor.u32 %v11480_v27, %v10081_v42  ;;  %v10264_v42 = vor.u32 %v11525_v12, %v10261_v41  ;;  %v11498_v43 = vld [vmem:[%s12366_s11 + $0x73c] sm:$0xf]  ;;  %v10141_v12 = vld [vmem:[%s12366_s11 + $0x72c] sm:$0xf0]  ;;  %v11519_v41 = vld [vmem:[%s12366_s11 + $0x7e4] sm:$0xf] }
 0x2ab   : > { %6718 = vmatpush.bf16.msrb.mxu1 %v9724_v11  ;;  %v11501_v11 = vld [vmem:[%s12366_s11 + $0x754] sm:$0xf] }
 0x2ac   : > { %6732 = vmatpush.bf16.msrb.mxu2 %v9820_v55  ;;  %v10372_v55 = vor.u32 %v11552_v36, %v10369_v23  ;;  %v10168_v27 = vor.u32 %v11501_v11, %v10165_v31  ;;  %v13876_v23 = vpop.f32.mrf.mxu2  ;;  %v11495_v11 = vld [vmem:[%s12366_s11 + $0x724] sm:$0xf]  ;;  %v13881_v31 = vpop.f32.mrf.mxu3 }
 0x2ad   : > { %6746 = vmatpush.bf16.msrb.mxu3 %v9916_v54  ;;  %v11549_v54 = vld [vmem:[%s12366_s11 + $0x8d4] sm:$0xf] }
 0x2ae   : > { %6705 = vmatpush.bf16.msrb.mxu0 %v9616_v10  ;;  %v10057_v10 = vld [vmem:[%s12366_s11 + $0x684] sm:$0xf0]  ;;  %v10360_v25 = vor.u32 %v11549_v54, %v10357_v47  ;;  %v10237_v54 = vld [vmem:[%s12366_s11 + $0x7ec] sm:$0xf0]  ;;  %v6483_v47 = vpop.f32.mrf.mxu0 }
 0x2af   : > { %6719 = vmatpush.bf16.msrb.mxu1 %v9712_v28  ;;  %v11522_v28 = vld [vmem:[%s12366_s11 + $0x7fc] sm:$0xf]  ;;  %v10060_v36 = vor.u32 %v11474_v40, %v10057_v10  ;;  %v10144_v10 = vor.u32 %v11495_v11, %v10141_v12  ;;  %v10021_v12 = vld [vmem:[%s12366_s11 + $0x63c] sm:$0xf0] }
 0x2b0   : > { %6733 = vmatpush.bf16.msrb.mxu2 %v9808_v57  ;;  %v10249_v57 = vld [vmem:[%s12366_s11 + $0x804] sm:$0xf0] }
 0x2b1   : > { %6747 = vmatpush.bf16.msrb.mxu3 %v9904_v50  ;;  %6706 = vmatmul.bf16.vlgmr.msrb.gmra.mxu0 %v12612_v4  ;;  %v10156_v50 = vor.u32 %v11498_v43, %v10153_v46  ;;  %v10240_v43 = vor.u32 %v11519_v41, %v10237_v54  ;;  %v11468_v46 = vld [vmem:[%s12366_s11 + $0x64c] sm:$0xf]  ;;  %v11489_v41 = vld [vmem:[%s12366_s11 + $0x6f4] sm:$0xf] }
 0x2b2   : > { %6754 = vmatpush.bf16.msra.mxu0 %v10084_v26  ;;  %6720 = vmatmul.bf16.vlgmr.msrb.gmra.mxu1 %v12619_v7  ;;  %v10252_v26 = vor.u32 %v11522_v28, %v10249_v57  ;;  %v10033_v28 = vld [vmem:[%s12366_s11 + $0x654] sm:$0xf0]  ;;  %v11492_v57 = vld [vmem:[%s12366_s11 + $0x70c] sm:$0xf] }
 0x2b3   : > { %6768 = vmatpush.bf16.msra.mxu1 %v10180_v61  ;;  %6734 = vmatmul.bf16.vlgmr.msrb.gmra.mxu2 %v12617_v20  ;;  %v11471_v61 = vld [vmem:[%s12366_s11 + $0x664] sm:$0xf] }
 0x2b4   : > { %6782 = vmatpush.bf16.msra.mxu2 %v10276_v1  ;;  %6748 = vmatmul.bf16.vlgmr.msrb.gmra.mxu3 %v12623_v22  ;;  %v10045_v1 = vld [vmem:[%s12366_s11 + $0x66c] sm:$0xf0]  ;;  %v11597_v22 = vld [vmem:[%s12366_s11 + $0xa54] sm:$0xf] }
 0x2b5   : > { %6796 = vmatpush.bf16.msra.mxu3 %v10372_v55  ;;  %v10348_v55 = vor.u32 %v11546_v14, %v10345_v2  ;;  %v10048_v40 = vor.u32 %v11471_v61, %v10045_v1  ;;  %v11540_v61 = vld [vmem:[%s12366_s11 + $0x88c] sm:$0xf] }
 0x2b6   : > { %6755 = vmatpush.bf16.msra.mxu0 %v10072_v21  ;;  %v11543_v21 = vld [vmem:[%s12366_s11 + $0x8a4] sm:$0xf] }
 0x2b7   : > { %6769 = vmatpush.bf16.msra.mxu1 %v10168_v27  ;;  %v10333_v27 = vld [vmem:[%s12366_s11 + $0x8ac] sm:$0xf0] }
 0x2b8   : > { %6783 = vmatpush.bf16.msra.mxu2 %v10264_v42  ;;  %v6484_v42 = vadd.f32 %v6483_v47, %v13829_v60  ;;  %v10336_v14 = vor.u32 %v11543_v21, %v10333_v27  ;;  %v10225_v60 = vld [vmem:[%s12366_s11 + $0x7d4] sm:$0xf0]  ;;  %v6511_v47 = vpop.f32.mrf.mxu2  ;;  %v10117_v21 = vld [vmem:[%s12366_s11 + $0x6fc] sm:$0xf0]  ;;  %v11513_v27 = vld [vmem:[%s12366_s11 + $0x7b4] sm:$0xf] }
 0x2b9   : > { %6797 = vmatpush.bf16.msra.mxu3 %v10360_v25  ;;  %v6497_v25 = vpop.f32.mrf.mxu1  ;;  %v10228_v11 = vor.u32 %v11516_v56, %v10225_v60  ;;  %v6525_v56 = vpop.f32.mrf.mxu3 }
 0x2ba   : > { %6756 = vmatpush.bf16.msra.mxu0 %v10060_v36  ;;  %v6498_v2 = vadd.f32 %v6497_v25, %v6484_v42  ;;  %v10129_v36 = vld [vmem:[%s12366_s11 + $0x714] sm:$0xf0]  ;;  %v10213_v42 = vld [vmem:[%s12366_s11 + $0x7bc] sm:$0xf0]  ;;  %v11537_v25 = vld [vmem:[%s12366_s11 + $0x874] sm:$0xf] }
 0x2bb   : > { %6770 = vmatpush.bf16.msra.mxu1 %v10156_v50  ;;  %v10321_v50 = vld [vmem:[%s12366_s11 + $0x894] sm:$0xf0]  ;;  %v10132_v1 = vor.u32 %v11492_v57, %v10129_v36  ;;  %v10216_v57 = vor.u32 %v11513_v27, %v10213_v42  ;;  %v11486_v36 = vld [vmem:[%s12366_s11 + $0x6dc] sm:$0xf]  ;;  %v10093_v27 = vld [vmem:[%s12366_s11 + $0x6cc] sm:$0xf0] }
 0x2bc   : > { %6784 = vmatpush.bf16.msra.mxu2 %v10252_v26  ;;  %v10036_v26 = vor.u32 %v11468_v46, %v10033_v28  ;;  %v10324_v54 = vor.u32 %v11540_v61, %v10321_v50  ;;  %v10120_v28 = vor.u32 %v11489_v41, %v10117_v21  ;;  %v10105_v61 = vld [vmem:[%s12366_s11 + $0x6e4] sm:$0xf0]  ;;  %v11510_v50 = vld [vmem:[%s12366_s11 + $0x79c] sm:$0xf]  ;;  %v9997_v41 = vld [vmem:[%s12366_s11 + $0x60c] sm:$0xf0] }
 0x2bd   : > { %6798 = vmatpush.bf16.msra.mxu3 %v10348_v55  ;;  %v11465_v55 = vld [vmem:[%s12366_s11 + $0x634] sm:$0xf]  ;;  %v11483_v21 = vld [vmem:[%s12366_s11 + $0x6c4] sm:$0xf] }
 0x2be   : > { %6757 = vmatpush.bf16.msra.mxu0 %v10048_v40  ;;  %v6512_v40 = vadd.f32 %v6511_v47, %v6498_v2  ;;  %v10009_v2 = vld [vmem:[%s12366_s11 + $0x624] sm:$0xf0]  ;;  %v11507_v42 = vld [vmem:[%s12366_s11 + $0x784] sm:$0xf] }
 0x2bf   : > { %6771 = vmatpush.bf16.msra.mxu1 %v10144_v10  ;;  %v10309_v10 = vld [vmem:[%s12366_s11 + $0x87c] sm:$0xf0] }
 0x2c0   : > { %6785 = vmatpush.bf16.msra.mxu2 %v10240_v43  ;;  %v10024_v43 = vor.u32 %v11465_v55, %v10021_v12  ;;  %v13905_v46 = vadd.f32 %v6525_v56, %v6512_v40  ;;  %v10312_v60 = vor.u32 %v11537_v25, %v10309_v10  ;;  %v11459_v12 = vld [vmem:[%s12366_s11 + $0x604] sm:$0xf]  ;;  %v10189_v25 = vld [vmem:[%s12366_s11 + $0x78c] sm:$0xf0] }
 0x2c1   : > { %6799 = vmatpush.bf16.msra.mxu3 %v10336_v14  ;;  %v11462_v14 = vld [vmem:[%s12366_s11 + $0x61c] sm:$0xf]  ;;  %v11531_v10 = vld [vmem:[%s12366_s11 + $0x844] sm:$0xf]  ;;  %v10285_v56 = vld [vmem:[%s12366_s11 + $0x84c] sm:$0xf0] }
 0x2c2   : > { %6758 = vmatpush.bf16.msra.mxu0 %v10036_v26  ;;  %v10201_v26 = vld [vmem:[%s12366_s11 + $0x7a4] sm:$0xf0]  ;;  %v10012_v55 = vor.u32 %v11462_v14, %v10009_v2  ;;  %v10465_v14 = vld [vmem:[%s12366_s11 + $0x9b4] sm:$0xf0]  ;;  %v11600_v2 = vld [vmem:[%s12366_s11 + $0xa6c] sm:$0xf] }
 0x2c3   : > { %6772 = vmatpush.bf16.msra.mxu1 %v10132_v1  ;;  %v11534_v1 = vld [vmem:[%s12366_s11 + $0x85c] sm:$0xf]  ;;  %v10204_v47 = vor.u32 %v11510_v50, %v10201_v26  ;;  %v10192_v50 = vor.u32 %v11507_v42, %v10189_v25  ;;  %v11648_v26 = vld [vmem:[%s12366_s11 + $0xbec] sm:$0xf]  ;;  %v11645_v42 = vld [vmem:[%s12366_s11 + $0xbd4] sm:$0xf]  ;;  %v10456_v25 = vor.u32 %v11573_v49, %v10453_v24 }
 0x2c4   : > { %6786 = vmatpush.bf16.msra.mxu2 %v10228_v11  ;;  %v10297_v11 = vld [vmem:[%s12366_s11 + $0x864] sm:$0xf0] }
 0x2c5   : > { %6800 = vmatpush.bf16.msra.mxu3 %v10324_v54  ;;  %v10108_v54 = vor.u32 %v11486_v36, %v10105_v61  ;;  %v10300_v40 = vor.u32 %v11534_v1, %v10297_v11  ;;  %v11624_v36 = vld [vmem:[%s12366_s11 + $0xb2c] sm:$0xf]  ;;  %v10657_v61 = vld [vmem:[%s12366_s11 + $0xb34] sm:$0xf0]  ;;  %v10288_v11 = vor.u32 %v11531_v10, %v10285_v56  ;;  %v10729_v24 = vld [vmem:[%s12366_s11 + $0xbc4] sm:$0xf0] }
 0x2c6   : > { %6759 = vmatpush.bf16.msra.mxu0 %v10024_v43  ;;  %v11576_v43 = vld [vmem:[%s12366_s11 + $0x9ac] sm:$0xf]  ;;  %v10753_v1 = vld [vmem:[%s12366_s11 + $0xbf4] sm:$0xf0] }
 0x2c7   : > { %6773 = vmatpush.bf16.msra.mxu1 %v10120_v28  ;;  %v10000_v28 = vor.u32 %v11459_v12, %v9997_v41  ;;  %v10660_v41 = vor.u32 %v11624_v36, %v10657_v61  ;;  %v11618_v36 = vld [vmem:[%s12366_s11 + $0xafc] sm:$0xf]  ;;  %v10633_v61 = vld [vmem:[%s12366_s11 + $0xb04] sm:$0xf0] }
 0x2c8   : > { %6787 = vmatpush.bf16.msra.mxu2 %v10216_v57  ;;  %v10561_v57 = vld [vmem:[%s12366_s11 + $0xa74] sm:$0xf0] }
 0x2c9   : > { %6801 = vmatpush.bf16.msra.mxu3 %v10312_v60  ;;  %v10096_v60 = vor.u32 %v11483_v21, %v10093_v27  ;;  %v10564_v12 = vor.u32 %v11600_v2, %v10561_v57  ;;  %v11621_v21 = vld [vmem:[%s12366_s11 + $0xb14] sm:$0xf]  ;;  %v10645_v27 = vld [vmem:[%s12366_s11 + $0xb1c] sm:$0xf0]  ;;  %v11594_v2 = vld [vmem:[%s12366_s11 + $0xa3c] sm:$0xf] }
 0x2ca   : > { %6760 = vmatpush.bf16.msra.mxu0 %v10012_v55  ;;  %v10468_v55 = vor.u32 %v11576_v43, %v10465_v14  ;;  %v10648_v56 = vor.u32 %v11621_v21, %v10645_v27  ;;  %v11570_v43 = vld [vmem:[%s12366_s11 + $0x97c] sm:$0xf]  ;;  %v10441_v14 = vld [vmem:[%s12366_s11 + $0x984] sm:$0xf0]  ;;  %v10717_v21 = vld [vmem:[%s12366_s11 + $0xbac] sm:$0xf0]  ;;  %v3212_v27 = vadd.f32 %v12917_v32, %v12907_v19  ;;  %v13967_v19 = vpop.f32.mrf.mxu0 }
 0x2cb   : > { %6774 = vmatpush.bf16.msra.mxu1 %v10108_v54  ;;  %v10756_v54 = vor.u32 %v11648_v26, %v10753_v1  ;;  %v10537_v57 = vld [vmem:[%s12366_s11 + $0xa44] sm:$0xf0]  ;;  %v10444_v49 = vor.u32 %v11570_v43, %v10441_v14  ;;  %v11567_v26 = vld [vmem:[%s12366_s11 + $0x964] sm:$0xf]  ;;  %v10429_v1 = vld [vmem:[%s12366_s11 + $0x96c] sm:$0xf0] }
 0x2cc   : > { %6788 = vmatpush.bf16.msra.mxu2 %v10204_v47  ;;  %v10549_v47 = vld [vmem:[%s12366_s11 + $0xa5c] sm:$0xf0]  ;;  %v11588_v43 = vld [vmem:[%s12366_s11 + $0xa0c] sm:$0xf] }
 0x2cd   : > { %6802 = vmatpush.bf16.msra.mxu3 %v10300_v40  ;;  %v10741_v40 = vld [vmem:[%s12366_s11 + $0xbdc] sm:$0xf0]  ;;  %v10552_v10 = vor.u32 %v11597_v22, %v10549_v47  ;;  %v11642_v22 = vld [vmem:[%s12366_s11 + $0xbbc] sm:$0xf]  ;;  %v11639_v47 = vld [vmem:[%s12366_s11 + $0xba4] sm:$0xf] }
 0x2ce   : > { %6761 = vmatpush.bf16.msra.mxu0 %v10000_v28  ;;  %v10744_v28 = vor.u32 %v11645_v42, %v10741_v40  ;;  %v10432_v42 = vor.u32 %v11567_v26, %v10429_v1  ;;  %v10720_v14 = vor.u32 %v11639_v47, %v10717_v21  ;;  %v11636_v32 = vld [vmem:[%s12366_s11 + $0xb8c] sm:$0xf]  ;;  %v11561_v26 = vld [vmem:[%s12366_s11 + $0x934] sm:$0xf]  ;;  %v10405_v1 = vld [vmem:[%s12366_s11 + $0x93c] sm:$0xf0] }
 0x2cf   : > { %6775 = vmatpush.bf16.msra.mxu1 %v10096_v60  ;;  %v10540_v60 = vor.u32 %v11594_v2, %v10537_v57  ;;  %v10513_v2 = vld [vmem:[%s12366_s11 + $0xa14] sm:$0xf0]  ;;  %v10693_v47 = vld [vmem:[%s12366_s11 + $0xb7c] sm:$0xf0] }
 0x2d0   : > { %6789 = vmatpush.bf16.msra.mxu2 %v10192_v50  ;;  %v10636_v50 = vor.u32 %v11618_v36, %v10633_v61  ;;  %v10609_v57 = vld [vmem:[%s12366_s11 + $0xad4] sm:$0xf0]  ;;  %v3226_v61 = vadd.f32 %v12931_v44, %v3212_v27 }
 0x2d1   : > { %6803 = vmatpush.bf16.msra.mxu3 %v10288_v11  ;;  %6762 = vmatmul.bf16.vlgmr.msra.gmra.mxu0 %v12688_v5  ;;  %v11591_v11 = vld [vmem:[%s12366_s11 + $0xa24] sm:$0xf]  ;;  %v10705_v36 = vld [vmem:[%s12366_s11 + $0xb94] sm:$0xf0] }
 0x2d2   : > { %6810 = vmatpush.bf16.msrb.mxu0 %v10468_v55  ;;  %6776 = vmatmul.bf16.vlgmr.msra.gmra.mxu1 %v12695_v15  ;;  %v10732_v55 = vor.u32 %v11642_v22, %v10729_v24  ;;  %v13972_v22 = vpop.f32.mrf.mxu1  ;;  %v10708_v44 = vor.u32 %v11636_v32, %v10705_v36  ;;  %v11630_v32 = vld [vmem:[%s12366_s11 + $0xb5c] sm:$0xf]  ;;  %v10681_v36 = vld [vmem:[%s12366_s11 + $0xb64] sm:$0xf0] }
 0x2d3   : > { %6824 = vmatpush.bf16.msrb.mxu1 %v10564_v12  ;;  %6790 = vmatmul.bf16.vlgmr.msra.gmra.mxu2 %v12693_v13  ;;  %v10525_v12 = vld [vmem:[%s12366_s11 + $0xa2c] sm:$0xf0] }
 0x2d4   : > { %6838 = vmatpush.bf16.msrb.mxu2 %v10660_v41  ;;  %6804 = vmatmul.bf16.vlgmr.msra.gmra.mxu3 %v12699_v17  ;;  %v11615_v41 = vld [vmem:[%s12366_s11 + $0xae4] sm:$0xf]  ;;  %v10528_v40 = vor.u32 %v11591_v11, %v10525_v12  ;;  %v11585_v11 = vld [vmem:[%s12366_s11 + $0x9f4] sm:$0xf] }
 0x2d5   : > { %6852 = vmatpush.bf16.msrb.mxu3 %v10756_v54  ;;  %v10621_v54 = vld [vmem:[%s12366_s11 + $0xaec] sm:$0xf0]  ;;  %v11609_v12 = vld [vmem:[%s12366_s11 + $0xab4] sm:$0xf] }
 0x2d6   : > { %6811 = vmatpush.bf16.msrb.mxu0 %v10456_v25  ;;  %v10624_v25 = vor.u32 %v11615_v41, %v10621_v54  ;;  %v10597_v41 = vld [vmem:[%s12366_s11 + $0xabc] sm:$0xf0]  ;;  %v11633_v54 = vld [vmem:[%s12366_s11 + $0xb74] sm:$0xf] }
 0x2d7   : > { %6825 = vmatpush.bf16.msrb.mxu1 %v10552_v10  ;;  %v11564_v10 = vld [vmem:[%s12366_s11 + $0x94c] sm:$0xf] }
 0x2d8   : > { %6839 = vmatpush.bf16.msrb.mxu2 %v10648_v56  ;;  %v10417_v56 = vld [vmem:[%s12366_s11 + $0x954] sm:$0xf0] }
 0x2d9   : > { %6853 = vmatpush.bf16.msrb.mxu3 %v10744_v28  ;;  %v11612_v28 = vld [vmem:[%s12366_s11 + $0xacc] sm:$0xf]  ;;  %v10420_v24 = vor.u32 %v11564_v10, %v10417_v56  ;;  %v11582_v10 = vld [vmem:[%s12366_s11 + $0x9dc] sm:$0xf] }
 0x2da   : > { %6812 = vmatpush.bf16.msrb.mxu0 %v10444_v49  ;;  %v6444_v49 = vadd.f32 %v13862_v3, %v13852_v63  ;;  %v3240_v63 = vadd.f32 %v12936_v53, %v3226_v61  ;;  %v10408_v3 = vor.u32 %v11561_v26, %v10405_v1  ;;  %v13990_v53 = vpop.f32.mrf.mxu2  ;;  %v13999_v61 = vpop.f32.mrf.mxu1  ;;  %v11579_v1 = vld [vmem:[%s12366_s11 + $0x9c4] sm:$0xf] }
 0x2db   : > { %6826 = vmatpush.bf16.msrb.mxu1 %v10540_v60  ;;  %v10516_v60 = vor.u32 %v11588_v43, %v10513_v2  ;;  %v10696_v43 = vor.u32 %v11633_v54, %v10693_v47  ;;  %v11606_v2 = vld [vmem:[%s12366_s11 + $0xa9c] sm:$0xf]  ;;  %v11627_v54 = vld [vmem:[%s12366_s11 + $0xb44] sm:$0xf] }
 0x2dc   : > { %6840 = vmatpush.bf16.msrb.mxu2 %v10636_v50  ;;  %v10612_v50 = vor.u32 %v11612_v28, %v10609_v57  ;;  %v6458_v21 = vadd.f32 %v13876_v23, %v6444_v49  ;;  %v3254_v56 = vadd.f32 %v12992_v48, %v3240_v63  ;;  %v10585_v23 = vld [vmem:[%s12366_s11 + $0xaa4] sm:$0xf0]  ;;  %v13995_v28 = vpop.f32.mrf.mxu3  ;;  %v6539_v57 = vpop.f32.mrf.mxu0  ;;  %v10381_v49 = vld [vmem:[%s12366_s11 + $0x90c] sm:$0xf0] }
 0x2dd   : > { %6854 = vmatpush.bf16.msrb.mxu3 %v10732_v55  ;;  %v10501_v55 = vld [vmem:[%s12366_s11 + $0x9fc] sm:$0xf0]  ;;  %v10588_v26 = vor.u32 %v11606_v2, %v10585_v23  ;;  %v9319_v63 = vld [vmem:[%s12366_s11 + $0xb0] sm:$0xf] }
 0x2de   : > { %6813 = vmatpush.bf16.msrb.mxu0 %v10432_v42  ;;  %v10504_v27 = vor.u32 %v11585_v11, %v10501_v55  ;;  %v10600_v42 = vor.u32 %v11609_v12, %v10597_v41  ;;  %v10477_v11 = vld [vmem:[%s12366_s11 + $0x9cc] sm:$0xf0]  ;;  %v3268_v55 = vadd.f32 %v12996_v51, %v3254_v56  ;;  %v10684_v12 = vor.u32 %v11630_v32, %v10681_v36 }
 0x2df   : > { %6827 = vmatpush.bf16.msrb.mxu1 %v10528_v40  ;;  %v11558_v40 = vld [vmem:[%s12366_s11 + $0x91c] sm:$0xf]  ;;  %v10573_v41 = vld [vmem:[%s12366_s11 + $0xa8c] sm:$0xf0]  ;;  %v10480_v51 = vor.u32 %v11579_v1, %v10477_v11  ;;  %v6540_v32 = vadd.f32 %v6539_v57, %v13905_v46  ;;  %v11311_v11 = vld [vmem:[%s12366_s11 + $0x160] sm:$0xf0] }
 0x2e0   : > { %6841 = vmatpush.bf16.msrb.mxu2 %v10624_v25  ;;  %v10393_v25 = vld [vmem:[%s12366_s11 + $0x924] sm:$0xf0]  ;;  %v9595_v46 = vld [vmem:[%s12366_s11 + $0x2d8] sm:$0xf]  ;;  %v11359_v57 = vld [vmem:[%s12366_s11 + $0x2e0] sm:$0xf0] }
 0x2e1   : > { %6855 = vmatpush.bf16.msrb.mxu3 %v10720_v14  ;;  %v10489_v14 = vld [vmem:[%s12366_s11 + $0x9e4] sm:$0xf0]  ;;  %v10396_v48 = vor.u32 %v11558_v40, %v10393_v25  ;;  %v11314_v40 = vld [vmem:[%s12366_s11 + $0x178] sm:$0xf0]  ;;  %v9511_v25 = vld [vmem:[%s12366_s11 + $0x230] sm:$0xf] }
 0x2e2   : > { %6814 = vmatpush.bf16.msrb.mxu0 %v10420_v24  ;;  %v11555_v24 = vld [vmem:[%s12366_s11 + $0x904] sm:$0xf] }
 0x2e3   : > { %6828 = vmatpush.bf16.msrb.mxu1 %v10516_v60  ;;  %v6472_v60 = vadd.f32 %v13881_v31, %v6458_v21  ;;  %v10669_v31 = vld [vmem:[%s12366_s11 + $0xb4c] sm:$0xf0] }
 0x2e4   : > { %6842 = vmatpush.bf16.msrb.mxu2 %v10612_v50  ;;  %v10492_v50 = vor.u32 %v11582_v10, %v10489_v14  ;;  %v9415_v21 = vld [vmem:[%s12366_s11 + $0x170] sm:$0xf]  ;;  %v11338_v10 = vld [vmem:[%s12366_s11 + $0x238] sm:$0xf0]  ;;  %v6581_v36 = vpop.f32.mrf.mxu3 }
 0x2e5   : > { %6856 = vmatpush.bf16.msrb.mxu3 %v10708_v44  ;;  %v11603_v44 = vld [vmem:[%s12366_s11 + $0xa84] sm:$0xf]  ;;  %v6486_v47 = vadd.f32 %v13967_v19, %v6472_v60  ;;  %v11362_v14 = vld [vmem:[%s12366_s11 + $0x2f8] sm:$0xf0]  ;;  %v6567_v19 = vpop.f32.mrf.mxu2 }
 0x2e6   : > { %6815 = vmatpush.bf16.msrb.mxu0 %v10408_v3  ;;  %v11290_v3 = vld [vmem:[%s12366_s11 + $0xb8] sm:$0xf0]  ;;  %v10576_v56 = vor.u32 %v11603_v44, %v10573_v41  ;;  %v11287_v60 = vld [vmem:[%s12366_s11 + $0xa0] sm:$0xf0]  ;;  %v9499_v44 = vld [vmem:[%s12366_s11 + $0x218] sm:$0xf] }
 0x2e7   : > { %6829 = vmatpush.bf16.msrb.mxu1 %v10504_v27  ;;  %v3282_v27 = vadd.f32 %v13013_v37, %v3268_v55  ;;  %v10672_v37 = vor.u32 %v11627_v54, %v10669_v31  ;;  %v9320_v2 = vor.u32 %v11290_v3, %v9319_v63  ;;  %v6500_v23 = vadd.f32 %v13972_v22, %v6486_v47  ;;  %v11335_v55 = vld [vmem:[%s12366_s11 + $0x220] sm:$0xf0]  ;;  %v6541_v22 = vpop.f32.mrf.mxu0  ;;  %v6555_v54 = vpop.f32.mrf.mxu1  ;;  %v9295_v63 = vld [vmem:[%s12366_s11 + $0x80] sm:$0xf]  ;;  %v11284_v3 = vld [vmem:[%s12366_s11 + $0x88] sm:$0xf0] }
 0x2e8   : > { %6843 = vmatpush.bf16.msrb.mxu2 %v10600_v42  ;;  %v10384_v42 = vor.u32 %v11555_v24, %v10381_v49  ;;  %v9512_v24 = vor.u32 %v11338_v10, %v9511_v25  ;;  %v9307_v49 = vld [vmem:[%s12366_s11 + $0x98] sm:$0xf]  ;;  %v6554_v31 = vadd.f32 %v13999_v61, %v6540_v32  ;;  %v9500_v47 = vor.u32 %v11335_v55, %v9499_v44  ;;  %v9583_v10 = vld [vmem:[%s12366_s11 + $0x2c0] sm:$0xf]  ;;  %v11305_v32 = vld [vmem:[%s12366_s11 + $0x130] sm:$0xf0] }
 0x2e9   : > { %6857 = vmatpush.bf16.msrb.mxu3 %v10696_v43  ;;  %v9607_v43 = vld [vmem:[%s12366_s11 + $0x2f0] sm:$0xf]  ;;  %v11353_v44 = vld [vmem:[%s12366_s11 + $0x2b0] sm:$0xf0] }
 0x2ea   : > { %6816 = vmatpush.bf16.msrb.mxu0 %v10396_v48  ;;  %v9416_v48 = vor.u32 %v11314_v40, %v9415_v21  ;;  %v9608_v1 = vor.u32 %v11362_v14, %v9607_v43  ;;  %v9391_v21 = vld [vmem:[%s12366_s11 + $0x140] sm:$0xf]  ;;  %v11332_v40 = vld [vmem:[%s12366_s11 + $0x208] sm:$0xf0]  ;;  %v6568_v61 = vadd.f32 %v6567_v19, %v6554_v31  ;;  %v9296_v43 = vor.u32 %v11284_v3, %v9295_v63  ;;  %v9283_v14 = vld [vmem:[%s12366_s11 + $0x68] sm:$0xf] }
 0x2eb   : > { %6830 = vmatpush.bf16.msrb.mxu1 %v10492_v50  ;;  %v9403_v50 = vld [vmem:[%s12366_s11 + $0x158] sm:$0xf]  ;;  %v9463_v63 = vld [vmem:[%s12366_s11 + $0x1d0] sm:$0xf]  ;;  %v11326_v3 = vld [vmem:[%s12366_s11 + $0x1d8] sm:$0xf0] }
 0x2ec   : > { %6844 = vmatpush.bf16.msrb.mxu2 %v10588_v26  ;;  %v3296_v26 = vadd.f32 %v13018_v29, %v3282_v27  ;;  %v9308_v29 = vor.u32 %v11287_v60, %v9307_v49  ;;  %v11308_v27 = vld [vmem:[%s12366_s11 + $0x148] sm:$0xf0]  ;;  %v9475_v49 = vld [vmem:[%s12366_s11 + $0x1e8] sm:$0xf]  ;;  %v11329_v60 = vld [vmem:[%s12366_s11 + $0x1f0] sm:$0xf0] }
 0x2ed   : > { %6858 = vmatpush.bf16.msrb.mxu3 %v10684_v12  ;;  %v6514_v12 = vadd.f32 %v13990_v53, %v6500_v23  ;;  %v9404_v53 = vor.u32 %v11311_v11, %v9403_v50  ;;  %v9392_v19 = vor.u32 %v11308_v27, %v9391_v21  ;;  %v9379_v23 = vld [vmem:[%s12366_s11 + $0x128] sm:$0xf]  ;;  %v6582_v50 = vadd.f32 %v6581_v36, %v6568_v61  ;;  %v9271_v36 = vld [vmem:[%s12366_s11 + $0x50] sm:$0xf] }
 0x2ee   : > { %6817 = vmatpush.bf16.msrb.mxu0 %v10384_v42  ;;  %v3310_v41 = vadd.f32 %v13071_v33, %v3296_v26  ;;  %v9596_v33 = vor.u32 %v11359_v57, %v9595_v46  ;;  %v9487_v42 = vld [vmem:[%s12366_s11 + $0x200] sm:$0xf]  ;;  %v6583_v26 = vpop.f32.mrf.mxu3  ;;  %v9571_v11 = vld [vmem:[%s12366_s11 + $0x2a8] sm:$0xf]  ;;  %v9476_v57 = vor.u32 %v11329_v60, %v9475_v49  ;;  %v9559_v21 = vld [vmem:[%s12366_s11 + $0x290] sm:$0xf]  ;;  %v9464_v61 = vor.u32 %v11326_v3, %v9463_v63 }
 0x2ef   : > { %6831 = vmatpush.bf16.msrb.mxu1 %v10480_v51  ;;  %v6528_v25 = vadd.f32 %v13995_v28, %v6514_v12  ;;  %v11356_v51 = vld [vmem:[%s12366_s11 + $0x2c8] sm:$0xf0]  ;;  %v9380_v12 = vor.u32 %v11305_v32, %v9379_v23  ;;  %v9547_v32 = vld [vmem:[%s12366_s11 + $0x278] sm:$0xf]  ;;  %v9247_v60 = vld [vmem:[%s12366_s11 + $0x20] sm:$0xf] }
 0x2f0   : > { %6845 = vmatpush.bf16.msrb.mxu2 %v10576_v56  ;;  %v3324_v56 = vadd.f32 %v13075_v39, %v3310_v41  ;;  %v6569_v39 = vpop.f32.mrf.mxu2  ;;  %v11278_v41 = vld [vmem:[%s12366_s11 + $0x58] sm:$0xf0]  ;;  %v11269_v63 = vld [vmem:[%s12366_s11 + $0x10] sm:$0xf0] }
 0x2f1   : > { %6859 = vmatpush.bf16.msrb.mxu3 %v10672_v37  ;;  %6818 = vmatmul.bf16.vlgmr.msrb.gmra.mxu0 %v12764_v6  ;;  %v6542_v28 = vadd.f32 %v6541_v22, %v6528_v25  ;;  %v9488_v37 = vor.u32 %v11332_v40, %v9487_v42  ;;  %v9272_v42 = vor.u32 %v11278_v41, %v9271_v36  ;;  %v9259_v40 = vld [vmem:[%s12366_s11 + $0x38] sm:$0xf]  ;;  %v9535_v41 = vld [vmem:[%s12366_s11 + $0x260] sm:$0xf] }
 0x2f2   : > { %6866 = vmatpush.bf16.msra.mxu0 %v9320_v2  ;;  %6832 = vmatmul.bf16.vlgmr.msrb.gmra.mxu1 %v12771_v18  ;;  %v11281_v2 = vld [vmem:[%s12366_s11 + $0x70] sm:$0xf0] }
 0x2f3   : > { %6880 = vmatpush.bf16.msra.mxu1 %v9416_v48  ;;  %6846 = vmatmul.bf16.vlgmr.msrb.gmra.mxu2 %v12769_v16  ;;  %v3338_v48 = vadd.f32 %v13092_v59, %v3324_v56  ;;  %v9284_v55 = vor.u32 %v11281_v2, %v9283_v14  ;;  %v6609_v59 = vpop.f32.mrf.mxu1  ;;  %v6556_v22 = vadd.f32 %v6555_v54, %v6542_v28  ;;  %v11299_v56 = vld [vmem:[%s12366_s11 + $0x100] sm:$0xf0]  ;;  %v9451_v28 = vld [vmem:[%s12366_s11 + $0x1b8] sm:$0xf] }
 0x2f4   : > { %6894 = vmatpush.bf16.msra.mxu2 %v9512_v24  ;;  %6860 = vmatmul.bf16.vlgmr.msrb.gmra.mxu3 %v12775_v8  ;;  %v9584_v24 = vor.u32 %v11356_v51, %v9583_v10  ;;  %v11275_v10 = vld [vmem:[%s12366_s11 + $0x40] sm:$0xf0]  ;;  %v9355_v51 = vld [vmem:[%s12366_s11 + $0xf8] sm:$0xf] }
 0x2f5   : > { %6908 = vmatpush.bf16.msra.mxu3 %v9608_v1  ;;  %v6595_v1 = vpop.f32.mrf.mxu0  ;;  %v3352_v31 = vadd.f32 %v13097_v0, %v3338_v48  ;;  %v6570_v54 = vadd.f32 %v6569_v39, %v6556_v22  ;;  %v11347_v48 = vld [vmem:[%s12366_s11 + $0x280] sm:$0xf0]  ;;  %v9356_v49 = vor.u32 %v11299_v56, %v9355_v51  ;;  %v11320_v22 = vld [vmem:[%s12366_s11 + $0x1a8] sm:$0xf0]  ;;  %v9703_v56 = vld [vmem:[%s12366_s11 + $0x3b0] sm:$0xf] }
 0x2f6   : > { %6867 = vmatpush.bf16.msra.mxu0 %v9308_v29  ;;  %v6596_v46 = vadd.f32 %v6595_v1, %v6582_v50  ;;  %v9367_v29 = vld [vmem:[%s12366_s11 + $0x110] sm:$0xf] }
 0x2f7   : > { %6881 = vmatpush.bf16.msra.mxu1 %v9404_v53  ;;  %v9572_v53 = vor.u32 %v11353_v44, %v9571_v11  ;;  %v3366_v27 = vadd.f32 %v13152_v35, %v3352_v31  ;;  %v11323_v35 = vld [vmem:[%s12366_s11 + $0x1c0] sm:$0xf0]  ;;  %v6637_v23 = vpop.f32.mrf.mxu3  ;;  %v11272_v11 = vld [vmem:[%s12366_s11 + $0x28] sm:$0xf0]  ;;  %v9343_v44 = vld [vmem:[%s12366_s11 + $0xe0] sm:$0xf] }
 0x2f8   : > { %6895 = vmatpush.bf16.msra.mxu2 %v9500_v47  ;;  %v11302_v47 = vld [vmem:[%s12366_s11 + $0x118] sm:$0xf0]  ;;  %v6610_v0 = vadd.f32 %v6609_v59, %v6596_v46  ;;  %v6623_v14 = vpop.f32.mrf.mxu2  ;;  %v9452_v1 = vor.u32 %v11323_v35, %v9451_v28  ;;  %v9439_v59 = vld [vmem:[%s12366_s11 + $0x1a0] sm:$0xf]  ;;  %v7090_v46 = vmul.f32 %v13118_v62, %v13118_v62  ;;  %v9248_v31 = vor.u32 %v11272_v11, %v9247_v60  ;;  %v11383_v11 = vld [vmem:[%s12366_s11 + $0x3a0] sm:$0xf0] }
 0x2f9   : > { %6909 = vmatpush.bf16.msra.mxu3 %v9596_v33  ;;  %v11350_v33 = vld [vmem:[%s12366_s11 + $0x298] sm:$0xf0]  ;;  %v9368_v25 = vor.u32 %v11302_v47, %v9367_v29  ;;  %v3380_v39 = vadd.f32 %v13154_v38, %v3366_v27  ;;  %v9548_v38 = vor.u32 %v11347_v48, %v9547_v32  ;;  %v11344_v29 = vld [vmem:[%s12366_s11 + $0x268] sm:$0xf0]  ;;  %v9235_v47 = vld [vmem:[%s12366_s11 + $0x8] sm:$0xf] }
 0x2fa   : > { %6868 = vmatpush.bf16.msra.mxu0 %v9296_v43  ;;  %v9560_v43 = vor.u32 %v11350_v33, %v9559_v21  ;;  %v11293_v21 = vld [vmem:[%s12366_s11 + $0xd0] sm:$0xf0]  ;;  %v9427_v33 = vld [vmem:[%s12366_s11 + $0x188] sm:$0xf]  ;;  %v9536_v27 = vor.u32 %v11344_v29, %v9535_v41  ;;  %v9236_v28 = vor.u32 %v11269_v63, %v9235_v47  ;;  %v11410_v35 = vld [vmem:[%s12366_s11 + $0x478] sm:$0xf0] }
 0x2fb   : > { %6882 = vmatpush.bf16.msra.mxu1 %v9392_v19  ;;  %v6584_v19 = vadd.f32 %v6583_v26, %v6570_v54  ;;  %v9331_v54 = vld [vmem:[%s12366_s11 + $0xc8] sm:$0xf]  ;;  %v9991_v32 = vld [vmem:[%s12366_s11 + $0x5f0] sm:$0xf]  ;;  %v11458_v48 = vld [vmem:[%s12366_s11 + $0x5f8] sm:$0xf0] }
 0x2fc   : > { %6896 = vmatpush.bf16.msra.mxu2 %v9488_v37  ;;  %v6624_v37 = vadd.f32 %v6623_v14, %v6610_v0  ;;  %v9523_v0 = vld [vmem:[%s12366_s11 + $0x248] sm:$0xf]  ;;  %v9799_v14 = vld [vmem:[%s12366_s11 + $0x470] sm:$0xf]  ;;  %v9679_v47 = vld [vmem:[%s12366_s11 + $0x380] sm:$0xf] }
 0x2fd   : > { %6910 = vmatpush.bf16.msra.mxu3 %v9584_v24  ;;  %v6597_v2 = vpop.f32.mrf.mxu0  ;;  %v9260_v24 = vor.u32 %v11275_v10, %v9259_v40  ;;  %v11317_v40 = vld [vmem:[%s12366_s11 + $0x190] sm:$0xf0]  ;;  %v11380_v63 = vld [vmem:[%s12366_s11 + $0x388] sm:$0xf0] }
 0x2fe   : > { %6869 = vmatpush.bf16.msra.mxu0 %v9284_v55  ;;  %v6598_v50 = vadd.f32 %v6597_v2, %v6584_v19  ;;  %v6638_v26 = vadd.f32 %v6637_v23, %v6624_v37  ;;  %v11296_v55 = vld [vmem:[%s12366_s11 + $0xe8] sm:$0xf0]  ;;  %v9895_v19 = vld [vmem:[%s12366_s11 + $0x530] sm:$0xf]  ;;  %v11434_v37 = vld [vmem:[%s12366_s11 + $0x538] sm:$0xf0]  ;;  %v9332_v2 = vor.u32 %v11293_v21, %v9331_v54  ;;  %v9428_v23 = vor.u32 %v11317_v40, %v9427_v33 }
 0x2ff   : > { %6883 = vmatpush.bf16.msra.mxu1 %v9380_v12  ;;  %v6611_v12 = vpop.f32.mrf.mxu1  ;;  %v6639_v51 = vpop.f32.mrf.mxu3  ;;  %v11404_v54 = vld [vmem:[%s12366_s11 + $0x448] sm:$0xf0]  ;;  %v9871_v21 = vld [vmem:[%s12366_s11 + $0x500] sm:$0xf] }
 0x300   : > { %6897 = vmatpush.bf16.msra.mxu2 %v9476_v57  ;;  %v3394_v57 = vadd.f32 %v13171_v58, %v3380_v39  ;;  %v7096_v36 = vmul.f32 %v6638_v26, %v6638_v26  ;;  %v6612_v62 = vadd.f32 %v6611_v12, %v6598_v50  ;;  %v9440_v58 = vor.u32 %v11320_v22, %v9439_v59  ;;  %v9883_v12 = vld [vmem:[%s12366_s11 + $0x518] sm:$0xf]  ;;  %v11431_v59 = vld [vmem:[%s12366_s11 + $0x520] sm:$0xf0]  ;;  %v11428_v33 = vld [vmem:[%s12366_s11 + $0x508] sm:$0xf0] }
 0x301   : > { %6911 = vmatpush.bf16.msra.mxu3 %v9572_v53  ;;  %v9344_v53 = vor.u32 %v11296_v55, %v9343_v44  ;;  %v9800_v50 = vor.u32 %v11410_v35, %v9799_v14  ;;  %v9896_v26 = vor.u32 %v11434_v37, %v9895_v19  ;;  %v9787_v44 = vld [vmem:[%s12366_s11 + $0x458] sm:$0xf]  ;;  %v9992_v55 = vor.u32 %v11458_v48, %v9991_v32  ;;  %v11452_v40 = vld [vmem:[%s12366_s11 + $0x5c8] sm:$0xf0]  ;;  %v11425_v14 = vld [vmem:[%s12366_s11 + $0x4f0] sm:$0xf0] }
 0x302   : > { %6870 = vmatpush.bf16.msra.mxu0 %v9272_v42  ;;  %v14090_v3 = vadd.f32 %v7096_v36, %v7090_v46  ;;  %v6625_v42 = vpop.f32.mrf.mxu2  ;;  %v11455_v36 = vld [vmem:[%s12366_s11 + $0x5e0] sm:$0xf0]  ;;  %v11449_v35 = vld [vmem:[%s12366_s11 + $0x5b0] sm:$0xf0]  ;;  %v9655_v32 = vld [vmem:[%s12366_s11 + $0x350] sm:$0xf] }
 0x303   : > { %6884 = vmatpush.bf16.msra.mxu1 %v9368_v25  ;;  %v11341_v25 = vld [vmem:[%s12366_s11 + $0x250] sm:$0xf0]  ;;  %v6626_v10 = vadd.f32 %v6625_v42, %v6612_v62  ;;  %v9775_v62 = vld [vmem:[%s12366_s11 + $0x440] sm:$0xf]  ;;  %v11374_v48 = vld [vmem:[%s12366_s11 + $0x358] sm:$0xf0] }
 0x304   : > { %6898 = vmatpush.bf16.msra.mxu2 %v9464_v61  ;;  %v3408_v61 = vadd.f32 %v13176_v9, %v3394_v57  ;;  %11819 = vrsqrt.f32 %v14090_v3  ;;  %v9524_v39 = vor.u32 %v11341_v25, %v9523_v0  ;;  %v9979_v57 = vld [vmem:[%s12366_s11 + $0x5d8] sm:$0xf]  ;;  %v9967_v42 = vld [vmem:[%s12366_s11 + $0x5c0] sm:$0xf]  ;;  %v9680_v0 = vor.u32 %v11380_v63, %v9679_v47  ;;  %v11419_v47 = vld [vmem:[%s12366_s11 + $0x4c0] sm:$0xf0] }
 0x305   : > { %6912 = vmatpush.bf16.msra.mxu3 %v9560_v43  ;;  %v11386_v43 = vld [vmem:[%s12366_s11 + $0x3b8] sm:$0xf0]  ;;  %v6640_v9 = vadd.f32 %v6639_v51, %v6626_v10  ;;  %v9667_v10 = vld [vmem:[%s12366_s11 + $0x368] sm:$0xf]  ;;  %v11377_v51 = vld [vmem:[%s12366_s11 + $0x370] sm:$0xf0] }
 0x306   : > { %6871 = vmatpush.bf16.msra.mxu0 %v9260_v24  ;;  %v9704_v24 = vor.u32 %v11386_v43, %v9703_v56  ;;  %v9763_v56 = vld [vmem:[%s12366_s11 + $0x428] sm:$0xf]  ;;  %v9668_v19 = vor.u32 %v11377_v51, %v9667_v10  ;;  %v9931_v63 = vld [vmem:[%s12366_s11 + $0x578] sm:$0xf]  ;;  %v9919_v10 = vld [vmem:[%s12366_s11 + $0x560] sm:$0xf] }
 0x307   : > { %6885 = vmatpush.bf16.msra.mxu1 %v9356_v49  ;;  %v7093_v49 = vmul.f32 %v3408_v61, %v3408_v61  ;;  %v7099_v60 = vmul.f32 %v6640_v9, %v6640_v9  ;;  %v9872_v61 = vor.u32 %v11428_v33, %v9871_v21  ;;  %v9859_v43 = vld [vmem:[%s12366_s11 + $0x4e8] sm:$0xf]  ;;  %v11368_v21 = vld [vmem:[%s12366_s11 + $0x328] sm:$0xf0]  ;;  %vm7115_vm0 = vcmp.eq.f32.partialorder %v14090_v3, inf }
 0x308   : > { %6899 = vmatpush.bf16.msra.mxu2 %v9452_v1  ;;  %v9691_v1 = vld [vmem:[%s12366_s11 + $0x398] sm:$0xf]  ;;  %v11440_v51 = vld [vmem:[%s12366_s11 + $0x568] sm:$0xf0]  ;;  %vm7117_vm2 = vcmp.eq.f32.partialorder %v14090_v3, 0.0 }
 0x309   : > { %6913 = vmatpush.bf16.msra.mxu3 %v9548_v38  ;;  %v11407_v38 = vld [vmem:[%s12366_s11 + $0x460] sm:$0xf0]  ;;  %v14116_v46 = vadd.f32 %v7099_v60, %v7093_v49  ;;  %v9692_v41 = vor.u32 %v11383_v11, %v9691_v1  ;;  %v11398_v49 = vld [vmem:[%s12366_s11 + $0x418] sm:$0xf0]  ;;  %v9847_v60 = vld [vmem:[%s12366_s11 + $0x4d0] sm:$0xf] }
 0x30a   : > { %6872 = vmatpush.bf16.msra.mxu0 %v9248_v31  ;;  %v14114_v22 = vpop.eup %11819  ;;  %v9788_v31 = vor.u32 %v11407_v38, %v9787_v44  ;;  %v9943_v1 = vld [vmem:[%s12366_s11 + $0x590] sm:$0xf]  ;;  %v11446_v11 = vld [vmem:[%s12366_s11 + $0x598] sm:$0xf0]  ;;  %v9656_v44 = vor.u32 %v11374_v48, %v9655_v32  ;;  %v9920_v48 = vor.u32 %v11440_v51, %v9919_v10  ;;  %v11500_v51 = vld [vmem:[%s12366_s11 + $0x748] sm:$0xf0] }
 0x30b   : > { %6886 = vmatpush.bf16.msra.mxu1 %v9344_v53  ;;  %v7109_v29 = vmul.f32 %v14114_v22, %v14090_v3  ;;  %11821 = vrsqrt.f32 %v14116_v46  ;;  %v9884_v53 = vor.u32 %v11431_v59, %v9883_v12  ;;  %vm7151_vm1 = vcmp.eq.f32.partialorder %v14116_v46, inf }
 0x30c   : > { %6900 = vmatpush.bf16.msra.mxu2 %v9440_v58  ;;  %v9980_v58 = vor.u32 %v11455_v36, %v9979_v57  ;;  %v9643_v57 = vld [vmem:[%s12366_s11 + $0x338] sm:$0xf]  ;;  %v11371_v36 = vld [vmem:[%s12366_s11 + $0x340] sm:$0xf0]  ;;  %v7154_v32 = vand.u32 2147483648, %v14116_v46  ;;  %vm7153_vm3 = vcmp.eq.f32.partialorder %v14116_v46, 0.0 }
 0x30d   : > { %6914 = vmatpush.bf16.msra.mxu3 %v9536_v27  ;;  %v7110_v27 = vmul.f32 %v14114_v22, %v7109_v29  ;;  %v9944_v29 = vor.u32 %v11446_v11, %v9943_v1 }
 0x30e   : > { %6873 = vmatpush.bf16.msra.mxu0 %v9236_v28 }
 0x30f   : > { %6887 = vmatpush.bf16.msra.mxu1 %v9332_v2  ;;  %v7111_v25 = vmul.f32 0.5, %v7110_v27 }
 0x310   : > { %6901 = vmatpush.bf16.msra.mxu2 %v9428_v23  ;;  %v9860_v23 = vor.u32 %v11425_v14, %v9859_v43 }
 0x311   : > { %6915 = vmatpush.bf16.msra.mxu3 %v9524_v39  ;;  %6874 = vmatmul.bf16.vlgmr.msra.gmra.mxu0 %v12543_v34  ;;  %v9776_v34 = vor.u32 %v11404_v54, %v9775_v62  ;;  %v11822_v28 = vpop.eup %11821  ;;  %v7112_v37 = vsub.f32 1.5, %v7111_v25  ;;  %v9751_v39 = vld [vmem:[%s12366_s11 + $0x410] sm:$0xf]  ;;  %v9631_v54 = vld [vmem:[%s12366_s11 + $0x320] sm:$0xf] }
 0x312   : > { %6922 = vmatpush.bf16.msrb.mxu0 %v9704_v24  ;;  %6888 = vmatmul.bf16.vlgmr.msra.gmra.mxu1 %v12555_v45  ;;  %v11401_v45 = vld [vmem:[%s12366_s11 + $0x430] sm:$0xf0]  ;;  %v7145_v9 = vmul.f32 %v11822_v28, %v14116_v46  ;;  %v9752_v12 = vor.u32 %v11398_v49, %v9751_v39  ;;  %v9823_v25 = vld [vmem:[%s12366_s11 + $0x4a0] sm:$0xf]  ;;  %v9632_v43 = vor.u32 %v11368_v21, %v9631_v54  ;;  %v9907_v39 = vld [vmem:[%s12366_s11 + $0x548] sm:$0xf] }
 0x313   : > { %6936 = vmatpush.bf16.msrb.mxu1 %v9800_v50  ;;  %6902 = vmatmul.bf16.vlgmr.msra.gmra.mxu2 %v12548_v30  ;;  %v9968_v30 = vor.u32 %v11452_v40, %v9967_v42  ;;  %v9764_v2 = vor.u32 %v11401_v45, %v9763_v56  ;;  %v11422_v50 = vld [vmem:[%s12366_s11 + $0x4d8] sm:$0xf0]  ;;  %v9727_v40 = vld [vmem:[%s12366_s11 + $0x3e0] sm:$0xf]  ;;  %v11365_v45 = vld [vmem:[%s12366_s11 + $0x310] sm:$0xf0] }
 0x314   : > { %6950 = vmatpush.bf16.msrb.mxu2 %v9896_v26  ;;  %6916 = vmatmul.bf16.vlgmr.msra.gmra.mxu3 %v12560_v52  ;;  %v9955_v52 = vld [vmem:[%s12366_s11 + $0x5a8] sm:$0xf]  ;;  %v7146_v26 = vmul.f32 %v11822_v28, %v7145_v9  ;;  %v9848_v59 = vor.u32 %v11422_v50, %v9847_v60  ;;  %v10087_v60 = vld [vmem:[%s12366_s11 + $0x6b0] sm:$0xf]  ;;  %v11482_v50 = vld [vmem:[%s12366_s11 + $0x6b8] sm:$0xf0] }
 0x315   : > { %6964 = vmatpush.bf16.msrb.mxu3 %v9992_v55  ;;  %v9956_v24 = vor.u32 %v11449_v35, %v9955_v52  ;;  %v7113_v55 = vmul.f32 %v14114_v22, %v7112_v37  ;;  %v11443_v22 = vld [vmem:[%s12366_s11 + $0x580] sm:$0xf0]  ;;  %v9715_v52 = vld [vmem:[%s12366_s11 + $0x3c8] sm:$0xf]  ;;  %v11389_v35 = vld [vmem:[%s12366_s11 + $0x3d0] sm:$0xf0] }
 0x316   : > { %6923 = vmatpush.bf16.msrb.mxu0 %v9692_v41  ;;  %v7147_v38 = vmul.f32 0.5, %v7146_v26  ;;  %v9739_v41 = vld [vmem:[%s12366_s11 + $0x3f8] sm:$0xf]  ;;  %v10183_v26 = vld [vmem:[%s12366_s11 + $0x770] sm:$0xf] }
 0x317   : > { %6937 = vmatpush.bf16.msrb.mxu1 %v9788_v31  ;;  %v11395_v31 = vld [vmem:[%s12366_s11 + $0x400] sm:$0xf0]  ;;  %v7114_v33 = vmul.f32 %v7113_v55, %v14090_v3  ;;  %v11506_v55 = vld [vmem:[%s12366_s11 + $0x778] sm:$0xf0]  ;;  %v10267_v54 = vld [vmem:[%s12366_s11 + $0x818] sm:$0xf] }
 0x318   : > { %6951 = vmatpush.bf16.msrb.mxu2 %v9884_v53  ;;  %v9835_v53 = vld [vmem:[%s12366_s11 + $0x4b8] sm:$0xf]  ;;  %v7148_v62 = vsub.f32 1.5, %v7147_v38  ;;  %v9740_v27 = vor.u32 %v11395_v31, %v9739_v41  ;;  %v10279_v38 = vld [vmem:[%s12366_s11 + $0x830] sm:$0xf]  ;;  %v10184_v31 = vor.u32 %v11506_v55, %v10183_v26 }
 0x319   : > { %6965 = vmatpush.bf16.msrb.mxu3 %v9980_v58  ;;  %v9644_v58 = vor.u32 %v11371_v36, %v9643_v57  ;;  %v9836_v42 = vor.u32 %v11419_v47, %v9835_v53  ;;  %v7116_v37 = vsel %vm7115_vm0, %v14090_v3, %v7114_v33  ;;  %v10375_v57 = vld [vmem:[%s12366_s11 + $0x8f0] sm:$0xf]  ;;  %v11554_v36 = vld [vmem:[%s12366_s11 + $0x8f8] sm:$0xf0]  ;;  %v10075_v47 = vld [vmem:[%s12366_s11 + $0x698] sm:$0xf] }
 0x31a   : > { %6924 = vmatpush.bf16.msrb.mxu0 %v9680_v0  ;;  %v11392_v0 = vld [vmem:[%s12366_s11 + $0x3e8] sm:$0xf0]  ;;  %v7149_v56 = vmul.f32 %v11822_v28, %v7148_v62  ;;  %v10376_v62 = vor.u32 %v11554_v36, %v10375_v57  ;;  %v11527_v21 = vld [vmem:[%s12366_s11 + $0x820] sm:$0xf0]  ;;  %v10363_v33 = vld [vmem:[%s12366_s11 + $0x8d8] sm:$0xf]  ;;  %v14240_v57 = vpop.f32.mrf.mxu1 }
 0x31b   : > { %6938 = vmatpush.bf16.msrb.mxu1 %v9776_v34  ;;  %v9932_v34 = vor.u32 %v11443_v22, %v9931_v63  ;;  %v9728_v14 = vor.u32 %v11392_v0, %v9727_v40  ;;  %v11479_v63 = vld [vmem:[%s12366_s11 + $0x6a0] sm:$0xf0]  ;;  %v10171_v22 = vld [vmem:[%s12366_s11 + $0x758] sm:$0xf]  ;;  %v10268_v0 = vor.u32 %v11527_v21, %v10267_v54  ;;  %v10231_v55 = vld [vmem:[%s12366_s11 + $0x7d0] sm:$0xf] }
 0x31c   : > { %6952 = vmatpush.bf16.msrb.mxu2 %v9872_v61  ;;  %v11416_v61 = vld [vmem:[%s12366_s11 + $0x4a8] sm:$0xf0]  ;;  %v7150_v9 = vmul.f32 %v7149_v56, %v14116_v46  ;;  %v10255_v56 = vld [vmem:[%s12366_s11 + $0x800] sm:$0xf]  ;;  %v10315_v54 = vld [vmem:[%s12366_s11 + $0x878] sm:$0xf] }
 0x31d   : > { %6966 = vmatpush.bf16.msrb.mxu3 %v9968_v30  ;;  %v9619_v30 = vld [vmem:[%s12366_s11 + $0x308] sm:$0xf]  ;;  %v9824_v28 = vor.u32 %v11416_v61, %v9823_v25  ;;  %v10063_v25 = vld [vmem:[%s12366_s11 + $0x680] sm:$0xf]  ;;  %v11539_v21 = vld [vmem:[%s12366_s11 + $0x880] sm:$0xf0] }
 0x31e   : > { %6925 = vmatpush.bf16.msrb.mxu0 %v9668_v19  ;;  %v9811_v19 = vld [vmem:[%s12366_s11 + $0x488] sm:$0xf]  ;;  %v7152_v49 = vsel %vm7151_vm1, %v14116_v46, %v7150_v9  ;;  %v10159_v61 = vld [vmem:[%s12366_s11 + $0x740] sm:$0xf]  ;;  %v11497_v9 = vld [vmem:[%s12366_s11 + $0x730] sm:$0xf0] }
 0x31f   : > { %6939 = vmatpush.bf16.msrb.mxu1 %v9764_v2  ;;  %v11413_v2 = vld [vmem:[%s12366_s11 + $0x490] sm:$0xf0]  ;;  %v14193_v11 = vsel %vm7153_vm3, %v7154_v32, %v7152_v49  ;;  %v10039_v49 = vld [vmem:[%s12366_s11 + $0x650] sm:$0xf] }
 0x320   : > { %6953 = vmatpush.bf16.msrb.mxu2 %v9860_v23  ;;  %v7118_v23 = vand.u32 2147483648, %v14090_v3  ;;  %v11530_v3 = vld [vmem:[%s12366_s11 + $0x838] sm:$0xf0]  ;;  %v11545_v32 = vld [vmem:[%s12366_s11 + $0x8b0] sm:$0xf0] }
 0x321   : > { %6967 = vmatpush.bf16.msrb.mxu3 %v9956_v24  ;;  %v11437_v24 = vld [vmem:[%s12366_s11 + $0x550] sm:$0xf0]  ;;  %v10280_v53 = vor.u32 %v11530_v3, %v10279_v38  ;;  %v11518_v38 = vld [vmem:[%s12366_s11 + $0x7d8] sm:$0xf0]  ;;  %v14236_v3 = vpop.f32.mrf.mxu0 }
 0x322   : > { %6926 = vmatpush.bf16.msrb.mxu0 %v9656_v44  ;;  %v14191_v1 = vsel %vm7117_vm2, %v7118_v23, %v7116_v37  ;;  %v9620_v44 = vor.u32 %v11365_v45, %v9619_v30  ;;  %v9908_v41 = vor.u32 %v11437_v24, %v9907_v39  ;;  %v11524_v30 = vld [vmem:[%s12366_s11 + $0x808] sm:$0xf0]  ;;  %v10351_v45 = vld [vmem:[%s12366_s11 + $0x8c0] sm:$0xf]  ;;  %v10147_v37 = vld [vmem:[%s12366_s11 + $0x728] sm:$0xf] }
 0x323   : > { %6940 = vmatpush.bf16.msrb.mxu1 %v9752_v12  ;;  %v7182_v46 = vpack.c.bf16 %v14193_v11, %v14191_v1  ;;  %v9716_v12 = vor.u32 %v11389_v35, %v9715_v52  ;;  %v10160_v52 = vor.u32 %v11500_v51, %v10159_v61  ;;  %v10256_v35 = vor.u32 %v11524_v30, %v10255_v56  ;;  %v10339_v23 = vld [vmem:[%s12366_s11 + $0x8a8] sm:$0xf]  ;;  %v10207_v51 = vld [vmem:[%s12366_s11 + $0x7a0] sm:$0xf]  ;;  %v11512_v56 = vld [vmem:[%s12366_s11 + $0x7a8] sm:$0xf0]  ;;  %v14258_v30 = vpop.f32.mrf.mxu3 }
 0x324   : > { %6954 = vmatpush.bf16.msrb.mxu2 %v9848_v59  ;;  %v9812_v59 = vor.u32 %v11413_v2, %v9811_v19  ;;  %v10051_v19 = vld [vmem:[%s12366_s11 + $0x668] sm:$0xf]  ;;  %v11521_v2 = vld [vmem:[%s12366_s11 + $0x7f0] sm:$0xf0]  ;;  %v10148_v39 = vor.u32 %v11497_v9, %v10147_v37  ;;  %v10340_v26 = vor.u32 %v11545_v32, %v10339_v23  ;;  %v10316_v61 = vor.u32 %v11539_v21, %v10315_v54  ;;  %v10651_v54 = vld [vmem:[%s12366_s11 + $0xb18] sm:$0xf] }
 0x325   : > { %6968 = vmatpush.bf16.msrb.mxu3 %v9944_v29  ;;  %v10088_v29 = vor.u32 %v11482_v50, %v10087_v60  ;;  %v11470_v60 = vld [vmem:[%s12366_s11 + $0x658] sm:$0xf0]  ;;  %v10135_v50 = vld [vmem:[%s12366_s11 + $0x710] sm:$0xf]  ;;  %v10099_v37 = vld [vmem:[%s12366_s11 + $0x6c8] sm:$0xf] }
 0x326   : > { %6927 = vmatpush.bf16.msrb.mxu0 %v9644_v58  ;;  %v11503_v58 = vld [vmem:[%s12366_s11 + $0x760] sm:$0xf0]  ;;  %v10040_v36 = vor.u32 %v11470_v60, %v10039_v49  ;;  %v10195_v9 = vld [vmem:[%s12366_s11 + $0x788] sm:$0xf]  ;;  %v11509_v23 = vld [vmem:[%s12366_s11 + $0x790] sm:$0xf0] }
 0x327   : > { %6941 = vmatpush.bf16.msrb.mxu1 %v9740_v27  ;;  %v11551_v27 = vld [vmem:[%s12366_s11 + $0x8e0] sm:$0xf0]  ;;  %v10172_v40 = vor.u32 %v11503_v58, %v10171_v22  ;;  %v10291_v32 = vld [vmem:[%s12366_s11 + $0x848] sm:$0xf]  ;;  %v10567_v49 = vld [vmem:[%s12366_s11 + $0xa70] sm:$0xf] }
 0x328   : > { %6955 = vmatpush.bf16.msrb.mxu2 %v9836_v42  ;;  %v10076_v42 = vor.u32 %v11479_v63, %v10075_v47  ;;  %v10364_v10 = vor.u32 %v11551_v27, %v10363_v33  ;;  %v10123_v47 = vld [vmem:[%s12366_s11 + $0x6f8] sm:$0xf]  ;;  %v11491_v22 = vld [vmem:[%s12366_s11 + $0x700] sm:$0xf0] }
 0x329   : > { %6969 = vmatpush.bf16.msrb.mxu3 %v9932_v34  ;;  %v11476_v34 = vld [vmem:[%s12366_s11 + $0x688] sm:$0xf0]  ;;  %v11515_v58 = vld [vmem:[%s12366_s11 + $0x7c0] sm:$0xf0]  ;;  %v10124_v27 = vor.u32 %v11491_v22, %v10123_v47 }
 0x32a   : > { %6928 = vmatpush.bf16.msrb.mxu0 %v9632_v43  ;;  %v11548_v43 = vld [vmem:[%s12366_s11 + $0x8c8] sm:$0xf0]  ;;  %v11575_v47 = vld [vmem:[%s12366_s11 + $0x9a0] sm:$0xf0] }
 0x32b   : > { %6942 = vmatpush.bf16.msrb.mxu1 %v9728_v14  ;;  %v14565_v14 = vld [vmem:[#allocation22_spill] sm:$0xff] }
 0x32c   : > { %6956 = vmatpush.bf16.msrb.mxu2 %v9824_v28  ;;  %v10243_v28 = vld [vmem:[%s12366_s11 + $0x7e8] sm:$0xf]  ;;  %v11623_v21 = vld [vmem:[%s12366_s11 + $0xb20] sm:$0xf0] }
 0x32d   : > { %6970 = vmatpush.bf16.msrb.mxu3 %v9920_v48  ;;  %v10244_v24 = vor.u32 %v11521_v2, %v10243_v28  ;;  %v14269_v28 = vpop.f32.mrf.mxu1 }
 0x32e   : > { %6929 = vmatpush.bf16.msrb.mxu0 %v9620_v44  ;;  %v11494_v44 = vld [vmem:[%s12366_s11 + $0x718] sm:$0xf0] }
 0x32f   : > { %6943 = vmatpush.bf16.msrb.mxu1 %v9716_v12  ;;  %v10327_v12 = vld [vmem:[%s12366_s11 + $0x890] sm:$0xf] }
 0x330   : > { %6957 = vmatpush.bf16.msrb.mxu2 %v9812_v59  ;;  %v11542_v59 = vld [vmem:[%s12366_s11 + $0x898] sm:$0xf0] }
 0x331   : > { %6971 = vmatpush.bf16.msrb.mxu3 %v9908_v41  ;;  %6930 = vmatmul.bf16.vlgmr.msrb.gmra.mxu0 %v12612_v4  ;;  %v10064_v4 = vor.u32 %v11476_v34, %v10063_v25  ;;  %v10136_v41 = vor.u32 %v11494_v44, %v10135_v50  ;;  %v10328_v63 = vor.u32 %v11542_v59, %v10327_v12  ;;  %v10111_v25 = vld [vmem:[%s12366_s11 + $0x6e0] sm:$0xf]  ;;  %v14253_v34 = vpop.f32.mrf.mxu2  ;;  %v11602_v50 = vld [vmem:[%s12366_s11 + $0xa78] sm:$0xf0]  ;;  %v10759_v12 = vld [vmem:[%s12366_s11 + $0xbf0] sm:$0xf] }
 0x332   : > { %6978 = vmatpush.bf16.msra.mxu0 %v10088_v29  ;;  %6944 = vmatmul.bf16.vlgmr.msrb.gmra.mxu1 %v12619_v7  ;;  %v10352_v7 = vor.u32 %v11548_v43, %v10351_v45  ;;  %v10232_v29 = vor.u32 %v11518_v38, %v10231_v55  ;;  %v10303_v45 = vld [vmem:[%s12366_s11 + $0x860] sm:$0xf]  ;;  %v11536_v43 = vld [vmem:[%s12366_s11 + $0x868] sm:$0xf0]  ;;  %v11626_v44 = vld [vmem:[%s12366_s11 + $0xb38] sm:$0xf0]  ;;  %v10196_v38 = vor.u32 %v11509_v23, %v10195_v9 }
 0x333   : > { %6992 = vmatpush.bf16.msra.mxu1 %v10184_v31  ;;  %6958 = vmatmul.bf16.vlgmr.msrb.gmra.mxu2 %v12617_v20  ;;  %v11473_v20 = vld [vmem:[%s12366_s11 + $0x670] sm:$0xf0]  ;;  %v10027_v31 = vld [vmem:[%s12366_s11 + $0x638] sm:$0xf]  ;;  %v10304_v2 = vor.u32 %v11536_v43, %v10303_v45  ;;  %v11650_v59 = vld [vmem:[%s12366_s11 + $0xbf8] sm:$0xf0] }
 0x334   : > { %7006 = vmatpush.bf16.msra.mxu2 %v10280_v53  ;;  %6972 = vmatmul.bf16.vlgmr.msrb.gmra.mxu3 %v14565_v14  ;;  %v10052_v48 = vor.u32 %v11473_v20, %v10051_v19  ;;  %v11467_v53 = vld [vmem:[%s12366_s11 + $0x640] sm:$0xf0]  ;;  %v10208_v20 = vor.u32 %v11512_v56, %v10207_v51  ;;  %v10447_v51 = vld [vmem:[%s12366_s11 + $0x980] sm:$0xf]  ;;  %v11572_v56 = vld [vmem:[%s12366_s11 + $0x988] sm:$0xf0] }
 0x335   : > { %7020 = vmatpush.bf16.msra.mxu3 %v10376_v62  ;;  %v10219_v62 = vld [vmem:[%s12366_s11 + $0x7b8] sm:$0xf]  ;;  %v10028_v33 = vor.u32 %v11467_v53, %v10027_v31  ;;  %v10543_v45 = vld [vmem:[%s12366_s11 + $0xa40] sm:$0xf]  ;;  %v14301_v43 = vpop.f32.mrf.mxu1  ;;  %v11569_v9 = vld [vmem:[%s12366_s11 + $0x970] sm:$0xf0] }
 0x336   : > { %6979 = vmatpush.bf16.msra.mxu0 %v10076_v42  ;;  %v10220_v42 = vor.u32 %v11515_v58, %v10219_v62  ;;  %v10459_v53 = vld [vmem:[%s12366_s11 + $0x998] sm:$0xf]  ;;  %v10760_v62 = vor.u32 %v11650_v59, %v10759_v12  ;;  %v11599_v58 = vld [vmem:[%s12366_s11 + $0xa60] sm:$0xf0]  ;;  %v11593_v23 = vld [vmem:[%s12366_s11 + $0xa30] sm:$0xf0] }
 0x337   : > { %6993 = vmatpush.bf16.msra.mxu1 %v10172_v40  ;;  %v10015_v40 = vld [vmem:[%s12366_s11 + $0x620] sm:$0xf]  ;;  %v10423_v12 = vld [vmem:[%s12366_s11 + $0x950] sm:$0xf]  ;;  %v11566_v59 = vld [vmem:[%s12366_s11 + $0x958] sm:$0xf0] }
 0x338   : > { %7007 = vmatpush.bf16.msra.mxu2 %v10268_v0  ;;  %v11464_v0 = vld [vmem:[%s12366_s11 + $0x628] sm:$0xf0] }
 0x339   : > { %7021 = vmatpush.bf16.msra.mxu3 %v10364_v10  ;;  %v11488_v10 = vld [vmem:[%s12366_s11 + $0x6e8] sm:$0xf0]  ;;  %v10016_v14 = vor.u32 %v11464_v0, %v10015_v40  ;;  %v14285_v22 = vpop.f32.mrf.mxu2  ;;  %v10460_v40 = vor.u32 %v11575_v47, %v10459_v53  ;;  %v6666_v0 = vadd.f32 %v14240_v57, %v14236_v3  ;;  %v10639_v3 = vld [vmem:[%s12366_s11 + $0xb00] sm:$0xf]  ;;  %v11614_v53 = vld [vmem:[%s12366_s11 + $0xad8] sm:$0xf0] }
 0x33a   : > { %6980 = vmatpush.bf16.msra.mxu0 %v10064_v4  ;;  %v10003_v4 = vld [vmem:[%s12366_s11 + $0x608] sm:$0xf]  ;;  %v10112_v19 = vor.u32 %v11488_v10, %v10111_v25  ;;  %v10652_v10 = vor.u32 %v11623_v21, %v10651_v54  ;;  %v11620_v57 = vld [vmem:[%s12366_s11 + $0xb08] sm:$0xf0] }
 0x33b   : > { %6994 = vmatpush.bf16.msra.mxu1 %v10160_v52  ;;  %v11461_v52 = vld [vmem:[%s12366_s11 + $0x610] sm:$0xf0] }
 0x33c   : > { %7008 = vmatpush.bf16.msra.mxu2 %v10256_v35  ;;  %v14264_v35 = vpop.f32.mrf.mxu0  ;;  %v10004_v60 = vor.u32 %v11461_v52, %v10003_v4  ;;  %v11596_v4 = vld [vmem:[%s12366_s11 + $0xa48] sm:$0xf0]  ;;  %v10735_v52 = vld [vmem:[%s12366_s11 + $0xbc0] sm:$0xf] }
 0x33d   : > { %7022 = vmatpush.bf16.msra.mxu3 %v10352_v7  ;;  %v11485_v7 = vld [vmem:[%s12366_s11 + $0x6d0] sm:$0xf0]  ;;  %v6668_v54 = vadd.f32 %v14269_v28, %v14264_v35  ;;  %v14341_v21 = vpop.f32.mrf.mxu1  ;;  %v11587_v35 = vld [vmem:[%s12366_s11 + $0xa00] sm:$0xf0]  ;;  %v10603_v28 = vld [vmem:[%s12366_s11 + $0xab8] sm:$0xf] }
 0x33e   : > { %6981 = vmatpush.bf16.msra.mxu0 %v10052_v48  ;;  %v11533_v48 = vld [vmem:[%s12366_s11 + $0x850] sm:$0xf0]  ;;  %v10100_v55 = vor.u32 %v11485_v7, %v10099_v37  ;;  %v10544_v37 = vor.u32 %v11596_v4, %v10543_v45  ;;  %v10640_v7 = vor.u32 %v11620_v57, %v10639_v3  ;;  %v11611_v45 = vld [vmem:[%s12366_s11 + $0xac0] sm:$0xf0] }
 0x33f   : > { %6995 = vmatpush.bf16.msra.mxu1 %v10148_v39  ;;  %v10471_v39 = vld [vmem:[%s12366_s11 + $0x9b0] sm:$0xf]  ;;  %v11635_v4 = vld [vmem:[%s12366_s11 + $0xb80] sm:$0xf0] }
 0x340   : > { %7009 = vmatpush.bf16.msra.mxu2 %v10244_v24  ;;  %v11578_v24 = vld [vmem:[%s12366_s11 + $0x9b8] sm:$0xf0]  ;;  %v14569_v3 = vld [vmem:[#allocation26_spill] sm:$0xff] }
 0x341   : > { %7023 = vmatpush.bf16.msra.mxu3 %v10340_v26  ;;  %v10663_v26 = vld [vmem:[%s12366_s11 + $0xb30] sm:$0xf] }
 0x342   : > { %6982 = vmatpush.bf16.msra.mxu0 %v10040_v36  ;;  %v10292_v36 = vor.u32 %v11533_v48, %v10291_v32  ;;  %v10664_v31 = vor.u32 %v11626_v44, %v10663_v26  ;;  %v10627_v32 = vld [vmem:[%s12366_s11 + $0xae8] sm:$0xf] }
 0x343   : > { %6996 = vmatpush.bf16.msra.mxu1 %v10136_v41  ;;  %v10472_v41 = vor.u32 %v11578_v24, %v10471_v39  ;;  %v10723_v48 = vld [vmem:[%s12366_s11 + $0xba8] sm:$0xf]  ;;  %v11641_v39 = vld [vmem:[%s12366_s11 + $0xbb0] sm:$0xf0] }
 0x344   : > { %7010 = vmatpush.bf16.msra.mxu2 %v10232_v29  ;;  %v10568_v29 = vor.u32 %v11602_v50, %v10567_v49  ;;  %v14296_v25 = vpop.f32.mrf.mxu0  ;;  %v14566_v24 = vld [vmem:[#allocation23_spill] sm:$0xff]  ;;  %v14567_v49 = vld [vmem:[#allocation24_spill] sm:$0xff] }
 0x345   : > { %7024 = vmatpush.bf16.msra.mxu3 %v10328_v63  ;;  %v10555_v63 = vld [vmem:[%s12366_s11 + $0xa58] sm:$0xf] }
 0x346   : > { %6983 = vmatpush.bf16.msra.mxu0 %v10028_v33  ;;  %v14290_v33 = vpop.f32.mrf.mxu3 }
 0x347   : > { %6997 = vmatpush.bf16.msra.mxu1 %v10124_v27  ;;  %v10747_v27 = vld [vmem:[%s12366_s11 + $0xbd8] sm:$0xf] }
 0x348   : > { %7011 = vmatpush.bf16.msra.mxu2 %v10220_v42  ;;  %v11647_v42 = vld [vmem:[%s12366_s11 + $0xbe0] sm:$0xf0] }
 0x349   : > { %7025 = vmatpush.bf16.msra.mxu3 %v10316_v61  ;;  %v10556_v61 = vor.u32 %v11599_v58, %v10555_v63  ;;  %v11638_v63 = vld [vmem:[%s12366_s11 + $0xb98] sm:$0xf0] }
 0x34a   : > { %6984 = vmatpush.bf16.msra.mxu0 %v10016_v14  ;;  %v10748_v14 = vor.u32 %v11647_v42, %v10747_v27  ;;  %v10424_v27 = vor.u32 %v11566_v59, %v10423_v12  ;;  %v10387_v12 = vld [vmem:[%s12366_s11 + $0x908] sm:$0xf]  ;;  %v11557_v59 = vld [vmem:[%s12366_s11 + $0x910] sm:$0xf0] }
 0x34b   : > { %6998 = vmatpush.bf16.msra.mxu1 %v10112_v19  ;;  %v11644_v19 = vld [vmem:[%s12366_s11 + $0xbc8] sm:$0xf0] }
 0x34c   : > { %7012 = vmatpush.bf16.msra.mxu2 %v10208_v20  ;;  %v6680_v20 = vadd.f32 %v14253_v34, %v6666_v0  ;;  %v3436_v34 = vadd.f32 %v14567_v49, %v14566_v24  ;;  %v14334_v47 = vpop.f32.mrf.mxu0  ;;  %v11632_v24 = vld [vmem:[%s12366_s11 + $0xb68] sm:$0xf0] }
 0x34d   : > { %7026 = vmatpush.bf16.msra.mxu3 %v10304_v2  ;;  %v10736_v2 = vor.u32 %v11644_v19, %v10735_v52 }
 0x34e   : > { %6985 = vmatpush.bf16.msra.mxu0 %v10004_v60  ;;  %v14323_v60 = vpop.f32.mrf.mxu2  ;;  %v6694_v26 = vadd.f32 %v14258_v30, %v6680_v20  ;;  %v14326_v44 = vpop.f32.mrf.mxu3  ;;  %v10711_v30 = vld [vmem:[%s12366_s11 + $0xb90] sm:$0xf]  ;;  %v10604_v20 = vor.u32 %v11611_v45, %v10603_v28  ;;  %v11666_v28 = vld [vmem:[%s12368_s29 + $0x78] sm:$0xff]  ;;  %v14573_v45 = vld [vmem:[#allocation30_spill] sm:$0xff] }
 0x34f   : > { %6999 = vmatpush.bf16.msra.mxu1 %v10100_v55 }
 0x350   : > { %7013 = vmatpush.bf16.msra.mxu2 %v10196_v38  ;;  %v6708_v42 = vadd.f32 %v14296_v25, %v6694_v26  ;;  %v6682_v25 = vadd.f32 %v14285_v22, %v6668_v54 }
 0x351   : > { %7027 = vmatpush.bf16.msra.mxu3 %v10292_v36  ;;  %6986 = vmatmul.bf16.vlgmr.msra.gmra.mxu0 %v12688_v5  ;;  %v10448_v5 = vor.u32 %v11572_v56, %v10447_v51  ;;  %v10519_v36 = vld [vmem:[%s12366_s11 + $0xa10] sm:$0xf]  ;;  %v10507_v51 = vld [vmem:[%s12366_s11 + $0x9f8] sm:$0xf]  ;;  %v10712_v56 = vor.u32 %v11638_v63, %v10711_v30  ;;  %v11605_v30 = vld [vmem:[%s12366_s11 + $0xa90] sm:$0xf0] }
 0x352   : > { %7034 = vmatpush.bf16.msrb.mxu0 %v10472_v41  ;;  %7000 = vmatmul.bf16.vlgmr.msra.gmra.mxu1 %v12695_v15  ;;  %v10531_v15 = vld [vmem:[%s12366_s11 + $0xa28] sm:$0xf]  ;;  %v10724_v41 = vor.u32 %v11641_v39, %v10723_v48  ;;  %v6722_v19 = vadd.f32 %v14301_v43, %v6708_v42  ;;  %v10687_v39 = vld [vmem:[%s12366_s11 + $0xb60] sm:$0xf]  ;;  %v6696_v49 = vadd.f32 %v14290_v33, %v6682_v25 }
 0x353   : > { %7048 = vmatpush.bf16.msrb.mxu1 %v10568_v29  ;;  %7014 = vmatmul.bf16.vlgmr.msra.gmra.mxu2 %v12693_v13  ;;  %v10435_v13 = vld [vmem:[%s12366_s11 + $0x968] sm:$0xf]  ;;  %v10532_v55 = vor.u32 %v11593_v23, %v10531_v15  ;;  %v11590_v29 = vld [vmem:[%s12366_s11 + $0xa18] sm:$0xf0]  ;;  %v11584_v23 = vld [vmem:[%s12366_s11 + $0x9e8] sm:$0xf0]  ;;  %v10688_v33 = vor.u32 %v11632_v24, %v10687_v39 }
 0x354   : > { %7062 = vmatpush.bf16.msrb.mxu2 %v10664_v31  ;;  %7028 = vmatmul.bf16.vlgmr.msra.gmra.mxu3 %v12699_v17  ;;  %v11617_v17 = vld [vmem:[%s12366_s11 + $0xaf0] sm:$0xf0]  ;;  %v10436_v50 = vor.u32 %v11569_v9, %v10435_v13  ;;  %v10615_v31 = vld [vmem:[%s12366_s11 + $0xad0] sm:$0xf]  ;;  %v10495_v13 = vld [vmem:[%s12366_s11 + $0x9e0] sm:$0xf]  ;;  %v6763_v48 = vpop.f32.mrf.mxu0  ;;  %v6736_v26 = vadd.f32 %v14323_v60, %v6722_v19  ;;  %v6710_v63 = vadd.f32 %v14334_v47, %v6696_v49 }
 0x355   : > { %7076 = vmatpush.bf16.msrb.mxu3 %v10760_v62  ;;  %v10628_v38 = vor.u32 %v11617_v17, %v10627_v32  ;;  %v14568_v62 = vld [vmem:[#allocation25_spill] sm:$0xff]  ;;  %v10616_v0 = vor.u32 %v11614_v53, %v10615_v31  ;;  %v14570_v9 = vld [vmem:[#allocation27_spill] sm:$0xff]  ;;  %v10591_v32 = vld [vmem:[%s12366_s11 + $0xaa0] sm:$0xf] }
 0x356   : > { %7035 = vmatpush.bf16.msrb.mxu0 %v10460_v40  ;;  %v3450_v58 = vadd.f32 %v14568_v62, %v3436_v34  ;;  %v10520_v40 = vor.u32 %v11590_v29, %v10519_v36  ;;  %v11608_v17 = vld [vmem:[%s12366_s11 + $0xaa8] sm:$0xf0]  ;;  %v6751_v43 = vpop.f32.mrf.mxu3  ;;  %v6777_v34 = vpop.f32.mrf.mxu1  ;;  %v10483_v36 = vld [vmem:[%s12366_s11 + $0x9c8] sm:$0xf]  ;;  %v11581_v31 = vld [vmem:[%s12366_s11 + $0x9d0] sm:$0xf0]  ;;  %v6750_v42 = vadd.f32 %v14326_v44, %v6736_v26  ;;  %v6724_v47 = vadd.f32 %v14341_v21, %v6710_v63 }
 0x357   : > { %7049 = vmatpush.bf16.msrb.mxu1 %v10556_v61  ;;  %v10411_v61 = vld [vmem:[%s12366_s11 + $0x938] sm:$0xf]  ;;  %v10579_v53 = vld [vmem:[%s12366_s11 + $0xa88] sm:$0xf]  ;;  %v11629_v60 = vld [vmem:[%s12366_s11 + $0xb50] sm:$0xf0] }
 0x358   : > { %7063 = vmatpush.bf16.msrb.mxu2 %v10652_v10  ;;  %v11563_v10 = vld [vmem:[%s12366_s11 + $0x940] sm:$0xf0]  ;;  %v3464_v57 = vadd.f32 %v14569_v3, %v3450_v58  ;;  %v10675_v62 = vld [vmem:[%s12366_s11 + $0xb48] sm:$0xf]  ;;  %v14572_v58 = vld [vmem:[#allocation29_spill] sm:$0xff] }
 0x359   : > { %7077 = vmatpush.bf16.msrb.mxu3 %v10748_v14  ;;  %v10699_v14 = vld [vmem:[%s12366_s11 + $0xb78] sm:$0xf]  ;;  %v10412_v52 = vor.u32 %v11563_v10, %v10411_v61  ;;  %v10676_v10 = vor.u32 %v11629_v60, %v10675_v62  ;;  %v14574_v25 = vld [vmem:[#allocation31_spill] sm:$0xff]  ;;  %v11665_v19 = vld [vmem:[%s12368_s29 + $0x70] sm:$0xff] }
 0x35a   : > { %7036 = vmatpush.bf16.msrb.mxu0 %v10448_v5  ;;  %v10508_v5 = vor.u32 %v11587_v35, %v10507_v51  ;;  %v3478_v15 = vadd.f32 %v14570_v9, %v3464_v57  ;;  %v10700_v22 = vor.u32 %v11635_v4, %v10699_v14  ;;  %v11658_v51 = vld [vmem:[%s12368_s29 + $0x38] sm:$0xff]  ;;  %v11657_v57 = vld [vmem:[%s12368_s29 + $0x30] sm:$0xff]  ;;  %v14577_v39 = vld [vmem:[#allocation34_spill] sm:$0xff] }
 0x35b   : > { %7050 = vmatpush.bf16.msrb.mxu1 %v10544_v37  ;;  %v10399_v37 = vld [vmem:[%s12366_s11 + $0x920] sm:$0xf]  ;;  %v11661_v62 = vld [vmem:[%s12368_s29 + $0x50] sm:$0xff] }
 0x35c   : > { %7064 = vmatpush.bf16.msrb.mxu2 %v10640_v7  ;;  %v11560_v7 = vld [vmem:[%s12366_s11 + $0x928] sm:$0xf0]  ;;  %v6765_v44 = vpop.f32.mrf.mxu0 }
 0x35d   : > { %7078 = vmatpush.bf16.msrb.mxu3 %v10736_v2  ;;  %v6737_v2 = vpop.f32.mrf.mxu2 }
 0x35e   : > { %7037 = vmatpush.bf16.msrb.mxu0 %v10436_v50  ;;  %v10400_v50 = vor.u32 %v11560_v7, %v10399_v37  ;;  %v6805_v35 = vpop.f32.mrf.mxu3  ;;  %v6738_v4 = vadd.f32 %v6737_v2, %v6724_v47  ;;  %v6779_v3 = vpop.f32.mrf.mxu1  ;;  %v11656_v37 = vld [vmem:[%s12368_s29 + $0x28] sm:$0xff]  ;;  %v14575_v7 = vld [vmem:[#allocation32_spill] sm:$0xff]  ;;  %v14576_v2 = vld [vmem:[#allocation33_spill] sm:$0xff] }
 0x35f   : > { %7051 = vmatpush.bf16.msrb.mxu1 %v10532_v55  ;;  %v10496_v55 = vor.u32 %v11584_v23, %v10495_v13 }
 0x360   : > { %7065 = vmatpush.bf16.msrb.mxu2 %v10628_v38  ;;  %v10592_v38 = vor.u32 %v11608_v17, %v10591_v32  ;;  %v11655_v32 = vld [vmem:[%s12368_s29 + $0x20] sm:$0xff] }
 0x361   : > { %7079 = vmatpush.bf16.msrb.mxu3 %v10724_v41  ;;  %v14571_v41 = vld [vmem:[#allocation28_spill] sm:$0xff] }
 0x362   : > { %7038 = vmatpush.bf16.msrb.mxu0 %v10424_v27  ;;  %v3492_v29 = vadd.f32 %v14571_v41, %v3478_v15  ;;  %v10388_v27 = vor.u32 %v11557_v59, %v10387_v12  ;;  %v11664_v15 = vld [vmem:[%s12368_s29 + $0x68] sm:$0xff] }
 0x363   : > { %7052 = vmatpush.bf16.msrb.mxu1 %v10520_v40  ;;  %v10484_v40 = vor.u32 %v11581_v31, %v10483_v36  ;;  %v14579_v31 = vld [vmem:[#allocation37_spill] sm:$0xff] }
 0x364   : > { %7066 = vmatpush.bf16.msrb.mxu2 %v10616_v0  ;;  %v3506_v54 = vadd.f32 %v14572_v58, %v3492_v29  ;;  %v10580_v0 = vor.u32 %v11605_v30, %v10579_v53  ;;  %v14580_v58 = vld [vmem:[#allocation35_spill] sm:$0xff] }
 0x365   : > { %7080 = vmatpush.bf16.msrb.mxu3 %v10712_v56  ;;  %v6791_v61 = vpop.f32.mrf.mxu2  ;;  %v6764_v56 = vadd.f32 %v6763_v48, %v6750_v42  ;;  %v11663_v48 = vld [vmem:[%s12368_s29 + $0x60] sm:$0xff] }
 0x366   : > { %7039 = vmatpush.bf16.msrb.mxu0 %v10412_v52  ;;  %v3520_v14 = vadd.f32 %v14573_v45, %v3506_v54  ;;  %v6807_v23 = vpop.f32.mrf.mxu3  ;;  %v7091_v54 = vmul.f32 %v14580_v58, %v14580_v58 }
 0x367   : > { %7053 = vmatpush.bf16.msrb.mxu1 %v10508_v5  ;;  %v6778_v21 = vadd.f32 %v6777_v34, %v6764_v56  ;;  %v6752_v5 = vadd.f32 %v6751_v43, %v6738_v4  ;;  %v11654_v34 = vld [vmem:[%s12368_s29 + $0x18] sm:$0xff]  ;;  %v14582_v56 = vld [vmem:[#allocation39_spill] sm:$0xff] }
 0x368   : > { %7067 = vmatpush.bf16.msrb.mxu2 %v10604_v20  ;;  %v3534_v52 = vadd.f32 %v14574_v25, %v3520_v14  ;;  %v11651_v14 = vld [vmem:[%s12368_s29] sm:$0xff] }
 0x369   : > { %7081 = vmatpush.bf16.msrb.mxu3 %v10700_v22  ;;  %v6792_v20 = vadd.f32 %v6791_v61, %v6778_v21  ;;  %v6766_v9 = vadd.f32 %v6765_v44, %v6752_v5  ;;  %v11659_v44 = vld [vmem:[%s12368_s29 + $0x40] sm:$0xff] }
 0x36a   : > { %7040 = vmatpush.bf16.msrb.mxu0 %v10400_v50  ;;  %v3548_v13 = vadd.f32 %v14575_v7, %v3534_v52  ;;  %v14578_v50 = vld [vmem:[#allocation36_spill] sm:$0xff] }
 0x36b   : > { %7054 = vmatpush.bf16.msrb.mxu1 %v10496_v55 }
 0x36c   : > { %7068 = vmatpush.bf16.msrb.mxu2 %v10592_v38  ;;  %v3562_v22 = vadd.f32 %v14576_v2, %v3548_v13  ;;  %v11662_v38 = vld [vmem:[%s12368_s29 + $0x58] sm:$0xff] }
 0x36d   : > { %7082 = vmatpush.bf16.msrb.mxu3 %v10688_v33  ;;  %v11653_v33 = vld [vmem:[%s12368_s29 + $0x10] sm:$0xff] }
 0x36e   : > { %7041 = vmatpush.bf16.msrb.mxu0 %v10388_v27  ;;  %v3576_v24 = vadd.f32 %v14577_v39, %v3562_v22  ;;  %v14581_v27 = vld [vmem:[#allocation38_spill] sm:$0xff] }
 0x36f   : > { %7055 = vmatpush.bf16.msrb.mxu1 %v10484_v40  ;;  %v6833_v17 = vpop.f32.mrf.mxu1 }
 0x370   : > { %7069 = vmatpush.bf16.msrb.mxu2 %v10580_v0  ;;  %v3590_v26 = vadd.f32 %v14578_v50, %v3576_v24  ;;  %v11652_v0 = vld [vmem:[%s12368_s29 + $0x8] sm:$0xff] }
 0x371   : > { %7083 = vmatpush.bf16.msrb.mxu3 %v10676_v10  ;;  %7042 = vmatmul.bf16.vlgmr.msrb.gmra.mxu0 %v12764_v6  ;;  %v6793_v6 = vpop.f32.mrf.mxu2 }
 0x372   : > { %7377 = vmatpush.bf16.msra.mxu0 %v11658_v51  ;;  %7056 = vmatmul.bf16.vlgmr.msrb.gmra.mxu1 %v12771_v18  ;;  %v6806_v18 = vadd.f32 %v6805_v35, %v6792_v20  ;;  %v3604_v53 = vadd.f32 %v14579_v31, %v3590_v26  ;;  %v11660_v51 = vld [vmem:[%s12368_s29 + $0x48] sm:$0xff] }
 0x373   : > { %7391 = vmatpush.bf16.msra.mxu1 %v11666_v28  ;;  %7070 = vmatmul.bf16.vlgmr.msrb.gmra.mxu2 %v12769_v16  ;;  %v6819_v16 = vpop.f32.mrf.mxu0 }
 0x374   : > { %7084 = vmatmul.bf16.vlgmr.msrb.gmra.mxu3 %v12775_v8  ;;  %v6780_v8 = vadd.f32 %v6779_v3, %v6766_v9  ;;  %v6820_v43 = vadd.f32 %v6819_v16, %v6806_v18  ;;  %v3618_v42 = vadd.f32 %v14581_v27, %v3604_v53 }
 0x376   : > { %7378 = vmatpush.bf16.msra.mxu0 %v11657_v57  ;;  %v6794_v49 = vadd.f32 %v6793_v6, %v6780_v8  ;;  %v6834_v55 = vadd.f32 %v6833_v17, %v6820_v43  ;;  %v3632_v35 = vadd.f32 %v14582_v56, %v3618_v42  ;;  %v11674_v56 = vld [vmem:[%s12368_s29 + $0xb8] sm:$0xff] }
 0x377   : > { %7392 = vmatpush.bf16.msra.mxu1 %v11665_v19  ;;  %v6861_v29 = vpop.f32.mrf.mxu3  ;;  %v6835_v60 = vpop.f32.mrf.mxu1  ;;  %7405 = vmatpush.bf16.msra.mxu2 %v11674_v56 }
 0x378   : > { %v6808_v59 = vadd.f32 %v6807_v23, %v6794_v49  ;;  %v7094_v3 = vmul.f32 %v3632_v35, %v3632_v35 }
 0x379   : > { %v6847_v12 = vpop.f32.mrf.mxu2 }
 0x37a   : > { %7379 = vmatpush.bf16.msra.mxu0 %v11656_v37  ;;  %v6848_v36 = vadd.f32 %v6847_v12, %v6834_v55 }
 0x37b   : > { %7393 = vmatpush.bf16.msra.mxu1 %v11664_v15  ;;  %v6821_v41 = vpop.f32.mrf.mxu0 }
 0x37c   : > { %v6822_v30 = vadd.f32 %v6821_v41, %v6808_v59  ;;  %v6862_v63 = vadd.f32 %v6861_v29, %v6848_v36  ;;  %v14583_v36 = vld [vmem:[#allocation40_spill] sm:$0xff]  ;;  %v14584_v41 = vld [vmem:[#allocation41_spill] sm:$0xff] }
 0x37d   : > { %v3660_v29 = vadd.f32 %v14584_v41, %v14583_v36  ;;  %v14595_v36 = vld [vmem:[#allocation53_spill] sm:$0xff] }
 0x37e   : > { %7380 = vmatpush.bf16.msra.mxu0 %v11655_v32  ;;  %v7097_v40 = vmul.f32 %v6862_v63, %v6862_v63  ;;  %v6836_v10 = vadd.f32 %v6835_v60, %v6822_v30  ;;  %v14585_v30 = vld [vmem:[#allocation42_spill] sm:$0xff] }
 0x37f   : > { %7394 = vmatpush.bf16.msra.mxu1 %v11663_v48  ;;  %v6863_v45 = vpop.f32.mrf.mxu3  ;;  %v3674_v63 = vadd.f32 %v14585_v30, %v3660_v29 }
 0x380   : > { %v7103_v61 = vadd.f32 %v7097_v40, %v7091_v54  ;;  %v14586_v54 = vld [vmem:[#allocation43_spill] sm:$0xff] }
 0x381   : > { %v6849_v47 = vpop.f32.mrf.mxu2  ;;  %v3688_v27 = vadd.f32 %v14586_v54, %v3674_v63 }
 0x382   : > { %7381 = vmatpush.bf16.msra.mxu0 %v11654_v34  ;;  %11823 = vrsqrt.f32 %v7103_v61  ;;  %v6850_v28 = vadd.f32 %v6849_v47, %v6836_v10  ;;  %vm7127_vm4 = vcmp.eq.f32.partialorder %v7103_v61, inf  ;;  %v7130_v16 = vand.u32 2147483648, %v7103_v61 }
 0x383   : > { %7395 = vmatpush.bf16.msra.mxu1 %v11662_v38  ;;  %vm7129_vm6 = vcmp.eq.f32.partialorder %v7103_v61, 0.0 }
 0x384   : > { %v6864_v4 = vadd.f32 %v6863_v45, %v6850_v28 }
 0x386   : > { %7382 = vmatpush.bf16.msra.mxu0 %v11653_v33  ;;  %v7100_v57 = vmul.f32 %v6864_v4, %v6864_v4 }
 0x387   : > { %7396 = vmatpush.bf16.msra.mxu1 %v11661_v62 }
 0x388   : > { %v11824_v25 = vpop.eup %11823  ;;  %v7106_v52 = vadd.f32 %v7100_v57, %v7094_v3  ;;  %v11673_v3 = vld [vmem:[%s12368_s29 + $0xb0] sm:$0xff]  ;;  %v14589_v57 = vld [vmem:[#allocation46_spill] sm:$0xff] }
 0x389   : > { %v7121_v21 = vmul.f32 %v11824_v25, %v7103_v61  ;;  %7406 = vmatpush.bf16.msra.mxu2 %v11673_v3 }
 0x38a   : > { %7383 = vmatpush.bf16.msra.mxu0 %v11652_v0  ;;  %11825 = vrsqrt.f32 %v7106_v52  ;;  %vm7163_vm5 = vcmp.eq.f32.partialorder %v7106_v52, inf  ;;  %v7166_v32 = vand.u32 2147483648, %v7106_v52  ;;  %vm7165_vm7 = vcmp.eq.f32.partialorder %v7106_v52, 0.0 }
 0x38b   : > { %7397 = vmatpush.bf16.msra.mxu1 %v11660_v51  ;;  %v7122_v19 = vmul.f32 %v11824_v25, %v7121_v21 }
 0x38d   : > { %v7123_v5 = vmul.f32 0.5, %v7122_v19 }
 0x38e   : > { %7384 = vmatpush.bf16.msra.mxu0 %v11651_v14  ;;  %v6875_v8 = vpop.f32.mrf.mxu0  ;;  %v14588_v14 = vld [vmem:[#allocation45_spill] sm:$0xff] }
 0x38f   : > { %7398 = vmatpush.bf16.msra.mxu1 %v11659_v44  ;;  %v7124_v20 = vsub.f32 1.5, %v7123_v5  ;;  %v6889_v43 = vpop.f32.mrf.mxu1 }
 0x390   : > { %v11826_v37 = vpop.eup %11825  ;;  %v6890_v26 = vadd.f32 %v6889_v43, %v6875_v8  ;;  %v14593_v43 = vld [vmem:[#allocation50_spill] sm:$0xff] }
 0x391   : > { %7385 = vmatmul.bf16.vlgmr.msra.gmra.mxu0 %v7182_v46  ;;  %v7157_v7 = vmul.f32 %v11826_v37, %v7106_v52  ;;  %v7125_v13 = vmul.f32 %v11824_v25, %v7124_v20 }
 0x393   : > { %v7158_v9 = vmul.f32 %v11826_v37, %v7157_v7  ;;  %v7126_v6 = vmul.f32 %v7125_v13, %v7103_v61  ;;  %v14590_v7 = vld [vmem:[#allocation47_spill] sm:$0xff] }
 0x395   : > { %v7159_v15 = vmul.f32 0.5, %v7158_v9  ;;  %v7128_v18 = vsel %vm7127_vm4, %v7103_v61, %v7126_v6  ;;  %v14587_v61 = vld [vmem:[#allocation44_spill] sm:$0xff]  ;;  %v11671_v6 = vld [vmem:[%s12368_s29 + $0xa0] sm:$0xff] }
 0x396   : > { %v7131_v11 = vsel %vm7129_vm6, %v7130_v16, %v7128_v18  ;;  %v6903_v48 = vpop.f32.mrf.mxu2  ;;  %v6877_v24 = vpop.f32.mrf.mxu0  ;;  %v3702_v10 = vadd.f32 %v14587_v61, %v3688_v27  ;;  %v14598_v61 = vld [vmem:[#allocation55_spill] sm:$0xff] }
 0x397   : > { %v7160_v2 = vsub.f32 1.5, %v7159_v15  ;;  %v6917_v39 = vpop.f32.mrf.mxu3  ;;  %v6891_v49 = vpop.f32.mrf.mxu1  ;;  %v6904_v12 = vadd.f32 %v6903_v48, %v6890_v26 }
 0x398   : > { %v6892_v62 = vadd.f32 %v6891_v49, %v6877_v24  ;;  %v3716_v4 = vadd.f32 %v14588_v14, %v3702_v10 }
 0x399   : > { %v7161_v22 = vmul.f32 %v11826_v37, %v7160_v2  ;;  %v6918_v33 = vadd.f32 %v6917_v39, %v6904_v12  ;;  %v11672_v37 = vld [vmem:[%s12368_s29 + $0xa8] sm:$0xff]  ;;  %v14591_v2 = vld [vmem:[#allocation48_spill] sm:$0xff] }
 0x39a   : > { %v3730_v25 = vadd.f32 %v14589_v57, %v3716_v4  ;;  %7407 = vmatpush.bf16.msra.mxu2 %v11672_v37 }
 0x39b   : > { %v7162_v23 = vmul.f32 %v7161_v22, %v7106_v52 }
 0x39c   : > { %v3744_v13 = vadd.f32 %v14590_v7, %v3730_v25 }
 0x39d   : > { %v7164_v1 = vsel %vm7163_vm5, %v7106_v52, %v7162_v23 }
 0x39e   : > { %v7167_v46 = vsel %vm7165_vm7, %v7166_v32, %v7164_v1  ;;  %v6905_v34 = vpop.f32.mrf.mxu2  ;;  %v3758_v22 = vadd.f32 %v14591_v2, %v3744_v13  ;;  %7408 = vmatpush.bf16.msra.mxu2 %v11671_v6  ;;  %v14592_v1 = vld [vmem:[#allocation49_spill] sm:$0xff] }
 0x39f   : > { %v7183_v17 = vpack.c.bf16 %v7167_v46, %v7131_v11  ;;  %v6919_v50 = vpop.f32.mrf.mxu3  ;;  %v6906_v42 = vadd.f32 %v6905_v34, %v6892_v62  ;;  %v11669_v34 = vld [vmem:[%s12368_s29 + $0x90] sm:$0xff] }
 0x3a0   : > { %v3772_v11 = vadd.f32 %v14592_v1, %v3758_v22 }
 0x3a1   : > { %7399 = vmatmul.bf16.vlgmr.msra.gmra.mxu1 %v7183_v17  ;;  %v6920_v35 = vadd.f32 %v6919_v50, %v6906_v42  ;;  %v11670_v17 = vld [vmem:[%s12368_s29 + $0x98] sm:$0xff] }
 0x3a2   : > { %v3786_v48 = vadd.f32 %v14593_v43, %v3772_v11  ;;  %7409 = vmatpush.bf16.msra.mxu2 %v11670_v17 }
 0x3a6   : > { %7410 = vmatpush.bf16.msra.mxu2 %v11669_v34 }
 0x3ae   : > { %v6931_v55 = vpop.f32.mrf.mxu0 }
 0x3af   : > { %v6945_v38 = vpop.f32.mrf.mxu1  ;;  %v6932_v60 = vadd.f32 %v6931_v55, %v6918_v33  ;;  %v11668_v33 = vld [vmem:[%s12368_s29 + $0x88] sm:$0xff] }
 0x3b0   : > { %7411 = vmatpush.bf16.msra.mxu2 %v11668_v33 }
 0x3b1   : > { %v6946_v40 = vadd.f32 %v6945_v38, %v6932_v60  ;;  %v14594_v38 = vld [vmem:[#allocation51_spill] sm:$0xff]  ;;  %v11667_v60 = vld [vmem:[%s12368_s29 + $0x80] sm:$0xff] }
 0x3b2   : > { %v3800_v12 = vadd.f32 %v14594_v38, %v3786_v48 }
 0x3b4   : > { %v3814_v41 = vadd.f32 %v14595_v36, %v3800_v12  ;;  %7412 = vmatpush.bf16.msra.mxu2 %v11667_v60  ;;  %v7181_v12 = vld [vmem:[#allocation3 + $0x8] sm:$0xff] }
 0x3b6   : > { %v6959_v59 = vpop.f32.mrf.mxu2  ;;  %v6933_v53 = vpop.f32.mrf.mxu0 }
 0x3b7   : > { %v6973_v31 = vpop.f32.mrf.mxu3  ;;  %v6947_v58 = vpop.f32.mrf.mxu1  ;;  %v6960_v28 = vadd.f32 %v6959_v59, %v6946_v40  ;;  %v6934_v44 = vadd.f32 %v6933_v53, %v6920_v35  ;;  %v14597_v40 = vld [vmem:[#allocation52_spill] sm:$0xff] }
 0x3b9   : > { %v6974_v52 = vadd.f32 %v6973_v31, %v6960_v28  ;;  %v6948_v19 = vadd.f32 %v6947_v58, %v6934_v44  ;;  %v14596_v58 = vld [vmem:[#allocation54_spill] sm:$0xff] }
 0x3ba   : > { %v3828_v54 = vadd.f32 %v14596_v58, %v3814_v41 }
 0x3bc   : > { %v3842_v10 = vadd.f32 %v14598_v61, %v3828_v54 }
 0x3be   : > { %v6961_v0 = vpop.f32.mrf.mxu2 }
 0x3bf   : > { %v6975_v51 = vpop.f32.mrf.mxu3  ;;  %v6962_v9 = vadd.f32 %v6961_v0, %v6948_v19  ;;  %v7092_v0 = vmul.f32 %v14597_v40, %v14597_v40 }
 0x3c1   : > { %v6976_v16 = vadd.f32 %v6975_v51, %v6962_v9 }
 0x3ce   : > { %v6987_v47 = vpop.f32.mrf.mxu0 }
 0x3cf   : > { %v7001_v45 = vpop.f32.mrf.mxu1  ;;  %v6988_v5 = vadd.f32 %v6987_v47, %v6974_v52 }
 0x3d1   : > { %v7002_v18 = vadd.f32 %v7001_v45, %v6988_v5  ;;  %v14599_v45 = vld [vmem:[#allocation56_spill] sm:$0xff] }
 0x3d2   : > { %v3856_v14 = vadd.f32 %v14599_v45, %v3842_v10 }
 0x3d4   : > { %v7095_v57 = vmul.f32 %v3856_v14, %v3856_v14 }
 0x3d6   : > { %v7015_v21 = vpop.f32.mrf.mxu2  ;;  %v6989_v15 = vpop.f32.mrf.mxu0 }
 0x3d7   : > { %v7029_v20 = vpop.f32.mrf.mxu3  ;;  %v7003_v23 = vpop.f32.mrf.mxu1  ;;  %v7016_v32 = vadd.f32 %v7015_v21, %v7002_v18  ;;  %v6990_v46 = vadd.f32 %v6989_v15, %v6976_v16 }
 0x3d9   : > { %v7030_v39 = vadd.f32 %v7029_v20, %v7016_v32  ;;  %v7004_v50 = vadd.f32 %v7003_v23, %v6990_v46 }
 0x3de   : > { %v7017_v8 = vpop.f32.mrf.mxu2 }
 0x3df   : > { %v7031_v24 = vpop.f32.mrf.mxu3  ;;  %v7018_v59 = vadd.f32 %v7017_v8, %v7004_v50 }
 0x3e1   : > { %v7032_v53 = vadd.f32 %v7031_v24, %v7018_v59  ;;  %v7180_v24 = vld [vmem:[#allocation3] sm:$0xff] }
 0x3ee   : > { %v7043_v49 = vpop.f32.mrf.mxu0 }
 0x3ef   : > { %v7044_v26 = vadd.f32 %v7043_v49, %v7030_v39  ;;  %v7057_v55 = vpop.f32.mrf.mxu1 }
 0x3f1   : > { %v7058_v29 = vadd.f32 %v7057_v55, %v7044_v26 }
 0x3f6   : > { %v7071_v31 = vpop.f32.mrf.mxu2  ;;  %v7045_v62 = vpop.f32.mrf.mxu0 }
 0x3f7   : > { %v7072_v30 = vadd.f32 %v7071_v31, %v7058_v29  ;;  %v7085_v63 = vpop.f32.mrf.mxu3  ;;  %v7046_v42 = vadd.f32 %v7045_v62, %v7032_v53  ;;  %v7059_v47 = vpop.f32.mrf.mxu1 }
 0x3f9   : > { %v7086_v27 = vadd.f32 %v7085_v63, %v7072_v30  ;;  %v7060_v35 = vadd.f32 %v7059_v47, %v7046_v42 }
 0x3fb   : > { %v7098_v51 = vmul.f32 %v7086_v27, %v7086_v27 }
 0x3fd   : > { %v7104_v56 = vadd.f32 %v7098_v51, %v7092_v0 }
 0x3fe   : > { %v7073_v28 = vpop.f32.mrf.mxu2 }
 0x3ff   : > { %11827 = vrsqrt.f32 %v7104_v56  ;;  %v7074_v4 = vadd.f32 %v7073_v28, %v7060_v35  ;;  %v7087_v44 = vpop.f32.mrf.mxu3  ;;  %vm7139_vm8 = vcmp.eq.f32.partialorder %v7104_v56, inf  ;;  %v7142_v32 = vand.u32 2147483648, %v7104_v56 }
 0x400   : > { %vm7141_vm10 = vcmp.eq.f32.partialorder %v7104_v56, 0.0 }
 0x401   : > { %v7088_v3 = vadd.f32 %v7087_v44, %v7074_v4 }
 0x403   : > { %v7101_v25 = vmul.f32 %v7088_v3, %v7088_v3 }
 0x405   : > { %v11828_v52 = vpop.eup %11827  ;;  %v7107_v21 = vadd.f32 %v7101_v25, %v7095_v57 }
 0x406   : > { %v7133_v19 = vmul.f32 %v11828_v52, %v7104_v56 }
 0x407   : > { %11829 = vrsqrt.f32 %v7107_v21  ;;  %vm7175_vm9 = vcmp.eq.f32.partialorder %v7107_v21, inf  ;;  %v7178_v1 = vand.u32 2147483648, %v7107_v21  ;;  %vm7177_vm11 = vcmp.eq.f32.partialorder %v7107_v21, 0.0 }
 0x408   : > { %v7134_v5 = vmul.f32 %v11828_v52, %v7133_v19 }
 0x40a   : > { %v7135_v20 = vmul.f32 0.5, %v7134_v5 }
 0x40c   : > { %v7136_v37 = vsub.f32 1.5, %v7135_v20 }
 0x40d   : > { %v11830_v7 = vpop.eup %11829 }
 0x40e   : > { %v7169_v13 = vmul.f32 %v11830_v7, %v7107_v21  ;;  %v7137_v9 = vmul.f32 %v11828_v52, %v7136_v37  ;;  %v7386_v48 = vpop.f32.mrf.mxu0 }
 0x410   : > { %v7170_v15 = vmul.f32 %v11830_v7, %v7169_v13  ;;  %v7138_v2 = vmul.f32 %v7137_v9, %v7104_v56 }
 0x412   : > { %v7171_v6 = vmul.f32 0.5, %v7170_v15  ;;  %v7140_v23 = vsel %vm7139_vm8, %v7104_v56, %v7138_v2 }
 0x413   : > { %v7143_v46 = vsel %vm7141_vm10, %v7142_v32, %v7140_v23 }
 0x414   : > { %v7172_v22 = vsub.f32 1.5, %v7171_v6 }
 0x416   : > { %v7173_v18 = vmul.f32 %v11830_v7, %v7172_v22  ;;  %v7388_v55 = vpop.f32.mrf.mxu0 }
 0x418   : > { %v7174_v16 = vmul.f32 %v7173_v18, %v7107_v21 }
 0x41a   : > { %v7176_v11 = vsel %vm7175_vm9, %v7107_v21, %v7174_v16 }
 0x41b   : > { %v7179_v17 = vsel %vm7177_vm11, %v7178_v1, %v7176_v11 }
 0x41c   : > { %v7184_v8 = vpack.c.bf16 %v7179_v17, %v7143_v46 }
 0x41e   : > { %7413 = vmatmul.bf16.vlgmr.msra.gmra.mxu2 %v7184_v8  ;;  %v7400_v43 = vpop.f32.mrf.mxu1 }
 0x41f   : > { %v7401_v39 = vadd.f32 %v7400_v43, %v7386_v48 }
 0x426   : > { %v7402_v26 = vpop.f32.mrf.mxu1 }
 0x427   : > { %v7403_v38 = vadd.f32 %v7402_v26, %v7388_v55 }
 0x4a1   : > { %v7414_v49 = vpop.f32.mrf.mxu2 }
 0x4a2   : > { %v7415_v34 = vadd.f32 %v7414_v49, %v7401_v39 }
 0x4a4   : > { %v7419_v50 = vadd.f32 %v7415_v34, %v7180_v24 }
 0x4a6   : > { %7421 = vst [vmem:[#allocation3] sm:$0xff] %v7419_v50 }
 0x4a9   : > { %v7416_v59 = vpop.f32.mrf.mxu2 }
 0x4aa   : > { %v7417_v36 = vadd.f32 %v7416_v59, %v7403_v38  ;;  %7426 = sbr.rel (%p10857_p13) target bundleno = 1220 (0x4c4), region = 68 }
 0x4ac   : > { %v7420_v41 = vadd.f32 %v7417_v36, %v7181_v12 }
 0x4ae   : > { %7422 = vst [vmem:[#allocation3 + $0x8] sm:$0xff] %v7420_v41 }
 0x4af   : > { %v7427_v29 = vld [vmem:[#allocation3] sm:$0xff] }
 0x4b0   : > { %v7429_v31 = vmax.f32 %v7427_v29, 1e-05 }
 0x4b2   : > { %11831 = vlog2.f32 %v7429_v31 }
 0x4b5   : > { %v7428_v33 = vld [vmem:[#allocation3 + $0x8] sm:$0xff] }
 0x4b6   : > { %v7430_v53 = vmax.f32 %v7428_v33, 1e-05 }
 0x4b8   : > { %11833 = vlog2.f32 %v7430_v53  ;;  %v11832_v30 = vpop.eup %11831 }
 0x4b9   : > { %v7432_v62 = vmul.f32 0.6931472, %v11832_v30 }
 0x4bb   : > { %v7435_v58 = vmul.f32 0.4342945, %v7432_v62 }
 0x4bd   : > { %7437 = vst [vmem:[%s12370_s2] sm:$0xff] %v7435_v58 }
 0x4be   : > { %v11834_v63 = vpop.eup %11833 }
 0x4bf   : > { %v7434_v60 = vmul.f32 0.6931472, %v11834_v63 }
 0x4c1   : > { %v7436_v54 = vmul.f32 0.4342945, %v7434_v60 }
 0x4c3   : > { %7438 = vst [vmem:[%s12370_s2 + $0x8] sm:$0xff] %v7436_v54 }
 0x4c4 PF: > { %s11675_s24 = sshll.u32 %s12103_s25, 4  ;;  %s14600_s17 = sld [smem:[#allocation61_spill]] }
 0x4c5   : > { %s7452_s5 = sshll.u32 %s12370_s2, 4  ;;  %s7440_s8 = scalar_lea.sflag [#allocation6], %s12345_s9  ;;  %s7453_s5 = int_to_ptr.vmem [resolvable:$true] %s7452_s5 }
 0x4ca   : > { %s7451_s13 = scalar_lea.hbm %s14600_s17, %s11675_s24  ;;  %s12005_s25 = scalar_lea.hbm %s14600_s17, 32 }
 0x4cb   : > { %s7454_s16 = sshll.u32 %s7451_s13, 4  ;;  %s7455_s16 = int_to_ptr.hbm [resolvable:$true] %s7454_s16 }
 0x4cc   : > { %s11999_s1 = sshra.s32 %s7455_s16, 4  ;;  %s12000_s1 = int_to_ptr.hbm [resolvable:$true] %s11999_s1 }
 0x4cd   : > { %s12001_s12 = scalar_lea.hbm %s12000_s1, 16  ;;  %p12006_p4 = scmp.lt.s32.totalorder %s12000_s1, %s14600_s17 }
 0x4ce   : > { %p12002_p0 = scmp.ne.s32.totalorder %s12000_s1, %s12001_s12  ;;  %p12007_p5 = scmp.lt.s32.totalorder %s12005_s25, %s12001_s12 }
 0x4d0   : > { %p12003_p2 = pnand %p12002_p0, %p12311_p6  ;;  %p12008_p8 = por %p12007_p5, %p12006_p4 }
 0x4d2   : > { %p12004_p3 = pneg %p12003_p2 }
 0x4d4   : > { %p12009_p9 = pnand %p12008_p8, %p12004_p3 }
 0x4d6   : > { %12012 = shalt.err (!%p12009_p9)
}
 0x4d7   : > { %s12126_s9 = smov 128   ;;  %s12127_s6 = smov 8  }
 0x4d8   : > { %11693 = dma.vmem_to_hbm [thread:$0]  (%p12311_p6), %s7453_s5, 256, %s7455_s16, %s7440_s8, %s12126_s9, %s12126_s9, %s12127_s6  }
 0x4d9 PF: > { %p11719_p10 = scmp.ge.s32.totalorder %s12115_s28, 2  ;;  %s7469_s15 = sand.u32 1, %s12087_s21  }
 0x4da   : > { %s7470_s11 = scalar_lea.sflag [#allocation6], %s7469_s15 }
 0x4db   : > { %p11713_p1 = pnand %p11719_p10, %p12315_p7 }
 0x4dd   : > { %p11714_p12 = pneg %p11713_p1 }
 0x4df   : > { %12070 = dma.done.wait (%p11714_p12), %s7470_s11, 256  }
 0x4e0   : > { %12072 = vsyncadd (%p11714_p12), %s7470_s11, 4294967040  ;;  %s22_s28 = sadd.s32 1, %s12115_s28   ;;  %s14601_s29 = sld [smem:[#allocation20_spill]] }
 0x4e1   : > { %p19_p11 = scmp.ge.s32.totalorder %s22_s28, 8   ;;  %s14602_s7 = sld [smem:[#allocation21_spill]] }
 0x4e2   : > { %s14603_s25 = sld [smem:[#allocation17_spill]]  ;;  %s14606_s18 = smov %s12079_s19 }
 0x4e3   : > { %s14604_s2 = sld [smem:[#allocation18_spill]]  ;;  %s14607_s19 = smov %s12083_s20 }
 0x4e4   : > { %s14605_s27 = sld [smem:[#allocation19_spill]]  ;;  %s14609_s21 = smov %s12091_s22 }
 0x4e5   : > { %s14610_s22 = smov %s12095_s23  ;;  %s14612_s24 = smov %s12107_s26 }
 0x4e6   : > { %s14608_s20 = smov %s14601_s29  ;;  %21 = sbr.rel (!%p19_p11) target bundleno = 16 (0x10), region = 130 }
 0x4e7   : > { %s14611_s23 = smov %s14602_s7 }
 0x4e9   : > { %s14613_s26 = smov %s14604_s2 }
 0x4eb   :  { %7476 = vsyncpa [#allocation5], 1 }
 0x4ec   :  { %7478 = vsyncpa [#allocation5 + $0x1], 1 }
 0x4ed   :  { %7479 = vsyncpa [#allocation8], 1 }
 0x4ee   :  { %7480 = vsyncpa [#allocation6], 1 }
 0x4ef   :  { %7482 = vsyncpa [#allocation6 + $0x1], 1 }

</bundles_post_ra>
